<compile_context>
chip_gen: v7x
topology: tpu7x:2x2x1
jax: 0.10.0
libtpu: 0.0.40
codegen_flags: <defaults>
</compile_context>

<pallas_src>
import jax
import jax.numpy as jnp
import numpy as np
from jax.experimental import pallas as pl
from jax.experimental.pallas import tpu as pltpu

EMB = 128  # config['embedding_size'] in the PyTorch module


def _elu(x):
    # ELU(alpha=1): x if x > 0 else exp(x) - 1 (clamp inside exp avoids overflow).
    return jnp.where(x > 0, x, jnp.exp(jnp.minimum(x, 0.0)) - 1.0)


def _round_up(x, m):
    return -(-x // m) * m


def _tpu_kind():
    try:
        return jax.devices()[0].device_kind.lower()
    except Exception:
        return ""


def _num_tensorcores():
    kind = _tpu_kind()
    return 2 if ("v7" in kind or "7x" in kind) else 1


def _is_v5e():
    kind = _tpu_kind()
    return ("v5e" in kind) or ("v5 lite" in kind) or ("v5lite" in kind)


def _make_kernel(tb, n, d_hidden, out_lanes, state_per_batch, act_dtype):
    rows = tb * n
    inv_n = 1.0 / n

    def kernel(state_ref, action_ref, w1s_ref, w1a_ref, b1_ref,
               w2_ref, b2_ref, w3_ref, b3_ref, out_ref):
        cdtype = w1a_ref.dtype   # matmul-operand dtype (bf16 by default)

        # ---- layer 1 (actor_l1; shared by actor and critic heads) ----------
        a_proj = jnp.dot(action_ref[...], w1a_ref[...],
                         preferred_element_type=jnp.float32)          # (rows, H)
        s_proj = jnp.dot(state_ref[...], w1s_ref[...],
                         preferred_element_type=jnp.float32)
        s_proj = s_proj + b1_ref[...]                                  # fold f32 bias
        if state_per_batch:
            # State projected once per batch element, broadcast over candidates.
            pre = a_proj.reshape(tb, n, d_hidden) + s_proj[:, None, :]
            pre = pre.reshape(rows, d_hidden)
        else:
            pre = a_proj + s_proj

        h = _elu(pre.astype(act_dtype))                                # (rows, H)

        # ---- fused layer 2: [actor_l2 | critic_l2] in one matmul ------------
        h2 = jnp.dot(h.astype(cdtype), w2_ref[...],
                     preferred_element_type=jnp.float32)               # (rows, 2H)
        g = _elu((h2 + b2_ref[...]).astype(act_dtype))

        # ---- fused layer 3 on the VPU/XLU (both heads have width 1) ---------
        # The :H / H: splits land on 128-lane boundaries -> layout no-ops.
        prod = (g * w3_ref[...].astype(act_dtype)).astype(jnp.float32)
        prod = prod.reshape(tb, n, 2 * d_hidden)
        logits = jnp.sum(prod[..., :d_hidden], axis=-1) + b3_ref[0]    # (tb, n)
        vraw = jnp.sum(prod[..., d_hidden:], axis=-1) + b3_ref[1]      # (tb, n)

        # Softmax over the candidate axis (dim=-2 of the PyTorch (B, N, 1)).
        m = jnp.max(logits, axis=-1, keepdims=True)
        e = jnp.exp(logits - m)
        denom = jnp.sum(e, axis=-1, keepdims=True)
        probs = e * pl.reciprocal(denom, approx=True)                  # (tb, n)

        # Critic value: mean over candidates as a scaled sum (no divide).
        values = jnp.sum(vraw, axis=-1, keepdims=True) * inv_n         # (tb, 1)

        # Lane-dense packed output: probs in lanes [0, n), value in lane n
        # (the value also fills the remaining lanes; the wrapper reads lane n).
        out_ref[...] = jnp.broadcast_to(values, (tb, out_lanes))
        out_ref[:, :n] = probs

    return kernel


def net_forward(state_input, action_input, params, *, block_b=None,
                compute_dtype=jnp.bfloat16, elu_dtype=None):
    """Pallas forward for Net. Returns (act_probs (B, N, 1), values (B, 1))."""
    (w1, b1, w2a, b2a, w3a, b3a, w2c, b2c, w3c, b3c) = params

    # TODO(synk): only the 3-D action_input branch (B, N, d) of the module is
    # implemented; the 4-D branch with a second unsqueeze/expand is not covered.
    B, N, d_act = action_input.shape
    d_state = state_input.shape[-1]
    d_hidden = w1.shape[1]
    assert w1.shape[0] == d_state + d_act
    state_per_batch = state_input.ndim < action_input.ndim

    compute_dtype = jnp.dtype(compute_dtype)
    if elu_dtype is None:
        # bf16 ELU only where the VPU/EUP is bf16-native (v6e / v7x).
        if compute_dtype == jnp.dtype(jnp.bfloat16) and _is_v5e():
            elu_dtype = jnp.float32
        else:
            elu_dtype = compute_dtype
    elu_dtype = jnp.dtype(elu_dtype)

    # ---- one-time host-side weight prep: split layer 1, fuse layers 2/3 -----
    w1s = w1[:d_state].astype(compute_dtype)                           # (d_state, H)
    w1a = w1[d_state:].astype(compute_dtype)                           # (d_act, H)
    b1f = b1.reshape(1, d_hidden).astype(jnp.float32)
    w2f = jnp.concatenate([w2a, w2c], axis=1).astype(compute_dtype)    # (H, 2H)
    b2f = jnp.concatenate([b2a, b2c], axis=1).astype(jnp.float32)      # (1, 2H)
    w3f = jnp.concatenate([w3a.reshape(1, d_hidden),
                           w3c.reshape(1, d_hidden)], axis=1
                          ).astype(compute_dtype)                      # (1, 2H)
    b3f = jnp.concatenate([b3a.ravel(), b3c.ravel()]).astype(jnp.float32)  # (2,)

    # ---- batch tiling ---------------------------------------------------------
    # Single grid step on single-TC chips (v5e/v6e); an even split on v7x.
    sub = 8 * max(1, 4 // compute_dtype.itemsize)      # sublane tile: 8 f32, 16 bf16
    max_rows = 2048                                    # rows per grid step cap
    tb_cap = max(sub, ((max_rows // max(N, 1)) // sub) * sub)
    num_tc = _num_tensorcores()
    if block_b is not None:
        tb = _round_up(block_b, sub)
    elif num_tc <= 1:
        tb = min(_round_up(B, sub), tb_cap)
    else:
        tb = min(_round_up(-(-B // num_tc), sub), tb_cap)
    tb = min(tb, _round_up(B, sub))
    B_pad = _round_up(B, tb)
    nb = B_pad // tb

    x_state = state_input.astype(compute_dtype)
    x_action = action_input.astype(compute_dtype)
    if B_pad != B:
        pad = B_pad - B
        x_state = jnp.pad(x_state, ((0, pad),) + ((0, 0),) * (x_state.ndim - 1))
        x_action = jnp.pad(x_action, ((0, pad), (0, 0), (0, 0)))

    # Flatten to lane/sublane-dense (rows, d) slabs so the kernel avoids any
    # reshape of packed (bf16) inputs.
    x_action = x_action.reshape(B_pad * N, d_act)
    action_spec = pl.BlockSpec((tb * N, d_act), lambda i: (i, 0))
    if state_per_batch:
        state_spec = pl.BlockSpec((tb, d_state), lambda i: (i, 0))
    else:
        x_state = x_state.reshape(B_pad * N, d_state)
        state_spec = pl.BlockSpec((tb * N, d_state), lambda i: (i, 0))

    def wspec(arr):
        # Block-invariant weights.
        # TODO(synk): pipeline_mode=pl.Buffered(1) would single-buffer these and
        # halve their VMEM footprint; unnecessary at these sizes.
        return pl.BlockSpec(arr.shape, lambda i: (0,) * arr.ndim)

    out_lanes = _round_up(N + 1, 128)
    kernel = _make_kernel(tb, N, d_hidden, out_lanes, state_per_batch, elu_dtype)

    packed = pl.pallas_call(
        kernel,
        out_shape=jax.ShapeDtypeStruct((B_pad, out_lanes), jnp.float32),
        grid_spec=pltpu.PrefetchScalarGridSpec(
            num_scalar_prefetch=0,
            grid=(nb,),
            in_specs=[state_spec, action_spec,
                      wspec(w1s), wspec(w1a), wspec(b1f),
                      wspec(w2f), wspec(b2f), wspec(w3f),
                      pl.BlockSpec(memory_space=pltpu.MemorySpace.SMEM)],
            out_specs=pl.BlockSpec((tb, out_lanes), lambda i: (i, 0))),
        compiler_params=pltpu.CompilerParams(
            dimension_semantics=("parallel",)),
    )(x_state, x_action, w1s, w1a, b1f, w2f, b2f, w3f, b3f)

    act_probs = packed[:B, :N, None]      # (B, N, 1) — matches PyTorch layout
    values = packed[:B, N:N + 1]          # (B, 1)
    return act_probs, values


def net_reference(state_input, action_input, params):
    """Pure-JAX reference mirroring the PyTorch forward."""
    (w1, b1, w2a, b2a, w3a, b3a, w2c, b2c, w3c, b3c) = params
    B, N, _ = action_input.shape
    if state_input.ndim < action_input.ndim:
        state_input = jnp.broadcast_to(
            state_input[:, None, :], (B, N, state_input.shape[-1]))
    x = jnp.concatenate([state_input, action_input], axis=-1)
    actor_x = _elu(x @ w1 + b1)
    actor_out = _elu(actor_x @ w2a + b2a)
    logits = actor_out @ w3a + b3a
    act_probs = jax.nn.softmax(logits, axis=-2)
    critic_x = _elu(x @ w1 + b1)
    critic_out = _elu(critic_x @ w2c + b2c)
    values = (critic_out @ w3c + b3c).mean(axis=-2)
    return act_probs, values


def init_params(key):
    ks = jax.random.split(key, 5)

    def linear(k, fan_in, fan_out):
        kw, kb = jax.random.split(k)
        bound = 1.0 / float(np.sqrt(fan_in))
        w = jax.random.uniform(kw, (fan_in, fan_out), jnp.float32, -bound, bound)
        b = jax.random.uniform(kb, (1, fan_out), jnp.float32, -bound, bound)
        return w, b

    w1, b1 = linear(ks[0], 3 * EMB, EMB)     # actor_l1
    w2a, b2a = linear(ks[1], EMB, EMB)       # actor_l2
    w3a, b3a = linear(ks[2], EMB, 1)         # actor_l3
    w2c, b2c = linear(ks[3], EMB, EMB)       # critic_l2
    w3c, b3c = linear(ks[4], EMB, 1)         # critic_l3
    return (w1, b1, w2a, b2a, w3a, b3a, w2c, b2c, w3c, b3c)


if __name__ == "__main__":
    key = jax.random.PRNGKey(0)
    k_state, k_action, k_param = jax.random.split(key, 3)

    B, N = 64, 8
    state_input = jax.random.normal(k_state, (B, 2 * EMB), jnp.float32)
    action_input = jax.random.normal(k_action, (B, N, EMB), jnp.float32)
    params = init_params(k_param)

    ref_probs, ref_values = net_reference(state_input, action_input, params)
    ref_probs, ref_values = jax.block_until_ready((ref_probs, ref_values))

    # f32 compute path: near-exact parity (only slack: approx softmax recip).
    p32, v32 = net_forward(state_input, action_input, params,
                           compute_dtype=jnp.float32)
    p32, v32 = jax.block_until_ready((p32, v32))
    np.testing.assert_allclose(np.asarray(p32), np.asarray(ref_probs),
                               rtol=2e-2, atol=1e-3)
    np.testing.assert_allclose(np.asarray(v32), np.asarray(ref_values),
                               rtol=1e-4, atol=1e-5)

    # Default path: bf16 matmul operands (+ bf16 ELU on v6e/v7x), f32 accum.
    pbf, vbf = net_forward(state_input, action_input, params)
    pbf, vbf = jax.block_until_ready((pbf, vbf))
    np.testing.assert_allclose(np.asarray(jnp.sum(pbf, axis=1)),
                               np.ones((B, 1), np.float32), atol=1e-2)
    np.testing.assert_allclose(np.asarray(pbf), np.asarray(ref_probs),
                               rtol=1e-1, atol=3e-2)
    np.testing.assert_allclose(np.asarray(vbf), np.asarray(ref_values),
                               rtol=1e-1, atol=6e-2)

    # Pre-expanded state (state.ndim == action.ndim branch of the module).
    state3 = jnp.broadcast_to(state_input[:, None, :], (B, N, 2 * EMB))
    p3, v3 = net_forward(state3, action_input, params, compute_dtype=jnp.float32)
    p3, v3 = jax.block_until_ready((p3, v3))
    np.testing.assert_allclose(np.asarray(p3), np.asarray(ref_probs),
                               rtol=2e-2, atol=1e-3)
    np.testing.assert_allclose(np.asarray(v3), np.asarray(ref_values),
                               rtol=1e-4, atol=1e-5)

    print("KERNEL_OK")
</pallas_src>

<mosaic_0001>
module attributes {stable_mosaic.version = 11 : i64} {
  func.func @kernel(%arg0: i32, %arg1: memref<64x256xf32, #tpu.memory_space<vmem>>, %arg2: memref<512x128xf32, #tpu.memory_space<vmem>>, %arg3: memref<256x128xf32, #tpu.memory_space<vmem>>, %arg4: memref<128x128xf32, #tpu.memory_space<vmem>>, %arg5: memref<1x128xf32, #tpu.memory_space<vmem>>, %arg6: memref<128x256xf32, #tpu.memory_space<vmem>>, %arg7: memref<1x256xf32, #tpu.memory_space<vmem>>, %arg8: memref<1x256xf32, #tpu.memory_space<vmem>>, %arg9: memref<2xf32, #tpu.memory_space<smem>>, %arg10: memref<64x128xf32, #tpu.memory_space<vmem>>) attributes {dimension_semantics = [#tpu.dimension_semantics<parallel>], iteration_bounds = array<i64: 1>, scalar_prefetch = 0 : i64, scratch_operands = 0 : i64, tpu.core_type = #tpu.core_type<tc>, window_params = [{transform_indices = @transform_0, window_bounds = array<i64: 64, 256>}, {transform_indices = @transform_1, window_bounds = array<i64: 512, 128>}, {pipeline_mode = #tpu.pipeline_mode<synchronous>, transform_indices = @transform_2, window_bounds = array<i64: 256, 128>}, {pipeline_mode = #tpu.pipeline_mode<synchronous>, transform_indices = @transform_3, window_bounds = array<i64: 128, 128>}, {pipeline_mode = #tpu.pipeline_mode<synchronous>, transform_indices = @transform_4, window_bounds = array<i64: 1, 128>}, {pipeline_mode = #tpu.pipeline_mode<synchronous>, transform_indices = @transform_5, window_bounds = array<i64: 128, 256>}, {pipeline_mode = #tpu.pipeline_mode<synchronous>, transform_indices = @transform_6, window_bounds = array<i64: 1, 256>}, {pipeline_mode = #tpu.pipeline_mode<synchronous>, transform_indices = @transform_7, window_bounds = array<i64: 1, 256>}, {transform_indices = @transform_8, window_bounds = array<i64: 2>}, {transform_indices = @transform_9, window_bounds = array<i64: 64, 128>}]} {
    %c0 = arith.constant 0 : index
    %c0_0 = arith.constant 0 : index
    %0 = vector.load %arg2[%c0, %c0_0] : memref<512x128xf32, #tpu.memory_space<vmem>>, vector<512x128xf32>
    %c0_1 = arith.constant 0 : index
    %c0_2 = arith.constant 0 : index
    %1 = vector.load %arg4[%c0_1, %c0_2] : memref<128x128xf32, #tpu.memory_space<vmem>>, vector<128x128xf32>
    %cst = arith.constant dense<0.000000e+00> : vector<512x128xf32>
    %2 = tpu.matmul %0, %1, %cst {dimension_numbers = #tpu.dot_dimension_numbers<[1], [0], [0], [1], [0, 0, 1, 1], [], []>} : vector<512x128xf32>, vector<128x128xf32>, vector<512x128xf32> -> vector<512x128xf32>
    %c0_3 = arith.constant 0 : index
    %c0_4 = arith.constant 0 : index
    %3 = vector.load %arg1[%c0_3, %c0_4] : memref<64x256xf32, #tpu.memory_space<vmem>>, vector<64x256xf32>
    %c0_5 = arith.constant 0 : index
    %c0_6 = arith.constant 0 : index
    %4 = vector.load %arg3[%c0_5, %c0_6] : memref<256x128xf32, #tpu.memory_space<vmem>>, vector<256x128xf32>
    %cst_7 = arith.constant dense<0.000000e+00> : vector<64x128xf32>
    %5 = tpu.matmul %3, %4, %cst_7 {dimension_numbers = #tpu.dot_dimension_numbers<[1], [0], [0], [1], [0, 0, 1, 1], [], []>} : vector<64x256xf32>, vector<256x128xf32>, vector<64x128xf32> -> vector<64x128xf32>
    %c0_8 = arith.constant 0 : index
    %c0_9 = arith.constant 0 : index
    %6 = vector.load %arg5[%c0_8, %c0_9] : memref<1x128xf32, #tpu.memory_space<vmem>>, vector<1x128xf32>
    %7 = vector.broadcast %6 : vector<1x128xf32> to vector<64x128xf32>
    %8 = arith.addf %5, %7 : vector<64x128xf32>
    %9 = vector.shape_cast %2 : vector<512x128xf32> to vector<64x8x128xf32>
    %10 = vector.shape_cast %8 : vector<64x128xf32> to vector<64x1x128xf32>
    %11 = vector.broadcast %10 : vector<64x1x128xf32> to vector<64x8x128xf32>
    %12 = arith.addf %9, %11 : vector<64x8x128xf32>
    %13 = vector.shape_cast %12 : vector<64x8x128xf32> to vector<512x128xf32>
    %cst_10 = arith.constant 0.000000e+00 : f32
    %14 = vector.broadcast %cst_10 : f32 to vector<512x128xf32>
    %15 = arith.cmpf ogt, %13, %14 : vector<512x128xf32>
    %cst_11 = arith.constant 0.000000e+00 : f32
    %16 = vector.broadcast %cst_11 : f32 to vector<512x128xf32>
    %17 = arith.minimumf %13, %16 : vector<512x128xf32>
    %18 = math.exp %17 : vector<512x128xf32>
    %cst_12 = arith.constant 1.000000e+00 : f32
    %19 = vector.broadcast %cst_12 : f32 to vector<512x128xf32>
    %20 = arith.subf %18, %19 : vector<512x128xf32>
    %21 = arith.select %15, %13, %20 : vector<512x128xi1>, vector<512x128xf32>
    %c0_13 = arith.constant 0 : index
    %c0_14 = arith.constant 0 : index
    %22 = vector.load %arg6[%c0_13, %c0_14] : memref<128x256xf32, #tpu.memory_space<vmem>>, vector<128x256xf32>
    %cst_15 = arith.constant dense<0.000000e+00> : vector<512x256xf32>
    %23 = tpu.matmul %21, %22, %cst_15 {dimension_numbers = #tpu.dot_dimension_numbers<[1], [0], [0], [1], [0, 0, 1, 1], [], []>} : vector<512x128xf32>, vector<128x256xf32>, vector<512x256xf32> -> vector<512x256xf32>
    %c0_16 = arith.constant 0 : index
    %c0_17 = arith.constant 0 : index
    %24 = vector.load %arg7[%c0_16, %c0_17] : memref<1x256xf32, #tpu.memory_space<vmem>>, vector<1x256xf32>
    %25 = vector.broadcast %24 : vector<1x256xf32> to vector<512x256xf32>
    %26 = arith.addf %23, %25 : vector<512x256xf32>
    %cst_18 = arith.constant 0.000000e+00 : f32
    %27 = vector.broadcast %cst_18 : f32 to vector<512x256xf32>
    %28 = arith.cmpf ogt, %26, %27 : vector<512x256xf32>
    %cst_19 = arith.constant 0.000000e+00 : f32
    %29 = vector.broadcast %cst_19 : f32 to vector<512x256xf32>
    %30 = arith.minimumf %26, %29 : vector<512x256xf32>
    %31 = math.exp %30 : vector<512x256xf32>
    %cst_20 = arith.constant 1.000000e+00 : f32
    %32 = vector.broadcast %cst_20 : f32 to vector<512x256xf32>
    %33 = arith.subf %31, %32 : vector<512x256xf32>
    %34 = arith.select %28, %26, %33 : vector<512x256xi1>, vector<512x256xf32>
    %c0_21 = arith.constant 0 : index
    %c0_22 = arith.constant 0 : index
    %35 = vector.load %arg8[%c0_21, %c0_22] : memref<1x256xf32, #tpu.memory_space<vmem>>, vector<1x256xf32>
    %36 = vector.broadcast %35 : vector<1x256xf32> to vector<512x256xf32>
    %37 = arith.mulf %34, %36 : vector<512x256xf32>
    %38 = vector.shape_cast %37 : vector<512x256xf32> to vector<64x8x256xf32>
    %39 = vector.extract_strided_slice %38 {offsets = [0, 0, 0], sizes = [64, 8, 128], strides = [1, 1, 1]} : vector<64x8x256xf32> to vector<64x8x128xf32>
    %cst_23 = arith.constant dense<0.000000e+00> : vector<64x8xf32>
    %40 = vector.multi_reduction <add>, %39, %cst_23 [2] : vector<64x8x128xf32> to vector<64x8xf32>
    %c0_24 = arith.constant 0 : index
    %41 = memref.load %arg9[%c0_24] : memref<2xf32, #tpu.memory_space<smem>>
    %42 = vector.broadcast %41 : f32 to vector<64x8xf32>
    %43 = arith.addf %40, %42 : vector<64x8xf32>
    %44 = vector.extract_strided_slice %38 {offsets = [0, 0, 128], sizes = [64, 8, 128], strides = [1, 1, 1]} : vector<64x8x256xf32> to vector<64x8x128xf32>
    %cst_25 = arith.constant dense<0.000000e+00> : vector<64x8xf32>
    %45 = vector.multi_reduction <add>, %44, %cst_25 [2] : vector<64x8x128xf32> to vector<64x8xf32>
    %c1 = arith.constant 1 : index
    %46 = memref.load %arg9[%c1] : memref<2xf32, #tpu.memory_space<smem>>
    %47 = vector.broadcast %46 : f32 to vector<64x8xf32>
    %48 = arith.addf %45, %47 : vector<64x8xf32>
    %cst_26 = arith.constant dense<0xFF800000> : vector<64xf32>
    %49 = vector.multi_reduction <maximumf>, %43, %cst_26 [1] : vector<64x8xf32> to vector<64xf32>
    %50 = vector.shape_cast %49 : vector<64xf32> to vector<64x1xf32>
    %51 = vector.broadcast %50 : vector<64x1xf32> to vector<64x8xf32>
    %52 = arith.subf %43, %51 : vector<64x8xf32>
    %53 = math.exp %52 : vector<64x8xf32>
    %cst_27 = arith.constant dense<0.000000e+00> : vector<64xf32>
    %54 = vector.multi_reduction <add>, %53, %cst_27 [1] : vector<64x8xf32> to vector<64xf32>
    %55 = vector.shape_cast %54 : vector<64xf32> to vector<64x1xf32>
    %56 = tpu.reciprocal %55 {approx = true} : vector<64x1xf32> -> vector<64x1xf32>
    %57 = vector.broadcast %56 : vector<64x1xf32> to vector<64x8xf32>
    %58 = arith.mulf %53, %57 : vector<64x8xf32>
    %cst_28 = arith.constant dense<0.000000e+00> : vector<64xf32>
    %59 = vector.multi_reduction <add>, %48, %cst_28 [1] : vector<64x8xf32> to vector<64xf32>
    %60 = vector.shape_cast %59 : vector<64xf32> to vector<64x1xf32>
    %cst_29 = arith.constant 1.250000e-01 : f32
    %61 = vector.broadcast %cst_29 : f32 to vector<64x1xf32>
    %62 = arith.mulf %60, %61 : vector<64x1xf32>
    %63 = vector.shape_cast %62 : vector<64x1xf32> to vector<64x1xf32>
    %64 = vector.broadcast %63 : vector<64x1xf32> to vector<64x128xf32>
    %c0_30 = arith.constant 0 : index
    %c0_31 = arith.constant 0 : index
    %65 = vector.load %arg10[%c0_30, %c0_31] : memref<64x128xf32, #tpu.memory_space<vmem>>, vector<64x128xf32>
    tpu.vector_store %arg10[%c0_30, %c0_31], %64 {strides = array<i32>} : memref<64x128xf32, #tpu.memory_space<vmem>>, vector<64x128xf32>,
    %c0_32 = arith.constant 0 : index
    %c0_33 = arith.constant 0 : index
    %66 = vector.load %arg10[%c0_32, %c0_33] : memref<64x128xf32, #tpu.memory_space<vmem>>, vector<64x8xf32>
    tpu.vector_store %arg10[%c0_32, %c0_33], %58 {strides = array<i32>} : memref<64x128xf32, #tpu.memory_space<vmem>>, vector<64x8xf32>,
    return
  }
  func.func @transform_0(%arg0: i32) -> (i32, i32) {
    %c0_i32 = arith.constant 0 : i32
    %c0_i32_0 = arith.constant 0 : i32
    return %arg0, %c0_i32 : i32, i32
  }
  func.func @transform_1(%arg0: i32) -> (i32, i32) {
    %c0_i32 = arith.constant 0 : i32
    %c0_i32_0 = arith.constant 0 : i32
    return %arg0, %c0_i32 : i32, i32
  }
  func.func @transform_2(%arg0: i32) -> (i32, i32) {
    %c0_i32 = arith.constant 0 : i32
    %c0_i32_0 = arith.constant 0 : i32
    %c0_i32_1 = arith.constant 0 : i32
    return %c0_i32, %c0_i32_0 : i32, i32
  }
  func.func @transform_3(%arg0: i32) -> (i32, i32) {
    %c0_i32 = arith.constant 0 : i32
    %c0_i32_0 = arith.constant 0 : i32
    %c0_i32_1 = arith.constant 0 : i32
    return %c0_i32, %c0_i32_0 : i32, i32
  }
  func.func @transform_4(%arg0: i32) -> (i32, i32) {
    %c0_i32 = arith.constant 0 : i32
    %c0_i32_0 = arith.constant 0 : i32
    %c0_i32_1 = arith.constant 0 : i32
    return %c0_i32, %c0_i32_0 : i32, i32
  }
  func.func @transform_5(%arg0: i32) -> (i32, i32) {
    %c0_i32 = arith.constant 0 : i32
    %c0_i32_0 = arith.constant 0 : i32
    %c0_i32_1 = arith.constant 0 : i32
    return %c0_i32, %c0_i32_0 : i32, i32
  }
  func.func @transform_6(%arg0: i32) -> (i32, i32) {
    %c0_i32 = arith.constant 0 : i32
    %c0_i32_0 = arith.constant 0 : i32
    %c0_i32_1 = arith.constant 0 : i32
    return %c0_i32, %c0_i32_0 : i32, i32
  }
  func.func @transform_7(%arg0: i32) -> (i32, i32) {
    %c0_i32 = arith.constant 0 : i32
    %c0_i32_0 = arith.constant 0 : i32
    %c0_i32_1 = arith.constant 0 : i32
    return %c0_i32, %c0_i32_0 : i32, i32
  }
  func.func @transform_8(%arg0: i32) -> i32 {
    %c0_i32 = arith.constant 0 : i32
    %c0_i32_0 = arith.constant 0 : i32
    return %c0_i32 : i32
  }
  func.func @transform_9(%arg0: i32) -> (i32, i32) {
    %c0_i32 = arith.constant 0 : i32
    %c0_i32_0 = arith.constant 0 : i32
    return %arg0, %c0_i32 : i32, i32
  }
}

</mosaic_0001>

<bundles_post_ra>
// kernel: tpu_custom_call.1
= control target key start
LH: loop header
LB: loop body
LE: loop exit
PB: predicated region body
PF: predicated region fallthrough
CT: control target
= control target key end

     0   :  { %14 = vsyncpa [#allocation3], 0  ;;  %s12102_s0 = inlined_call_operand.hbm [shape: f32[64,256], index: 0, kind: input, shape index: {}]   ;;  %s12103_s1 = inlined_call_operand.hbm [shape: f32[512,128], index: 1, kind: input, shape index: {}]   ;;  %s12104_s2 = inlined_call_operand.hbm [shape: f32[256,128], index: 2, kind: input, shape index: {}]   ;;  %s12105_s3 = inlined_call_operand.hbm [shape: f32[128,128], index: 3, kind: input, shape index: {}]   ;;  %s12106_s4 = inlined_call_operand.vmem [shape: f32[1,128], index: 4, kind: input, shape index: {}]   ;;  %s12107_s5 = inlined_call_operand.hbm [shape: f32[128,256], index: 5, kind: input, shape index: {}]   ;;  %s12108_s6 = inlined_call_operand.vmem [shape: f32[1,256], index: 6, kind: input, shape index: {}]   ;;  %s12109_s7 = inlined_call_operand.vmem [shape: f32[1,256], index: 7, kind: input, shape index: {}]   ;;  %s12110_s8 = inlined_call_operand.vmem [shape: f32[2], index: 8, kind: input, shape index: {}]   ;;  %s12111_s9 = inlined_call_operand.hbm [shape: f32[64,128], index: 9, kind: output, shape index: {}]  }
   0x1   :  { %15 = vsyncpa [#allocation7], 0 }
   0x2   :  { %16 = vsyncpa [#allocation10], 0 }
   0x3   :  { %17 = vsyncpa [#allocation5], 0 }
   0x4   :  { %18 = vsyncpa [#allocation4], 0  ;;  %s7931_s30 = smov [#allocation6]   ;;  %s7777_s13 = scalar_lea.hbm %s12103_s1, 8192 }
   0x5   :  { %s36_s10 = sshll.u32 %s7931_s30, 4  ;;  %p7778_p0 = scmp.ne.s32.totalorder %s12103_s1, %s7777_s13  ;;  %s37_s10 = int_to_ptr.vmem [resolvable:$true] %s36_s10 }
   0x6   :  { %p7781_p1 = scmp.lt.u32.totalorder %s7777_s13, %s12103_s1 }
   0x8   :  { %p7783_p2 = pnand %p7781_p1, %p7778_p0 }
   0xa   :  { %7786 = shalt.err (!%p7783_p2)
}
   0xb   :  { %s7787_s18 = scalar_lea.vmem %s37_s10, 8192  ;;  %p7792_p4 = scmp.lt.s32.totalorder %s37_s10, %s37_s10 }
   0xc   :  { %p7788_p3 = scmp.ne.s32.totalorder %s37_s10, %s7787_s18  ;;  %p7793_p5 = scmp.lt.s32.totalorder %s7787_s18, %s7787_s18 }
   0xe   :  { %p7794_p6 = por %p7793_p5, %p7792_p4 }
  0x10   :  { %p7795_p7 = pnand %p7794_p6, %p7788_p3 }
  0x12   :  { %7798 = shalt.err (!%p7795_p7)
}
  0x13   :  { %s7932_s19 = smov 128   ;;  %s7933_s20 = smov 8  }
  0x14   :  { %42 = dma.hbm_to_vmem [thread:$0]  %s12103_s1, 8192, %s37_s10, [#allocation7], %s7932_s19, %s7932_s19, %s7933_s20  }
  0x15   :  { %s7934_s23 = smov [#allocation9]   ;;  %s7935_s25 = smov [#allocation2]  }
  0x16   :  { %s60_s24 = sshll.u32 %s7934_s23, 4  ;;  %s24_s26 = sshll.u32 %s7935_s25, 4  ;;  %s61_s24 = int_to_ptr.vmem [resolvable:$true] %s60_s24  ;;  %s25_s26 = int_to_ptr.vmem [resolvable:$true] %s24_s26 }
  0x17   :  { %s7799_s29 = scalar_lea.hbm %s12105_s3, 2048 }
  0x18   :  { %p7800_p8 = scmp.ne.s32.totalorder %s12105_s3, %s7799_s29  ;;  %p7803_p9 = scmp.lt.u32.totalorder %s7799_s29, %s12105_s3 }
  0x1a   :  { %p7805_p10 = pnand %p7803_p9, %p7800_p8 }
  0x1c   :  { %7808 = shalt.err (!%p7805_p10)
}
  0x1d   :  { %s7809_s1 = scalar_lea.vmem %s61_s24, 2048  ;;  %p7814_p12 = scmp.lt.s32.totalorder %s61_s24, %s61_s24 }
  0x1e   :  { %p7810_p11 = scmp.ne.s32.totalorder %s61_s24, %s7809_s1  ;;  %p7815_p13 = scmp.lt.s32.totalorder %s7809_s1, %s7809_s1 }
  0x20   :  { %p7816_p0 = por %p7815_p13, %p7814_p12 }
  0x22   :  { %p7817_p1 = pnand %p7816_p0, %p7810_p11 }
  0x24   :  { %7820 = shalt.err (!%p7817_p1)
}
  0x25   :  { %66 = dma.hbm_to_vmem [thread:$0]  %s12105_s3, 2048, %s61_s24, [#allocation10], %s7932_s19, %s7932_s19, %s7933_s20  }
  0x26   :  { %s7821_s17 = scalar_lea.hbm %s12102_s0, 2048 }
  0x27   :  { %p7822_p2 = scmp.ne.s32.totalorder %s12102_s0, %s7821_s17  ;;  %p7825_p3 = scmp.lt.u32.totalorder %s7821_s17, %s12102_s0 }
  0x29   :  { %p7827_p4 = pnand %p7825_p3, %p7822_p2 }
  0x2b   :  { %7830 = shalt.err (!%p7827_p4)
}
  0x2c   :  { %s7831_s25 = scalar_lea.vmem %s25_s26, 2048  ;;  %p7836_p6 = scmp.lt.s32.totalorder %s25_s26, %s25_s26 }
  0x2d   :  { %p7832_p5 = scmp.ne.s32.totalorder %s25_s26, %s7831_s25  ;;  %p7837_p7 = scmp.lt.s32.totalorder %s7831_s25, %s7831_s25 }
  0x2f   :  { %p7838_p8 = por %p7837_p7, %p7836_p6 }
  0x31   :  { %p7839_p9 = pnand %p7838_p8, %p7832_p5 }
  0x33   :  { %7842 = shalt.err (!%p7839_p9)
}
  0x34   :  { %s7936_s3 = smov 256   ;;  %s7937_s24 = smov 16  }
  0x35   :  { %30 = dma.hbm_to_vmem [thread:$0]  %s12102_s0, 2048, %s25_s26, [#allocation3], %s7936_s3, %s7936_s3, %s7937_s24  }
  0x36   :  { %s7938_s29 = smov [#allocation8]   ;;  %s7939_s11 = smov [#allocation11]  }
  0x37   :  { %s48_s30 = sshll.u32 %s7938_s29, 4  ;;  %s74_s12 = sshll.u32 %s7939_s11, 4  ;;  %s49_s30 = int_to_ptr.vmem [resolvable:$true] %s48_s30  ;;  %s75_s12 = int_to_ptr.vmem [resolvable:$true] %s74_s12 }
  0x38   :  { %s7843_s10 = scalar_lea.hbm %s12104_s2, 4096 }
  0x39   :  { %p7844_p10 = scmp.ne.s32.totalorder %s12104_s2, %s7843_s10  ;;  %p7847_p11 = scmp.lt.u32.totalorder %s7843_s10, %s12104_s2 }
  0x3b   :  { %p7849_p12 = pnand %p7847_p11, %p7844_p10 }
  0x3d   :  { %7852 = shalt.err (!%p7849_p12)
}
  0x3e   :  { %s7853_s0 = scalar_lea.vmem %s49_s30, 4096  ;;  %p7858_p0 = scmp.lt.s32.totalorder %s49_s30, %s49_s30 }
  0x3f   :  { %p7854_p13 = scmp.ne.s32.totalorder %s49_s30, %s7853_s0  ;;  %p7859_p1 = scmp.lt.s32.totalorder %s7853_s0, %s7853_s0 }
  0x41   :  { %p7860_p2 = por %p7859_p1, %p7858_p0 }
  0x43   :  { %p7861_p3 = pnand %p7860_p2, %p7854_p13 }
  0x45   :  { %7864 = shalt.err (!%p7861_p3)
}
  0x46   :  { %54 = dma.hbm_to_vmem [thread:$0]  %s12104_s2, 4096, %s49_s30, [#allocation7], %s7932_s19, %s7932_s19, %s7933_s20  }
  0x47   :  { %s91_s23 = sshll.u32 %s12110_s8, 4  ;;  %s7865_s28 = scalar_lea.hbm %s12107_s5, 4096  ;;  %s92_s23 = int_to_ptr.vmem [resolvable:$true] %s91_s23 }
  0x48   :  { %p7866_p4 = scmp.ne.s32.totalorder %s12107_s5, %s7865_s28  ;;  %p7869_p5 = scmp.lt.u32.totalorder %s7865_s28, %s12107_s5 }
  0x4a   :  { %p7871_p6 = pnand %p7869_p5, %p7866_p4 }
  0x4c   :  { %7874 = shalt.err (!%p7871_p6)
}
  0x4d   :  { %s7875_s2 = scalar_lea.vmem %s75_s12, 4096  ;;  %p7880_p8 = scmp.lt.s32.totalorder %s75_s12, %s75_s12 }
  0x4e   :  { %p7876_p7 = scmp.ne.s32.totalorder %s75_s12, %s7875_s2  ;;  %p7881_p9 = scmp.lt.s32.totalorder %s7875_s2, %s7875_s2 }
  0x50   :  { %p7882_p10 = por %p7881_p9, %p7880_p8 }
  0x52   :  { %p7883_p11 = pnand %p7882_p10, %p7876_p7 }
  0x54   :  { %7886 = shalt.err (!%p7883_p11)
}
  0x55   :  { %80 = dma.hbm_to_vmem [thread:$0]  %s12107_s5, 4096, %s75_s12, [#allocation10], %s7936_s3, %s7936_s3, %s7937_s24  }
  0x56   :  { %s7887_s10 = scalar_lea.vmem %s92_s23, 16  ;;  %p7892_p13 = scmp.lt.s32.totalorder %s92_s23, %s92_s23 }
  0x57   :  { %p7888_p12 = scmp.ne.s32.totalorder %s92_s23, %s7887_s10  ;;  %p7893_p0 = scmp.lt.s32.totalorder %s7887_s10, %s7887_s10 }
  0x59   :  { %p7894_p1 = por %p7893_p0, %p7892_p13 }
  0x5b   :  { %p7895_p2 = pnand %p7894_p1, %p7888_p12 }
  0x5d   :  { %7898 = shalt.err (!%p7895_p2)
}
  0x5e   :  { %s7940_s14 = smov [#allocation12]  }
  0x5f   :  { %94 = dma.vmem_to_smem %s92_s23, 16, %s7940_s14, [#allocation5]  }
  0x60   :  { %7921 = dma.done.wait [#allocation3], 2048  }
  0x61   :  { %7922 = vsyncadd [#allocation3], 4294965248 }
  0x62   :  { %7923 = dma.done.wait [#allocation7], 12288  }
  0x63   :  { %7924 = vsyncadd [#allocation7], 4294955008 }
  0x64   :  { %7925 = dma.done.wait [#allocation10], 6144  }
  0x65   :  { %7926 = vsyncadd [#allocation10], 4294961152 }
  0x66   :  { %7927 = dma.done.wait [#allocation5], 16  }
  0x67   :  { %7928 = vsyncadd [#allocation5], 4294967280 }
  0x68   :  { %113 = sfence }
  0x69   :  { %v178_v0 = vld [vmem:[#allocation9] sm:$0xff]  ;;  %v179_v1 = vld [vmem:[#allocation9 + $0x8] sm:$0xff]  ;;  %v180_v9 = vld [vmem:[#allocation9 + $0x10] sm:$0xff]  ;;  %s9921_s17 = sld [smem:[#allocation12 + $0x1]]  ;;  %s7944_s0 = smov [#allocation13]  }
  0x6a   :  { %v611_v2 = vld [vmem:[#allocation8 + $0x80] sm:$0xff]  ;;  %v7120_v3 = vpack.c.bf16 %v179_v1, %v178_v0  ;;  %v612_v4 = vld [vmem:[#allocation8 + $0x88] sm:$0xff]  ;;  %v181_v10 = vld [vmem:[#allocation9 + $0x18] sm:$0xff]  ;;  %s6647_s26 = sshll.u32 %s7944_s0, 4  ;;  %s6648_s26 = int_to_ptr.vmem [resolvable:$true] %s6647_s26 }
  0x6b   :  { %v595_v5 = vld [vmem:[#allocation8] sm:$0xff]  ;;  %v596_v6 = vld [vmem:[#allocation8 + $0x8] sm:$0xff]  ;;  %v7152_v7 = vpack.c.bf16 %v612_v4, %v611_v2  ;;  %v613_v11 = vld [vmem:[#allocation8 + $0x90] sm:$0xff]  ;;  %v7124_v12 = vpack.c.bf16 %v181_v10, %v180_v9  ;;  %s7899_s18 = scalar_lea.vmem %s6648_s26, 1024  ;;  %p7904_p4 = scmp.lt.s32.totalorder %s6648_s26, %s6648_s26 }
  0x6c   :  { %v7154_v8 = vpack.c.bf16 %v596_v6, %v595_v5  ;;  %7121 = vmatprep.subr.bf16.mxu0 %v7120_v3  ;;  %v614_v13 = vld [vmem:[#allocation8 + $0x98] sm:$0xff]  ;;  %v597_v14 = vld [vmem:[#allocation8 + $0x10] sm:$0xff]  ;;  %v182_v17 = vld [vmem:[#allocation9 + $0x20] sm:$0xff]  ;;  %p7900_p3 = scmp.ne.s32.totalorder %s6648_s26, %s7899_s18  ;;  %p7905_p5 = scmp.lt.s32.totalorder %s7899_s18, %s7899_s18 }
  0x6d   :  { %v598_v15 = vld [vmem:[#allocation8 + $0x18] sm:$0xff]  ;;  %7153 = vmatprep.subr.bf16.mxu1 %v7152_v7  ;;  %7123 = vmatpush3.bf16.msra.mxu0 %v7120_v3  ;;  %v7156_v16 = vpack.c.bf16 %v614_v13, %v613_v11  ;;  %v183_v18 = vld [vmem:[#allocation9 + $0x28] sm:$0xff]  ;;  %v615_v19 = vld [vmem:[#allocation8 + $0xa0] sm:$0xff] }
  0x6e   :  { %7155 = vmatpush3.bf16.msra.mxu1 %v7154_v8  ;;  %7125 = vmatprep.subr.bf16.mxu0 %v7124_v12  ;;  %v7158_v20 = vpack.c.bf16 %v598_v15, %v597_v14  ;;  %v7128_v21 = vpack.c.bf16 %v183_v18, %v182_v17  ;;  %v616_v22 = vld [vmem:[#allocation8 + $0xa8] sm:$0xff]  ;;  %v599_v23 = vld [vmem:[#allocation8 + $0x20] sm:$0xff]  ;;  %v184_v26 = vld [vmem:[#allocation9 + $0x30] sm:$0xff]  ;;  %p7906_p6 = por %p7905_p5, %p7904_p4 }
  0x6f   :  { %7157 = vmatprep.subr.bf16.mxu1 %v7156_v16  ;;  %v7160_v24 = vpack.c.bf16 %v616_v22, %v615_v19  ;;  %v600_v25 = vld [vmem:[#allocation8 + $0x28] sm:$0xff]  ;;  %v185_v27 = vld [vmem:[#allocation9 + $0x38] sm:$0xff]  ;;  %v617_v28 = vld [vmem:[#allocation8 + $0xb0] sm:$0xff] }
  0x70   :  { %v618_v29 = vld [vmem:[#allocation8 + $0xb8] sm:$0xff]  ;;  %v7162_v30 = vpack.c.bf16 %v600_v25, %v599_v23  ;;  %v7132_v31 = vpack.c.bf16 %v185_v27, %v184_v26  ;;  %v601_v32 = vld [vmem:[#allocation8 + $0x30] sm:$0xff]  ;;  %v186_v35 = vld [vmem:[#allocation9 + $0x40] sm:$0xff]  ;;  %p7907_p7 = pnand %p7906_p6, %p7900_p3 }
  0x71   :  { %7127 = vmatpush3.bf16.msra.mxu0 %v7124_v12  ;;  %v7164_v33 = vpack.c.bf16 %v618_v29, %v617_v28  ;;  %v602_v34 = vld [vmem:[#allocation8 + $0x38] sm:$0xff]  ;;  %v187_v36 = vld [vmem:[#allocation9 + $0x48] sm:$0xff]  ;;  %v619_v37 = vld [vmem:[#allocation8 + $0xc0] sm:$0xff] }
  0x72   :  { %7159 = vmatpush3.bf16.msra.mxu1 %v7158_v20  ;;  %7129 = vmatprep.subr.bf16.mxu0 %v7128_v21  ;;  %v620_v38 = vld [vmem:[#allocation8 + $0xc8] sm:$0xff]  ;;  %v7166_v39 = vpack.c.bf16 %v602_v34, %v601_v32  ;;  %v7136_v40 = vpack.c.bf16 %v187_v36, %v186_v35  ;;  %v603_v41 = vld [vmem:[#allocation8 + $0x40] sm:$0xff]  ;;  %v188_v44 = vld [vmem:[#allocation9 + $0x50] sm:$0xff] }
  0x73   :  { %7161 = vmatprep.subr.bf16.mxu1 %v7160_v24  ;;  %v7168_v42 = vpack.c.bf16 %v620_v38, %v619_v37  ;;  %v604_v43 = vld [vmem:[#allocation8 + $0x48] sm:$0xff]  ;;  %v189_v45 = vld [vmem:[#allocation9 + $0x58] sm:$0xff]  ;;  %v621_v46 = vld [vmem:[#allocation8 + $0xd0] sm:$0xff] }
  0x74   :  { %v622_v47 = vld [vmem:[#allocation8 + $0xd8] sm:$0xff]  ;;  %v114_v48 = vld [vmem:[#allocation6] sm:$0xff]  ;;  %v580_v49 = vld [vmem:[#allocation2 + $0x8] sm:$0xff]  ;;  %v7170_v50 = vpack.c.bf16 %v604_v43, %v603_v41  ;;  %v7140_v51 = vpack.c.bf16 %v189_v45, %v188_v44 }
  0x75   :  { %7131 = vmatpush3.bf16.msra.mxu0 %v7128_v21  ;;  %v605_v52 = vld [vmem:[#allocation8 + $0x50] sm:$0xff]  ;;  %v7172_v53 = vpack.c.bf16 %v622_v47, %v621_v46  ;;  %v606_v54 = vld [vmem:[#allocation8 + $0x58] sm:$0xff]  ;;  %v190_v55 = vld [vmem:[#allocation9 + $0x60] sm:$0xff]  ;;  %7024 = vmatprep.mubr.f32.mxu0 %v114_v48 }
  0x76   :  { %7163 = vmatpush3.bf16.msra.mxu1 %v7162_v30  ;;  %7133 = vmatprep.subr.bf16.mxu0 %v7132_v31  ;;  %v191_v56 = vld [vmem:[#allocation9 + $0x68] sm:$0xff]  ;;  %v623_v57 = vld [vmem:[#allocation8 + $0xe0] sm:$0xff]  ;;  %v7174_v59 = vpack.c.bf16 %v606_v54, %v605_v52  ;;  %v192_v0 = vld [vmem:[#allocation9 + $0x70] sm:$0xff] }
  0x77   :  { %7165 = vmatprep.subr.bf16.mxu1 %v7164_v33  ;;  %v624_v58 = vld [vmem:[#allocation8 + $0xe8] sm:$0xff]  ;;  %698 = vmatprep.mubr.f32.mxu1 %v580_v49  ;;  %v7144_v60 = vpack.c.bf16 %v191_v56, %v190_v55  ;;  %v607_v61 = vld [vmem:[#allocation8 + $0x60] sm:$0xff]  ;;  %v193_v1 = vld [vmem:[#allocation9 + $0x78] sm:$0xff] }
  0x78   :  { %v7176_v62 = vpack.c.bf16 %v624_v58, %v623_v57  ;;  %v608_v63 = vld [vmem:[#allocation8 + $0x68] sm:$0xff]  ;;  %v625_v2 = vld [vmem:[#allocation8 + $0xf0] sm:$0xff]  ;;  %v626_v3 = vld [vmem:[#allocation8 + $0xf8] sm:$0xff]  ;;  %v7148_v5 = vpack.c.bf16 %v193_v1, %v192_v0 }
  0x79   :  { %7135 = vmatpush3.bf16.msra.mxu0 %v7132_v31  ;;  %v7178_v4 = vpack.c.bf16 %v608_v63, %v607_v61  ;;  %v7180_v6 = vpack.c.bf16 %v626_v3, %v625_v2  ;;  %v609_v7 = vld [vmem:[#allocation8 + $0x70] sm:$0xff]  ;;  %v610_v8 = vld [vmem:[#allocation8 + $0x78] sm:$0xff]  ;;  %v115_v10 = vld [vmem:[#allocation6 + $0x8] sm:$0xff] }
  0x7a   :  { %7167 = vmatpush3.bf16.msra.mxu1 %v7166_v39  ;;  %7137 = vmatprep.subr.bf16.mxu0 %v7136_v40  ;;  %v7182_v9 = vpack.c.bf16 %v610_v8, %v609_v7  ;;  %v579_v11 = vld [vmem:[#allocation2] sm:$0xff]  ;;  %v116_v12 = vld [vmem:[#allocation6 + $0x10] sm:$0xff]  ;;  %v1908_v13 = vld [vmem:[#allocation11 + $0x8] sm:$0xff] }
  0x7b   :  { %7169 = vmatprep.subr.bf16.mxu1 %v7168_v42  ;;  %v1910_v14 = vld [vmem:[#allocation11 + $0x18] sm:$0xff]  ;;  %v1907_v17 = vld [vmem:[#allocation11] sm:$0xff]  ;;  %v1909_v18 = vld [vmem:[#allocation11 + $0x10] sm:$0xff] }
  0x7c   :  { %v582_v15 = vld [vmem:[#allocation2 + $0x18] sm:$0xff]  ;;  %v7184_v16 = vpack.c.bf16 %v1910_v14, %v1908_v13  ;;  %v7186_v20 = vpack.c.bf16 %v1909_v18, %v1907_v17  ;;  %v1912_v21 = vld [vmem:[#allocation11 + $0x28] sm:$0xff]  ;;  %v1911_v23 = vld [vmem:[#allocation11 + $0x20] sm:$0xff] }
  0x7d   :  { %7139 = vmatpush3.bf16.msra.mxu0 %v7136_v40  ;;  %v117_v19 = vld [vmem:[#allocation6 + $0x18] sm:$0xff]  ;;  %v581_v24 = vld [vmem:[#allocation2 + $0x10] sm:$0xff]  ;;  %v118_v25 = vld [vmem:[#allocation6 + $0x20] sm:$0xff] }
  0x7e   :  { %7171 = vmatpush3.bf16.msra.mxu1 %v7170_v50  ;;  %7141 = vmatprep.subr.bf16.mxu0 %v7140_v51  ;;  %v1914_v22 = vld [vmem:[#allocation11 + $0x38] sm:$0xff]  ;;  %v1913_v27 = vld [vmem:[#allocation11 + $0x30] sm:$0xff]  ;;  %v584_v28 = vld [vmem:[#allocation2 + $0x28] sm:$0xff] }
  0x7f   :  { %7173 = vmatprep.subr.bf16.mxu1 %v7172_v53  ;;  %v7188_v26 = vpack.c.bf16 %v1914_v22, %v1912_v21  ;;  %v7190_v29 = vpack.c.bf16 %v1913_v27, %v1911_v23  ;;  %v1916_v30 = vld [vmem:[#allocation11 + $0x48] sm:$0xff]  ;;  %v1918_v31 = vld [vmem:[#allocation11 + $0x58] sm:$0xff]  ;;  %v1915_v34 = vld [vmem:[#allocation11 + $0x40] sm:$0xff] }
  0x80   :  { %v119_v32 = vld [vmem:[#allocation6 + $0x28] sm:$0xff]  ;;  %v7192_v33 = vpack.c.bf16 %v1918_v31, %v1916_v30  ;;  %v1917_v35 = vld [vmem:[#allocation11 + $0x50] sm:$0xff]  ;;  %v583_v37 = vld [vmem:[#allocation2 + $0x20] sm:$0xff] }
  0x81   :  { %7143 = vmatpush3.bf16.msra.mxu0 %v7140_v51  ;;  %v120_v36 = vld [vmem:[#allocation6 + $0x30] sm:$0xff]  ;;  %v586_v38 = vld [vmem:[#allocation2 + $0x38] sm:$0xff]  ;;  %v7194_v39 = vpack.c.bf16 %v1917_v35, %v1915_v34  ;;  %v1920_v40 = vld [vmem:[#allocation11 + $0x68] sm:$0xff] }
  0x82   :  { %7175 = vmatpush3.bf16.msra.mxu1 %v7174_v59  ;;  %7145 = vmatprep.subr.bf16.mxu0 %v7144_v60  ;;  %v1922_v41 = vld [vmem:[#allocation11 + $0x78] sm:$0xff]  ;;  %v1919_v43 = vld [vmem:[#allocation11 + $0x60] sm:$0xff]  ;;  %v1921_v44 = vld [vmem:[#allocation11 + $0x70] sm:$0xff] }
  0x83   :  { %7177 = vmatprep.subr.bf16.mxu1 %v7176_v62  ;;  %v7196_v42 = vpack.c.bf16 %v1922_v41, %v1920_v40  ;;  %v121_v45 = vld [vmem:[#allocation6 + $0x38] sm:$0xff]  ;;  %v122_v46 = vld [vmem:[#allocation6 + $0x40] sm:$0xff]  ;;  %v585_v47 = vld [vmem:[#allocation2 + $0x30] sm:$0xff]  ;;  %v7198_v51 = vpack.c.bf16 %v1921_v44, %v1919_v43 }
  0x84   :  { %v1924_v48 = vld [vmem:[#allocation11 + $0x88] sm:$0xff]  ;;  %v1926_v49 = vld [vmem:[#allocation11 + $0x98] sm:$0xff]  ;;  %v1923_v53 = vld [vmem:[#allocation11 + $0x80] sm:$0xff] }
  0x85   :  { %7147 = vmatpush3.bf16.msra.mxu0 %v7144_v60  ;;  %v588_v50 = vld [vmem:[#allocation2 + $0x48] sm:$0xff]  ;;  %v7200_v52 = vpack.c.bf16 %v1926_v49, %v1924_v48  ;;  %v1925_v54 = vld [vmem:[#allocation11 + $0x90] sm:$0xff]  ;;  %v1930_v57 = vld [vmem:[#allocation11 + $0xb8] sm:$0xff] }
  0x86   :  { %7179 = vmatpush3.bf16.msra.mxu1 %v7178_v4  ;;  %7149 = vmatprep.subr.bf16.mxu0 %v7148_v5  ;;  %v123_v55 = vld [vmem:[#allocation6 + $0x48] sm:$0xff]  ;;  %v124_v58 = vld [vmem:[#allocation6 + $0x50] sm:$0xff]  ;;  %v587_v59 = vld [vmem:[#allocation2 + $0x40] sm:$0xff]  ;;  %v7202_v61 = vpack.c.bf16 %v1925_v54, %v1923_v53 }
  0x87   :  { %7181 = vmatprep.subr.bf16.mxu1 %v7180_v6  ;;  %v1928_v56 = vld [vmem:[#allocation11 + $0xa8] sm:$0xff]  ;;  %v590_v60 = vld [vmem:[#allocation2 + $0x58] sm:$0xff]  ;;  %v1927_v63 = vld [vmem:[#allocation11 + $0xa0] sm:$0xff] }
  0x88   :  { %v7204_v62 = vpack.c.bf16 %v1930_v57, %v1928_v56  ;;  %v1929_v0 = vld [vmem:[#allocation11 + $0xb0] sm:$0xff]  ;;  %v125_v1 = vld [vmem:[#allocation6 + $0x58] sm:$0xff]  ;;  %v1932_v2 = vld [vmem:[#allocation11 + $0xc8] sm:$0xff] }
  0x89   :  { %7151 = vmatpush3.bf16.msra.mxu0 %v7148_v5  ;;  %v1934_v3 = vld [vmem:[#allocation11 + $0xd8] sm:$0xff]  ;;  %v126_v4 = vld [vmem:[#allocation6 + $0x60] sm:$0xff]  ;;  %v589_v5 = vld [vmem:[#allocation2 + $0x50] sm:$0xff]  ;;  %v7206_v7 = vpack.c.bf16 %v1929_v0, %v1927_v63 }
  0x8a   :  { %7183 = vmatpush3.bf16.msra.mxu1 %v7182_v9  ;;  %7185 = vmatprep.subr.bf16.mxu0 %v7184_v16  ;;  %v592_v6 = vld [vmem:[#allocation2 + $0x68] sm:$0xff]  ;;  %v7208_v8 = vpack.c.bf16 %v1934_v3, %v1932_v2  ;;  %v129_v13 = vld [vmem:[#allocation6 + $0x78] sm:$0xff]  ;;  %v130_v14 = vld [vmem:[#allocation6 + $0x80] sm:$0xff] }
  0x8b   :  { %7216 = vmatprep.subr.bf16.mxu1 %v7184_v16  ;;  %v127_v9 = vld [vmem:[#allocation6 + $0x68] sm:$0xff]  ;;  %v132_v17 = vld [vmem:[#allocation6 + $0x90] sm:$0xff]  ;;  %v133_v18 = vld [vmem:[#allocation6 + $0x98] sm:$0xff] }
  0x8c   :  { %7025 = vmatmul.mubr.f32.vlgmr.msra.gmra.mrb[0].mxu0 %v115_v10  ;;  %v128_v10 = vld [vmem:[#allocation6 + $0x70] sm:$0xff]  ;;  %v131_v16 = vld [vmem:[#allocation6 + $0x88] sm:$0xff]  ;;  %v137_v22 = vld [vmem:[#allocation6 + $0xb8] sm:$0xff] }
  0x8d   :  { %699 = vmatmul.mubr.f32.vlgmr.msra.gmra.mrb[0].mxu1 %v579_v11  ;;  %7027 = vmatprep.mubr.f32.mxu0 %v116_v12  ;;  %v591_v11 = vld [vmem:[#allocation2 + $0x60] sm:$0xff]  ;;  %v594_v12 = vld [vmem:[#allocation2 + $0x78] sm:$0xff]  ;;  %v136_v21 = vld [vmem:[#allocation6 + $0xb0] sm:$0xff] }
  0x8e   :  { %703 = vmatprep.mubr.f32.mxu1 %v582_v15  ;;  %7187 = vmatpush1.bf16.msra.mxu0 %v7186_v20  ;;  %v593_v15 = vld [vmem:[#allocation2 + $0x70] sm:$0xff]  ;;  %v138_v23 = vld [vmem:[#allocation6 + $0xc0] sm:$0xff]  ;;  %v145_v30 = vld [vmem:[#allocation6 + $0xf8] sm:$0xff] }
  0x8f   :  { %7189 = vmatprep.subr.bf16.mxu0 %v7188_v26  ;;  %7224 = vmatpush1.bf16.msra.mxu1 %v7186_v20  ;;  %v135_v20 = vld [vmem:[#allocation6 + $0xa8] sm:$0xff]  ;;  %v142_v27 = vld [vmem:[#allocation6 + $0xe0] sm:$0xff]  ;;  %v149_v34 = vld [vmem:[#allocation6 + $0x118] sm:$0xff] }
  0x90   :  { %7028 = vmatmul.mubr.f32.gmra.mrb[2].mxu0 %v117_v19  ;;  %7217 = vmatprep.subr.bf16.mxu1 %v7188_v26  ;;  %v134_v19 = vld [vmem:[#allocation6 + $0xa0] sm:$0xff]  ;;  %v141_v26 = vld [vmem:[#allocation6 + $0xd8] sm:$0xff]  ;;  %v155_v40 = vld [vmem:[#allocation6 + $0x148] sm:$0xff] }
  0x91   :  { %704 = vmatmul.mubr.f32.gmra.mrb[2].mxu1 %v581_v24  ;;  %7030 = vmatprep.mubr.f32.mxu0 %v118_v25  ;;  %v139_v24 = vld [vmem:[#allocation6 + $0xc8] sm:$0xff]  ;;  %v140_v25 = vld [vmem:[#allocation6 + $0xd0] sm:$0xff]  ;;  %v146_v31 = vld [vmem:[#allocation6 + $0x100] sm:$0xff] }
  0x92   :  { %708 = vmatprep.mubr.f32.mxu1 %v584_v28  ;;  %7191 = vmatpush1.bf16.msra.mxu0 %v7190_v29  ;;  %v143_v28 = vld [vmem:[#allocation6 + $0xe8] sm:$0xff]  ;;  %v150_v35 = vld [vmem:[#allocation6 + $0x120] sm:$0xff]  ;;  %v156_v41 = vld [vmem:[#allocation6 + $0x150] sm:$0xff] }
  0x93   :  { %7193 = vmatprep.subr.bf16.mxu0 %v7192_v33  ;;  %7225 = vmatpush1.bf16.msra.mxu1 %v7190_v29  ;;  %v144_v29 = vld [vmem:[#allocation6 + $0xf0] sm:$0xff]  ;;  %v158_v43 = vld [vmem:[#allocation6 + $0x160] sm:$0xff]  ;;  %v161_v49 = vld [vmem:[#allocation6 + $0x178] sm:$0xff] }
  0x94   :  { %7031 = vmatmul.mubr.f32.gmra.mrb[4].mxu0 %v119_v32  ;;  %7218 = vmatprep.subr.bf16.mxu1 %v7192_v33  ;;  %v147_v32 = vld [vmem:[#allocation6 + $0x108] sm:$0xff]  ;;  %v148_v33 = vld [vmem:[#allocation6 + $0x110] sm:$0xff]  ;;  %v1931_v44 = vld [vmem:[#allocation11 + $0xc0] sm:$0xff] }
  0x95   :  { %7033 = vmatprep.mubr.f32.mxu0 %v120_v36  ;;  %709 = vmatmul.mubr.f32.gmra.mrb[4].mxu1 %v583_v37  ;;  %v151_v36 = vld [vmem:[#allocation6 + $0x128] sm:$0xff]  ;;  %v152_v37 = vld [vmem:[#allocation6 + $0x130] sm:$0xff]  ;;  %v165_v53 = vld [vmem:[#allocation6 + $0x198] sm:$0xff] }
  0x96   :  { %713 = vmatprep.mubr.f32.mxu1 %v586_v38  ;;  %7195 = vmatpush1.bf16.msra.mxu0 %v7194_v39  ;;  %v153_v38 = vld [vmem:[#allocation6 + $0x138] sm:$0xff]  ;;  %v160_v48 = vld [vmem:[#allocation6 + $0x170] sm:$0xff]  ;;  %v166_v54 = vld [vmem:[#allocation6 + $0x1a0] sm:$0xff] }
  0x97   :  { %7197 = vmatprep.subr.bf16.mxu0 %v7196_v42  ;;  %7226 = vmatpush1.bf16.msra.mxu1 %v7194_v39  ;;  %v154_v39 = vld [vmem:[#allocation6 + $0x140] sm:$0xff]  ;;  %v168_v56 = vld [vmem:[#allocation6 + $0x1b0] sm:$0xff]  ;;  %v169_v57 = vld [vmem:[#allocation6 + $0x1b8] sm:$0xff] }
  0x98   :  { %7034 = vmatmul.mubr.f32.gmra.mrb[6].mxu0 %v121_v45  ;;  %7219 = vmatprep.subr.bf16.mxu1 %v7196_v42  ;;  %v157_v42 = vld [vmem:[#allocation6 + $0x158] sm:$0xff]  ;;  %v1933_v45 = vld [vmem:[#allocation11 + $0xd0] sm:$0xff]  ;;  %v174_v0 = vld [vmem:[#allocation6 + $0x1e0] sm:$0xff] }
  0x99   :  { %7036 = vmatprep.mubr.f32.mxu0 %v122_v46  ;;  %714 = vmatmul.mubr.f32.gmra.mrb[6].mxu1 %v585_v47  ;;  %v159_v46 = vld [vmem:[#allocation6 + $0x168] sm:$0xff]  ;;  %v7210_v47 = vpack.c.bf16 %v1933_v45, %v1931_v44  ;;  %v1938_v63 = vld [vmem:[#allocation11 + $0xf8] sm:$0xff]  ;;  %v1935_v2 = vld [vmem:[#allocation11 + $0xe0] sm:$0xff] }
  0x9a   :  { %718 = vmatprep.mubr.f32.mxu1 %v588_v50  ;;  %7199 = vmatpush1.bf16.msra.mxu0 %v7198_v51  ;;  %v162_v50 = vld [vmem:[#allocation6 + $0x180] sm:$0xff]  ;;  %v1937_v3 = vld [vmem:[#allocation11 + $0xf0] sm:$0xff] }
  0x9b   :  { %7201 = vmatprep.subr.bf16.mxu0 %v7200_v52  ;;  %7227 = vmatpush1.bf16.msra.mxu1 %v7198_v51  ;;  %v163_v51 = vld [vmem:[#allocation6 + $0x188] sm:$0xff] }
  0x9c   :  { %7037 = vmatmul.mubr.f32.gmra.mrb[8].mxu0 %v123_v55  ;;  %7220 = vmatprep.subr.bf16.mxu1 %v7200_v52  ;;  %v164_v52 = vld [vmem:[#allocation6 + $0x190] sm:$0xff]  ;;  %v167_v55 = vld [vmem:[#allocation6 + $0x1a8] sm:$0xff] }
  0x9d   :  { %7039 = vmatprep.mubr.f32.mxu0 %v124_v58  ;;  %719 = vmatmul.mubr.f32.gmra.mrb[8].mxu1 %v587_v59  ;;  %v170_v58 = vld [vmem:[#allocation6 + $0x1c0] sm:$0xff]  ;;  %v171_v59 = vld [vmem:[#allocation6 + $0x1c8] sm:$0xff] }
  0x9e   :  { %723 = vmatprep.mubr.f32.mxu1 %v590_v60  ;;  %7203 = vmatpush1.bf16.msra.mxu0 %v7202_v61  ;;  %v172_v60 = vld [vmem:[#allocation6 + $0x1d0] sm:$0xff] }
  0x9f   :  { %7205 = vmatprep.subr.bf16.mxu0 %v7204_v62  ;;  %7228 = vmatpush1.bf16.msra.mxu1 %v7202_v61  ;;  %v173_v61 = vld [vmem:[#allocation6 + $0x1d8] sm:$0xff] }
  0xa0   :  { %7040 = vmatmul.mubr.f32.gmra.mrb[10].mxu0 %v125_v1  ;;  %7221 = vmatprep.subr.bf16.mxu1 %v7204_v62  ;;  %v1936_v62 = vld [vmem:[#allocation11 + $0xe8] sm:$0xff] }
  0xa1   :  { %7042 = vmatprep.mubr.f32.mxu0 %v126_v4  ;;  %724 = vmatmul.mubr.f32.gmra.mrb[10].mxu1 %v589_v5  ;;  %v7212_v1 = vpack.c.bf16 %v1938_v63, %v1936_v62  ;;  %v7214_v4 = vpack.c.bf16 %v1937_v3, %v1935_v2  ;;  %v175_v5 = vld [vmem:[#allocation6 + $0x1e8] sm:$0xff] }
  0xa2   :  { %728 = vmatprep.mubr.f32.mxu1 %v592_v6  ;;  %7207 = vmatpush1.bf16.msra.mxu0 %v7206_v7  ;;  %v176_v6 = vld [vmem:[#allocation6 + $0x1f0] sm:$0xff] }
  0xa3   :  { %7209 = vmatprep.subr.bf16.mxu0 %v7208_v8  ;;  %7229 = vmatpush1.bf16.msra.mxu1 %v7206_v7  ;;  %v177_v7 = vld [vmem:[#allocation6 + $0x1f8] sm:$0xff] }
  0xa4   :  { %7043 = vmatmul.mubr.f32.gmra.mrb[12].mxu0 %v127_v9  ;;  %7222 = vmatprep.subr.bf16.mxu1 %v7208_v8  ;;  %v12113_v8 = vmov 0.0   ;;  %v7942_v9 = vmov 1966171168  }
  0xa5   :  { %7045 = vmatprep.mubr.f32.mxu0 %v128_v10  ;;  %729 = vmatmul.mubr.f32.gmra.mrb[12].mxu1 %v591_v11  ;;  %v749_v10 = vunpack.c.l.s4 %v7942_v9  ;;  %v12112_v11 = vlaneseq }
  0xa6   :  { %733 = vmatprep.mubr.f32.mxu1 %v594_v12  ;;  %7211 = vmatpush1.bf16.msra.mxu0 %v7210_v47 }
  0xa7   :  { %7230 = vmatpush1.bf16.msra.mxu1 %v7210_v47  ;;  %7213 = vmatprep.subr.bf16.mxu0 %v7212_v1  ;;  %v750_v12 = vunpack.c.0.s8 %v749_v10 }
  0xa8   :  { %7046 = vmatmul.mubr.f32.gmra.mrb[14].mxu0 %v129_v13  ;;  %7223 = vmatprep.subr.bf16.mxu1 %v7212_v1  ;;  %v8076_v13 = vshrl.u32 %v12112_v11, 7 }
  0xa9   :  { %7048 = vmatprep.mubr.f32.mxu0 %v130_v14  ;;  %734 = vmatmul.mubr.f32.gmra.mrb[14].mxu1 %v593_v15 }
  0xaa   :  { %7215 = vmatpush1.bf16.msra.mxu0 %v7214_v4  ;;  %2135 = vmatprep.mubr.f32.mxu1 %v12113_v8  ;;  %12212 = vst [vmem:[#allocation19_spill] sm:$0xff] %v8076_v13 }
  0xab   :  { %7231 = vmatpush1.bf16.msra.mxu1 %v7214_v4 }
  0xac   :  { %7049 = vmatmul.mubr.f32.gmra.mrb[16].mxu0 %v131_v16 }
  0xad   :  { %7051 = vmatprep.mubr.f32.mxu0 %v132_v17  ;;  %v8083_v17 = vld [vmem:[%s12106_s4] ss:$0 sm:$0xff] }
  0xb0   :  { %7052 = vmatmul.mubr.f32.gmra.mrb[18].mxu0 %v133_v18 }
  0xb1   :  { %7054 = vmatprep.mubr.f32.mxu0 %v134_v19 }
  0xb4   :  { %7055 = vmatmul.mubr.f32.gmra.mrb[20].mxu0 %v135_v20  ;;  %v8086_v20 = vsub.s32 %v750_v12, %v8076_v13 }
  0xb5   :  { %7057 = vmatprep.mubr.f32.mxu0 %v136_v21 }
  0xb8   :  { %7058 = vmatmul.mubr.f32.gmra.mrb[22].mxu0 %v137_v22 }
  0xb9   :  { %7060 = vmatprep.mubr.f32.mxu0 %v138_v23 }
  0xbc   :  { %7061 = vmatmul.mubr.f32.gmra.mrb[24].mxu0 %v139_v24 }
  0xbd   :  { %7063 = vmatprep.mubr.f32.mxu0 %v140_v25 }
  0xc0   :  { %7064 = vmatmul.mubr.f32.gmra.mrb[26].mxu0 %v141_v26 }
  0xc1   :  { %7066 = vmatprep.mubr.f32.mxu0 %v142_v27 }
  0xc4   :  { %7067 = vmatmul.mubr.f32.gmra.mrb[28].mxu0 %v143_v28  ;;  %v8091_v28 = vsub.s32 0, %v8076_v13 }
  0xc5   :  { %7069 = vmatprep.mubr.f32.mxu0 %v144_v29 }
  0xc6   :  { %12213 = vst [vmem:[#allocation20_spill] sm:$0xff] %v8091_v28 }
  0xc8   :  { %7070 = vmatmul.mubr.f32.gmra.mrb[30].mxu0 %v145_v30 }
  0xc9   :  { %7072 = vmatprep.mubr.f32.mxu0 %v146_v31 }
  0xcc   :  { %7073 = vmatmul.mubr.f32.gmra.mrb[32].mxu0 %v147_v32 }
  0xcd   :  { %7075 = vmatprep.mubr.f32.mxu0 %v148_v33 }
  0xd0   :  { %7076 = vmatmul.mubr.f32.gmra.mrb[34].mxu0 %v149_v34 }
  0xd1   :  { %7078 = vmatprep.mubr.f32.mxu0 %v150_v35 }
  0xd4   :  { %7079 = vmatmul.mubr.f32.gmra.mrb[36].mxu0 %v151_v36 }
  0xd5   :  { %7081 = vmatprep.mubr.f32.mxu0 %v152_v37 }
  0xd8   :  { %7082 = vmatmul.mubr.f32.gmra.mrb[38].mxu0 %v153_v38 }
  0xd9   :  { %7084 = vmatprep.mubr.f32.mxu0 %v154_v39 }
  0xdc   :  { %7085 = vmatmul.mubr.f32.gmra.mrb[40].mxu0 %v155_v40 }
  0xdd   :  { %7087 = vmatprep.mubr.f32.mxu0 %v156_v41 }
  0xe0   :  { %7088 = vmatmul.mubr.f32.gmra.mrb[42].mxu0 %v157_v42 }
  0xe1   :  { %7090 = vmatprep.mubr.f32.mxu0 %v158_v43 }
  0xe4   :  { %7091 = vmatmul.mubr.f32.gmra.mrb[44].mxu0 %v159_v46 }
  0xe5   :  { %7093 = vmatprep.mubr.f32.mxu0 %v160_v48 }
  0xe8   :  { %7094 = vmatmul.mubr.f32.gmra.mrb[46].mxu0 %v161_v49 }
  0xe9   :  { %7096 = vmatprep.mubr.f32.mxu0 %v162_v50 }
  0xec   :  { %7097 = vmatmul.mubr.f32.gmra.mrb[48].mxu0 %v163_v51 }
  0xed   :  { %7099 = vmatprep.mubr.f32.mxu0 %v164_v52 }
  0xf0   :  { %7100 = vmatmul.mubr.f32.gmra.mrb[50].mxu0 %v165_v53 }
  0xf1   :  { %7102 = vmatprep.mubr.f32.mxu0 %v166_v54 }
  0xf4   :  { %7103 = vmatmul.mubr.f32.gmra.mrb[52].mxu0 %v167_v55 }
  0xf5   :  { %7105 = vmatprep.mubr.f32.mxu0 %v168_v56 }
  0xf8   :  { %7106 = vmatmul.mubr.f32.gmra.mrb[54].mxu0 %v169_v57 }
  0xf9   :  { %7108 = vmatprep.mubr.f32.mxu0 %v170_v58 }
  0xfc   :  { %7109 = vmatmul.mubr.f32.gmra.mrb[56].mxu0 %v171_v59 }
  0xfd   :  { %7111 = vmatprep.mubr.f32.mxu0 %v172_v60 }
 0x100   :  { %7112 = vmatmul.mubr.f32.gmra.mrb[58].mxu0 %v173_v61 }
 0x101   :  { %7114 = vmatprep.mubr.f32.mxu0 %v174_v0 }
 0x104   :  { %7115 = vmatmul.mubr.f32.gmra.mrb[60].mxu0 %v175_v5 }
 0x105   :  { %7117 = vmatprep.mubr.f32.mxu0 %v176_v6 }
 0x108   :  { %7118 = vmatmul.mubr.f32.gmra.mrb[62].mxu0 %v177_v7 }
 0x109   :  { %2015 = vmatprep.mubr.f32.mxu0 %v12113_v8 }
 0x15f   :  { %v8078_v14 = vpop.f32.mrb[0].mxu0 }
 0x160   :  { %v6968_v15 = vpop.f32.mrb[0].mxu1  ;;  %v260_v16 = vpop.f32.mrb[1].mxu0 }
 0x161   :  { %v6969_v18 = vpop.f32.mrb[1].mxu1 }
 0x162   :  { %v6970_v19 = vadd.f32 %v6969_v18, %v6968_v15 }
 0x163   :  { %v7029_v21 = vpop.f32.mrb[2].mxu0 }
 0x164   :  { %v701_v22 = vadd.f32 %v6970_v19, %v8083_v17  ;;  %v6971_v23 = vpop.f32.mrb[2].mxu1  ;;  %v270_v24 = vpop.f32.mrb[3].mxu0 }
 0x165   :  { %v6972_v25 = vpop.f32.mrb[3].mxu1 }
 0x166   :  { %v747_v26 = vcombine.high %v701_v22, %v701_v22  ;;  %v754_v27 = vrot.slane %v701_v22, %v8086_v20  ;;  %v6973_v29 = vadd.f32 %v6972_v25, %v6971_v23 }
 0x167   :  { %v7032_v30 = vpop.f32.mrb[4].mxu0 }
 0x168   :  { %v761_v31 = vrot.slane %v747_v26, %v8086_v20  ;;  %v762_v32 = vcombine.high %v754_v27, %v754_v27  ;;  %v770_v33 = vrot.slane %v754_v27, %v8086_v20  ;;  %v706_v34 = vadd.f32 %v6973_v29, %v8083_v17  ;;  %v280_v35 = vpop.f32.mrb[5].mxu0  ;;  %v6974_v36 = vpop.f32.mrb[4].mxu1 }
 0x169   :  { %v6975_v37 = vpop.f32.mrb[5].mxu1 }
 0x16a   :  { %v1142_v38 = vrot.slane %v770_v33, %v8091_v28  ;;  %v8098_v39 = vrot.slane %v762_v32, %v8086_v20  ;;  %v803_v40 = vrot.slane %v706_v34, %v8086_v20  ;;  %v792_v41 = vcombine.high %v770_v33, %v770_v33 }
 0x16b   :  { %v763_v42 = vcombine.high %v761_v31, %v761_v31  ;;  %v777_v43 = vrot.slane %v761_v31, %v8086_v20  ;;  %v7035_v44 = vpop.f32.mrb[6].mxu0  ;;  %v6976_v45 = vadd.f32 %v6975_v37, %v6974_v36  ;;  %v796_v58 = vcombine.high %v706_v34, %v706_v34 }
 0x16c   :  { %v8102_v46 = vadd.f32 %v1142_v38, %v260_v16  ;;  %v794_v47 = vcombine.high %v8098_v39, %v8098_v39  ;;  %v290_v48 = vpop.f32.mrb[7].mxu0  ;;  %v811_v49 = vcombine.high %v803_v40, %v803_v40  ;;  %v8106_v50 = vpop.f32.mrb[6].mxu1  ;;  %v1150_v51 = vrot.slane %v792_v41, %v8091_v28 }
 0x16d   :  { %v791_v52 = vrot.slane %v763_v42, %v8086_v20  ;;  %v1158_v53 = vrot.slane %v777_v43, %v8091_v28  ;;  %v793_v54 = vcombine.high %v777_v43, %v777_v43  ;;  %v8111_v55 = vpop.f32.mrb[7].mxu1  ;;  %v810_v19 = vrot.slane %v796_v58, %v8086_v20 }
 0x16e   :  { %v1587_v56 = vmin.f32 %v8102_v46, 0.0  ;;  %v1154_v57 = vrot.slane %v794_v47, %v8091_v28  ;;  %v833_v59 = vrot.slane %v811_v49, %v8086_v20  ;;  %v8116_v60 = vadd.f32 %v1150_v51, %v270_v24 }
 0x16f   :  { %v1162_v61 = vrot.slane %v791_v52, %v8091_v28  ;;  %v8119_v62 = vadd.f32 %v1158_v53, %v280_v35  ;;  %v795_v63 = vcombine.high %v791_v52, %v791_v52  ;;  %v7038_v0 = vpop.f32.mrb[8].mxu0  ;;  %v1166_v3 = vrot.slane %v793_v54, %v8091_v28 }
 0x170   :  { %v1651_v1 = vmul.f32 1.442695, %v1587_v56  ;;  %v8121_v2 = vadd.f32 %v7029_v21, %v1154_v57  ;;  %v1178_v4 = vrot.slane %v833_v59, %v8091_v28  ;;  %v300_v5 = vpop.f32.mrb[9].mxu0  ;;  %v8125_v6 = vpop.f32.mrb[8].mxu1  ;;  %v819_v21 = vrot.slane %v803_v40, %v8086_v20 }
 0x171   :  { %v8127_v7 = vadd.f32 %v7032_v30, %v1162_v61  ;;  %v1170_v9 = vrot.slane %v795_v63, %v8091_v28  ;;  %v8130_v10 = vpop.f32.mrb[9].mxu1  ;;  %v8132_v12 = vadd.f32 %v1166_v3, %v290_v48  ;;  %v843_v24 = vcombine.high %v833_v59, %v833_v59 }
 0x172   :  { %7248 = vpow2.f32 %v1651_v1  ;;  %v8134_v15 = vadd.f32 %v7038_v0, %v1178_v4  ;;  %v1174_v26 = vrot.slane %v819_v21, %v8091_v28  ;;  %v711_v31 = vadd.f32 %v6976_v45, %v8083_v17 }
 0x173   :  { %v8136_v16 = vadd.f32 %v7035_v44, %v1170_v9  ;;  %v7041_v18 = vpop.f32.mrb[10].mxu0  ;;  %v1186_v27 = vrot.slane %v843_v24, %v8091_v28  ;;  %v841_v32 = vcombine.high %v819_v21, %v819_v21  ;;  %v812_v33 = vcombine.high %v810_v19, %v810_v19 }
 0x174   :  { %v310_v22 = vpop.f32.mrb[11].mxu0  ;;  %v8140_v23 = vpop.f32.mrb[10].mxu1  ;;  %v8146_v30 = vadd.f32 %v1174_v26, %v300_v5  ;;  %v1589_v38 = vmin.f32 %v8116_v60, 0.0  ;;  %vm1523_vm0 = vcmp.gt.f32.partialorder %v8102_v46, 0.0  ;;  %v1590_v42 = vmin.f32 %v8121_v2, 0.0 }
 0x175   :  { %12214 = vst [vmem:[#allocation21_spill] sm:$0xff] %v8140_v23  ;;  %v8142_v25 = vpop.f32.mrb[11].mxu1  ;;  %v8151_v36 = vadd.f32 %v7041_v18, %v1186_v27  ;;  %v1182_v40 = vrot.slane %v841_v32, %v8091_v28  ;;  %v840_v41 = vrot.slane %v812_v33, %v8086_v20  ;;  %v826_v43 = vrot.slane %v810_v19, %v8086_v20 }
 0x176   :  { %12215 = vst [vmem:[#allocation22_spill] sm:$0xff] %v8142_v25  ;;  %v852_v47 = vrot.slane %v711_v31, %v8086_v20  ;;  %v1591_v54 = vmin.f32 %v8119_v62, 0.0  ;;  %v1655_v58 = vmul.f32 1.442695, %v1589_v38  ;;  %v1592_v59 = vmin.f32 %v8127_v7, 0.0 }
 0x177   :  { %v7044_v29 = vpop.f32.mrb[12].mxu0  ;;  %v8162_v48 = vadd.f32 %v1182_v40, %v310_v22  ;;  %v1194_v49 = vrot.slane %v840_v41, %v8091_v28  ;;  %v844_v51 = vcombine.high %v840_v41, %v840_v41  ;;  %v1190_v56 = vrot.slane %v826_v43, %v8091_v28 }
 0x178   :  { %v320_v34 = vpop.f32.mrb[13].mxu0  ;;  %v8149_v35 = vpop.f32.mrb[12].mxu1  ;;  %v842_v57 = vcombine.high %v826_v43, %v826_v43  ;;  %v845_v1 = vcombine.high %v711_v31, %v711_v31  ;;  %v1657_v9 = vmul.f32 1.442695, %v1590_v42  ;;  %v1594_v18 = vmin.f32 %v8136_v16, 0.0 }
 0x179   :  { %12216 = vst [vmem:[#allocation23_spill] sm:$0xff] %v8149_v35  ;;  %v8153_v37 = vpop.f32.mrb[13].mxu1  ;;  %v8168_v61 = vadd.f32 %v7044_v29, %v1194_v49  ;;  %v1202_v63 = vrot.slane %v844_v51, %v8091_v28  ;;  %v8174_v3 = vadd.f32 %v1190_v56, %v320_v34  ;;  %v860_v21 = vcombine.high %v852_v47, %v852_v47 }
 0x17a   :  { %12217 = vst [vmem:[#allocation24_spill] sm:$0xff] %v8153_v37  ;;  %v1198_v4 = vrot.slane %v842_v57, %v8091_v28  ;;  %v1593_v24 = vmin.f32 %v8132_v12, 0.0  ;;  %v1146_v27 = vrot.slane %v8098_v39, %v8091_v28  ;;  %v1661_v29 = vmul.f32 1.442695, %v1592_v59 }
 0x17b   :  { %v7047_v44 = vpop.f32.mrb[14].mxu0  ;;  %v1659_v31 = vmul.f32 1.442695, %v1591_v54  ;;  %v882_v32 = vrot.slane %v860_v21, %v8086_v20  ;;  %v1596_v33 = vmin.f32 %v8134_v15, 0.0  ;;  %v859_v34 = vrot.slane %v845_v1, %v8086_v20 }
 0x17c   :  { %v7249_v45 = vpop.eup %7248  ;;  %v330_v52 = vpop.f32.mrb[15].mxu0  ;;  %v8178_v19 = vadd.f32 %v7047_v44, %v1202_v63  ;;  %v8192_v41 = vadd.f32 %v8078_v14, %v1146_v27  ;;  %7250 = vpow2.f32 %v1655_v58  ;;  %v1665_v42 = vmul.f32 1.442695, %v1594_v18 }
 0x17d   :  { %v6663_v53 = vadd.f32 -1.0, %v7249_v45  ;;  %v8181_v26 = vadd.f32 %v1198_v4, %v330_v52  ;;  %v1210_v43 = vrot.slane %v882_v32, %v8091_v28  ;;  %v892_v44 = vcombine.high %v882_v32, %v882_v32 }
 0x17e   :  { %12218 = vst [vmem:[#allocation25_spill] sm:$0xff] %v8178_v19  ;;  %7252 = vpow2.f32 %v1657_v9  ;;  %v1663_v45 = vmul.f32 1.442695, %v1593_v24  ;;  %v1588_v14 = vmin.f32 %v8192_v41, 0.0  ;;  %v861_v57 = vcombine.high %v859_v34, %v859_v34 }
 0x17f   :  { %v1843_v0 = vsel %vm1523_vm0, %v8102_v46, %v6663_v53  ;;  %v7050_v5 = vpop.f32.mrb[16].mxu0  ;;  %12219 = vst [vmem:[#allocation26_spill] sm:$0xff] %v8181_v26  ;;  %v868_v46 = vrot.slane %v852_v47, %v8086_v20  ;;  %v1595_v47 = vmin.f32 %v8146_v30, 0.0  ;;  %7254 = vpow2.f32 %v1661_v29 }
 0x180   :  { %2016 = vmatmul.mubr.f32.vlgmr.msra.gmra.mrb[64].mxu0 %v1843_v0  ;;  %v340_v22 = vpop.f32.mrb[17].mxu0  ;;  %v8198_v51 = vadd.f32 %v7050_v5, %v1210_v43  ;;  %v1218_v52 = vrot.slane %v892_v44, %v8091_v28  ;;  %7256 = vpow2.f32 %v1659_v31  ;;  %v1598_v53 = vmin.f32 %v8151_v36, 0.0 }
 0x181   :  { %2021 = vmatprep.mubr.f32.mxu0 %v12113_v8  ;;  %v1206_v38 = vrot.slane %v868_v46, %v8091_v28  ;;  %v890_v54 = vcombine.high %v868_v46, %v868_v46  ;;  %7258 = vpow2.f32 %v1665_v42  ;;  %v1669_v58 = vmul.f32 1.442695, %v1596_v33 }
 0x182   :  { %v1653_v63 = vmul.f32 1.442695, %v1588_v14  ;;  %v1667_v1 = vmul.f32 1.442695, %v1595_v47  ;;  %v1597_v4 = vmin.f32 %v8162_v48, 0.0  ;;  %v889_v9 = vrot.slane %v861_v57, %v8086_v20 }
 0x183   :  { %v7053_v40 = vpop.f32.mrb[18].mxu0  ;;  %v8196_v49 = vadd.f32 %v1206_v38, %v340_v22  ;;  %v1214_v5 = vrot.slane %v890_v54, %v8091_v28  ;;  %v875_v18 = vrot.slane %v859_v34, %v8086_v20  ;;  %v1673_v21 = vmul.f32 1.442695, %v1598_v53 }
 0x184   :  { %v350_v39 = vpop.f32.mrb[19].mxu0  ;;  %v8203_v59 = vadd.f32 %v7053_v40, %v1218_v52  ;;  %7260 = vpow2.f32 %v1653_v63  ;;  %v1226_v24 = vrot.slane %v889_v9, %v8091_v28  ;;  %v893_v29 = vcombine.high %v889_v9, %v889_v9  ;;  %v8232_v63 = vpop.f32.mrb[14].mxu1 }
 0x185   :  { %7262 = vpow2.f32 %v1663_v45  ;;  %v8209_v22 = vadd.f32 %v1214_v5, %v350_v39  ;;  %v1222_v27 = vrot.slane %v875_v18, %v8091_v28  ;;  %v1671_v32 = vmul.f32 1.442695, %v1597_v4  ;;  %12220 = vst [vmem:[#allocation27_spill] sm:$0xff] %v8232_v63 }
 0x186   :  { %7264 = vpow2.f32 %v1669_v58  ;;  %v7251_v38 = vpop.eup %7250  ;;  %v1600_v40 = vmin.f32 %v8168_v61, 0.0  ;;  %v1234_v42 = vrot.slane %v893_v29, %v8091_v28  ;;  %v891_v43 = vcombine.high %v875_v18, %v875_v18  ;;  %v8247_v29 = vpop.f32.mrb[15].mxu1 }
 0x187   :  { %v7056_v56 = vpop.f32.mrb[20].mxu0  ;;  %7266 = vpow2.f32 %v1667_v1  ;;  %v1599_v39 = vmin.f32 %v8174_v3, 0.0  ;;  %v6979_v47 = vadd.f32 %v8111_v55, %v8106_v50  ;;  %v1602_v53 = vmin.f32 %v8178_v19, 0.0  ;;  %12221 = vst [vmem:[#allocation28_spill] sm:$0xff] %v8247_v29 }
 0x188   :  { %v360_v0 = vpop.f32.mrb[21].mxu0  ;;  %v8213_v33 = vadd.f32 %v7056_v56, %v1226_v24  ;;  %v8219_v44 = vpop.eup %7252  ;;  %7268 = vpow2.f32 %v1673_v21  ;;  %v1230_v57 = vrot.slane %v891_v43, %v8091_v28  ;;  %v8239_v55 = vmul.f32 1.442695, %v1600_v40 }
 0x189   :  { %v8216_v34 = vadd.f32 %v1222_v27, %v360_v0  ;;  %v8225_v14 = vpop.eup %7254  ;;  %7270 = vpow2.f32 %v1671_v32  ;;  %v716_v1 = vadd.f32 %v6979_v47, %v8083_v17  ;;  %v1601_v4 = vmin.f32 %v8181_v26, 0.0 }
 0x18a   :  { %v1608_v45 = vmin.f32 %v8213_v33, 0.0  ;;  %v8234_v0 = vpop.eup %7256  ;;  %v8244_v18 = vmul.f32 1.442695, %v1599_v39  ;;  %v6665_v43 = vadd.f32 -1.0, %v7251_v38  ;;  %vm1524_vm1 = vcmp.gt.f32.partialorder %v8192_v41, 0.0 }
 0x18b   :  { %v7059_v46 = vpop.f32.mrb[22].mxu0  ;;  %v1607_v54 = vmin.f32 %v8216_v34, 0.0  ;;  %v8237_v50 = vpop.eup %7258  ;;  %v894_v24 = vcombine.high %v716_v1, %v716_v1  ;;  %v8258_v11 = vmul.f32 1.442695, %v1601_v4  ;;  %vm1525_vm2 = vcmp.gt.f32.partialorder %v8116_v60, 0.0 }
 0x18c   :  { %v370_v31 = vpop.f32.mrb[23].mxu0  ;;  %v8229_v56 = vadd.f32 %v7059_v46, %v1234_v42  ;;  %v1693_v21 = vmul.f32 1.442695, %v1608_v45  ;;  %v901_v46 = vrot.slane %v716_v1, %v8086_v20  ;;  %v8249_v42 = vmul.f32 1.442695, %v1602_v53 }
 0x18d   :  { %v1691_v5 = vmul.f32 1.442695, %v1607_v54  ;;  %v8242_v9 = vadd.f32 %v1230_v57, %v370_v31  ;;  %v908_v45 = vrot.slane %v894_v24, %v8086_v20  ;;  %v1845_v13 = vsel %vm1525_vm2, %v8116_v60, %v6665_v43 }
 0x18e   :  { %v7261_v32 = vpop.eup %7260  ;;  %v1610_v39 = vmin.f32 %v8229_v56, 0.0  ;;  %v909_v57 = vcombine.high %v901_v46, %v901_v46  ;;  %v917_v38 = vrot.slane %v901_v46, %v8086_v20  ;;  %v12222_v46 = vmov 0.0  }
 0x18f   :  { %v7062_v52 = vpop.f32.mrb[24].mxu0  ;;  %7272 = vpow2.f32 %v1691_v5  ;;  %v1609_v40 = vmin.f32 %v8242_v9, 0.0  ;;  %v8252_v54 = vpop.eup %7262  ;;  %v6664_v31 = vadd.f32 -1.0, %v7261_v32  ;;  %v910_v26 = vcombine.high %v908_v45, %v908_v45 }
 0x190   :  { %v380_v58 = vpop.f32.mrb[25].mxu0  ;;  %v8256_v1 = vpop.eup %7264  ;;  %7274 = vpow2.f32 %v1693_v21  ;;  %v931_v32 = vrot.slane %v909_v57, %v8086_v20  ;;  %v1238_v4 = vrot.slane %v917_v38, %v8091_v28  ;;  %v939_v19 = vcombine.high %v917_v38, %v917_v38 }
 0x191   :  { %v1695_v53 = vmul.f32 1.442695, %v1609_v40  ;;  %v8262_v5 = vpop.eup %7266  ;;  %v1844_v8 = vsel %vm1524_vm1, %v8192_v41, %v6664_v31  ;;  %v1697_v63 = vmul.f32 1.442695, %v1610_v39  ;;  %v924_v31 = vrot.slane %v908_v45, %v8086_v20 }
 0x192   :  { %2022 = vmatmul.mubr.f32.gmra.mrb[66].mxu0 %v1844_v8  ;;  %v8269_v29 = vpop.eup %7268  ;;  %v1242_v41 = vrot.slane %v931_v32, %v8091_v28  ;;  %v941_v21 = vcombine.high %v931_v32, %v931_v32  ;;  %v8274_v57 = vadd.f32 %v1238_v4, %v380_v58  ;;  %v1246_v8 = vrot.slane %v939_v19, %v8091_v28 }
 0x193   :  { %v7065_v27 = vpop.f32.mrb[26].mxu0  ;;  %2027 = vmatprep.mubr.f32.mxu0 %v12222_v46  ;;  %7276 = vpow2.f32 %v1695_v53  ;;  %v938_v60 = vrot.slane %v910_v26, %v8086_v20  ;;  %v8278_v43 = vpop.eup %7270  ;;  %v6666_v38 = vadd.f32 -1.0, %v8219_v44  ;;  %v1254_v35 = vrot.slane %v924_v31, %v8091_v28 }
 0x194   :  { %v390_v47 = vpop.f32.mrb[27].mxu0  ;;  %v8281_v37 = vadd.f32 %v7062_v52, %v1242_v41  ;;  %v1250_v39 = vrot.slane %v941_v21, %v8091_v28  ;;  %v1611_v45 = vmin.f32 %v8274_v57, 0.0  ;;  %7278 = vpow2.f32 %v1697_v63 }
 0x195   :  { %v8286_v58 = vadd.f32 %v1246_v8, %v390_v47  ;;  %v1258_v19 = vrot.slane %v938_v60, %v8091_v28  ;;  %v942_v53 = vcombine.high %v938_v60, %v938_v60  ;;  %vm1526_vm3 = vcmp.gt.f32.partialorder %v8121_v2, 0.0 }
 0x196   :  { %2028 = vmatmul.mubr.f32.gmra.mrb[68].mxu0 %v1845_v13  ;;  %v1612_v44 = vmin.f32 %v8281_v37, 0.0  ;;  %v8291_v52 = vadd.f32 %v7065_v27, %v1250_v39  ;;  %v1699_v13 = vmul.f32 1.442695, %v1611_v45  ;;  %v1603_v8 = vmin.f32 %v8196_v49, 0.0 }
 0x197   :  { %v7068_v24 = vpop.f32.mrb[28].mxu0  ;;  %2033 = vmatprep.mubr.f32.mxu0 %v12222_v46  ;;  %v1266_v47 = vrot.slane %v942_v53, %v8091_v28  ;;  %v1846_v25 = vsel %vm1526_vm3, %v8121_v2, %v6666_v38  ;;  %v6667_v63 = vadd.f32 -1.0, %v8234_v0  ;;  %vm1543_vm4 = vcmp.gt.f32.partialorder %v8216_v34, 0.0 }
 0x198   :  { %v400_v40 = vpop.f32.mrb[29].mxu0  ;;  %v8296_v21 = vadd.f32 %v7068_v24, %v1258_v19  ;;  %7280 = vpow2.f32 %v1699_v13  ;;  %v1701_v2 = vmul.f32 1.442695, %v1612_v44  ;;  %v1613_v0 = vmin.f32 %v8286_v58, 0.0 }
 0x199   :  { %v8293_v4 = vadd.f32 %v1254_v35, %v400_v40  ;;  %v7273_v41 = vpop.eup %7272  ;;  %v1604_v35 = vmin.f32 %v8198_v51, 0.0  ;;  %7282 = vpow2.f32 %v8239_v55  ;;  %vm1527_vm5 = vcmp.gt.f32.partialorder %v8119_v62, 0.0 }
 0x19a   :  { %v6683_v60 = vadd.f32 -1.0, %v7273_v41  ;;  %2034 = vmatmul.mubr.f32.gmra.mrb[70].mxu0 %v1846_v25  ;;  %v7275_v40 = vpop.eup %7274  ;;  %7284 = vpow2.f32 %v8244_v18  ;;  %v940_v25 = vcombine.high %v924_v31, %v924_v31  ;;  %v1683_v38 = vmul.f32 1.442695, %v1603_v8 }
 0x19b   :  { %v7071_v32 = vpop.f32.mrb[30].mxu0  ;;  %2039 = vmatprep.mubr.f32.mxu0 %v12222_v46  ;;  %7286 = vpow2.f32 %v8249_v42  ;;  %v6668_v55 = vadd.f32 -1.0, %v8225_v14  ;;  %v1685_v19 = vmul.f32 1.442695, %v1604_v35  ;;  %v6684_v31 = vadd.f32 -1.0, %v7275_v40 }
 0x19c   :  { %v410_v26 = vpop.f32.mrb[31].mxu0  ;;  %v8306_v27 = vadd.f32 %v7071_v32, %v1266_v47  ;;  %v1863_v39 = vsel %vm1543_vm4, %v8216_v34, %v6683_v60  ;;  %v1847_v32 = vsel %vm1527_vm5, %v8119_v62, %v6667_v63  ;;  %7288 = vpow2.f32 %v8258_v11 }
 0x19d   :  { %2136 = vmatmul.mubr.f32.vlgmr.msra.gmra.mrb[16].mxu1 %v1863_v39  ;;  %v7277_v45 = vpop.eup %7276  ;;  %v1262_v18 = vrot.slane %v940_v25, %v8091_v28  ;;  %7290 = vpow2.f32 %v1701_v2  ;;  %v1614_v62 = vmin.f32 %v8291_v52, 0.0  ;;  %v1703_v14 = vmul.f32 1.442695, %v1613_v0 }
 0x19e   :  { %2141 = vmatprep.mubr.f32.mxu1 %v12222_v46  ;;  %2040 = vmatmul.mubr.f32.gmra.mrb[72].mxu0 %v1847_v32  ;;  %vm1544_vm6 = vcmp.gt.f32.partialorder %v8213_v33, 0.0  ;;  %v1606_v42 = vmin.f32 %v8203_v59, 0.0  ;;  %vm1528_vm7 = vcmp.gt.f32.partialorder %v8127_v7, 0.0  ;;  %v7279_v41 = vpop.eup %7278  ;;  %7292 = vpow2.f32 %v1683_v38 }
 0x19f   :  { %v8302_v23 = vpop.f32.mrb[32].mxu0  ;;  %2045 = vmatprep.mubr.f32.mxu0 %v12222_v46  ;;  %v8331_v11 = vadd.f32 %v1262_v18, %v410_v26  ;;  %v1864_v44 = vsel %vm1544_vm6, %v8213_v33, %v6684_v31  ;;  %v1848_v13 = vsel %vm1528_vm7, %v8127_v7, %v6668_v55  ;;  %v6669_v47 = vadd.f32 -1.0, %v8252_v54 }
 0x1a0   :  { %v8308_v24 = vpop.f32.mrb[33].mxu0  ;;  %v6685_v8 = vadd.f32 -1.0, %v7277_v45  ;;  %7294 = vpow2.f32 %v1685_v19  ;;  %v1615_v63 = vmin.f32 %v8293_v4, 0.0  ;;  %v1705_v33 = vmul.f32 1.442695, %v1614_v62 }
 0x1a1   :  { %2142 = vmatmul.mubr.f32.gmra.mrb[18].mxu1 %v1864_v44  ;;  %7296 = vpow2.f32 %v1703_v14  ;;  %vm1545_vm8 = vcmp.gt.f32.partialorder %v8242_v9, 0.0  ;;  %vm1529_vm9 = vcmp.gt.f32.partialorder %v8132_v12, 0.0  ;;  %v6686_v35 = vadd.f32 -1.0, %v7279_v41 }
 0x1a2   :  { %2046 = vmatmul.mubr.f32.gmra.mrb[74].mxu0 %v1848_v13  ;;  %2147 = vmatprep.mubr.f32.mxu1 %v12222_v46  ;;  %v7281_v7 = vpop.eup %7280  ;;  %v1865_v54 = vsel %vm1545_vm8, %v8242_v9, %v6685_v8  ;;  %v6982_v40 = vadd.f32 %v8130_v10, %v8125_v6  ;;  %v1689_v2 = vmul.f32 1.442695, %v1606_v42  ;;  %v1849_v0 = vsel %vm1529_vm9, %v8132_v12, %v6669_v47 }
 0x1a3   :  { %v8320_v34 = vpop.f32.mrb[34].mxu0  ;;  %2051 = vmatprep.mubr.f32.mxu0 %v12222_v46  ;;  %v8348_v39 = vpop.eup %7282  ;;  %v1616_v25 = vmin.f32 %v8296_v21, 0.0  ;;  %v6670_v38 = vadd.f32 -1.0, %v8237_v50  ;;  %v1605_v9 = vmin.f32 %v8209_v22, 0.0  ;;  %v1707_v45 = vmul.f32 1.442695, %v1615_v63 }
 0x1a4   :  { %v8324_v53 = vpop.f32.mrb[35].mxu0  ;;  %v8355_v55 = vpop.eup %7284  ;;  %v6687_v6 = vadd.f32 -1.0, %v7281_v7  ;;  %v721_v10 = vadd.f32 %v6982_v40, %v8083_v17  ;;  %7298 = vpow2.f32 %v1705_v33  ;;  %v1617_v50 = vmin.f32 %v8331_v11, 0.0 }
 0x1a5   :  { %2148 = vmatmul.mubr.f32.gmra.mrb[20].mxu1 %v1865_v54  ;;  %v8362_v12 = vpop.eup %7286  ;;  %vm1546_vm10 = vcmp.gt.f32.partialorder %v8229_v56, 0.0  ;;  %vm1547_vm11 = vcmp.gt.f32.partialorder %v8274_v57, 0.0  ;;  %vm1530_vm12 = vcmp.gt.f32.partialorder %v8136_v16, 0.0  ;;  %v6671_v31 = vadd.f32 -1.0, %v8262_v5 }
 0x1a6   :  { %2052 = vmatmul.mubr.f32.gmra.mrb[76].mxu0 %v1849_v0  ;;  %2153 = vmatprep.mubr.f32.mxu1 %v12222_v46  ;;  %v8368_v18 = vpop.eup %7288  ;;  %v1866_v62 = vsel %vm1546_vm10, %v8229_v56, %v6686_v35  ;;  %v950_v14 = vrot.slane %v721_v10, %v8086_v20  ;;  %7300 = vpow2.f32 %v1689_v2  ;;  %v1709_v44 = vmul.f32 1.442695, %v1616_v25 }
 0x1a7   :  { %v8336_v60 = vpop.f32.mrb[36].mxu0  ;;  %2057 = vmatprep.mubr.f32.mxu0 %v12222_v46  ;;  %v7291_v42 = vpop.eup %7290  ;;  %v1850_v41 = vsel %vm1530_vm12, %v8136_v16, %v6670_v38  ;;  %7302 = vpow2.f32 %v1707_v45  ;;  %v6672_v47 = vadd.f32 -1.0, %v8256_v1  ;;  %v1867_v56 = vsel %vm1547_vm11, %v8274_v57, %v6687_v6 }
 0x1a8   :  { %v8340_v26 = vpop.f32.mrb[37].mxu0  ;;  %v958_v5 = vcombine.high %v950_v14, %v950_v14  ;;  %v8384_v63 = vpop.eup %7292  ;;  %v8386_v33 = vmul.f32 1.442695, %v1605_v9  ;;  %v1711_v16 = vmul.f32 1.442695, %v1617_v50  ;;  %vm1531_vm13 = vcmp.gt.f32.partialorder %v8146_v30, 0.0 }
 0x1a9   :  { %2154 = vmatmul.mubr.f32.gmra.mrb[22].mxu1 %v1866_v62  ;;  %v966_v1 = vrot.slane %v950_v14, %v8086_v20  ;;  %v1618_v54 = vmin.f32 %v8306_v27, 0.0  ;;  %v1851_v57 = vsel %vm1531_vm13, %v8146_v30, %v6671_v31  ;;  %v6688_v35 = vadd.f32 -1.0, %v7291_v42 }
 0x1aa   :  { %2058 = vmatmul.mubr.f32.gmra.mrb[78].mxu0 %v1850_v41  ;;  %2159 = vmatprep.mubr.f32.mxu1 %v12222_v46  ;;  %v8391_v7 = vpop.eup %7294  ;;  %v980_v40 = vrot.slane %v958_v5, %v8086_v20  ;;  %vm1532_vm14 = vcmp.gt.f32.partialorder %v8134_v15, 0.0  ;;  %v943_v0 = vcombine.high %v721_v10, %v721_v10  ;;  %vm1548_vm15 = vcmp.gt.f32.partialorder %v8281_v37, 0.0 }
 0x1ab   :  { %v8353_v32 = vpop.f32.mrb[38].mxu0  ;;  %2063 = vmatprep.mubr.f32.mxu0 %v12222_v46  ;;  %v7297_v2 = vpop.eup %7296  ;;  %v1270_v25 = vrot.slane %v966_v1, %v8091_v28  ;;  %7304 = vpow2.f32 %v1709_v44  ;;  %v1852_v9 = vsel %vm1532_vm14, %v8134_v15, %v6672_v47  ;;  %v6673_v10 = vadd.f32 -1.0, %v8278_v43 }
 0x1ac   :  { %v8360_v19 = vpop.f32.mrb[39].mxu0  ;;  %v1274_v30 = vrot.slane %v980_v40, %v8091_v28  ;;  %v990_v45 = vcombine.high %v980_v40, %v980_v40  ;;  %7306 = vpow2.f32 %v1711_v16  ;;  %v988_v31 = vcombine.high %v966_v1, %v966_v1 }
 0x1ad   :  { %2160 = vmatmul.mubr.f32.gmra.mrb[24].mxu1 %v1867_v56  ;;  %v8409_v50 = vadd.f32 %v1270_v25, %v8308_v24  ;;  %v1868_v62 = vsel %vm1548_vm15, %v8281_v37, %v6688_v35  ;;  %v6689_v14 = vadd.f32 -1.0, %v7297_v2  ;;  %v957_v41 = vrot.slane %v943_v0, %v8086_v20 }
 0x1ae   :  { %2064 = vmatmul.mubr.f32.gmra.mrb[80].mxu0 %v1851_v57  ;;  %2165 = vmatprep.mubr.f32.mxu1 %v12222_v46  ;;  %v8413_v15 = vadd.f32 %v8302_v23, %v1274_v30  ;;  %v1282_v42 = vrot.slane %v990_v45, %v8091_v28  ;;  %v7299_v44 = vpop.eup %7298  ;;  %vm1549_vm0 = vcmp.gt.f32.partialorder %v8286_v58, 0.0  ;;  %v1278_v24 = vrot.slane %v988_v31, %v8091_v28 }
 0x1af   :  { %v8375_v13 = vpop.f32.mrb[40].mxu0  ;;  %2069 = vmatprep.mubr.f32.mxu0 %v12222_v46  ;;  %v1619_v43 = vmin.f32 %v8409_v50, 0.0  ;;  %v1713_v56 = vmul.f32 1.442695, %v1618_v54  ;;  %vm1533_vm1 = vcmp.gt.f32.partialorder %v8162_v48, 0.0  ;;  %v6674_v23 = vadd.f32 -1.0, %v8269_v29 }
 0x1b0   :  { %v8382_v8 = vpop.f32.mrb[41].mxu0  ;;  %v8426_v37 = vadd.f32 %v8320_v34, %v1282_v42  ;;  %v8430_v16 = vpop.eup %7300  ;;  %v1853_v1 = vsel %vm1533_vm1, %v8162_v48, %v6673_v10  ;;  %vm1534_vm2 = vcmp.gt.f32.partialorder %v8151_v36, 0.0  ;;  %v8436_v54 = vadd.f32 %v1278_v24, %v8324_v53  ;;  %v12223_v24 = vld [vmem:[#allocation21_spill] sm:$0xff] }
 0x1b1   :  { %2166 = vmatmul.mubr.f32.gmra.mrb[26].mxu1 %v1868_v62  ;;  %v959_v57 = vcombine.high %v957_v41, %v957_v41  ;;  %v7303_v29 = vpop.eup %7302  ;;  %v6675_v35 = vadd.f32 -1.0, %v8355_v55  ;;  %v1869_v34 = vsel %vm1549_vm0, %v8286_v58, %v6689_v14  ;;  %vm1550_vm3 = vcmp.gt.f32.partialorder %v8291_v52, 0.0 }
 0x1b2   :  { %2070 = vmatmul.mubr.f32.gmra.mrb[82].mxu0 %v1852_v9  ;;  %2171 = vmatprep.mubr.f32.mxu1 %v12222_v46  ;;  %v6690_v40 = vadd.f32 -1.0, %v7299_v44  ;;  %v1620_v2 = vmin.f32 %v8413_v15, 0.0  ;;  %v1715_v48 = vmul.f32 1.442695, %v1619_v43  ;;  %v973_v53 = vrot.slane %v957_v41, %v8086_v20 }
 0x1b3   :  { %v8399_v38 = vpop.f32.mrb[42].mxu0  ;;  %2075 = vmatprep.mubr.f32.mxu0 %v12222_v46  ;;  %v987_v0 = vrot.slane %v959_v57, %v8086_v20  ;;  %7308 = vpow2.f32 %v1713_v56  ;;  %v1854_v55 = vsel %vm1534_vm2, %v8151_v36, %v6674_v23  ;;  %vm1535_vm4 = vcmp.gt.f32.partialorder %v8174_v3, 0.0  ;;  %v12224_v56 = vld [vmem:[#allocation22_spill] sm:$0xff] }
 0x1b4   :  { %v8404_v6 = vpop.f32.mrb[43].mxu0  ;;  %v6676_v58 = vadd.f32 -1.0, %v8348_v39  ;;  %vm1536_vm5 = vcmp.gt.f32.partialorder %v8168_v61, 0.0  ;;  %v6691_v30 = vadd.f32 -1.0, %v7303_v29  ;;  %v1286_v10 = vrot.slane %v973_v53, %v8091_v28 }
 0x1b5   :  { %2172 = vmatmul.mubr.f32.gmra.mrb[28].mxu1 %v1869_v34  ;;  %v1290_v45 = vrot.slane %v987_v0, %v8091_v28  ;;  %v7305_v31 = vpop.eup %7304  ;;  %v1855_v36 = vsel %vm1535_vm4, %v8174_v3, %v6675_v35  ;;  %v1870_v39 = vsel %vm1550_vm3, %v8291_v52, %v6690_v40  ;;  %vm1551_vm6 = vcmp.gt.f32.partialorder %v8293_v4, 0.0 }
 0x1b6   :  { %2076 = vmatmul.mubr.f32.gmra.mrb[84].mxu0 %v1853_v1  ;;  %2177 = vmatprep.mubr.f32.mxu1 %v12222_v46  ;;  %v1621_v62 = vmin.f32 %v8436_v54, 0.0  ;;  %v7307_v14 = vpop.eup %7306  ;;  %v1717_v42 = vmul.f32 1.442695, %v1620_v2  ;;  %7310 = vpow2.f32 %v1715_v48  ;;  %v8470_v41 = vadd.f32 %v1286_v10, %v8340_v26 }
 0x1b7   :  { %v8420_v47 = vpop.f32.mrb[44].mxu0  ;;  %2081 = vmatprep.mubr.f32.mxu0 %v12222_v46  ;;  %v8467_v44 = vadd.f32 %v8336_v60, %v1290_v45  ;;  %v1856_v3 = vsel %vm1536_vm5, %v8168_v61, %v6676_v58  ;;  %v6677_v52 = vadd.f32 -1.0, %v8368_v18  ;;  %v6985_v23 = vadd.f32 %v12224_v56, %v12223_v24  ;;  %v12226_v45 = vld [vmem:[#allocation24_spill] sm:$0xff] }
 0x1b8   :  { %v8428_v5 = vpop.f32.mrb[45].mxu0  ;;  %v991_v1 = vcombine.high %v987_v0, %v987_v0  ;;  %v6678_v26 = vadd.f32 -1.0, %v8362_v12  ;;  %v1871_v57 = vsel %vm1551_vm6, %v8293_v4, %v6691_v30  ;;  %v1622_v61 = vmin.f32 %v8426_v37, 0.0  ;;  %v12225_v30 = vld [vmem:[#allocation23_spill] sm:$0xff] }
 0x1b9   :  { %2178 = vmatmul.mubr.f32.gmra.mrb[30].mxu1 %v1870_v39  ;;  %v989_v29 = vcombine.high %v973_v53, %v973_v53  ;;  %v1719_v18 = vmul.f32 1.442695, %v1621_v62  ;;  %v6692_v35 = vadd.f32 -1.0, %v7305_v31  ;;  %v726_v34 = vadd.f32 %v6985_v23, %v8083_v17  ;;  %v12227_v31 = vld [vmem:[#allocation27_spill] sm:$0xff] }
 0x1ba   :  { %2082 = vmatmul.mubr.f32.gmra.mrb[86].mxu0 %v1854_v55  ;;  %2183 = vmatprep.mubr.f32.mxu1 %v12222_v46  ;;  %v1298_v40 = vrot.slane %v991_v1, %v8091_v28  ;;  %7312 = vpow2.f32 %v1717_v42  ;;  %vm1552_vm7 = vcmp.gt.f32.partialorder %v8296_v21, 0.0  ;;  %vm1553_vm8 = vcmp.gt.f32.partialorder %v8331_v11, 0.0 }
 0x1bb   :  { %v8446_v25 = vpop.f32.mrb[46].mxu0  ;;  %2087 = vmatprep.mubr.f32.mxu0 %v12222_v46  ;;  %v1294_v12 = vrot.slane %v989_v29, %v8091_v28  ;;  %v6693_v4 = vadd.f32 -1.0, %v7307_v14  ;;  %v992_v48 = vcombine.high %v726_v34, %v726_v34  ;;  %v999_v0 = vrot.slane %v726_v34, %v8086_v20  ;;  %v12229_v14 = vld [vmem:[#allocation26_spill] sm:$0xff] }
 0x1bc   :  { %v8454_v9 = vpop.f32.mrb[47].mxu0  ;;  %v8499_v17 = vadd.f32 %v8353_v32, %v1298_v40  ;;  %v1721_v55 = vmul.f32 1.442695, %v1622_v61  ;;  %v8509_v10 = vadd.f32 %v12226_v45, %v12225_v30  ;;  %vm1537_vm9 = vcmp.gt.f32.partialorder %v12229_v14, 0.0  ;;  %v12230_v32 = vld [vmem:[#allocation25_spill] sm:$0xff] }
 0x1bd   :  { %2184 = vmatmul.mubr.f32.gmra.mrb[32].mxu1 %v1871_v57  ;;  %v8505_v58 = vadd.f32 %v1294_v12, %v8360_v19  ;;  %v7309_v62 = vpop.eup %7308  ;;  %vm1538_vm10 = vcmp.gt.f32.partialorder %v12230_v32, 0.0  ;;  %7314 = vpow2.f32 %v1719_v18  ;;  %v1872_v42 = vsel %vm1552_vm7, %v8296_v21, %v6692_v35 }
 0x1be   :  { %2088 = vmatmul.mubr.f32.gmra.mrb[88].mxu0 %v1855_v36  ;;  %2189 = vmatprep.mubr.f32.mxu1 %v12222_v46  ;;  %v12228_v36 = vld [vmem:[#allocation28_spill] sm:$0xff]  ;;  %v1623_v19 = vmin.f32 %v8470_v41, 0.0  ;;  %v1006_v24 = vrot.slane %v992_v48, %v8086_v20  ;;  %v1007_v56 = vcombine.high %v999_v0, %v999_v0  ;;  %v1015_v23 = vrot.slane %v999_v0, %v8086_v20 }
 0x1bf   :  { %v8472_v43 = vpop.f32.mrb[48].mxu0  ;;  %2093 = vmatprep.mubr.f32.mxu0 %v12222_v46  ;;  %v8513_v39 = vadd.f32 %v12228_v36, %v12227_v31  ;;  %7316 = vpow2.f32 %v8386_v33  ;;  %v1857_v57 = vsel %vm1537_vm9, %v12229_v14, %v6677_v52  ;;  %v1858_v61 = vsel %vm1538_vm10, %v12230_v32, %v6678_v26 }
 0x1c0   :  { %v8481_v60 = vpop.f32.mrb[49].mxu0  ;;  %v1873_v21 = vsel %vm1553_vm8, %v8331_v11, %v6693_v4  ;;  %v7311_v18 = vpop.eup %7310  ;;  %7318 = vpow2.f32 %v1721_v55  ;;  %v1029_v35 = vrot.slane %v1007_v56, %v8086_v20  ;;  %v1302_v33 = vrot.slane %v1015_v23, %v8091_v28 }
 0x1c1   :  { %2190 = vmatmul.mubr.f32.gmra.mrb[34].mxu1 %v1872_v42  ;;  %v1624_v52 = vmin.f32 %v8467_v44, 0.0  ;;  %vm1554_vm11 = vcmp.gt.f32.partialorder %v8306_v27, 0.0  ;;  %v6694_v26 = vadd.f32 -1.0, %v7309_v62  ;;  %v1037_v34 = vcombine.high %v1015_v23, %v1015_v23 }
 0x1c2   :  { %2094 = vmatmul.mubr.f32.gmra.mrb[90].mxu0 %v1856_v3  ;;  %2195 = vmatprep.mubr.f32.mxu1 %v12222_v46  ;;  %v1008_v3 = vcombine.high %v1006_v24, %v1006_v24  ;;  %v1723_v40 = vmul.f32 1.442695, %v1623_v19  ;;  %v1306_v11 = vrot.slane %v1029_v35, %v8091_v28  ;;  %v8541_v12 = vadd.f32 %v1302_v33, %v8382_v8 }
 0x1c3   :  { %v8494_v2 = vpop.f32.mrb[50].mxu0  ;;  %2099 = vmatprep.mubr.f32.mxu0 %v12222_v46  ;;  %v1039_v4 = vcombine.high %v1029_v35, %v1029_v35  ;;  %v6679_v0 = vadd.f32 -1.0, %v8384_v63  ;;  %v6680_v55 = vadd.f32 -1.0, %v8391_v7  ;;  %v6695_v30 = vadd.f32 -1.0, %v7311_v18 }
 0x1c4   :  { %v8501_v53 = vpop.f32.mrb[51].mxu0  ;;  %v1310_v45 = vrot.slane %v1037_v34, %v8091_v28  ;;  %v7313_v36 = vpop.eup %7312  ;;  %vm1555_vm12 = vcmp.gt.f32.partialorder %v8409_v50, 0.0  ;;  %v8554_v8 = vadd.f32 %v8375_v13, %v1306_v11  ;;  %v1036_v63 = vrot.slane %v1008_v3, %v8086_v20 }
 0x1c5   :  { %2196 = vmatmul.mubr.f32.gmra.mrb[36].mxu1 %v1873_v21  ;;  %v1314_v62 = vrot.slane %v1039_v4, %v8091_v28  ;;  %v1874_v7 = vsel %vm1554_vm11, %v8306_v27, %v6694_v26  ;;  %v1625_v14 = vmin.f32 %v8505_v58, 0.0  ;;  %v1022_v42 = vrot.slane %v1006_v24, %v8086_v20 }
 0x1c6   :  { %2100 = vmatmul.mubr.f32.gmra.mrb[92].mxu0 %v1857_v57  ;;  %2201 = vmatprep.mubr.f32.mxu1 %v12222_v46  ;;  %v8563_v32 = vadd.f32 %v1310_v45, %v8404_v6  ;;  %v1725_v19 = vmul.f32 1.442695, %v1624_v52  ;;  %7320 = vpow2.f32 %v1723_v40  ;;  %v1322_v56 = vrot.slane %v1036_v63, %v8091_v28 }
 0x1c7   :  { %v8523_v1 = vpop.f32.mrb[52].mxu0  ;;  %2105 = vmatprep.mubr.f32.mxu0 %v12222_v46  ;;  %v8567_v13 = vadd.f32 %v8399_v38, %v1314_v62  ;;  %v7315_v57 = vpop.eup %7314  ;;  %v1875_v27 = vsel %vm1555_vm12, %v8409_v50, %v6695_v30  ;;  %v6696_v6 = vadd.f32 -1.0, %v7313_v36  ;;  %v1318_v24 = vrot.slane %v1022_v42, %v8091_v28  ;;  %v8580_v38 = vld [vmem:[%s12106_s4] ss:$0 sm:$0xff] }
 0x1c8   :  { %v8532_v29 = vpop.f32.mrb[53].mxu0  ;;  %v731_v21 = vadd.f32 %v8580_v38, %v8509_v10  ;;  %vm1539_vm13 = vcmp.gt.f32.partialorder %v8196_v49, 0.0  ;;  %vm1556_vm14 = vcmp.gt.f32.partialorder %v8413_v15, 0.0  ;;  %v1727_v35 = vmul.f32 1.442695, %v1625_v14 }
 0x1c9   :  { %2202 = vmatmul.mubr.f32.gmra.mrb[38].mxu1 %v1874_v7  ;;  %v7317_v50 = vpop.eup %7316  ;;  %v8591_v33 = vadd.f32 %v8420_v47, %v1322_v56  ;;  %v8594_v3 = vadd.f32 %v1318_v24, %v8428_v5  ;;  %v1859_v10 = vsel %vm1539_vm13, %v8196_v49, %v6679_v0  ;;  %vm1540_vm15 = vcmp.gt.f32.partialorder %v8198_v51, 0.0 }
 0x1ca   :  { %2106 = vmatmul.mubr.f32.gmra.mrb[94].mxu0 %v1858_v61  ;;  %2207 = vmatprep.mubr.f32.mxu1 %v12222_v46  ;;  %v1626_v61 = vmin.f32 %v8499_v17, 0.0  ;;  %v7319_v52 = vpop.eup %7318  ;;  %7322 = vpow2.f32 %v1725_v19  ;;  %v1860_v34 = vsel %vm1540_vm15, %v8198_v51, %v6680_v55  ;;  %v1876_v47 = vsel %vm1556_vm14, %v8413_v15, %v6696_v6 }
 0x1cb   :  { %v8543_v48 = vpop.f32.mrb[54].mxu0  ;;  %2111 = vmatprep.mubr.f32.mxu0 %v12222_v46  ;;  %v6697_v40 = vadd.f32 -1.0, %v7315_v57  ;;  %v1048_v5 = vrot.slane %v731_v21, %v8086_v20  ;;  %v6681_v49 = vadd.f32 -1.0, %v7317_v50  ;;  %vm1557_vm0 = vcmp.gt.f32.partialorder %v8436_v54, 0.0 }
 0x1cc   :  { %v8549_v31 = vpop.f32.mrb[55].mxu0  ;;  %v1040_v4 = vcombine.high %v1036_v63, %v1036_v63  ;;  %v1038_v0 = vcombine.high %v1022_v42, %v1022_v42  ;;  %vm1541_vm1 = vcmp.gt.f32.partialorder %v8209_v22, 0.0  ;;  %v1729_v30 = vmul.f32 1.442695, %v1626_v61 }
 0x1cd   :  { %2208 = vmatmul.mubr.f32.gmra.mrb[40].mxu1 %v1875_v27  ;;  %7324 = vpow2.f32 %v1727_v35  ;;  %v6698_v51 = vadd.f32 -1.0, %v7319_v52  ;;  %v1627_v15 = vmin.f32 %v8541_v12, 0.0  ;;  %v1041_v55 = vcombine.high %v731_v21, %v731_v21 }
 0x1ce   :  { %2112 = vmatmul.mubr.f32.gmra.mrb[96].mxu0 %v1859_v10  ;;  %2213 = vmatprep.mubr.f32.mxu1 %v12222_v46  ;;  %v1330_v45 = vrot.slane %v1040_v4, %v8091_v28  ;;  %v1326_v36 = vrot.slane %v1038_v0, %v8091_v28  ;;  %v1877_v63 = vsel %vm1557_vm0, %v8436_v54, %v6697_v40  ;;  %vm1558_vm2 = vcmp.gt.f32.partialorder %v8426_v37, 0.0 }
 0x1cf   :  { %v8570_v23 = vpop.f32.mrb[56].mxu0  ;;  %2117 = vmatprep.mubr.f32.mxu0 %v12222_v46  ;;  %v1056_v7 = vcombine.high %v1048_v5, %v1048_v5  ;;  %v1064_v14 = vrot.slane %v1048_v5, %v8086_v20  ;;  %v1861_v56 = vsel %vm1541_vm1, %v8209_v22, %v6681_v49  ;;  %v6682_v57 = vadd.f32 -1.0, %v8430_v16 }
 0x1d0   :  { %v8584_v18 = vpop.f32.mrb[57].mxu0  ;;  %v7321_v19 = vpop.eup %7320  ;;  %v8626_v27 = vadd.f32 %v8446_v25, %v1330_v45  ;;  %v8629_v54 = vadd.f32 %v1326_v36, %v8454_v9  ;;  %7326 = vpow2.f32 %v1729_v30  ;;  %v1628_v50 = vmin.f32 %v8554_v8, 0.0 }
 0x1d1   :  { %2214 = vmatmul.mubr.f32.gmra.mrb[42].mxu1 %v1876_v47  ;;  %v1078_v6 = vrot.slane %v1056_v7, %v8086_v20  ;;  %v1334_v24 = vrot.slane %v1064_v14, %v8091_v28  ;;  %v1086_v21 = vcombine.high %v1064_v14, %v1064_v14  ;;  %v1731_v61 = vmul.f32 1.442695, %v1627_v15 }
 0x1d2   :  { %2118 = vmatmul.mubr.f32.gmra.mrb[98].mxu0 %v1860_v34  ;;  %2219 = vmatprep.mubr.f32.mxu1 %v12222_v46  ;;  %v1878_v22 = vsel %vm1558_vm2, %v8426_v37, %v6698_v51  ;;  %v1055_v16 = vrot.slane %v1041_v55, %v8086_v20  ;;  %v6699_v9 = vadd.f32 -1.0, %v7321_v19  ;;  %vm1542_vm3 = vcmp.gt.f32.partialorder %v8203_v59, 0.0 }
 0x1d3   :  { %v8598_v26 = vpop.f32.mrb[58].mxu0  ;;  %2123 = vmatprep.mubr.f32.mxu0 %v12222_v46  ;;  %v1338_v35 = vrot.slane %v1078_v6, %v8091_v28  ;;  %v8643_v52 = vadd.f32 %v1334_v24, %v8481_v60  ;;  %v1088_v10 = vcombine.high %v1078_v6, %v1078_v6  ;;  %vm1559_vm4 = vcmp.gt.f32.partialorder %v8470_v41, 0.0 }
 0x1d4   :  { %v8604_v11 = vpop.f32.mrb[59].mxu0  ;;  %v7323_v47 = vpop.eup %7322  ;;  %v1342_v37 = vrot.slane %v1086_v21, %v8091_v28  ;;  %v1862_v40 = vsel %vm1542_vm3, %v8203_v59, %v6682_v57  ;;  %v1629_v5 = vmin.f32 %v8563_v32, 0.0  ;;  %v1057_v60 = vcombine.high %v1055_v16, %v1055_v16 }
 0x1d5   :  { %2220 = vmatmul.mubr.f32.gmra.mrb[44].mxu1 %v1877_v63  ;;  %v8654_v49 = vadd.f32 %v8472_v43, %v1338_v35  ;;  %v1733_v4 = vmul.f32 1.442695, %v1628_v50  ;;  %7328 = vpow2.f32 %v1731_v61  ;;  %v1346_v0 = vrot.slane %v1088_v10, %v8091_v28 }
 0x1d6   :  { %2124 = vmatmul.mubr.f32.gmra.mrb[100].mxu0 %v1861_v56  ;;  %2225 = vmatprep.mubr.f32.mxu1 %v12222_v46  ;;  %v8658_v30 = vadd.f32 %v1342_v37, %v8501_v53  ;;  %v1879_v59 = vsel %vm1559_vm4, %v8470_v41, %v6699_v9  ;;  %v6700_v15 = vadd.f32 -1.0, %v7323_v47  ;;  %vm1560_vm5 = vcmp.gt.f32.partialorder %v8467_v44, 0.0 }
 0x1d7   :  { %v8612_v62 = vpop.f32.mrb[60].mxu0  ;;  %2129 = vmatprep.mubr.f32.mxu0 %v12222_v46  ;;  %v7325_v51 = vpop.eup %7324  ;;  %v8664_v43 = vadd.f32 %v8494_v2, %v1346_v0  ;;  %v1630_v55 = vmin.f32 %v8567_v13, 0.0  ;;  %v1735_v45 = vmul.f32 1.442695, %v1629_v5  ;;  %v1085_v36 = vrot.slane %v1057_v60, %v8086_v20 }
 0x1d8   :  { %v8618_v42 = vpop.f32.mrb[61].mxu0  ;;  %v1071_v53 = vrot.slane %v1055_v16, %v8086_v20  ;;  %7330 = vpow2.f32 %v1733_v4  ;;  %v1880_v41 = vsel %vm1560_vm5, %v8467_v44, %v6700_v15  ;;  %v6701_v7 = vadd.f32 -1.0, %v7325_v51 }
 0x1d9   :  { %2226 = vmatmul.mubr.f32.gmra.mrb[46].mxu1 %v1878_v22  ;;  %v1354_v14 = vrot.slane %v1085_v36, %v8091_v28  ;;  %vm1561_vm6 = vcmp.gt.f32.partialorder %v8505_v58, 0.0  ;;  %v1737_v19 = vmul.f32 1.442695, %v1630_v55  ;;  %7332 = vpow2.f32 %v1735_v45 }
 0x1da   :  { %2130 = vmatmul.mubr.f32.gmra.mrb[102].mxu0 %v1862_v40  ;;  %2231 = vmatprep.mubr.f32.mxu1 %v12222_v46  ;;  %v7327_v63 = vpop.eup %7326  ;;  %v1350_v2 = vrot.slane %v1071_v53, %v8091_v28  ;;  %v1631_v6 = vmin.f32 %v8594_v3, 0.0  ;;  %v736_v44 = vadd.f32 %v8580_v38, %v8513_v39  ;;  %v1089_v24 = vcombine.high %v1085_v36, %v1085_v36 }
 0x1db   :  { %v8638_v25 = vpop.f32.mrb[62].mxu0  ;;  %v8675_v56 = vadd.f32 %v8523_v1, %v1354_v14  ;;  %v1087_v21 = vcombine.high %v1071_v53, %v1071_v53  ;;  %v1881_v50 = vsel %vm1561_vm6, %v8505_v58, %v6701_v7  ;;  %v6702_v61 = vadd.f32 -1.0, %v7327_v63 }
 0x1dc   :  { %v8645_v34 = vpop.f32.mrb[63].mxu0  ;;  %v8678_v57 = vadd.f32 %v1350_v2, %v8532_v29  ;;  %vm1562_vm7 = vcmp.gt.f32.partialorder %v8499_v17, 0.0  ;;  %v1097_v1 = vrot.slane %v736_v44, %v8086_v20  ;;  %v1362_v29 = vrot.slane %v1089_v24, %v8091_v28 }
 0x1dd   :  { %2232 = vmatmul.mubr.f32.gmra.mrb[48].mxu1 %v1879_v59  ;;  %v1358_v16 = vrot.slane %v1087_v21, %v8091_v28  ;;  %v1632_v9 = vmin.f32 %v8591_v33, 0.0  ;;  %7334 = vpow2.f32 %v1737_v19  ;;  %v1739_v39 = vmul.f32 1.442695, %v1631_v6 }
 0x1de   :  { %2237 = vmatprep.mubr.f32.mxu1 %v12222_v46  ;;  %v8691_v38 = vadd.f32 %v8543_v48, %v1362_v29  ;;  %v1882_v35 = vsel %vm1562_vm7, %v8499_v17, %v6702_v61  ;;  %v1105_v47 = vcombine.high %v1097_v1, %v1097_v1  ;;  %v1113_v37 = vrot.slane %v1097_v1, %v8086_v20 }
 0x1df   :  { %v7329_v22 = vpop.eup %7328  ;;  %v8694_v58 = vadd.f32 %v1358_v16, %v8549_v31  ;;  %vm1563_vm8 = vcmp.gt.f32.partialorder %v8541_v12, 0.0  ;;  %v1090_v5 = vcombine.high %v736_v44, %v736_v44  ;;  %v1741_v60 = vmul.f32 1.442695, %v1632_v9 }
 0x1e0   :  { %v6703_v10 = vadd.f32 -1.0, %v7329_v22  ;;  %v1127_v4 = vrot.slane %v1105_v47, %v8086_v20  ;;  %v1366_v48 = vrot.slane %v1113_v37, %v8091_v28  ;;  %7336 = vpow2.f32 %v1739_v39 }
 0x1e1   :  { %2238 = vmatmul.mubr.f32.gmra.mrb[50].mxu1 %v1880_v41  ;;  %v1633_v31 = vmin.f32 %v8629_v54, 0.0  ;;  %v1135_v0 = vcombine.high %v1113_v37, %v1113_v37  ;;  %vm1564_vm9 = vcmp.gt.f32.partialorder %v8554_v8, 0.0  ;;  %v1104_v45 = vrot.slane %v1090_v5, %v8086_v20 }
 0x1e2   :  { %2243 = vmatprep.mubr.f32.mxu1 %v12222_v46  ;;  %v7331_v40 = vpop.eup %7330  ;;  %v1883_v17 = vsel %vm1563_vm8, %v8541_v12, %v6703_v10  ;;  %v1370_v15 = vrot.slane %v1127_v4, %v8091_v28  ;;  %v8707_v55 = vadd.f32 %v1366_v48, %v8584_v18  ;;  %v1137_v36 = vcombine.high %v1127_v4, %v1127_v4 }
 0x1e3   :  { %v7333_v51 = vpop.eup %7332  ;;  %v6704_v59 = vadd.f32 -1.0, %v7331_v40  ;;  %v1374_v53 = vrot.slane %v1135_v0, %v8091_v28  ;;  %7338 = vpow2.f32 %v1741_v60  ;;  %v1634_v12 = vmin.f32 %v8626_v27, 0.0 }
 0x1e4   :  { %v8713_v63 = vadd.f32 %v8570_v23, %v1370_v15  ;;  %v1743_v41 = vmul.f32 1.442695, %v1633_v31  ;;  %v1378_v7 = vrot.slane %v1137_v36, %v8091_v28  ;;  %v6705_v2 = vadd.f32 -1.0, %v7333_v51 }
 0x1e5   :  { %2244 = vmatmul.mubr.f32.gmra.mrb[52].mxu1 %v1881_v50  ;;  %v8718_v18 = vadd.f32 %v1374_v53, %v8604_v11  ;;  %v1884_v14 = vsel %vm1564_vm9, %v8554_v8, %v6704_v59  ;;  %v1106_v19 = vcombine.high %v1104_v45, %v1104_v45  ;;  %vm1565_vm10 = vcmp.gt.f32.partialorder %v8563_v32, 0.0 }
 0x1e6   :  { %2249 = vmatprep.mubr.f32.mxu1 %v12222_v46  ;;  %v8724_v23 = vadd.f32 %v8598_v26, %v1378_v7  ;;  %v1120_v44 = vrot.slane %v1104_v45, %v8086_v20  ;;  %v1745_v21 = vmul.f32 1.442695, %v1634_v12  ;;  %7340 = vpow2.f32 %v1743_v41 }
 0x1e7   :  { %v7335_v6 = vpop.eup %7334  ;;  %v1134_v24 = vrot.slane %v1106_v19, %v8086_v20  ;;  %v1635_v11 = vmin.f32 %v8643_v52, 0.0  ;;  %v1885_v8 = vsel %vm1565_vm10, %v8563_v32, %v6705_v2  ;;  %vm1566_vm11 = vcmp.gt.f32.partialorder %v8567_v13, 0.0 }
 0x1e8   :  { %v1382_v50 = vrot.slane %v1120_v44, %v8091_v28  ;;  %v6706_v61 = vadd.f32 -1.0, %v7335_v6  ;;  %v1136_v16 = vcombine.high %v1120_v44, %v1120_v44  ;;  %7342 = vpow2.f32 %v1745_v21 }
 0x1e9   :  { %2250 = vmatmul.mubr.f32.gmra.mrb[54].mxu1 %v1882_v35  ;;  %v1386_v22 = vrot.slane %v1134_v24, %v8091_v28  ;;  %v1138_v29 = vcombine.high %v1134_v24, %v1134_v24  ;;  %v1636_v9 = vmin.f32 %v8654_v49, 0.0  ;;  %v1747_v39 = vmul.f32 1.442695, %v1635_v11 }
 0x1ea   :  { %2255 = vmatprep.mubr.f32.mxu1 %v12222_v46  ;;  %v7337_v26 = vpop.eup %7336  ;;  %v8735_v1 = vadd.f32 %v1382_v50, %v8618_v42  ;;  %v1886_v35 = vsel %vm1566_vm11, %v8567_v13, %v6706_v61  ;;  %v1390_v42 = vrot.slane %v1136_v16, %v8091_v28  ;;  %vm1567_vm12 = vcmp.gt.f32.partialorder %v8594_v3, 0.0 }
 0x1eb   :  { %v8738_v20 = vadd.f32 %v8612_v62, %v1386_v22  ;;  %v6707_v10 = vadd.f32 -1.0, %v7337_v26  ;;  %v1394_v47 = vrot.slane %v1138_v29, %v8091_v28  ;;  %v1749_v40 = vmul.f32 1.442695, %v1636_v9 }
 0x1ec   :  { %v8750_v37 = vadd.f32 %v1390_v42, %v8645_v34  ;;  %7344 = vpow2.f32 %v1747_v39  ;;  %v1637_v5 = vmin.f32 %v8658_v30, 0.0  ;;  %vm1568_vm13 = vcmp.gt.f32.partialorder %v8591_v33, 0.0 }
 0x1ed   :  { %2256 = vmatmul.mubr.f32.gmra.mrb[56].mxu1 %v1883_v17  ;;  %v7339_v32 = vpop.eup %7338  ;;  %v8747_v62 = vadd.f32 %v8638_v25, %v1394_v47  ;;  %v1887_v13 = vsel %vm1567_vm12, %v8594_v3, %v6707_v10  ;;  %7346 = vpow2.f32 %v1749_v40  ;;  %v1638_v25 = vmin.f32 %v8664_v43, 0.0 }
 0x1ee   :  { %2261 = vmatprep.mubr.f32.mxu1 %v12222_v46  ;;  %v6708_v60 = vadd.f32 -1.0, %v7339_v32  ;;  %v1751_v48 = vmul.f32 1.442695, %v1637_v5  ;;  %vm1569_vm14 = vcmp.gt.f32.partialorder %v8629_v54, 0.0  ;;  %v1639_v3 = vmin.f32 %v8678_v57, 0.0 }
 0x1ef   :  { %v1753_v51 = vmul.f32 1.442695, %v1638_v25  ;;  %vm1570_vm15 = vcmp.gt.f32.partialorder %v8626_v27, 0.0  ;;  %vm1571_vm0 = vcmp.gt.f32.partialorder %v8643_v52, 0.0  ;;  %vm1572_vm1 = vcmp.gt.f32.partialorder %v8654_v49, 0.0 }
 0x1f0   :  { %v7341_v4 = vpop.eup %7340  ;;  %v1888_v34 = vsel %vm1568_vm13, %v8591_v33, %v6708_v60  ;;  %7348 = vpow2.f32 %v1751_v48  ;;  %v1640_v33 = vmin.f32 %v8675_v56, 0.0  ;;  %v1755_v45 = vmul.f32 1.442695, %v1639_v3 }
 0x1f1   :  { %2262 = vmatmul.mubr.f32.gmra.mrb[58].mxu1 %v1884_v14  ;;  %v6709_v31 = vadd.f32 -1.0, %v7341_v4  ;;  %7350 = vpow2.f32 %v1753_v51  ;;  %vm1573_vm2 = vcmp.gt.f32.partialorder %v8658_v30, 0.0  ;;  %vm1574_vm3 = vcmp.gt.f32.partialorder %v8664_v43, 0.0 }
 0x1f2   :  { %2267 = vmatprep.mubr.f32.mxu1 %v12222_v46  ;;  %v7343_v0 = vpop.eup %7342  ;;  %v1757_v41 = vmul.f32 1.442695, %v1640_v33  ;;  %7352 = vpow2.f32 %v1755_v45  ;;  %vm1575_vm4 = vcmp.gt.f32.partialorder %v8678_v57, 0.0  ;;  %vm1576_vm5 = vcmp.gt.f32.partialorder %v8675_v56, 0.0 }
 0x1f3   :  { %v1889_v17 = vsel %vm1569_vm14, %v8629_v54, %v6709_v31  ;;  %v6710_v59 = vadd.f32 -1.0, %v7343_v0  ;;  %v1641_v54 = vmin.f32 %v8694_v58, 0.0  ;;  %vm1577_vm6 = vcmp.gt.f32.partialorder %v8694_v58, 0.0 }
 0x1f4   :  { %7354 = vpow2.f32 %v1757_v41  ;;  %vm1578_vm7 = vcmp.gt.f32.partialorder %v8691_v38, 0.0  ;;  %vm1579_vm8 = vcmp.gt.f32.partialorder %v8707_v55, 0.0  ;;  %vm1580_vm9 = vcmp.gt.f32.partialorder %v8713_v63, 0.0 }
 0x1f5   :  { %2268 = vmatmul.mubr.f32.gmra.mrb[60].mxu1 %v1885_v8  ;;  %v1890_v36 = vsel %vm1570_vm15, %v8626_v27, %v6710_v59  ;;  %v1642_v27 = vmin.f32 %v8691_v38, 0.0  ;;  %v1759_v19 = vmul.f32 1.442695, %v1641_v54  ;;  %vm1581_vm10 = vcmp.gt.f32.partialorder %v8718_v18, 0.0 }
 0x1f6   :  { %2273 = vmatprep.mubr.f32.mxu1 %v12222_v46  ;;  %v7345_v15 = vpop.eup %7344  ;;  %vm1582_vm11 = vcmp.gt.f32.partialorder %v8724_v23, 0.0  ;;  %vm1583_vm12 = vcmp.gt.f32.partialorder %v8735_v1, 0.0  ;;  %vm1584_vm13 = vcmp.gt.f32.partialorder %v8738_v20, 0.0  ;;  %vm1585_vm14 = vcmp.gt.f32.partialorder %v8750_v37, 0.0 }
 0x1f7   :  { %v6711_v53 = vadd.f32 -1.0, %v7345_v15  ;;  %v7347_v12 = vpop.eup %7346  ;;  %v1761_v21 = vmul.f32 1.442695, %v1642_v27  ;;  %7356 = vpow2.f32 %v1759_v19  ;;  %vm1586_vm15 = vcmp.gt.f32.partialorder %v8747_v62, 0.0 }
 0x1f8   :  { %v6712_v14 = vadd.f32 -1.0, %v7347_v12 }
 0x1f9   :  { %2274 = vmatmul.mubr.f32.gmra.mrb[62].mxu1 %v1886_v35  ;;  %v1891_v7 = vsel %vm1571_vm0, %v8643_v52, %v6711_v53  ;;  %v1643_v52 = vmin.f32 %v8707_v55, 0.0  ;;  %7358 = vpow2.f32 %v1761_v21 }
 0x1fa   :  { %2279 = vmatprep.mubr.f32.mxu1 %v12222_v46  ;;  %v7349_v2 = vpop.eup %7348  ;;  %v1892_v6 = vsel %vm1572_vm1, %v8654_v49, %v6712_v14  ;;  %v1644_v49 = vmin.f32 %v8713_v63, 0.0 }
 0x1fb   :  { %v6713_v44 = vadd.f32 -1.0, %v7349_v2  ;;  %v7351_v24 = vpop.eup %7350  ;;  %v1763_v61 = vmul.f32 1.442695, %v1643_v52 }
 0x1fc   :  { %v6714_v50 = vadd.f32 -1.0, %v7351_v24  ;;  %v7353_v8 = vpop.eup %7352  ;;  %v1765_v16 = vmul.f32 1.442695, %v1644_v49 }
 0x1fd   :  { %2280 = vmatmul.mubr.f32.gmra.mrb[64].mxu1 %v1887_v13  ;;  %v1893_v11 = vsel %vm1573_vm2, %v8658_v30, %v6713_v44  ;;  %v6715_v26 = vadd.f32 -1.0, %v7353_v8  ;;  %7360 = vpow2.f32 %v1763_v61  ;;  %v1645_v30 = vmin.f32 %v8718_v18, 0.0  ;;  %v3168_v61 = vld [vmem:[%s12109_s7] sm:$0x3]  ;;  %s9899_s7 = sld [smem:[#allocation12]] }
 0x1fe   :  { %2285 = vmatprep.mubr.f32.mxu1 %v12222_v46  ;;  %v1894_v22 = vsel %vm1574_vm3, %v8664_v43, %v6714_v50  ;;  %v7355_v29 = vpop.eup %7354  ;;  %7362 = vpow2.f32 %v1765_v16  ;;  %v1646_v43 = vmin.f32 %v8724_v23, 0.0 }
 0x1ff   :  { %v1895_v9 = vsel %vm1575_vm4, %v8678_v57, %v6715_v26  ;;  %v6716_v39 = vadd.f32 -1.0, %v7355_v29  ;;  %v1767_v35 = vmul.f32 1.442695, %v1645_v30  ;;  %v1647_v57 = vmin.f32 %v8735_v1, 0.0 }
 0x200   :  { %v1769_v40 = vmul.f32 1.442695, %v1646_v43  ;;  %v8843_v26 = vrot.slane %v3168_v61, %v8091_v28 }
 0x201   :  { %2286 = vmatmul.mubr.f32.gmra.mrb[66].mxu1 %v1888_v34  ;;  %v7357_v32 = vpop.eup %7356  ;;  %v1896_v10 = vsel %vm1576_vm5, %v8675_v56, %v6716_v39  ;;  %7364 = vpow2.f32 %v1767_v35  ;;  %v1648_v56 = vmin.f32 %v8738_v20, 0.0  ;;  %v1771_v4 = vmul.f32 1.442695, %v1647_v57 }
 0x202   :  { %2291 = vmatprep.mubr.f32.mxu1 %v12222_v46  ;;  %v6717_v47 = vadd.f32 -1.0, %v7357_v32  ;;  %7366 = vpow2.f32 %v1769_v40 }
 0x203   :  { %v7359_v42 = vpop.eup %7358  ;;  %v1773_v31 = vmul.f32 1.442695, %v1648_v56  ;;  %7368 = vpow2.f32 %v1771_v4 }
 0x204   :  { %v1897_v5 = vsel %vm1577_vm6, %v8694_v58, %v6717_v47  ;;  %v6718_v13 = vadd.f32 -1.0, %v7359_v42  ;;  %v1649_v58 = vmin.f32 %v8750_v37, 0.0 }
 0x205   :  { %2292 = vmatmul.mubr.f32.gmra.mrb[68].mxu1 %v1889_v17  ;;  %7370 = vpow2.f32 %v1773_v31 }
 0x206   :  { %2297 = vmatprep.mubr.f32.mxu1 %v12222_v46  ;;  %v1898_v25 = vsel %vm1578_vm7, %v8691_v38, %v6718_v13  ;;  %v1650_v38 = vmin.f32 %v8747_v62, 0.0  ;;  %v1775_v17 = vmul.f32 1.442695, %v1649_v58 }
 0x207   :  { %v7361_v60 = vpop.eup %7360 }
 0x208   :  { %v6719_v48 = vadd.f32 -1.0, %v7361_v60  ;;  %v7363_v34 = vpop.eup %7362  ;;  %v1777_v45 = vmul.f32 1.442695, %v1650_v38  ;;  %7372 = vpow2.f32 %v1775_v17 }
 0x209   :  { %2298 = vmatmul.mubr.f32.gmra.mrb[70].mxu1 %v1890_v36  ;;  %v6720_v51 = vadd.f32 -1.0, %v7363_v34 }
 0x20a   :  { %2303 = vmatprep.mubr.f32.mxu1 %v12222_v46  ;;  %v1899_v0 = vsel %vm1579_vm8, %v8707_v55, %v6719_v48  ;;  %7374 = vpow2.f32 %v1777_v45 }
 0x20b   :  { %v7365_v3 = vpop.eup %7364  ;;  %v1900_v59 = vsel %vm1580_vm9, %v8713_v63, %v6720_v51 }
 0x20c   :  { %v6721_v15 = vadd.f32 -1.0, %v7365_v3  ;;  %v7367_v33 = vpop.eup %7366 }
 0x20d   :  { %2304 = vmatmul.mubr.f32.gmra.mrb[72].mxu1 %v1891_v7  ;;  %v6722_v36 = vadd.f32 -1.0, %v7367_v33  ;;  %v7369_v53 = vpop.eup %7368 }
 0x20e   :  { %2309 = vmatprep.mubr.f32.mxu1 %v12222_v46  ;;  %v1901_v55 = vsel %vm1581_vm10, %v8718_v18, %v6721_v15  ;;  %v6723_v12 = vadd.f32 -1.0, %v7369_v53 }
 0x20f   :  { %v1902_v63 = vsel %vm1582_vm11, %v8724_v23, %v6722_v36  ;;  %v7371_v41 = vpop.eup %7370 }
 0x210   :  { %v1903_v54 = vsel %vm1583_vm12, %v8735_v1, %v6723_v12  ;;  %v6724_v18 = vadd.f32 -1.0, %v7371_v41 }
 0x211   :  { %2310 = vmatmul.mubr.f32.gmra.mrb[74].mxu1 %v1892_v6  ;;  %v12231_v6 = vld [vmem:[#allocation19_spill] sm:$0xff] }
 0x212   :  { %2315 = vmatprep.mubr.f32.mxu1 %v12222_v46  ;;  %v7373_v7 = vpop.eup %7372  ;;  %v1904_v14 = vsel %vm1584_vm13, %v8738_v20, %v6724_v18  ;;  %v1939_v20 = vld [vmem:[%s12108_s6] sm:$0x3]  ;;  %v8829_v44 = vsub.s32 1, %v12231_v6 }
 0x213   :  { %v6725_v2 = vadd.f32 -1.0, %v7373_v7  ;;  %v8832_v24 = vrot.slane %v1939_v20, %v8091_v28 }
 0x214   :  { %v7375_v23 = vpop.eup %7374  ;;  %12232 = vst [vmem:[#allocation21_spill] sm:$0xff] %v8829_v44  ;;  %v8846_v39 = vrot.slane %v3168_v61, %v8829_v44 }
 0x215   :  { %2316 = vmatmul.mubr.f32.gmra.mrb[76].mxu1 %v1893_v11  ;;  %v1905_v27 = vsel %vm1585_vm14, %v8750_v37, %v6725_v2  ;;  %v6726_v19 = vadd.f32 -1.0, %v7375_v23  ;;  %v8835_v37 = vrot.slane %v1939_v20, %v8829_v44 }
 0x216   :  { %2321 = vmatprep.mubr.f32.mxu1 %v12222_v46 }
 0x217   :  { %v1906_v1 = vsel %vm1586_vm15, %v8747_v62, %v6726_v19 }
 0x219   :  { %2322 = vmatmul.mubr.f32.gmra.mrb[78].mxu1 %v1894_v22 }
 0x21a   :  { %2327 = vmatprep.mubr.f32.mxu1 %v12222_v46 }
 0x21d   :  { %2328 = vmatmul.mubr.f32.gmra.mrb[80].mxu1 %v1895_v9 }
 0x21e   :  { %2333 = vmatprep.mubr.f32.mxu1 %v12222_v46 }
 0x221   :  { %2334 = vmatmul.mubr.f32.gmra.mrb[82].mxu1 %v1896_v10 }
 0x222   :  { %2339 = vmatprep.mubr.f32.mxu1 %v12222_v46 }
 0x225   :  { %2340 = vmatmul.mubr.f32.gmra.mrb[84].mxu1 %v1897_v5 }
 0x226   :  { %2345 = vmatprep.mubr.f32.mxu1 %v12222_v46 }
 0x229   :  { %2346 = vmatmul.mubr.f32.gmra.mrb[86].mxu1 %v1898_v25 }
 0x22a   :  { %2351 = vmatprep.mubr.f32.mxu1 %v12222_v46 }
 0x22d   :  { %2352 = vmatmul.mubr.f32.gmra.mrb[88].mxu1 %v1899_v0 }
 0x22e   :  { %2357 = vmatprep.mubr.f32.mxu1 %v12222_v46 }
 0x231   :  { %2358 = vmatmul.mubr.f32.gmra.mrb[90].mxu1 %v1900_v59 }
 0x232   :  { %2363 = vmatprep.mubr.f32.mxu1 %v12222_v46 }
 0x235   :  { %2364 = vmatmul.mubr.f32.gmra.mrb[92].mxu1 %v1901_v55 }
 0x236   :  { %2369 = vmatprep.mubr.f32.mxu1 %v12222_v46 }
 0x239   :  { %2370 = vmatmul.mubr.f32.gmra.mrb[94].mxu1 %v1902_v63 }
 0x23a   :  { %2375 = vmatprep.mubr.f32.mxu1 %v12222_v46 }
 0x23d   :  { %2376 = vmatmul.mubr.f32.gmra.mrb[96].mxu1 %v1903_v54 }
 0x23e   :  { %2381 = vmatprep.mubr.f32.mxu1 %v12222_v46 }
 0x241   :  { %2382 = vmatmul.mubr.f32.gmra.mrb[98].mxu1 %v1904_v14 }
 0x242   :  { %2387 = vmatprep.mubr.f32.mxu1 %v12222_v46 }
 0x245   :  { %2388 = vmatmul.mubr.f32.gmra.mrb[100].mxu1 %v1905_v27 }
 0x246   :  { %2393 = vmatprep.mubr.f32.mxu1 %v12222_v46 }
 0x249   :  { %2394 = vmatmul.mubr.f32.gmra.mrb[102].mxu1 %v1906_v1 }
 0x253   :  { %v2017_v21 = vpop.f32.mrb[64].mxu0 }
 0x254   :  { %v2018_v52 = vadd.f32 %v2017_v21, %v8832_v24  ;;  %v2019_v46 = vpop.f32.mrb[65].mxu0 }
 0x255   :  { %v2020_v62 = vadd.f32 %v2019_v46, %v8835_v37 }
 0x256   :  { %v2528_v11 = vmin.f32 %v2018_v52, 0.0  ;;  %vm2400_vm0 = vcmp.gt.f32.partialorder %v2018_v52, 0.0 }
 0x257   :  { %v2529_v50 = vmin.f32 %v2020_v62, 0.0  ;;  %vm2401_vm1 = vcmp.gt.f32.partialorder %v2020_v62, 0.0 }
 0x258   :  { %v2656_v8 = vmul.f32 1.442695, %v2528_v11 }
 0x259   :  { %v2658_v49 = vmul.f32 1.442695, %v2529_v50 }
 0x25a   :  { %7376 = vpow2.f32 %v2656_v8 }
 0x25b   :  { %7378 = vpow2.f32 %v2658_v49 }
 0x264   :  { %v7377_v22 = vpop.eup %7376 }
 0x265   :  { %v7379_v29 = vpop.eup %7378  ;;  %v6727_v16 = vadd.f32 -1.0, %v7377_v22  ;;  %v2023_v35 = vpop.f32.mrb[66].mxu0 }
 0x266   :  { %v6728_v30 = vadd.f32 -1.0, %v7379_v29  ;;  %v2024_v10 = vadd.f32 %v2023_v35, %v8832_v24  ;;  %v2025_v47 = vpop.f32.mrb[67].mxu0 }
 0x267   :  { %v3040_v9 = vsel %vm2400_vm0, %v2018_v52, %v6727_v16  ;;  %v2026_v40 = vadd.f32 %v2025_v47, %v8835_v37 }
 0x268   :  { %v3180_v32 = vmul.f32 %v8843_v26, %v3040_v9  ;;  %v3041_v43 = vsel %vm2401_vm1, %v2020_v62, %v6728_v30  ;;  %v2530_v57 = vmin.f32 %v2024_v10, 0.0  ;;  %vm2402_vm2 = vcmp.gt.f32.partialorder %v2024_v10, 0.0 }
 0x269   :  { %v3181_v42 = vmul.f32 %v8846_v39, %v3041_v43  ;;  %v2531_v5 = vmin.f32 %v2026_v40, 0.0  ;;  %v2029_v13 = vpop.f32.mrb[68].mxu0  ;;  %vm2403_vm3 = vcmp.gt.f32.partialorder %v2026_v40, 0.0 }
 0x26a   :  { %3308 = vadd.xlane.f32.xlu0 %v3180_v32  ;;  %v2660_v60 = vmul.f32 1.442695, %v2530_v57  ;;  %v8853_v56 = vadd.f32 %v2029_v13, %v8832_v24  ;;  %v2031_v4 = vpop.f32.mrb[69].mxu0 }
 0x26b   :  { %v2662_v25 = vmul.f32 1.442695, %v2531_v5  ;;  %v8856_v48 = vadd.f32 %v2031_v4, %v8835_v37 }
 0x26c   :  { %7380 = vpow2.f32 %v2660_v60  ;;  %v2532_v34 = vmin.f32 %v8853_v56, 0.0  ;;  %vm2404_vm4 = vcmp.gt.f32.partialorder %v8853_v56, 0.0 }
 0x26d   :  { %7382 = vpow2.f32 %v2662_v25  ;;  %v2533_v31 = vmin.f32 %v8856_v48, 0.0  ;;  %v2035_v58 = vpop.f32.mrb[70].mxu0  ;;  %vm2405_vm5 = vcmp.gt.f32.partialorder %v8856_v48, 0.0 }
 0x26e   :  { %3502 = vadd.xlane.f32.xlu0 %v3181_v42  ;;  %v2664_v0 = vmul.f32 1.442695, %v2532_v34  ;;  %v8861_v51 = vadd.f32 %v2035_v58, %v8832_v24  ;;  %v2037_v3 = vpop.f32.mrb[71].mxu0 }
 0x26f   :  { %v2666_v38 = vmul.f32 1.442695, %v2533_v31  ;;  %v8864_v17 = vadd.f32 %v2037_v3, %v8835_v37 }
 0x270   :  { %v8866_v59 = vpop.f32.mrb[16].mxu1  ;;  %7384 = vpow2.f32 %v2664_v0  ;;  %v2534_v15 = vmin.f32 %v8861_v51, 0.0  ;;  %vm2406_vm6 = vcmp.gt.f32.partialorder %v8861_v51, 0.0 }
 0x271   :  { %v8869_v33 = vpop.f32.mrb[17].mxu1  ;;  %7386 = vpow2.f32 %v2666_v38  ;;  %v2535_v45 = vmin.f32 %v8864_v17, 0.0  ;;  %v2041_v55 = vpop.f32.mrb[72].mxu0  ;;  %vm2407_vm7 = vcmp.gt.f32.partialorder %v8864_v17, 0.0 }
 0x272   :  { %v2668_v36 = vmul.f32 1.442695, %v2534_v15  ;;  %v8873_v53 = vadd.f32 %v2041_v55, %v8832_v24  ;;  %v2043_v63 = vpop.f32.mrb[73].mxu0 }
 0x273   :  { %v2670_v12 = vmul.f32 1.442695, %v2535_v45  ;;  %v8876_v41 = vadd.f32 %v2043_v63, %v8835_v37 }
 0x274   :  { %7388 = vpow2.f32 %v2668_v36  ;;  %v2536_v54 = vmin.f32 %v8873_v53, 0.0  ;;  %v8879_v18 = vpop.f32.mrb[18].mxu1  ;;  %vm2408_vm8 = vcmp.gt.f32.partialorder %v8873_v53, 0.0 }
 0x275   :  { %7390 = vpow2.f32 %v2670_v12  ;;  %v2537_v7 = vmin.f32 %v8876_v41, 0.0  ;;  %v2047_v14 = vpop.f32.mrb[74].mxu0  ;;  %v8882_v2 = vpop.f32.mrb[19].mxu1  ;;  %vm2409_vm9 = vcmp.gt.f32.partialorder %v8876_v41, 0.0 }
 0x276   :  { %v7381_v23 = vpop.eup %7380  ;;  %v2672_v27 = vmul.f32 1.442695, %v2536_v54  ;;  %v8885_v19 = vadd.f32 %v2047_v14, %v8832_v24  ;;  %v2049_v1 = vpop.f32.mrb[75].mxu0 }
 0x277   :  { %v7383_v20 = vpop.eup %7382  ;;  %v6729_v21 = vadd.f32 -1.0, %v7381_v23  ;;  %v2674_v62 = vmul.f32 1.442695, %v2537_v7  ;;  %v8897_v32 = vadd.f32 %v2049_v1, %v8835_v37 }
 0x278   :  { %7392 = vpow2.f32 %v2672_v27  ;;  %v6730_v52 = vadd.f32 -1.0, %v7383_v20  ;;  %v8887_v46 = vpop.f32.mrb[20].mxu1  ;;  %v2538_v61 = vmin.f32 %v8885_v19, 0.0  ;;  %vm2410_vm10 = vcmp.gt.f32.partialorder %v8885_v19, 0.0 }
 0x279   :  { %v2053_v11 = vpop.f32.mrb[76].mxu0  ;;  %v3042_v50 = vsel %vm2402_vm2, %v2024_v10, %v6729_v21  ;;  %v8889_v8 = vpop.f32.mrb[21].mxu1  ;;  %7394 = vpow2.f32 %v2674_v62  ;;  %v2539_v31 = vmin.f32 %v8897_v32, 0.0  ;;  %v8936_v21 = vadd.f32 %v8866_v59, %v8832_v24 }
 0x27a   :  { %v7385_v49 = vpop.eup %7384  ;;  %v8893_v22 = vadd.f32 %v2053_v11, %v8832_v24  ;;  %v2055_v29 = vpop.f32.mrb[77].mxu0  ;;  %v3043_v16 = vsel %vm2403_vm3, %v2026_v40, %v6730_v52  ;;  %v3182_v30 = vmul.f32 %v8843_v26, %v3042_v50  ;;  %v2676_v13 = vmul.f32 1.442695, %v2538_v61 }
 0x27b   :  { %v7387_v9 = vpop.eup %7386  ;;  %v3183_v43 = vmul.f32 %v8846_v39, %v3043_v16  ;;  %v6731_v35 = vadd.f32 -1.0, %v7385_v49  ;;  %v8911_v58 = vadd.f32 %v2055_v29, %v8835_v37  ;;  %v2678_v7 = vmul.f32 1.442695, %v2539_v31 }
 0x27c   :  { %3310 = vadd.xlane.f32.xlu0 %v3182_v30  ;;  %v8901_v10 = vpop.f32.mrb[22].mxu1  ;;  %v6732_v40 = vadd.f32 -1.0, %v7387_v9  ;;  %v2540_v60 = vmin.f32 %v8893_v22, 0.0  ;;  %7396 = vpow2.f32 %v2676_v13  ;;  %v2568_v9 = vmin.f32 %v8936_v21, 0.0 }
 0x27d   :  { %v2059_v47 = vpop.f32.mrb[78].mxu0  ;;  %3504 = vadd.xlane.f32.xlu1 %v3183_v43  ;;  %v3044_v42 = vsel %vm2404_vm4, %v8853_v56, %v6731_v35  ;;  %v8905_v57 = vpop.f32.mrb[23].mxu1  ;;  %v2541_v14 = vmin.f32 %v8911_v58, 0.0  ;;  %v8968_v13 = vadd.f32 %v8879_v18, %v8832_v24  ;;  %vm2412_vm11 = vcmp.gt.f32.partialorder %v8893_v22, 0.0 }
 0x27e   :  { %v7389_v5 = vpop.eup %7388  ;;  %v2061_v4 = vpop.f32.mrb[79].mxu0  ;;  %v3184_v25 = vmul.f32 %v8843_v26, %v3044_v42  ;;  %v3045_v56 = vsel %vm2405_vm5, %v8856_v48, %v6732_v40  ;;  %v8918_v15 = vadd.f32 %v2059_v47, %v8832_v24  ;;  %v2680_v63 = vmul.f32 1.442695, %v2540_v60 }
 0x27f   :  { %v7391_v34 = vpop.eup %7390  ;;  %v3185_v0 = vmul.f32 %v8846_v39, %v3045_v56  ;;  %v6733_v3 = vadd.f32 -1.0, %v7389_v5  ;;  %v2682_v49 = vmul.f32 1.442695, %v2541_v14  ;;  %v8948_v61 = vadd.f32 %v2061_v4, %v8835_v37 }
 0x280   :  { %v8915_v38 = vpop.f32.mrb[24].mxu1  ;;  %v6734_v54 = vadd.f32 -1.0, %v7391_v34  ;;  %v2542_v20 = vmin.f32 %v8918_v15, 0.0  ;;  %7398 = vpow2.f32 %v2680_v63  ;;  %v8964_v42 = vadd.f32 %v8869_v33, %v8835_v37 }
 0x281   :  { %v8920_v45 = vpop.f32.mrb[80].mxu0  ;;  %3312 = vadd.xlane.f32.xlu1 %v3184_v25  ;;  %v8923_v55 = vpop.f32.mrb[25].mxu1  ;;  %3506 = vadd.xlane.f32.xlu0 %v3185_v0  ;;  %v3046_v48 = vsel %vm2406_vm6, %v8861_v51, %v6733_v3  ;;  %7400 = vpow2.f32 %v2678_v7  ;;  %v2543_v47 = vmin.f32 %v8948_v61, 0.0  ;;  %v2736_v4 = vmul.f32 1.442695, %v2568_v9 }
 0x282   :  { %v7393_v36 = vpop.eup %7392  ;;  %v8925_v12 = vpop.f32.mrb[81].mxu0  ;;  %v3186_v23 = vmul.f32 %v8843_v26, %v3046_v48  ;;  %v3047_v51 = vsel %vm2407_vm7, %v8864_v17, %v6734_v54  ;;  %v2684_v17 = vmul.f32 1.442695, %v2542_v20  ;;  %7402 = vpow2.f32 %v2682_v49 }
 0x283   :  { %v6735_v27 = vadd.f32 -1.0, %v7393_v36  ;;  %v7395_v29 = vpop.eup %7394  ;;  %v3187_v16 = vmul.f32 %v8846_v39, %v3047_v51  ;;  %v2686_v0 = vmul.f32 1.442695, %v2543_v47  ;;  %v2569_v18 = vmin.f32 %v8964_v42, 0.0 }
 0x284   :  { %v8931_v1 = vpop.f32.mrb[26].mxu1  ;;  %v6736_v40 = vadd.f32 -1.0, %v7395_v29  ;;  %7404 = vpow2.f32 %v2684_v17  ;;  %v2570_v63 = vmin.f32 %v8968_v13, 0.0  ;;  %v8985_v48 = vadd.f32 %v8882_v2, %v8835_v37 }
 0x285   :  { %v8938_v52 = vpop.f32.mrb[82].mxu0  ;;  %3314 = vadd.xlane.f32.xlu1 %v3186_v23  ;;  %v8942_v62 = vpop.f32.mrb[27].mxu1  ;;  %v3048_v50 = vsel %vm2408_vm8, %v8873_v53, %v6735_v27  ;;  %7406 = vpow2.f32 %v2736_v4  ;;  %v8992_v7 = vadd.f32 %v8920_v45, %v8832_v24  ;;  %v2738_v51 = vmul.f32 1.442695, %v2569_v18 }
 0x286   :  { %v8944_v11 = vpop.f32.mrb[83].mxu0  ;;  %v3188_v59 = vmul.f32 %v8843_v26, %v3048_v50  ;;  %v7397_v5 = vpop.eup %7396  ;;  %v3049_v25 = vsel %vm2409_vm9, %v8876_v41, %v6736_v40  ;;  %7408 = vpow2.f32 %v2686_v0  ;;  %v2740_v49 = vmul.f32 1.442695, %v2570_v63 }
 0x287   :  { %v3189_v33 = vmul.f32 %v8846_v39, %v3049_v25  ;;  %v6737_v3 = vadd.f32 -1.0, %v7397_v5  ;;  %vm2411_vm12 = vcmp.gt.f32.partialorder %v8897_v32, 0.0  ;;  %v9015_v40 = vadd.f32 %v8925_v12, %v8835_v37 }
 0x288   :  { %v8952_v30 = vpop.f32.mrb[28].mxu1  ;;  %3316 = vadd.xlane.f32.xlu0 %v3188_v59  ;;  %v2571_v59 = vmin.f32 %v8985_v48, 0.0  ;;  %7410 = vpow2.f32 %v2738_v51  ;;  %vm2413_vm13 = vcmp.gt.f32.partialorder %v8911_v58, 0.0  ;;  %vm2414_vm14 = vcmp.gt.f32.partialorder %v8918_v15, 0.0 }
 0x289   :  { %v8955_v43 = vpop.f32.mrb[84].mxu0  ;;  %v8957_v35 = vpop.f32.mrb[29].mxu1  ;;  %3508 = vadd.xlane.f32.xlu1 %v3187_v16  ;;  %v3050_v14 = vsel %vm2410_vm10, %v8885_v19, %v6737_v3  ;;  %v2544_v16 = vmin.f32 %v8992_v7, 0.0  ;;  %7412 = vpow2.f32 %v2740_v49  ;;  %vm2440_vm15 = vcmp.gt.f32.partialorder %v8936_v21, 0.0 }
 0x28a   :  { %v8959_v53 = vpop.f32.mrb[85].mxu0  ;;  %v7399_v36 = vpop.eup %7398  ;;  %v3190_v2 = vmul.f32 %v8843_v26, %v3050_v14  ;;  %v2742_v0 = vmul.f32 1.442695, %v2571_v59  ;;  %vm2415_vm0 = vcmp.gt.f32.partialorder %v8948_v61, 0.0  ;;  %vm2441_vm1 = vcmp.gt.f32.partialorder %v8964_v42, 0.0 }
 0x28b   :  { %v7401_v54 = vpop.eup %7400  ;;  %v6739_v50 = vadd.f32 -1.0, %v7399_v36  ;;  %v2688_v36 = vmul.f32 1.442695, %v2544_v16  ;;  %vm2442_vm2 = vcmp.gt.f32.partialorder %v8968_v13, 0.0  ;;  %vm2416_vm3 = vcmp.gt.f32.partialorder %v8992_v7, 0.0 }
 0x28c   :  { %v8971_v60 = vpop.f32.mrb[30].mxu1  ;;  %3510 = vadd.xlane.f32.xlu0 %v3189_v33  ;;  %v6738_v45 = vadd.f32 -1.0, %v7401_v54  ;;  %v7403_v19 = vpop.eup %7402  ;;  %v9032_v54 = vadd.f32 %v8938_v52, %v8832_v24  ;;  %v9044_v52 = vadd.f32 %v8887_v46, %v8832_v24  ;;  %vm2443_vm4 = vcmp.gt.f32.partialorder %v8985_v48, 0.0 }
 0x28d   :  { %v8974_v34 = vpop.f32.mrb[86].mxu0  ;;  %v8976_v31 = vpop.f32.mrb[31].mxu1  ;;  %3318 = vadd.xlane.f32.xlu1 %v3190_v2  ;;  %v3052_v17 = vsel %vm2412_vm11, %v8893_v22, %v6739_v50  ;;  %v6740_v18 = vadd.f32 -1.0, %v7403_v19  ;;  %7414 = vpow2.f32 %v2688_v36  ;;  %vm2417_vm5 = vcmp.gt.f32.partialorder %v9015_v40, 0.0 }
 0x28e   :  { %v8979_v56 = vpop.f32.mrb[87].mxu0  ;;  %v3192_v5 = vmul.f32 %v8843_v26, %v3052_v17  ;;  %v3051_v4 = vsel %vm2411_vm12, %v8897_v32, %v6738_v45  ;;  %v7405_v33 = vpop.eup %7404  ;;  %v2545_v32 = vmin.f32 %v9015_v40, 0.0  ;;  %7416 = vpow2.f32 %v2742_v0 }
 0x28f   :  { %v3191_v22 = vmul.f32 %v8846_v39, %v3051_v4  ;;  %v3053_v14 = vsel %vm2413_vm13, %v8911_v58, %v6740_v18  ;;  %v6741_v2 = vadd.f32 -1.0, %v7405_v33  ;;  %v7407_v50 = vpop.eup %7406  ;;  %v2546_v4 = vmin.f32 %v9032_v54, 0.0 }
 0x290   :  { %v8988_v41 = vpop.f32.mrb[32].mxu1  ;;  %3320 = vadd.xlane.f32.xlu0 %v3192_v5  ;;  %v3193_v49 = vmul.f32 %v8846_v39, %v3053_v14  ;;  %v7409_v19 = vpop.eup %7408  ;;  %v2690_v5 = vmul.f32 1.442695, %v2545_v32  ;;  %v2572_v0 = vmin.f32 %v9044_v52, 0.0  ;;  %v9065_v32 = vadd.f32 %v8889_v8, %v8835_v37 }
 0x291   :  { %v8995_v23 = vpop.f32.mrb[88].mxu0  ;;  %v8997_v27 = vpop.f32.mrb[33].mxu1  ;;  %3512 = vadd.xlane.f32.xlu1 %v3191_v22  ;;  %v3054_v59 = vsel %vm2414_vm14, %v8918_v15, %v6741_v2  ;;  %v6767_v15 = vadd.f32 -1.0, %v7407_v50  ;;  %v9056_v22 = vadd.f32 %v8944_v11, %v8835_v37  ;;  %v6742_v18 = vadd.f32 -1.0, %v7409_v19 }
 0x292   :  { %v9000_v20 = vpop.f32.mrb[89].mxu0  ;;  %v3194_v58 = vmul.f32 %v8843_v26, %v3054_v59  ;;  %v7411_v14 = vpop.eup %7410  ;;  %7418 = vpow2.f32 %v2690_v5  ;;  %v2744_v28 = vmul.f32 1.442695, %v2572_v0  ;;  %v2573_v5 = vmin.f32 %v9065_v32, 0.0 }
 0x293   :  { %v3080_v46 = vsel %vm2440_vm15, %v8936_v21, %v6767_v15  ;;  %v2692_v21 = vmul.f32 1.442695, %v2546_v4  ;;  %v3055_v59 = vsel %vm2415_vm0, %v8948_v61, %v6742_v18  ;;  %v9080_v15 = vadd.f32 %v8901_v10, %v8832_v24 }
 0x294   :  { %v9004_v29 = vpop.f32.mrb[34].mxu1  ;;  %3514 = vadd.xlane.f32.xlu0 %v3193_v49  ;;  %v3220_v2 = vmul.f32 %v8843_v26, %v3080_v46  ;;  %v7413_v49 = vpop.eup %7412  ;;  %v3195_v8 = vmul.f32 %v8846_v39, %v3055_v59  ;;  %v6768_v46 = vadd.f32 -1.0, %v7411_v14  ;;  %v9090_v18 = vadd.f32 %v8955_v43, %v8832_v24 }
 0x295   :  { %v9009_v9 = vpop.f32.mrb[90].mxu0  ;;  %v9011_v47 = vpop.f32.mrb[35].mxu1  ;;  %3322 = vadd.xlane.f32.xlu1 %v3194_v58  ;;  %v2547_v58 = vmin.f32 %v9056_v22, 0.0  ;;  %v6769_v61 = vadd.f32 -1.0, %v7413_v49  ;;  %7420 = vpow2.f32 %v2692_v21  ;;  %v2574_v21 = vmin.f32 %v9080_v15, 0.0 }
 0x296   :  { %v9019_v25 = vpop.f32.mrb[91].mxu0  ;;  %v3081_v10 = vsel %vm2441_vm1, %v8964_v42, %v6768_v46  ;;  %v9103_v43 = vadd.f32 %v8905_v57, %v8835_v37  ;;  %7422 = vpow2.f32 %v2744_v28  ;;  %v9121_v28 = vadd.f32 %v8974_v34, %v8832_v24 }
 0x297   :  { %v2694_v59 = vmul.f32 1.442695, %v2547_v58  ;;  %v3082_v49 = vsel %vm2442_vm2, %v8968_v13, %v6769_v61  ;;  %v2746_v61 = vmul.f32 1.442695, %v2573_v5  ;;  %vm2418_vm6 = vcmp.gt.f32.partialorder %v9032_v54, 0.0 }
 0x298   :  { %v9022_v3 = vpop.f32.mrb[36].mxu1  ;;  %3348 = vadd.xlane.f32.xlu0 %v3220_v2  ;;  %v7415_v2 = vpop.eup %7414  ;;  %v3222_v42 = vmul.f32 %v8843_v26, %v3082_v49  ;;  %v2748_v49 = vmul.f32 1.442695, %v2574_v21  ;;  %vm2444_vm7 = vcmp.gt.f32.partialorder %v9044_v52, 0.0  ;;  %vm2419_vm8 = vcmp.gt.f32.partialorder %v9056_v22, 0.0 }
 0x299   :  { %v9025_v12 = vpop.f32.mrb[92].mxu0  ;;  %v9027_v63 = vpop.f32.mrb[37].mxu1  ;;  %3516 = vadd.xlane.f32.xlu1 %v3195_v8  ;;  %v3221_v8 = vmul.f32 %v8846_v39, %v3081_v10  ;;  %v2548_v10 = vmin.f32 %v9090_v18, 0.0  ;;  %v6743_v57 = vadd.f32 -1.0, %v7415_v2  ;;  %7424 = vpow2.f32 %v2694_v59 }
 0x29a   :  { %v9035_v51 = vpop.f32.mrb[93].mxu0  ;;  %v7417_v6 = vpop.eup %7416  ;;  %v9132_v59 = vadd.f32 %v8915_v38, %v8832_v24  ;;  %7426 = vpow2.f32 %v2746_v61  ;;  %v2550_v38 = vmin.f32 %v9121_v28, 0.0  ;;  %v9158_v61 = vadd.f32 %v8995_v23, %v8832_v24 }
 0x29b   :  { %v3056_v5 = vsel %vm2416_vm3, %v8992_v7, %v6743_v57  ;;  %v9142_v7 = vadd.f32 %v8979_v56, %v8835_v37  ;;  %7428 = vpow2.f32 %v2748_v49  ;;  %v9172_v23 = vadd.f32 %v8931_v1, %v8832_v24 }
 0x29c   :  { %v9040_v45 = vpop.f32.mrb[38].mxu1  ;;  %3542 = vadd.xlane.f32.xlu0 %v3221_v8  ;;  %v7419_v8 = vpop.eup %7418  ;;  %v3196_v34 = vmul.f32 %v8843_v26, %v3056_v5  ;;  %v9150_v5 = vadd.f32 %v8923_v55, %v8835_v37  ;;  %vm2445_vm9 = vcmp.gt.f32.partialorder %v9065_v32, 0.0  ;;  %vm2446_vm10 = vcmp.gt.f32.partialorder %v9080_v15, 0.0 }
 0x29d   :  { %v9047_v16 = vpop.f32.mrb[94].mxu0  ;;  %v9049_v17 = vpop.f32.mrb[39].mxu1  ;;  %3350 = vadd.xlane.f32.xlu1 %v3222_v42  ;;  %vm2420_vm11 = vcmp.gt.f32.partialorder %v9090_v18, 0.0  ;;  %vm2447_vm12 = vcmp.gt.f32.partialorder %v9103_v43, 0.0  ;;  %vm2422_vm14 = vcmp.gt.f32.partialorder %v9121_v28, 0.0  ;;  %vm2448_vm15 = vcmp.gt.f32.partialorder %v9132_v59, 0.0 }
 0x29e   :  { %v9052_v33 = vpop.f32.mrb[95].mxu0  ;;  %vm2423_vm0 = vcmp.gt.f32.partialorder %v9142_v7, 0.0  ;;  %vm2449_vm1 = vcmp.gt.f32.partialorder %v9150_v5, 0.0  ;;  %vm2450_vm2 = vcmp.gt.f32.partialorder %v9172_v23, 0.0  ;;  %vm2424_vm3 = vcmp.gt.f32.partialorder %v9158_v61, 0.0 }
 0x2a0   :  { %v9060_v36 = vpop.f32.mrb[40].mxu1  ;;  %3324 = vadd.xlane.f32.xlu0 %v3196_v34  ;;  %v2700_v34 = vmul.f32 1.442695, %v2550_v38 }
 0x2a1   :  { %12233 = vst [vmem:[#allocation22_spill] sm:$0xff] %v9060_v36  ;;  %v9069_v11 = vpop.f32.mrb[96].mxu0  ;;  %v9071_v50 = vpop.f32.mrb[41].mxu1 }
 0x2a2   :  { %12234 = vst [vmem:[#allocation23_spill] sm:$0xff] %v9071_v50  ;;  %v9074_v19 = vpop.f32.mrb[97].mxu0  ;;  %v2696_v50 = vmul.f32 1.442695, %v2548_v10 }
 0x2a4   :  { %v9082_v44 = vpop.f32.mrb[42].mxu1  ;;  %7430 = vpow2.f32 %v2696_v50 }
 0x2a5   :  { %12235 = vst [vmem:[#allocation24_spill] sm:$0xff] %v9082_v44  ;;  %v9086_v4 = vpop.f32.mrb[98].mxu0  ;;  %v9096_v0 = vpop.f32.mrb[43].mxu1 }
 0x2a6   :  { %v9094_v14 = vpop.f32.mrb[99].mxu0  ;;  %12236 = vst [vmem:[#allocation27_spill] sm:$0xff] %v9096_v0  ;;  %v9110_v0 = vadd.f32 %v8959_v53, %v8835_v37  ;;  %v6770_v53 = vadd.f32 -1.0, %v7417_v6 }
 0x2a8   :  { %v9106_v46 = vpop.f32.mrb[44].mxu1  ;;  %v2549_v2 = vmin.f32 %v9110_v0, 0.0  ;;  %v3083_v6 = vsel %vm2443_vm4, %v8985_v48, %v6770_v53  ;;  %v6744_v48 = vadd.f32 -1.0, %v7419_v8  ;;  %v7421_v53 = vpop.eup %7420  ;;  %v2551_v8 = vmin.f32 %v9142_v7, 0.0 }
 0x2a9   :  { %12237 = vst [vmem:[#allocation28_spill] sm:$0xff] %v9106_v46  ;;  %v9112_v58 = vpop.f32.mrb[100].mxu0  ;;  %v9114_v13 = vpop.f32.mrb[45].mxu1  ;;  %v2575_v46 = vmin.f32 %v9103_v43, 0.0  ;;  %v3223_v57 = vmul.f32 %v8846_v39, %v3083_v6  ;;  %vm2421_vm13 = vcmp.gt.f32.partialorder %v9110_v0, 0.0 }
 0x2aa   :  { %12238 = vst [vmem:[#allocation26_spill] sm:$0xff] %v9114_v13  ;;  %v9117_v44 = vpop.f32.mrb[101].mxu0  ;;  %v2698_v6 = vmul.f32 1.442695, %v2549_v2  ;;  %v3057_v55 = vsel %vm2417_vm5, %v9015_v40, %v6744_v48  ;;  %v7423_v2 = vpop.eup %7422  ;;  %v6745_v40 = vadd.f32 -1.0, %v7421_v53 }
 0x2ab   :  { %v2750_v10 = vmul.f32 1.442695, %v2575_v46  ;;  %3544 = vadd.xlane.f32.xlu1 %v3223_v57  ;;  %v9166_v46 = vadd.f32 %v9000_v20, %v8835_v37  ;;  %v3197_v49 = vmul.f32 %v8846_v39, %v3057_v55  ;;  %v2577_v57 = vmin.f32 %v9150_v5, 0.0  ;;  %v7425_v48 = vpop.eup %7424 }
 0x2ac   :  { %v9127_v42 = vpop.f32.mrb[46].mxu1  ;;  %v2552_v55 = vmin.f32 %v9158_v61, 0.0  ;;  %v3058_v38 = vsel %vm2418_vm6, %v9032_v54, %v6745_v40  ;;  %v9191_v54 = vadd.f32 %v9009_v9, %v8832_v24 }
 0x2ad   :  { %12239 = vst [vmem:[#allocation25_spill] sm:$0xff] %v9127_v42  ;;  %v9136_v13 = vpop.f32.mrb[102].mxu0  ;;  %v9138_v21 = vpop.f32.mrb[47].mxu1  ;;  %7432 = vpow2.f32 %v2750_v10  ;;  %3518 = vadd.xlane.f32.xlu0 %v3197_v49  ;;  %v2553_v1 = vmin.f32 %v9166_v46, 0.0  ;;  %v3198_v53 = vmul.f32 %v8843_v26, %v3058_v38  ;;  %v6771_v10 = vadd.f32 -1.0, %v7423_v2 }
 0x2ae   :  { %12240 = vst [vmem:[#allocation29_spill] sm:$0xff] %v9138_v21  ;;  %v9145_v42 = vpop.f32.mrb[103].mxu0  ;;  %v2576_v21 = vmin.f32 %v9132_v59, 0.0  ;;  %7434 = vpow2.f32 %v2698_v6  ;;  %v2754_v49 = vmul.f32 1.442695, %v2577_v57  ;;  %v7427_v2 = vpop.eup %7426  ;;  %vm2425_vm5 = vcmp.gt.f32.partialorder %v9166_v46, 0.0 }
 0x2af   :  { %12241 = vst [vmem:[#allocation30_spill] sm:$0xff] %v9145_v42  ;;  %7436 = vpow2.f32 %v2700_v34  ;;  %v2578_v42 = vmin.f32 %v9172_v23, 0.0  ;;  %3326 = vadd.xlane.f32.xlu1 %v3198_v53  ;;  %v3084_v6 = vsel %vm2444_vm7, %v9044_v52, %v6771_v10  ;;  %v2704_v34 = vmul.f32 1.442695, %v2552_v55 }
 0x2b0   :  { %v9153_v56 = vpop.f32.mrb[48].mxu1  ;;  %v2752_v20 = vmul.f32 1.442695, %v2576_v21  ;;  %v9187_v21 = vadd.f32 %v8942_v62, %v8835_v37  ;;  %v3224_v57 = vmul.f32 %v8843_v26, %v3084_v6  ;;  %v7429_v62 = vpop.eup %7428  ;;  %v2554_v55 = vmin.f32 %v9191_v54, 0.0 }
 0x2b1   :  { %12242 = vst [vmem:[#allocation31_spill] sm:$0xff] %v9153_v56  ;;  %v9161_v36 = vpop.f32.mrb[49].mxu1  ;;  %v2702_v56 = vmul.f32 1.442695, %v2551_v8  ;;  %v6746_v8 = vadd.f32 -1.0, %v7425_v48  ;;  %v7431_v48 = vpop.eup %7430  ;;  %v6772_v10 = vadd.f32 -1.0, %v7427_v2 }
 0x2b2   :  { %12243 = vst [vmem:[#allocation32_spill] sm:$0xff] %v9161_v36  ;;  %7438 = vpow2.f32 %v2752_v20  ;;  %v2756_v53 = vmul.f32 1.442695, %v2578_v42  ;;  %3352 = vadd.xlane.f32.xlu0 %v3224_v57  ;;  %v2579_v20 = vmin.f32 %v9187_v21, 0.0  ;;  %v2708_v57 = vmul.f32 1.442695, %v2554_v55 }
 0x2b3   :  { %v3059_v9 = vsel %vm2419_vm8, %v9056_v22, %v6746_v8  ;;  %7440 = vpow2.f32 %v2702_v56  ;;  %v9215_v56 = vadd.f32 %v8952_v30, %v8832_v24  ;;  %v6773_v8 = vadd.f32 -1.0, %v7429_v62 }
 0x2b4   :  { %v9175_v50 = vpop.f32.mrb[50].mxu1  ;;  %v3199_v52 = vmul.f32 %v8846_v39, %v3059_v9  ;;  %7442 = vpow2.f32 %v2754_v49  ;;  %v3085_v49 = vsel %vm2445_vm9, %v9065_v32, %v6772_v10  ;;  %v9226_v32 = vadd.f32 %v8957_v35, %v8835_v37 }
 0x2b5   :  { %v9179_v36 = vpop.f32.mrb[51].mxu1  ;;  %7444 = vpow2.f32 %v2704_v34  ;;  %v3225_v34 = vmul.f32 %v8846_v39, %v3085_v49  ;;  %v3086_v9 = vsel %vm2446_vm10, %v9080_v15, %v6773_v8  ;;  %v9236_v49 = vadd.f32 %v9025_v12, %v8832_v24 }
 0x2b6   :  { %12244 = vst [vmem:[#allocation33_spill] sm:$0xff] %v9179_v36  ;;  %v2706_v36 = vmul.f32 1.442695, %v2553_v1  ;;  %v9208_v1 = vadd.f32 %v9019_v25, %v8835_v37  ;;  %3520 = vadd.xlane.f32.xlu1 %v3199_v52  ;;  %v2758_v25 = vmul.f32 1.442695, %v2579_v20  ;;  %v6747_v52 = vadd.f32 -1.0, %v7431_v48 }
 0x2b7   :  { %v7433_v42 = vpop.eup %7432  ;;  %3546 = vadd.xlane.f32.xlu0 %v3225_v34  ;;  %v3226_v62 = vmul.f32 %v8843_v26, %v3086_v9  ;;  %v2580_v20 = vmin.f32 %v9215_v56, 0.0  ;;  %v9247_v12 = vadd.f32 %v8971_v60, %v8832_v24  ;;  %vm2451_vm4 = vcmp.gt.f32.partialorder %v9187_v21, 0.0 }
 0x2b8   :  { %v9194_v40 = vpop.f32.mrb[52].mxu1  ;;  %7446 = vpow2.f32 %v2706_v36  ;;  %v7435_v2 = vpop.eup %7434  ;;  %v2555_v30 = vmin.f32 %v9208_v1, 0.0  ;;  %v3060_v15 = vsel %vm2420_vm11, %v9090_v18, %v6747_v52  ;;  %v6774_v48 = vadd.f32 -1.0, %v7433_v42 }
 0x2b9   :  { %v9198_v38 = vpop.f32.mrb[53].mxu1  ;;  %7448 = vpow2.f32 %v2756_v53  ;;  %v7437_v36 = vpop.eup %7436  ;;  %v6748_v55 = vadd.f32 -1.0, %v7435_v2  ;;  %v3200_v35 = vmul.f32 %v8843_v26, %v3060_v15  ;;  %vm2426_vm6 = vcmp.gt.f32.partialorder %v9191_v54, 0.0 }
 0x2ba   :  { %3354 = vadd.xlane.f32.xlu1 %v3226_v62  ;;  %7450 = vpow2.f32 %v2758_v25  ;;  %v3087_v8 = vsel %vm2447_vm12, %v9103_v43, %v6774_v48  ;;  %v6749_v18 = vadd.f32 -1.0, %v7437_v36  ;;  %v2710_v43 = vmul.f32 1.442695, %v2555_v30 }
 0x2bb   :  { %v3061_v34 = vsel %vm2421_vm13, %v9110_v0, %v6748_v55  ;;  %7452 = vpow2.f32 %v2708_v57  ;;  %3328 = vadd.xlane.f32.xlu0 %v3200_v35  ;;  %v3227_v9 = vmul.f32 %v8846_v39, %v3087_v8  ;;  %v2581_v0 = vmin.f32 %v9226_v32, 0.0 }
 0x2bc   :  { %v9204_v6 = vpop.f32.mrb[54].mxu1  ;;  %v7439_v10 = vpop.eup %7438  ;;  %v3062_v36 = vsel %vm2422_vm14, %v9121_v28, %v6749_v18  ;;  %v2760_v57 = vmul.f32 1.442695, %v2580_v20  ;;  %v2556_v48 = vmin.f32 %v9236_v49, 0.0  ;;  %v3201_v60 = vmul.f32 %v8846_v39, %v3061_v34 }
 0x2bd   :  { %v9211_v22 = vpop.f32.mrb[55].mxu1  ;;  %v7441_v2 = vpop.eup %7440  ;;  %v6775_v62 = vadd.f32 -1.0, %v7439_v10  ;;  %v9262_v35 = vadd.f32 %v9035_v51, %v8835_v37  ;;  %v9266_v30 = vadd.f32 %v8976_v31, %v8835_v37  ;;  %v2582_v34 = vmin.f32 %v9247_v12, 0.0 }
 0x2be   :  { %12245 = vst [vmem:[#allocation34_spill] sm:$0xff] %v9211_v22  ;;  %v7443_v25 = vpop.eup %7442  ;;  %3548 = vadd.xlane.f32.xlu1 %v3227_v9  ;;  %v6750_v20 = vadd.f32 -1.0, %v7441_v2  ;;  %v9274_v18 = vadd.f32 %v9047_v16, %v8832_v24  ;;  %v3202_v51 = vmul.f32 %v8843_v26, %v3062_v36  ;;  %7454 = vpow2.f32 %v2710_v43 }
 0x2bf   :  { %v7445_v15 = vpop.eup %7444  ;;  %v3088_v28 = vsel %vm2448_vm15, %v9132_v59, %v6775_v62  ;;  %3522 = vadd.xlane.f32.xlu0 %v3201_v60  ;;  %v9282_v31 = vadd.f32 %v9052_v33, %v8835_v37  ;;  %7456 = vpow2.f32 %v2760_v57  ;;  %v2762_v2 = vmul.f32 1.442695, %v2581_v0 }
 0x2c0   :  { %v9221_v22 = vpop.f32.mrb[56].mxu1  ;;  %v3063_v59 = vsel %vm2423_vm0, %v9142_v7, %v6750_v20  ;;  %v3228_v16 = vmul.f32 %v8843_v26, %v3088_v28  ;;  %v2712_v62 = vmul.f32 1.442695, %v2556_v48  ;;  %v2557_v60 = vmin.f32 %v9262_v35, 0.0 }
 0x2c1   :  { %v9230_v53 = vpop.f32.mrb[57].mxu1  ;;  %v2583_v36 = vmin.f32 %v9266_v30, 0.0  ;;  %v2764_v43 = vmul.f32 1.442695, %v2582_v34  ;;  %v3203_v33 = vmul.f32 %v8846_v39, %v3063_v59  ;;  %v2559_v57 = vmin.f32 %v9282_v31, 0.0 }
 0x2c2   :  { %v9258_v55 = vpop.eup %7446  ;;  %3330 = vadd.xlane.f32.xlu1 %v3202_v51  ;;  %v9298_v48 = vadd.f32 %v8988_v41, %v8832_v24  ;;  %7458 = vpow2.f32 %v2762_v2  ;;  %v9303_v34 = vadd.f32 %v8997_v27, %v8835_v37  ;;  %vm2452_vm7 = vcmp.gt.f32.partialorder %v9215_v56, 0.0 }
 0x2c3   :  { %v7449_v8 = vpop.eup %7448  ;;  %3356 = vadd.xlane.f32.xlu0 %v3228_v16  ;;  %7460 = vpow2.f32 %v2712_v62  ;;  %v2766_v59 = vmul.f32 1.442695, %v2583_v36  ;;  %v9317_v62 = vadd.f32 %v9069_v11, %v8832_v24  ;;  %v9322_v36 = vadd.f32 %v9004_v29, %v8832_v24 }
 0x2c4   :  { %v9243_v42 = vpop.f32.mrb[58].mxu1  ;;  %v7451_v0 = vpop.eup %7450  ;;  %v6777_v28 = vadd.f32 -1.0, %v7449_v8  ;;  %7462 = vpow2.f32 %v2764_v43  ;;  %v2718_v8 = vmul.f32 1.442695, %v2559_v57  ;;  %v2584_v2 = vmin.f32 %v9298_v48, 0.0 }
 0x2c5   :  { %v9251_v52 = vpop.f32.mrb[59].mxu1  ;;  %v7453_v20 = vpop.eup %7452  ;;  %7464 = vpow2.f32 %v2766_v59  ;;  %v9330_v11 = vadd.f32 %v9074_v19, %v8835_v37  ;;  %v2560_v59 = vmin.f32 %v9317_v62, 0.0  ;;  %v2586_v19 = vmin.f32 %v9322_v36, 0.0 }
 0x2c6   :  { %12246 = vst [vmem:[#allocation35_spill] sm:$0xff] %v9251_v52  ;;  %3524 = vadd.xlane.f32.xlu1 %v3203_v33  ;;  %v3090_v16 = vsel %vm2450_vm2, %v9172_v23, %v6777_v28  ;;  %v6751_v33 = vadd.f32 -1.0, %v7445_v15  ;;  %v6778_v23 = vadd.f32 -1.0, %v7451_v0  ;;  %v2768_v29 = vmul.f32 1.442695, %v2584_v2 }
 0x2c7   :  { %vm2427_vm8 = vcmp.gt.f32.partialorder %v9208_v1, 0.0  ;;  %vm2453_vm9 = vcmp.gt.f32.partialorder %v9226_v32, 0.0  ;;  %vm2454_vm10 = vcmp.gt.f32.partialorder %v9247_v12, 0.0  ;;  %vm2428_vm11 = vcmp.gt.f32.partialorder %v9236_v49, 0.0 }
 0x2c8   :  { %v9269_v10 = vpop.f32.mrb[60].mxu1  ;;  %v3091_v57 = vsel %vm2451_vm4, %v9187_v21, %v6778_v23  ;;  %v6753_v21 = vadd.f32 -1.0, %v7453_v20  ;;  %vm2455_vm12 = vcmp.gt.f32.partialorder %v9266_v30, 0.0  ;;  %vm2429_vm13 = vcmp.gt.f32.partialorder %v9262_v35, 0.0 }
 0x2c9   :  { %12247 = vst [vmem:[#allocation36_spill] sm:$0xff] %v9269_v10  ;;  %v9278_v9 = vpop.f32.mrb[61].mxu1  ;;  %v6776_v10 = vadd.f32 -1.0, %v7443_v25  ;;  %vm2430_vm14 = vcmp.gt.f32.partialorder %v9274_v18, 0.0  ;;  %vm2456_vm15 = vcmp.gt.f32.partialorder %v9298_v48, 0.0  ;;  %vm2431_vm0 = vcmp.gt.f32.partialorder %v9282_v31, 0.0 }
 0x2ca   :  { %12248 = vst [vmem:[#allocation37_spill] sm:$0xff] %v9278_v9  ;;  %v2558_v9 = vmin.f32 %v9274_v18, 0.0  ;;  %v3066_v23 = vsel %vm2426_vm6, %v9191_v54, %v6753_v21  ;;  %vm2458_vm2 = vcmp.gt.f32.partialorder %v9322_v36, 0.0 }
 0x2cb   :  { %v3089_v25 = vsel %vm2449_vm1, %v9150_v5, %v6776_v10  ;;  %v3230_v5 = vmul.f32 %v8843_v26, %v3090_v16  ;;  %v9342_v16 = vadd.f32 %v9011_v47, %v8835_v37  ;;  %vm2457_vm1 = vcmp.gt.f32.partialorder %v9303_v34, 0.0 }
 0x2cc   :  { %v9288_v52 = vpop.f32.mrb[62].mxu1  ;;  %v3229_v51 = vmul.f32 %v8846_v39, %v3089_v25  ;;  %v2716_v27 = vmul.f32 1.442695, %v2558_v9  ;;  %v2585_v25 = vmin.f32 %v9303_v34, 0.0  ;;  %v3064_v9 = vsel %vm2424_vm3, %v9158_v61, %v6751_v33 }
 0x2cd   :  { %v9293_v7 = vpop.f32.mrb[63].mxu1  ;;  %3358 = vadd.xlane.f32.xlu1 %v3230_v5  ;;  %v3204_v0 = vmul.f32 %v8843_v26, %v3064_v9  ;;  %v3231_v61 = vmul.f32 %v8846_v39, %v3091_v57  ;;  %v2720_v9 = vmul.f32 1.442695, %v2560_v59  ;;  %v2772_v57 = vmul.f32 1.442695, %v2586_v19 }
 0x2ce   :  { %12249 = vst [vmem:[#allocation38_spill] sm:$0xff] %v9293_v7  ;;  %v2714_v7 = vmul.f32 1.442695, %v2557_v60  ;;  %3550 = vadd.xlane.f32.xlu0 %v3229_v51  ;;  %v7455_v60 = vpop.eup %7454  ;;  %v2770_v51 = vmul.f32 1.442695, %v2585_v25  ;;  %vm2432_vm3 = vcmp.gt.f32.partialorder %v9317_v62, 0.0 }
 0x2cf   :  { %v7457_v43 = vpop.eup %7456  ;;  %vm2459_vm4 = vcmp.gt.f32.partialorder %v9342_v16, 0.0 }
 0x2d0   :  { %v9308_v41 = vpop.f32.mrb[64].mxu1  ;;  %7466 = vpow2.f32 %v2714_v7  ;;  %v6752_v7 = vadd.f32 -1.0, %v9258_v55  ;;  %v6779_v55 = vadd.f32 -1.0, %v7457_v43 }
 0x2d1   :  { %v9311_v10 = vpop.f32.mrb[65].mxu1  ;;  %7468 = vpow2.f32 %v2716_v27  ;;  %3552 = vadd.xlane.f32.xlu1 %v3231_v61  ;;  %v7459_v27 = vpop.eup %7458  ;;  %v2587_v61 = vmin.f32 %v9342_v16, 0.0 }
 0x2d2   :  { %7470 = vpow2.f32 %v2718_v8  ;;  %3332 = vadd.xlane.f32.xlu0 %v3204_v0  ;;  %v2561_v8 = vmin.f32 %v9330_v11, 0.0  ;;  %v3065_v2 = vsel %vm2425_vm5, %v9166_v46, %v6752_v7  ;;  %v7461_v25 = vpop.eup %7460  ;;  %v9357_v0 = vadd.f32 %v9086_v4, %v8832_v24 }
 0x2d3   :  { %7472 = vpow2.f32 %v2768_v29  ;;  %v3205_v47 = vmul.f32 %v8846_v39, %v3065_v2  ;;  %v7463_v20 = vpop.eup %7462  ;;  %v3206_v46 = vmul.f32 %v8843_v26, %v3066_v23  ;;  %v3092_v43 = vsel %vm2452_vm7, %v9215_v56, %v6779_v55 }
 0x2d4   :  { %v9326_v15 = vpop.f32.mrb[66].mxu1  ;;  %v6754_v29 = vadd.f32 -1.0, %v7455_v60  ;;  %7474 = vpow2.f32 %v2770_v51  ;;  %v2722_v54 = vmul.f32 1.442695, %v2561_v8  ;;  %v6780_v59 = vadd.f32 -1.0, %v7459_v27  ;;  %v7465_v4 = vpop.eup %7464 }
 0x2d5   :  { %v9334_v28 = vpop.f32.mrb[67].mxu1  ;;  %3334 = vadd.xlane.f32.xlu1 %v3206_v46  ;;  %v9369_v2 = vadd.f32 %v9022_v3, %v8832_v24  ;;  %v3232_v56 = vmul.f32 %v8843_v26, %v3092_v43  ;;  %7476 = vpow2.f32 %v2720_v9  ;;  %v2562_v51 = vmin.f32 %v9357_v0, 0.0 }
 0x2d6   :  { %3526 = vadd.xlane.f32.xlu0 %v3205_v47  ;;  %v3067_v19 = vsel %vm2427_vm8, %v9208_v1, %v6754_v29  ;;  %v3093_v27 = vsel %vm2453_vm9, %v9226_v32, %v6780_v59  ;;  %7478 = vpow2.f32 %v2772_v57  ;;  %v2774_v47 = vmul.f32 1.442695, %v2587_v61 }
 0x2d7   :  { %v3207_v8 = vmul.f32 %v8846_v39, %v3067_v19  ;;  %v9379_v3 = vadd.f32 %v9094_v14, %v8835_v37  ;;  %v6781_v23 = vadd.f32 -1.0, %v7463_v20  ;;  %v9385_v9 = vadd.f32 %v9027_v63, %v8835_v37 }
 0x2d8   :  { %v9345_v5 = vpop.f32.mrb[68].mxu1  ;;  %v6755_v32 = vadd.f32 -1.0, %v7461_v25  ;;  %v6782_v43 = vadd.f32 -1.0, %v7465_v4  ;;  %v2588_v61 = vmin.f32 %v9369_v2, 0.0  ;;  %v3233_v14 = vmul.f32 %v8846_v39, %v3093_v27 }
 0x2d9   :  { %v9350_v33 = vpop.f32.mrb[69].mxu1  ;;  %3528 = vadd.xlane.f32.xlu1 %v3207_v8  ;;  %v3094_v20 = vsel %vm2454_vm10, %v9247_v12, %v6781_v23  ;;  %7480 = vpow2.f32 %v2722_v54  ;;  %v2724_v25 = vmul.f32 1.442695, %v2562_v51  ;;  %v9399_v4 = vadd.f32 %v9112_v58, %v8832_v24 }
 0x2da   :  { %v7467_v60 = vpop.eup %7466  ;;  %3360 = vadd.xlane.f32.xlu0 %v3232_v56  ;;  %v3234_v29 = vmul.f32 %v8843_v26, %v3094_v20  ;;  %v3068_v63 = vsel %vm2428_vm11, %v9236_v49, %v6755_v32  ;;  %v3095_v19 = vsel %vm2455_vm12, %v9266_v30, %v6782_v43  ;;  %7482 = vpow2.f32 %v2774_v47 }
 0x2db   :  { %v7469_v55 = vpop.eup %7468  ;;  %v6756_v59 = vadd.f32 -1.0, %v7467_v60  ;;  %v2563_v8 = vmin.f32 %v9379_v3, 0.0  ;;  %v9407_v49 = vadd.f32 %v9040_v45, %v8832_v24  ;;  %v2776_v51 = vmul.f32 1.442695, %v2588_v61 }
 0x2dc   :  { %v9362_v7 = vpop.f32.mrb[70].mxu1  ;;  %v7471_v46 = vpop.eup %7470  ;;  %v6757_v60 = vadd.f32 -1.0, %v7469_v55  ;;  %v2589_v58 = vmin.f32 %v9385_v9, 0.0  ;;  %v3208_v27 = vmul.f32 %v8843_v26, %v3068_v63  ;;  %v3235_v47 = vmul.f32 %v8846_v39, %v3095_v19 }
 0x2dd   :  { %v9365_v21 = vpop.f32.mrb[71].mxu1  ;;  %v7473_v56 = vpop.eup %7472  ;;  %3362 = vadd.xlane.f32.xlu1 %v3234_v29  ;;  %v3069_v23 = vsel %vm2429_vm13, %v9262_v35, %v6756_v59  ;;  %v2564_v32 = vmin.f32 %v9399_v4, 0.0  ;;  %v9420_v55 = vadd.f32 %v9049_v17, %v8835_v37  ;;  %v6758_v61 = vadd.f32 -1.0, %v7471_v46 }
 0x2de   :  { %3554 = vadd.xlane.f32.xlu0 %v3233_v14  ;;  %v7475_v30 = vpop.eup %7474  ;;  %v6783_v45 = vadd.f32 -1.0, %v7473_v56  ;;  %v3070_v43 = vsel %vm2430_vm14, %v9274_v18, %v6757_v60  ;;  %7484 = vpow2.f32 %v2724_v25  ;;  %v2726_v29 = vmul.f32 1.442695, %v2563_v8 }
 0x2df   :  { %v7477_v20 = vpop.eup %7476  ;;  %v9427_v35 = vadd.f32 %v9117_v44, %v8835_v37  ;;  %v2590_v63 = vmin.f32 %v9407_v49, 0.0  ;;  %7486 = vpow2.f32 %v2776_v51  ;;  %v2778_v56 = vmul.f32 1.442695, %v2589_v58 }
 0x2e0   :  { %v9381_v1 = vpop.f32.mrb[72].mxu1  ;;  %v7479_v17 = vpop.eup %7478  ;;  %v3209_v18 = vmul.f32 %v8846_v39, %v3069_v23  ;;  %v3210_v46 = vmul.f32 %v8843_v26, %v3070_v43  ;;  %v3096_v25 = vsel %vm2456_vm15, %v9298_v48, %v6783_v45  ;;  %v6784_v44 = vadd.f32 -1.0, %v7475_v30  ;;  %v12252_v23 = vld [vmem:[#allocation30_spill] sm:$0xff] }
 0x2e1   :  { %12250 = vst [vmem:[#allocation39_spill] sm:$0xff] %v9381_v1  ;;  %v9388_v57 = vpop.f32.mrb[73].mxu1  ;;  %3556 = vadd.xlane.f32.xlu1 %v3235_v47  ;;  %v2728_v19 = vmul.f32 1.442695, %v2564_v32  ;;  %v2591_v8 = vmin.f32 %v9420_v55, 0.0  ;;  %v9440_v60 = vadd.f32 %v9136_v13, %v8832_v24  ;;  %v3071_v51 = vsel %vm2431_vm0, %v9282_v31, %v6758_v61  ;;  %v12253_v13 = vld [vmem:[#allocation22_spill] sm:$0xff] }
 0x2e2   :  { %3336 = vadd.xlane.f32.xlu0 %v3208_v27  ;;  %7488 = vpow2.f32 %v2726_v29  ;;  %v2565_v27 = vmin.f32 %v9427_v35, 0.0  ;;  %v2780_v47 = vmul.f32 1.442695, %v2590_v63  ;;  %v9450_v45 = vadd.f32 %v12252_v23, %v8835_v37 }
 0x2e3   :  { %v7481_v30 = vpop.eup %7480  ;;  %v9454_v32 = vadd.f32 %v12253_v13, %v8832_v24  ;;  %v3236_v31 = vmul.f32 %v8843_v26, %v3096_v25  ;;  %7490 = vpow2.f32 %v2778_v56  ;;  %v3211_v61 = vmul.f32 %v8846_v39, %v3071_v51 }
 0x2e4   :  { %v9402_v12 = vpop.f32.mrb[74].mxu1  ;;  %v7483_v43 = vpop.eup %7482  ;;  %v3097_v29 = vsel %vm2457_vm1, %v9303_v34, %v6784_v44  ;;  %v6785_v63 = vadd.f32 -1.0, %v7479_v17  ;;  %7492 = vpow2.f32 %v2728_v19  ;;  %v2730_v13 = vmul.f32 1.442695, %v2565_v27 }
 0x2e5   :  { %12251 = vst [vmem:[#allocation40_spill] sm:$0xff] %v9402_v12  ;;  %v9409_v54 = vpop.f32.mrb[75].mxu1  ;;  %3338 = vadd.xlane.f32.xlu1 %v3210_v46  ;;  %v2566_v46 = vmin.f32 %v9440_v60, 0.0  ;;  %7494 = vpow2.f32 %v2780_v47  ;;  %v2567_v51 = vmin.f32 %v9450_v45, 0.0  ;;  %v2592_v34 = vmin.f32 %v9454_v32, 0.0 }
 0x2e6   :  { %3530 = vadd.xlane.f32.xlu0 %v3209_v18  ;;  %v2782_v18 = vmul.f32 1.442695, %v2591_v8  ;;  %v3098_v25 = vsel %vm2458_vm2, %v9322_v36, %v6785_v63  ;;  %v3237_v17 = vmul.f32 %v8846_v39, %v3097_v29  ;;  %v6759_v44 = vadd.f32 -1.0, %v7477_v20  ;;  %v12254_v8 = vld [vmem:[#allocation23_spill] sm:$0xff]  ;;  %v12256_v20 = vld [vmem:[#allocation24_spill] sm:$0xff] }
 0x2e7   :  { %v3238_v27 = vmul.f32 %v8843_v26, %v3098_v25  ;;  %v6786_v47 = vadd.f32 -1.0, %v7483_v43  ;;  %v9482_v12 = vadd.f32 %v12256_v20, %v8832_v24  ;;  %v2734_v43 = vmul.f32 1.442695, %v2567_v51  ;;  %v12257_v20 = vld [vmem:[#allocation27_spill] sm:$0xff] }
 0x2e8   :  { %v9423_v14 = vpop.f32.mrb[76].mxu1  ;;  %v7485_v19 = vpop.eup %7484  ;;  %7496 = vpow2.f32 %v2782_v18  ;;  %v3072_v63 = vsel %vm2432_vm3, %v9317_v62, %v6759_v44  ;;  %v2784_v18 = vmul.f32 1.442695, %v2592_v34  ;;  %vm2433_vm5 = vcmp.gt.f32.partialorder %v9330_v11, 0.0 }
 0x2e9   :  { %v9430_v59 = vpop.f32.mrb[77].mxu1  ;;  %3532 = vadd.xlane.f32.xlu1 %v3211_v61  ;;  %v7487_v36 = vpop.eup %7486  ;;  %v2732_v61 = vmul.f32 1.442695, %v2566_v46  ;;  %v3099_v25 = vsel %vm2459_vm4, %v9342_v16, %v6786_v47  ;;  %7498 = vpow2.f32 %v2730_v13  ;;  %v3212_v46 = vmul.f32 %v8843_v26, %v3072_v63  ;;  %v12259_v63 = vld [vmem:[#allocation28_spill] sm:$0xff] }
 0x2ea   :  { %3364 = vadd.xlane.f32.xlu0 %v3236_v31  ;;  %v9472_v31 = vadd.f32 %v12254_v8, %v8835_v37  ;;  %v3239_v44 = vmul.f32 %v8846_v39, %v3099_v25  ;;  %v6761_v1 = vadd.f32 -1.0, %v7485_v19  ;;  %vm2434_vm6 = vcmp.gt.f32.partialorder %v9357_v0, 0.0 }
 0x2eb   :  { %7500 = vpow2.f32 %v2732_v61  ;;  %v2594_v51 = vmin.f32 %v9482_v12, 0.0  ;;  %v6787_v19 = vadd.f32 -1.0, %v7487_v36  ;;  %v9505_v25 = vadd.f32 %v12259_v63, %v8832_v24  ;;  %v12260_v36 = vld [vmem:[#allocation26_spill] sm:$0xff] }
 0x2ec   :  { %v9443_v58 = vpop.f32.mrb[78].mxu1  ;;  %v2593_v62 = vmin.f32 %v9472_v31, 0.0  ;;  %7502 = vpow2.f32 %v2784_v18  ;;  %vm2460_vm7 = vcmp.gt.f32.partialorder %v9369_v2, 0.0  ;;  %vm2435_vm8 = vcmp.gt.f32.partialorder %v9379_v3, 0.0 }
 0x2ed   :  { %v9446_v48 = vpop.f32.mrb[79].mxu1  ;;  %3366 = vadd.xlane.f32.xlu1 %v3238_v27  ;;  %v9492_v27 = vadd.f32 %v12257_v20, %v8835_v37  ;;  %7504 = vpow2.f32 %v2734_v43  ;;  %vm2461_vm9 = vcmp.gt.f32.partialorder %v9385_v9, 0.0  ;;  %vm2462_vm10 = vcmp.gt.f32.partialorder %v9407_v49, 0.0 }
 0x2ee   :  { %3558 = vadd.xlane.f32.xlu0 %v3237_v17  ;;  %v7489_v17 = vpop.eup %7488  ;;  %vm2436_vm11 = vcmp.gt.f32.partialorder %v9399_v4, 0.0  ;;  %vm2463_vm12 = vcmp.gt.f32.partialorder %v9420_v55, 0.0  ;;  %vm2437_vm13 = vcmp.gt.f32.partialorder %v9427_v35, 0.0  ;;  %vm2438_vm14 = vcmp.gt.f32.partialorder %v9440_v60, 0.0 }
 0x2ef   :  { %v7491_v13 = vpop.eup %7490  ;;  %v6762_v18 = vadd.f32 -1.0, %v7489_v17  ;;  %vm2464_vm15 = vcmp.gt.f32.partialorder %v9454_v32, 0.0  ;;  %vm2439_vm0 = vcmp.gt.f32.partialorder %v9450_v45, 0.0  ;;  %vm2465_vm1 = vcmp.gt.f32.partialorder %v9472_v31, 0.0 }
 0x2f0   :  { %v9462_v23 = vpop.f32.mrb[80].mxu1  ;;  %v7493_v61 = vpop.eup %7492  ;;  %v6788_v43 = vadd.f32 -1.0, %v7491_v13  ;;  %vm2466_vm2 = vcmp.gt.f32.partialorder %v9482_v12, 0.0  ;;  %vm2468_vm3 = vcmp.gt.f32.partialorder %v9505_v25, 0.0  ;;  %vm2467_vm4 = vcmp.gt.f32.partialorder %v9492_v27, 0.0 }
 0x2f1   :  { %v9465_v56 = vpop.f32.mrb[81].mxu1  ;;  %3560 = vadd.xlane.f32.xlu1 %v3239_v44  ;;  %v7495_v20 = vpop.eup %7494  ;;  %v2786_v44 = vmul.f32 1.442695, %v2593_v62 }
 0x2f2   :  { %3340 = vadd.xlane.f32.xlu0 %v3212_v46 }
 0x2f3   :  { %7506 = vpow2.f32 %v2786_v44 }
 0x2f4   :  { %v9478_v29 = vpop.f32.mrb[82].mxu1 }
 0x2f5   :  { %12255 = vst [vmem:[#allocation30_spill] sm:$0xff] %v9478_v29  ;;  %v9485_v8 = vpop.f32.mrb[83].mxu1  ;;  %v6760_v29 = vadd.f32 -1.0, %v7481_v30  ;;  %v3074_v30 = vsel %vm2434_vm6, %v9357_v0, %v6761_v1  ;;  %v3100_v0 = vsel %vm2460_vm7, %v9369_v2, %v6787_v19  ;;  %v2595_v1 = vmin.f32 %v9492_v27, 0.0 }
 0x2f6   :  { %v2596_v2 = vmin.f32 %v9505_v25, 0.0  ;;  %v3240_v19 = vmul.f32 %v8843_v26, %v3100_v0 }
 0x2f7   :  { %v3073_v34 = vsel %vm2433_vm5, %v9330_v11, %v6760_v29  ;;  %v3214_v11 = vmul.f32 %v8843_v26, %v3074_v30  ;;  %v9514_v29 = vadd.f32 %v12260_v36, %v8835_v37  ;;  %v7497_v30 = vpop.eup %7496  ;;  %v12263_v36 = vld [vmem:[#allocation25_spill] sm:$0xff]  ;;  %v9535_v44 = vpop.xlane.xlu0 %3308 }
 0x2f8   :  { %v9496_v16 = vpop.f32.mrb[84].mxu1  ;;  %v3213_v46 = vmul.f32 %v8846_v39, %v3073_v34  ;;  %v2788_v34 = vmul.f32 1.442695, %v2594_v51  ;;  %v3101_v51 = vsel %vm2461_vm9, %v9385_v9, %v6788_v43 }
 0x2f9   :  { %v9501_v47 = vpop.f32.mrb[85].mxu1  ;;  %3342 = vadd.xlane.f32.xlu1 %v3214_v11  ;;  %v2790_v11 = vmul.f32 1.442695, %v2595_v1  ;;  %v2597_v13 = vmin.f32 %v9514_v29, 0.0  ;;  %v3241_v43 = vmul.f32 %v8846_v39, %v3101_v51  ;;  %vm2469_vm5 = vcmp.gt.f32.partialorder %v9514_v29, 0.0 }
 0x2fa   :  { %12258 = vst [vmem:[#allocation22_spill] sm:$0xff] %v9501_v47  ;;  %3534 = vadd.xlane.f32.xlu0 %v3213_v46  ;;  %v3075_v47 = vsel %vm2435_vm8, %v9379_v3, %v6762_v18  ;;  %v7499_v46 = vpop.eup %7498  ;;  %7508 = vpow2.f32 %v2788_v34  ;;  %v6763_v3 = vadd.f32 -1.0, %v7493_v61  ;;  %v2792_v18 = vmul.f32 1.442695, %v2596_v2 }
 0x2fb   :  { %v3215_v17 = vmul.f32 %v8846_v39, %v3075_v47  ;;  %v6790_v47 = vadd.f32 -1.0, %v7497_v30  ;;  %v7501_v1 = vpop.eup %7500  ;;  %v6764_v61 = vadd.f32 -1.0, %v7499_v46  ;;  %7510 = vpow2.f32 %v2790_v11 }
 0x2fc   :  { %v9516_v63 = vpop.f32.mrb[86].mxu1  ;;  %v3076_v34 = vsel %vm2436_vm11, %v9399_v4, %v6763_v3  ;;  %v7503_v30 = vpop.eup %7502  ;;  %v6765_v46 = vadd.f32 -1.0, %v7501_v1  ;;  %7512 = vpow2.f32 %v2792_v18 }
 0x2fd   :  { %12261 = vst [vmem:[#allocation23_spill] sm:$0xff] %v9516_v63  ;;  %v9519_v62 = vpop.f32.mrb[87].mxu1  ;;  %v6789_v63 = vadd.f32 -1.0, %v7495_v20  ;;  %3536 = vadd.xlane.f32.xlu1 %v3215_v17  ;;  %v3103_v17 = vsel %vm2463_vm12, %v9420_v55, %v6790_v47  ;;  %v7505_v51 = vpop.eup %7504  ;;  %v3216_v55 = vmul.f32 %v8843_v26, %v3076_v34  ;;  %v3077_v47 = vsel %vm2437_vm13, %v9427_v35, %v6764_v61 }
 0x2fe   :  { %12262 = vst [vmem:[#allocation24_spill] sm:$0xff] %v9519_v62  ;;  %v9530_v62 = vadd.f32 %v12263_v36, %v8832_v24  ;;  %3368 = vadd.xlane.f32.xlu0 %v3240_v19  ;;  %v3243_v11 = vmul.f32 %v8846_v39, %v3103_v17  ;;  %v3078_v1 = vsel %vm2438_vm14, %v9440_v60, %v6765_v46  ;;  %v12272_v46 = vld [vmem:[#allocation32_spill] sm:$0xff] }
 0x2ff   :  { %v3102_v36 = vsel %vm2462_vm10, %v9407_v49, %v6789_v63  ;;  %v12267_v49 = vld [vmem:[#allocation29_spill] sm:$0xff]  ;;  %v3217_v61 = vmul.f32 %v8846_v39, %v3077_v47  ;;  %v3218_v60 = vmul.f32 %v8843_v26, %v3078_v1 }
 0x300   :  { %v9532_v0 = vpop.f32.mrb[88].mxu1  ;;  %v3242_v20 = vmul.f32 %v8843_v26, %v3102_v36  ;;  %v2598_v19 = vmin.f32 %v9530_v62, 0.0  ;;  %v9551_v63 = vadd.f32 %v12267_v49, %v8835_v37  ;;  %v12268_v36 = vld [vmem:[#allocation31_spill] sm:$0xff]  ;;  %v6791_v49 = vadd.f32 -1.0, %v7503_v30 }
 0x301   :  { %12264 = vst [vmem:[#allocation27_spill] sm:$0xff] %v9532_v0  ;;  %v9537_v9 = vpop.f32.mrb[89].mxu1  ;;  %v9555_v4 = vadd.f32 %v12268_v36, %v8832_v24  ;;  %vm2470_vm6 = vcmp.gt.f32.partialorder %v9530_v62, 0.0  ;;  %v12290_v0 = vld [vmem:[#allocation37_spill] sm:$0xff] }
 0x302   :  { %12265 = vst [vmem:[#allocation28_spill] sm:$0xff] %v9537_v9  ;;  %3562 = vadd.xlane.f32.xlu0 %v3241_v43  ;;  %3370 = vadd.xlane.f32.xlu1 %v3242_v20  ;;  %v2794_v43 = vmul.f32 1.442695, %v2597_v13  ;;  %v2796_v36 = vmul.f32 1.442695, %v2598_v19  ;;  %v6766_v13 = vadd.f32 -1.0, %v7505_v51  ;;  %v7507_v20 = vpop.eup %7506  ;;  %v3104_v51 = vsel %vm2464_vm15, %v9454_v32, %v6791_v49 }
 0x303   :  { %v2599_v34 = vmin.f32 %v9551_v63, 0.0  ;;  %v2600_v17 = vmin.f32 %v9555_v4, 0.0  ;;  %vm2472_vm7 = vcmp.gt.f32.partialorder %v9555_v4, 0.0  ;;  %vm2471_vm8 = vcmp.gt.f32.partialorder %v9551_v63, 0.0 }
 0x304   :  { %v9547_v2 = vpop.f32.mrb[90].mxu1  ;;  %v7509_v19 = vpop.eup %7508  ;;  %7514 = vpow2.f32 %v2794_v43  ;;  %v9589_v43 = vadd.f32 %v9175_v50, %v8832_v24 }
 0x305   :  { %12266 = vst [vmem:[#allocation26_spill] sm:$0xff] %v9547_v2  ;;  %v9557_v3 = vpop.f32.mrb[91].mxu1  ;;  %v9564_v2 = vpop.xlane.xlu0 %3502  ;;  %7516 = vpow2.f32 %v2796_v36  ;;  %v2798_v47 = vmul.f32 1.442695, %v2599_v34  ;;  %v12275_v36 = vld [vmem:[#allocation33_spill] sm:$0xff] }
 0x306   :  { %12269 = vst [vmem:[#allocation25_spill] sm:$0xff] %v9557_v3  ;;  %3344 = vadd.xlane.f32.xlu0 %v3216_v55  ;;  %3564 = vadd.xlane.f32.xlu1 %v3243_v11  ;;  %v9582_v55 = vadd.f32 %v12272_v46, %v8835_v37  ;;  %v3079_v11 = vsel %vm2439_vm0, %v9450_v45, %v6766_v13  ;;  %v6792_v13 = vadd.f32 -1.0, %v7507_v20  ;;  %v7511_v34 = vpop.eup %7510  ;;  %v2602_v20 = vmin.f32 %v9589_v43, 0.0 }
 0x307   :  { %v9598_v1 = vadd.f32 %v12275_v36, %v8835_v37  ;;  %v3244_v45 = vmul.f32 %v8843_v26, %v3104_v51  ;;  %v3219_v50 = vmul.f32 %v8846_v39, %v3079_v11  ;;  %7518 = vpow2.f32 %v2798_v47 }
 0x308   :  { %v9568_v18 = vpop.f32.mrb[92].mxu1  ;;  %v2601_v46 = vmin.f32 %v9582_v55, 0.0  ;;  %v3105_v36 = vsel %vm2465_vm1, %v9472_v31, %v6792_v13  ;;  %vm2473_vm9 = vcmp.gt.f32.partialorder %v9582_v55, 0.0  ;;  %vm2474_vm10 = vcmp.gt.f32.partialorder %v9589_v43, 0.0 }
 0x309   :  { %12270 = vst [vmem:[#allocation29_spill] sm:$0xff] %v9568_v18  ;;  %v9572_v35 = vpop.f32.mrb[93].mxu1  ;;  %v2800_v18 = vmul.f32 1.442695, %v2600_v17  ;;  %v9592_v32 = vpop.xlane.xlu0 %3310  ;;  %v6793_v17 = vadd.f32 -1.0, %v7509_v19  ;;  %v3245_v3 = vmul.f32 %v8846_v39, %v3105_v36  ;;  %vm2475_vm12 = vcmp.gt.f32.partialorder %v9598_v1, 0.0 }
 0x30a   :  { %12271 = vst [vmem:[#allocation31_spill] sm:$0xff] %v9572_v35  ;;  %v9575_v30 = vpop.xlane.xlu1 %3504  ;;  %3538 = vadd.xlane.f32.xlu0 %v3217_v61  ;;  %3346 = vadd.xlane.f32.xlu1 %v3218_v60  ;;  %v7513_v60 = vpop.eup %7512  ;;  %v2802_v13 = vmul.f32 1.442695, %v2601_v46 }
 0x30b   :  { %v3106_v19 = vsel %vm2466_vm2, %v9482_v12, %v6793_v17  ;;  %7520 = vpow2.f32 %v2800_v18  ;;  %v6795_v47 = vadd.f32 -1.0, %v7513_v60  ;;  %v2804_v17 = vmul.f32 1.442695, %v2602_v20 }
 0x30c   :  { %v9585_v35 = vpop.f32.mrb[94].mxu1  ;;  %v3246_v31 = vmul.f32 %v8843_v26, %v3106_v19  ;;  %v6794_v60 = vadd.f32 -1.0, %v7511_v34  ;;  %7522 = vpow2.f32 %v2802_v13 }
 0x30d   :  { %12273 = vst [vmem:[#allocation32_spill] sm:$0xff] %v9585_v35  ;;  %v9594_v49 = vpop.f32.mrb[95].mxu1  ;;  %v2603_v35 = vmin.f32 %v9598_v1, 0.0  ;;  %v3108_v36 = vsel %vm2468_vm3, %v9505_v25, %v6795_v47  ;;  %7524 = vpow2.f32 %v2804_v17  ;;  %v9671_v17 = vadd.f32 %v9243_v42, %v8832_v24  ;;  %v12288_v42 = vld [vmem:[#allocation36_spill] sm:$0xff] }
 0x30e   :  { %12274 = vst [vmem:[#allocation41_spill] sm:$0xff] %v9594_v49  ;;  %v9603_v61 = vpop.xlane.xlu1 %3312  ;;  %v9608_v49 = vadd.f32 %v9194_v40, %v8832_v24  ;;  %3372 = vadd.xlane.f32.xlu0 %v3244_v45  ;;  %3540 = vadd.xlane.f32.xlu1 %v3219_v50  ;;  %v9621_v40 = vadd.f32 %v9198_v38, %v8835_v37  ;;  %v9625_v45 = vpop.xlane.xlu0 %3506 }
 0x30f   :  { %v7515_v50 = vpop.eup %7514  ;;  %v9633_v38 = vadd.f32 %v9204_v6, %v8832_v24  ;;  %v3248_v20 = vmul.f32 %v8843_v26, %v3108_v36  ;;  %v9648_v6 = vadd.f32 %v9221_v22, %v8832_v24  ;;  %v3107_v25 = vsel %vm2467_vm4, %v9492_v27, %v6794_v60 }
 0x310   :  { %v9611_v51 = vpop.f32.mrb[96].mxu1  ;;  %v2604_v12 = vmin.f32 %v9608_v49, 0.0  ;;  %vm2476_vm11 = vcmp.gt.f32.partialorder %v9608_v49, 0.0  ;;  %vm2477_vm13 = vcmp.gt.f32.partialorder %v9621_v40, 0.0  ;;  %vm2482_vm2 = vcmp.gt.f32.partialorder %v9671_v17, 0.0 }
 0x311   :  { %12276 = vst [vmem:[#allocation33_spill] sm:$0xff] %v9611_v51  ;;  %v9615_v11 = vpop.f32.mrb[97].mxu1  ;;  %v12281_v51 = vld [vmem:[#allocation34_spill] sm:$0xff]  ;;  %v2606_v47 = vmin.f32 %v9633_v38, 0.0  ;;  %v2608_v60 = vmin.f32 %v9648_v6, 0.0  ;;  %vm2478_vm14 = vcmp.gt.f32.partialorder %v9633_v38, 0.0 }
 0x312   :  { %12277 = vst [vmem:[#allocation42_spill] sm:$0xff] %v9615_v11  ;;  %3566 = vadd.xlane.f32.xlu0 %v3245_v3  ;;  %3374 = vadd.xlane.f32.xlu1 %v3246_v31  ;;  %v9636_v19 = vpop.xlane.xlu1 %3314  ;;  %v7517_v11 = vpop.eup %7516  ;;  %v2806_v3 = vmul.f32 1.442695, %v2603_v35  ;;  %v9642_v9 = vadd.f32 %v12281_v51, %v8835_v37  ;;  %v2808_v34 = vmul.f32 1.442695, %v2604_v12  ;;  %v9655_v35 = vadd.f32 %v9230_v53, %v8835_v37 }
 0x313   :  { %12279 = vst [vmem:[#allocation44_spill] sm:$0xff] %v9636_v19  ;;  %v3247_v51 = vmul.f32 %v8846_v39, %v3107_v25  ;;  %v6796_v53 = vadd.f32 -1.0, %v7515_v50  ;;  %v7519_v13 = vpop.eup %7518  ;;  %v9697_v19 = vadd.f32 %v12290_v0, %v8835_v37  ;;  %vm2480_vm15 = vcmp.gt.f32.partialorder %v9648_v6, 0.0 }
 0x314   :  { %v9629_v18 = vpop.f32.mrb[98].mxu1  ;;  %7526 = vpow2.f32 %v2806_v3  ;;  %v2607_v27 = vmin.f32 %v9642_v9, 0.0  ;;  %v2609_v3 = vmin.f32 %v9655_v35, 0.0  ;;  %v6798_v0 = vadd.f32 -1.0, %v7519_v13 }
 0x315   :  { %12278 = vst [vmem:[#allocation43_spill] sm:$0xff] %v9629_v18  ;;  %v9638_v46 = vpop.f32.mrb[99].mxu1  ;;  %v2605_v18 = vmin.f32 %v9621_v40, 0.0  ;;  %v9662_v22 = vpop.xlane.xlu0 %3316  ;;  %7528 = vpow2.f32 %v2808_v34  ;;  %vm2479_vm0 = vcmp.gt.f32.partialorder %v9642_v9, 0.0  ;;  %vm2481_vm1 = vcmp.gt.f32.partialorder %v9655_v35, 0.0 }
 0x316   :  { %12280 = vst [vmem:[#allocation45_spill] sm:$0xff] %v9638_v46  ;;  %3376 = vadd.xlane.f32.xlu0 %v3248_v20  ;;  %12283 = vst [vmem:[#allocation46_spill] sm:$0xff] %v9662_v22  ;;  %3568 = vadd.xlane.f32.xlu1 %v3247_v51  ;;  %v6797_v20 = vadd.f32 -1.0, %v7517_v11  ;;  %v9673_v25 = vpop.xlane.xlu1 %3508  ;;  %v12286_v51 = vld [vmem:[#allocation35_spill] sm:$0xff]  ;;  %v2812_v46 = vmul.f32 1.442695, %v2606_v47  ;;  %v9687_v11 = vadd.f32 %v12288_v42, %v8832_v24 }
 0x317   :  { %v2810_v12 = vmul.f32 1.442695, %v2605_v18  ;;  %12285 = vst [vmem:[#allocation48_spill] sm:$0xff] %v9673_v25  ;;  %v9678_v50 = vadd.f32 %v12286_v51, %v8835_v37  ;;  %v3109_v18 = vsel %vm2469_vm5, %v9514_v29, %v6796_v53  ;;  %v2814_v51 = vmul.f32 1.442695, %v2607_v27 }
 0x318   :  { %v9658_v31 = vpop.f32.mrb[100].mxu1  ;;  %v3249_v25 = vmul.f32 %v8846_v39, %v3109_v18  ;;  %v3110_v34 = vsel %vm2470_vm6, %v9530_v62, %v6797_v20  ;;  %v2816_v47 = vmul.f32 1.442695, %v2608_v60  ;;  %v2610_v53 = vmin.f32 %v9671_v17, 0.0 }
 0x319   :  { %12282 = vst [vmem:[#allocation34_spill] sm:$0xff] %v9658_v31  ;;  %v9664_v36 = vpop.f32.mrb[101].mxu1  ;;  %v7521_v31 = vpop.eup %7520  ;;  %v3250_v29 = vmul.f32 %v8843_v26, %v3110_v34  ;;  %7530 = vpow2.f32 %v2810_v12  ;;  %v2818_v62 = vmul.f32 1.442695, %v2609_v3  ;;  %v2611_v20 = vmin.f32 %v9678_v50, 0.0 }
 0x31a   :  { %12284 = vst [vmem:[#allocation47_spill] sm:$0xff] %v9664_v36  ;;  %3570 = vadd.xlane.f32.xlu0 %v3249_v25  ;;  %v6799_v18 = vadd.f32 -1.0, %v7521_v31  ;;  %v9702_v42 = vpop.xlane.xlu0 %3510  ;;  %7532 = vpow2.f32 %v2812_v46  ;;  %v2612_v27 = vmin.f32 %v9687_v11, 0.0  ;;  %v9709_v12 = vadd.f32 %v9288_v52, %v8832_v24  ;;  %v9712_v25 = vpop.xlane.xlu1 %3318 }
 0x31b   :  { %12291 = vst [vmem:[#allocation37_spill] sm:$0xff] %v9702_v42  ;;  %3378 = vadd.xlane.f32.xlu1 %v3250_v29  ;;  %12292 = vst [vmem:[#allocation49_spill] sm:$0xff] %v9712_v25  ;;  %v7523_v31 = vpop.eup %7522  ;;  %7534 = vpow2.f32 %v2814_v51  ;;  %v2613_v3 = vmin.f32 %v9697_v19, 0.0  ;;  %v3111_v29 = vsel %vm2471_vm8, %v9551_v63, %v6798_v0  ;;  %v2820_v46 = vmul.f32 1.442695, %v2610_v53 }
 0x31c   :  { %v9683_v36 = vpop.f32.mrb[102].mxu1  ;;  %v3112_v60 = vsel %vm2472_vm7, %v9555_v4, %v6799_v18  ;;  %v7525_v13 = vpop.eup %7524  ;;  %7536 = vpow2.f32 %v2816_v47  ;;  %v2822_v52 = vmul.f32 1.442695, %v2611_v20  ;;  %v2824_v4 = vmul.f32 1.442695, %v2612_v27  ;;  %v12294_v47 = vld [vmem:[#allocation38_spill] sm:$0xff] }
 0x31d   :  { %12287 = vst [vmem:[#allocation35_spill] sm:$0xff] %v9683_v36  ;;  %v9693_v22 = vpop.f32.mrb[103].mxu1  ;;  %v3252_v34 = vmul.f32 %v8843_v26, %v3112_v60  ;;  %7538 = vpow2.f32 %v2818_v62  ;;  %v2614_v18 = vmin.f32 %v9709_v12, 0.0  ;;  %v6800_v51 = vadd.f32 -1.0, %v7523_v31 }
 0x31e   :  { %12289 = vst [vmem:[#allocation36_spill] sm:$0xff] %v9693_v22  ;;  %v3251_v22 = vmul.f32 %v8846_v39, %v3111_v29  ;;  %v7527_v36 = vpop.eup %7526  ;;  %v9720_v25 = vpop.xlane.xlu0 %3320  ;;  %v2826_v63 = vmul.f32 1.442695, %v2613_v3  ;;  %v9724_v53 = vadd.f32 %v12294_v47, %v8835_v37  ;;  %v6801_v62 = vadd.f32 -1.0, %v7525_v13 }
 0x31f   :  { %3380 = vadd.xlane.f32.xlu0 %v3252_v34  ;;  %12293 = vst [vmem:[#allocation50_spill] sm:$0xff] %v9720_v25  ;;  %v7529_v60 = vpop.eup %7528  ;;  %7540 = vpow2.f32 %v2820_v46  ;;  %v9729_v20 = vadd.f32 %v9308_v41, %v8832_v24  ;;  %v9735_v0 = vpop.xlane.xlu1 %3512  ;;  %v3113_v27 = vsel %vm2473_vm9, %v9582_v55, %v6800_v51  ;;  %v2828_v3 = vmul.f32 1.442695, %v2614_v18 }
 0x320   :  { %3572 = vadd.xlane.f32.xlu1 %v3251_v22  ;;  %v9733_v22 = vadd.f32 %v9311_v10, %v8835_v37  ;;  %12295 = vst [vmem:[#allocation38_spill] sm:$0xff] %v9735_v0  ;;  %7542 = vpow2.f32 %v2822_v52  ;;  %v3253_v34 = vmul.f32 %v8846_v39, %v3113_v27  ;;  %v3114_v29 = vsel %vm2474_vm10, %v9589_v43, %v6801_v62 }
 0x321   :  { %7544 = vpow2.f32 %v2824_v4  ;;  %v2615_v41 = vmin.f32 %v9724_v53, 0.0  ;;  %v9743_v13 = vadd.f32 %v9326_v15, %v8832_v24  ;;  %v3254_v10 = vmul.f32 %v8843_v26, %v3114_v29 }
 0x322   :  { %7546 = vpow2.f32 %v2826_v63  ;;  %v9746_v46 = vpop.xlane.xlu0 %3514  ;;  %v2616_v55 = vmin.f32 %v9729_v20, 0.0  ;;  %v2617_v4 = vmin.f32 %v9733_v22, 0.0  ;;  %v9752_v18 = vadd.f32 %v9334_v28, %v8835_v37 }
 0x323   :  { %v7531_v31 = vpop.eup %7530  ;;  %12296 = vst [vmem:[#allocation51_spill] sm:$0xff] %v9746_v46  ;;  %3574 = vadd.xlane.f32.xlu0 %v3253_v34  ;;  %v6803_v43 = vadd.f32 -1.0, %v7529_v60  ;;  %v9758_v15 = vadd.f32 %v9345_v5, %v8832_v24  ;;  %v6802_v63 = vadd.f32 -1.0, %v7527_v36  ;;  %7548 = vpow2.f32 %v2828_v3  ;;  %v9763_v28 = vpop.xlane.xlu1 %3322 }
 0x324   :  { %v7533_v52 = vpop.eup %7532  ;;  %3382 = vadd.xlane.f32.xlu1 %v3254_v10  ;;  %12297 = vst [vmem:[#allocation52_spill] sm:$0xff] %v9763_v28  ;;  %v2830_v60 = vmul.f32 1.442695, %v2615_v41  ;;  %v2618_v34 = vmin.f32 %v9743_v13, 0.0  ;;  %v2832_v10 = vmul.f32 1.442695, %v2616_v55  ;;  %v9779_v41 = vadd.f32 %v9362_v7, %v8832_v24 }
 0x325   :  { %v9754_v51 = vpop.eup %7534  ;;  %v3116_v62 = vsel %vm2476_vm11, %v9608_v49, %v6803_v43  ;;  %v3115_v29 = vsel %vm2475_vm12, %v9598_v1, %v6802_v63  ;;  %v2834_v46 = vmul.f32 1.442695, %v2617_v4  ;;  %v2619_v0 = vmin.f32 %v9752_v18, 0.0 }
 0x326   :  { %v7537_v47 = vpop.eup %7536  ;;  %v3256_v5 = vmul.f32 %v8843_v26, %v3116_v62  ;;  %v3255_v36 = vmul.f32 %v8846_v39, %v3115_v29  ;;  %v2620_v3 = vmin.f32 %v9758_v15, 0.0  ;;  %v9775_v49 = vadd.f32 %v9350_v33, %v8835_v37  ;;  %v9781_v62 = vpop.xlane.xlu0 %3348 }
 0x327   :  { %v9765_v27 = vpop.eup %7538  ;;  %v6804_v43 = vadd.f32 -1.0, %v7531_v31  ;;  %12298 = vst [vmem:[#allocation53_spill] sm:$0xff] %v9781_v62  ;;  %v9787_v55 = vadd.f32 %v9365_v21, %v8835_v37  ;;  %v9791_v4 = vadd.f32 %v9388_v57, %v8835_v37  ;;  %v6805_v33 = vadd.f32 -1.0, %v7533_v52 }
 0x328   :  { %3384 = vadd.xlane.f32.xlu0 %v3256_v5  ;;  %3576 = vadd.xlane.f32.xlu1 %v3255_v36  ;;  %7550 = vpow2.f32 %v2830_v60  ;;  %v2836_v31 = vmul.f32 1.442695, %v2618_v34  ;;  %v2838_v21 = vmul.f32 1.442695, %v2619_v0  ;;  %v9802_v36 = vpop.xlane.xlu1 %3516  ;;  %v2840_v52 = vmul.f32 1.442695, %v2620_v3 }
 0x329   :  { %v9783_v1 = vpop.eup %7540  ;;  %v3117_v63 = vsel %vm2477_vm13, %v9621_v40, %v6804_v43  ;;  %7552 = vpow2.f32 %v2832_v10  ;;  %v3118_v57 = vsel %vm2478_vm14, %v9633_v38, %v6805_v33  ;;  %12299 = vst [vmem:[#allocation54_spill] sm:$0xff] %v9802_v36  ;;  %v2621_v60 = vmin.f32 %v9775_v49, 0.0 }
 0x32a   :  { %v9794_v7 = vpop.eup %7542  ;;  %v3257_v29 = vmul.f32 %v8846_v39, %v3117_v63  ;;  %v9809_v40 = vadd.f32 %v9409_v54, %v8835_v37  ;;  %v3258_v34 = vmul.f32 %v8843_v26, %v3118_v57  ;;  %7554 = vpow2.f32 %v2834_v46  ;;  %v9819_v43 = vpop.xlane.xlu0 %3542 }
 0x32b   :  { %v9798_v5 = vpop.eup %7544  ;;  %v2622_v0 = vmin.f32 %v9779_v41, 0.0  ;;  %v2623_v10 = vmin.f32 %v9787_v55, 0.0  ;;  %v2625_v38 = vmin.f32 %v9791_v4, 0.0  ;;  %7556 = vpow2.f32 %v2836_v31  ;;  %12300 = vst [vmem:[#allocation55_spill] sm:$0xff] %v9819_v43 }
 0x32c   :  { %v9804_v62 = vpop.eup %7546  ;;  %3578 = vadd.xlane.f32.xlu0 %v3257_v29  ;;  %v9817_v3 = vadd.f32 %v9423_v14, %v8832_v24  ;;  %3386 = vadd.xlane.f32.xlu1 %v3258_v34  ;;  %7558 = vpow2.f32 %v2838_v21  ;;  %v9825_v46 = vadd.f32 %v9430_v59, %v8835_v37  ;;  %v2842_v33 = vmul.f32 1.442695, %v2621_v60  ;;  %v9833_v43 = vpop.xlane.xlu1 %3350 }
 0x32d   :  { %v9821_v54 = vpop.eup %7548  ;;  %7560 = vpow2.f32 %v2840_v52  ;;  %v2627_v31 = vmin.f32 %v9809_v40, 0.0  ;;  %v6807_v63 = vadd.f32 -1.0, %v7537_v47  ;;  %v2844_v29 = vmul.f32 1.442695, %v2622_v0  ;;  %12301 = vst [vmem:[#allocation56_spill] sm:$0xff] %v9833_v43 }
 0x32e   :  { %v2846_v14 = vmul.f32 1.442695, %v2623_v10  ;;  %v2850_v57 = vmul.f32 1.442695, %v2625_v38  ;;  %v9831_v34 = vadd.f32 %v9443_v58, %v8832_v24  ;;  %v2628_v21 = vmin.f32 %v9817_v3, 0.0  ;;  %v9852_v43 = vpop.xlane.xlu0 %3324 }
 0x32f   :  { %v9838_v59 = vadd.f32 %v9446_v48, %v8835_v37  ;;  %v3120_v52 = vsel %vm2480_vm15, %v9648_v6, %v6807_v63  ;;  %v6806_v60 = vadd.f32 -1.0, %v9754_v51  ;;  %v2629_v47 = vmin.f32 %v9825_v46, 0.0  ;;  %12302 = vst [vmem:[#allocation57_spill] sm:$0xff] %v9852_v43 }
 0x330   :  { %v9845_v0 = vadd.f32 %v9462_v23, %v8832_v24  ;;  %v3260_v58 = vmul.f32 %v8843_v26, %v3120_v52  ;;  %7562 = vpow2.f32 %v2842_v33  ;;  %v2854_v38 = vmul.f32 1.442695, %v2627_v31  ;;  %v12304_v33 = vld [vmem:[#allocation39_spill] sm:$0xff] }
 0x331   :  { %v3119_v48 = vsel %vm2479_vm0, %v9642_v9, %v6806_v60  ;;  %7564 = vpow2.f32 %v2844_v29  ;;  %v2630_v51 = vmin.f32 %v9831_v34, 0.0  ;;  %v9859_v23 = vadd.f32 %v9465_v56, %v8835_v37  ;;  %v12305_v56 = vld [vmem:[#allocation30_spill] sm:$0xff] }
 0x332   :  { %v9849_v10 = vpop.eup %7550  ;;  %3388 = vadd.xlane.f32.xlu0 %v3260_v58  ;;  %v3259_v63 = vmul.f32 %v8846_v39, %v3119_v48  ;;  %7566 = vpow2.f32 %v2846_v14  ;;  %v9864_v31 = vadd.f32 %v12304_v33, %v8832_v24  ;;  %v2856_v9 = vmul.f32 1.442695, %v2628_v21  ;;  %v12308_v48 = vld [vmem:[#allocation40_spill] sm:$0xff] }
 0x333   :  { %v9854_v6 = vpop.eup %7552  ;;  %12303 = vst [vmem:[#allocation58_spill] sm:$0xff] %v9859_v23  ;;  %v2631_v52 = vmin.f32 %v9838_v59, 0.0  ;;  %7568 = vpow2.f32 %v2850_v57  ;;  %v2858_v29 = vmul.f32 1.442695, %v2629_v47  ;;  %v2632_v43 = vmin.f32 %v9845_v0, 0.0 }
 0x334   :  { %v9867_v60 = vpop.eup %7554  ;;  %v9872_v36 = vadd.f32 %v12305_v56, %v8832_v24  ;;  %3580 = vadd.xlane.f32.xlu1 %v3259_v63  ;;  %v9880_v21 = vadd.f32 %v12308_v48, %v8832_v24  ;;  %7570 = vpow2.f32 %v2854_v38  ;;  %v9884_v57 = vadd.f32 %v9485_v8, %v8835_v37 }
 0x335   :  { %v9876_v14 = vpop.eup %7556  ;;  %v2860_v33 = vmul.f32 1.442695, %v2630_v51  ;;  %v2633_v63 = vmin.f32 %v9859_v23, 0.0  ;;  %v6808_v56 = vadd.f32 -1.0, %v9765_v27  ;;  %v2624_v48 = vmin.f32 %v9864_v31, 0.0 }
 0x336   :  { %12306 = vst [vmem:[#allocation39_spill] sm:$0xff] %v9872_v36  ;;  %12309 = vst [vmem:[#allocation40_spill] sm:$0xff] %v9884_v57  ;;  %v9887_v47 = vpop.eup %7558  ;;  %7572 = vpow2.f32 %v2856_v9  ;;  %v2862_v38 = vmul.f32 1.442695, %v2631_v52  ;;  %v6809_v8 = vadd.f32 -1.0, %v9783_v1  ;;  %v2634_v51 = vmin.f32 %v9872_v36, 0.0 }
 0x337   :  { %7574 = vpow2.f32 %v2858_v29  ;;  %v2864_v25 = vmul.f32 1.442695, %v2632_v43  ;;  %v3121_v27 = vsel %vm2481_vm1, %v9655_v35, %v6808_v56  ;;  %v2635_v42 = vmin.f32 %v9884_v57, 0.0  ;;  %v12313_v56 = vld [vmem:[#allocation22_spill] sm:$0xff] }
 0x338   :  { %v9874_v58 = vpop.xlane.xlu1 %3544  ;;  %v9907_v9 = vadd.f32 %v9496_v16, %v8832_v24  ;;  %v3261_v1 = vmul.f32 %v8846_v39, %v3121_v27  ;;  %v3122_v52 = vsel %vm2482_vm2, %v9671_v17, %v6809_v8  ;;  %v2626_v43 = vmin.f32 %v9880_v21, 0.0 }
 0x339   :  { %12307 = vst [vmem:[#allocation30_spill] sm:$0xff] %v9874_v58  ;;  %v9892_v58 = vpop.eup %7560  ;;  %7576 = vpow2.f32 %v2860_v33  ;;  %v2866_v29 = vmul.f32 1.442695, %v2633_v63  ;;  %v2848_v35 = vmul.f32 1.442695, %v2624_v48  ;;  %v9919_v16 = vadd.f32 %v12313_v56, %v8835_v37 }
 0x33a   :  { %v9896_v28 = vpop.xlane.xlu0 %3518  ;;  %12311 = vst [vmem:[#allocation60_spill] sm:$0xff] %v9907_v9  ;;  %v9915_v23 = vpop.eup %7562  ;;  %7578 = vpow2.f32 %v2862_v38  ;;  %3582 = vadd.xlane.f32.xlu0 %v3261_v1  ;;  %vm2484_vm3 = vcmp.gt.f32.partialorder %v9687_v11, 0.0  ;;  %v12315_v33 = vlaneseq  ;;  %v2868_v8 = vmul.f32 1.442695, %v2634_v51 }
 0x33b   :  { %12310 = vst [vmem:[#allocation59_spill] sm:$0xff] %v9896_v28  ;;  %v3262_v28 = vmul.f32 %v8843_v26, %v3122_v52  ;;  %12314 = vst [vmem:[#allocation22_spill] sm:$0xff] %v9919_v16  ;;  %v9924_v17 = vpop.eup %7564  ;;  %7580 = vpow2.f32 %v2864_v25  ;;  %v6811_v27 = vadd.f32 -1.0, %v9798_v5  ;;  %v2870_v38 = vmul.f32 1.442695, %v2635_v42 }
 0x33c   :  { %v9913_v36 = vpop.xlane.xlu1 %3326  ;;  %v3761_v63 = vand.u32 127, %v12315_v33  ;;  %v9928_v48 = vpop.eup %7566  ;;  %v2636_v52 = vmin.f32 %v9907_v9, 0.0  ;;  %vm2483_vm4 = vcmp.gt.f32.partialorder %v9678_v50, 0.0  ;;  %v6810_v1 = vadd.f32 -1.0, %v9794_v7  ;;  %v12318_v7 = vld [vmem:[#allocation19_spill] sm:$0xff] }
 0x33d   :  { %12312 = vst [vmem:[#allocation61_spill] sm:$0xff] %v9913_v36  ;;  %3390 = vadd.xlane.f32.xlu1 %v3262_v28  ;;  %v7569_v36 = vpop.eup %7568  ;;  %v2852_v57 = vmul.f32 1.442695, %v2626_v43  ;;  %7582 = vpow2.f32 %v2866_v29  ;;  %v3124_v25 = vsel %vm2484_vm3, %v9687_v11, %v6811_v27  ;;  %v2637_v42 = vmin.f32 %v9919_v16, 0.0  ;;  %v12319_v27 = vld [vmem:[#allocation23_spill] sm:$0xff] }
 0x33e   :  { %v7571_v28 = vpop.eup %7570  ;;  %7584 = vpow2.f32 %v2848_v35  ;;  %v3264_v5 = vmul.f32 %v8843_v26, %v3124_v25  ;;  %v3123_v51 = vsel %vm2483_vm4, %v9678_v50, %v6810_v1  ;;  %v9944_v9 = vsub.s32 %v3761_v63, %v12318_v7 }
 0x33f   :  { %v9933_v56 = vpop.xlane.xlu0 %3352  ;;  %7586 = vpow2.f32 %v2868_v8  ;;  %v9947_v43 = vstv %s9899_s7  ;;  %v3263_v29 = vmul.f32 %v8846_v39, %v3123_v51  ;;  %v2872_v35 = vmul.f32 1.442695, %v2636_v52 }
 0x340   :  { %12316 = vst [vmem:[#allocation62_spill] sm:$0xff] %v9933_v56  ;;  %v7573_v11 = vpop.eup %7572  ;;  %7588 = vpow2.f32 %v2870_v38  ;;  %v9952_v56 = vadd.f32 %v12319_v27, %v8832_v24  ;;  %3392 = vadd.xlane.f32.xlu0 %v3264_v5  ;;  %vm2485_vm5 = vcmp.gt.f32.partialorder %v9697_v19, 0.0  ;;  %v6812_v63 = vadd.f32 -1.0, %v9804_v62  ;;  %v12322_v62 = vld [vmem:[#allocation24_spill] sm:$0xff] }
 0x341   :  { %v7575_v50 = vpop.eup %7574  ;;  %7590 = vpow2.f32 %v2852_v57  ;;  %3584 = vadd.xlane.f32.xlu1 %v3263_v29  ;;  %vm2486_vm6 = vcmp.gt.f32.partialorder %v9709_v12, 0.0  ;;  %v6813_v8 = vadd.f32 -1.0, %v9821_v54  ;;  %v9958_v1 = vadd.f32 -1.0, %v7569_v36 }
 0x342   :  { %v9960_v38 = vadd.f32 -1.0, %v7571_v28  ;;  %v2874_v52 = vmul.f32 1.442695, %v2637_v42  ;;  %v9963_v25 = vstv %s9921_s17  ;;  %v9969_v57 = vadd.f32 %v9947_v43, %v9535_v44 }
 0x343   :  { %v9941_v33 = vpop.xlane.xlu1 %3520  ;;  %v7577_v5 = vpop.eup %7576  ;;  %v9973_v29 = vadd.f32 %v12322_v62, %v8835_v37  ;;  %v3125_v54 = vsel %vm2485_vm5, %v9697_v19, %v6812_v63  ;;  %v3126_v36 = vsel %vm2486_vm6, %v9709_v12, %v6813_v8  ;;  %7592 = vpow2.f32 %v2872_v35 }
 0x344   :  { %12317 = vst [vmem:[#allocation63_spill] sm:$0xff] %v9941_v33  ;;  %v9965_v51 = vpop.xlane.xlu0 %3546  ;;  %12321 = vst [vmem:[#allocation64_spill] sm:$0xff] %v9969_v57  ;;  %v7579_v28 = vpop.eup %7578  ;;  %v2638_v42 = vmin.f32 %v9952_v56, 0.0  ;;  %v3265_v27 = vmul.f32 %v8846_v39, %v3125_v54  ;;  %v3266_v7 = vmul.f32 %v8843_v26, %v3126_v36  ;;  %v9982_v33 = vadd.f32 -1.0, %v7573_v11 }
 0x345   :  { %12320 = vst [vmem:[#allocation23_spill] sm:$0xff] %v9965_v51  ;;  %v7581_v44 = vpop.eup %7580  ;;  %v9984_v16 = vadd.f32 -1.0, %v7575_v50  ;;  %v3632_v19 = vadd.f32 %v9963_v25, %v9564_v2  ;;  %vm2488_vm7 = vcmp.gt.f32.partialorder %v9729_v20, 0.0  ;;  %7594 = vpow2.f32 %v2874_v52 }
 0x346   :  { %v3633_v12 = vadd.f32 %v9963_v25, %v9575_v30  ;;  %3586 = vadd.xlane.f32.xlu0 %v3265_v27  ;;  %3394 = vadd.xlane.f32.xlu1 %v3266_v7  ;;  %v6815_v35 = vadd.f32 -1.0, %v9854_v6  ;;  %vm2487_vm8 = vcmp.gt.f32.partialorder %v9724_v53, 0.0  ;;  %v3765_v50 = vrot.slane %v9969_v57, %v9944_v9 }
 0x347   :  { %v9980_v51 = vpop.xlane.xlu1 %3354  ;;  %v7583_v11 = vpop.eup %7582  ;;  %v2639_v2 = vmin.f32 %v9973_v29, 0.0  ;;  %v10000_v8 = vadd.f32 %v9947_v43, %v9592_v32  ;;  %v6814_v30 = vadd.f32 -1.0, %v9849_v10  ;;  %v10005_v7 = vadd.f32 -1.0, %v7577_v5 }
 0x348   :  { %12323 = vst [vmem:[#allocation24_spill] sm:$0xff] %v9980_v51  ;;  %v9993_v63 = vpop.xlane.xlu0 %3328  ;;  %v10003_v52 = vpop.eup %7584  ;;  %v10007_v6 = vadd.f32 -1.0, %v7579_v28  ;;  %v2876_v62 = vmul.f32 1.442695, %v2638_v42  ;;  %v3128_v54 = vsel %vm2488_vm7, %v9729_v20, %v6815_v35  ;;  %v10014_v57 = vadd.f32 -1.0, %v7581_v44 }
 0x349   :  { %12324 = vst [vmem:[#allocation65_spill] sm:$0xff] %v10000_v8  ;;  %v7587_v27 = vpop.eup %7586  ;;  %vm4018_vm9 = vcmask 1041409   ;;  %v3268_v32 = vmul.f32 %v8843_v26, %v3128_v54  ;;  %v3127_v10 = vsel %vm2487_vm8, %v9724_v53, %v6814_v30  ;;  %v10020_v28 = vadd.f32 -1.0, %v7583_v11 }
 0x34a   :  { %v7589_v5 = vpop.eup %7588  ;;  %v5701_v42 = vrot.slane %v3632_v19, %v9944_v9  ;;  %v5705_v51 = vrot.slane %v3633_v12, %v9944_v9  ;;  %v3267_v20 = vmul.f32 %v8846_v39, %v3127_v10  ;;  %v3769_v54 = vrot.slane %v10000_v8, %v9944_v9 }
 0x34b   :  { %v10012_v36 = vpop.xlane.xlu1 %3548  ;;  %v10027_v44 = vpop.eup %7590  ;;  %v10033_v53 = vadd.f32 %v9947_v43, %v9603_v61  ;;  %3396 = vadd.xlane.f32.xlu0 %v3268_v32  ;;  %vm2489_vm10 = vcmp.gt.f32.partialorder %v9733_v22, 0.0  ;;  %7596 = vpow2.f32 %v2876_v62  ;;  %v3634_v19 = vadd.f32 %v9963_v25, %v9625_v45  ;;  %v12329_v61 = vld [vmem:[#allocation44_spill] sm:$0xff] }
 0x34c   :  { %12325 = vst [vmem:[#allocation66_spill] sm:$0xff] %v10012_v36  ;;  %v10025_v35 = vpop.xlane.xlu0 %3522  ;;  %v2878_v36 = vmul.f32 1.442695, %v2639_v2  ;;  %3588 = vadd.xlane.f32.xlu1 %v3267_v20  ;;  %v6816_v12 = vadd.f32 -1.0, %v9867_v60  ;;  %vm2490_vm11 = vcmp.gt.f32.partialorder %v9743_v13, 0.0  ;;  %v10042_v2 = vadd.f32 -1.0, %v7587_v27 }
 0x34d   :  { %12326 = vst [vmem:[#allocation67_spill] sm:$0xff] %v10025_v35  ;;  %12327 = vst [vmem:[#allocation68_spill] sm:$0xff] %v10033_v53  ;;  %v10044_v30 = vadd.f32 -1.0, %v7589_v5  ;;  %v10048_v32 = vadd.f32 %v9947_v43, %v12329_v61  ;;  %v6817_v62 = vadd.f32 -1.0, %v9876_v14  ;;  %v7593_v10 = vpop.eup %7592  ;;  %v5954_v45 = vsel %vm4018_vm9, %v5705_v51, %v5701_v42  ;;  %v12331_v60 = vld [vmem:[#allocation27_spill] sm:$0xff]  ;;  %v12333_v61 = vld [vmem:[#allocation28_spill] sm:$0xff] }
 0x34e   :  { %vm4020_vm12 = vcmask 1042434   ;;  %v10054_v20 = vadd.f32 %v12331_v60, %v8832_v24  ;;  %v3129_v8 = vsel %vm2489_vm10, %v9733_v22, %v6816_v12  ;;  %v3773_v5 = vrot.slane %v10033_v53, %v9944_v9 }
 0x34f   :  { %v10040_v11 = vpop.xlane.xlu1 %3330  ;;  %12330 = vst [vmem:[#allocation44_spill] sm:$0xff] %v10048_v32  ;;  %v3269_v14 = vmul.f32 %v8846_v39, %v3129_v8  ;;  %v3130_v51 = vsel %vm2490_vm11, %v9743_v13, %v6817_v62  ;;  %v7595_v42 = vpop.eup %7594  ;;  %7598 = vpow2.f32 %v2878_v36  ;;  %v4019_v60 = vsel %vm4018_vm9, %v3769_v54, %v3765_v50 }
 0x350   :  { %12328 = vst [vmem:[#allocation69_spill] sm:$0xff] %v10040_v11  ;;  %v10057_v27 = vpop.xlane.xlu0 %3356  ;;  %v10063_v11 = vadd.f32 %v12333_v61, %v8835_v37  ;;  %v5709_v35 = vrot.slane %v3634_v19, %v9944_v9  ;;  %v3270_v22 = vmul.f32 %v8843_v26, %v3130_v51  ;;  %vm4022_vm13 = vcmask 1043459  }
 0x351   :  { %12332 = vst [vmem:[#allocation27_spill] sm:$0xff] %v10057_v27  ;;  %v10072_v27 = vadd.f32 -1.0, %v7593_v10  ;;  %v3777_v61 = vrot.slane %v10048_v32, %v9944_v9  ;;  %3590 = vadd.xlane.f32.xlu0 %v3269_v14  ;;  %v6819_v8 = vadd.f32 -1.0, %v9892_v58  ;;  %vm2497_vm14 = vcmp.gt.f32.partialorder %v9791_v4, 0.0 }
 0x352   :  { %v2640_v13 = vmin.f32 %v10054_v20, 0.0  ;;  %3398 = vadd.xlane.f32.xlu1 %v3270_v22  ;;  %vm2492_vm15 = vcmp.gt.f32.partialorder %v9758_v15, 0.0  ;;  %vm2491_vm0 = vcmp.gt.f32.partialorder %v9752_v18, 0.0  ;;  %v6818_v50 = vadd.f32 -1.0, %v9887_v47 }
 0x353   :  { %v10070_v12 = vpop.xlane.xlu1 %3524  ;;  %v10084_v54 = vadd.f32 -1.0, %v7595_v42  ;;  %v4021_v19 = vsel %vm4020_vm12, %v3773_v5, %v4019_v60  ;;  %v2641_v62 = vmin.f32 %v10063_v11, 0.0  ;;  %v3132_v58 = vsel %vm2492_vm15, %v9758_v15, %v6819_v8  ;;  %v12336_v8 = vld [vmem:[#allocation46_spill] sm:$0xff] }
 0x354   :  { %v10090_v10 = vsel %vm4020_vm12, %v5709_v35, %v5954_v45  ;;  %v3272_v14 = vmul.f32 %v8843_v26, %v3132_v58  ;;  %v3131_v51 = vsel %vm2491_vm0, %v9752_v18, %v6818_v50  ;;  %v6820_v22 = vadd.f32 -1.0, %v9915_v23  ;;  %v12335_v45 = vld [vmem:[#allocation26_spill] sm:$0xff]  ;;  %v12339_v58 = vld [vmem:[#allocation48_spill] sm:$0xff] }
 0x355   :  { %v10098_v42 = vsel %vm4022_vm13, %v3777_v61, %v4021_v19  ;;  %v3271_v5 = vmul.f32 %v8846_v39, %v3131_v51  ;;  %vm2493_vm1 = vcmp.gt.f32.partialorder %v9775_v49, 0.0  ;;  %v6821_v15 = vadd.f32 -1.0, %v9924_v17  ;;  %v7597_v60 = vpop.eup %7596  ;;  %v12338_v17 = vld [vmem:[#allocation25_spill] sm:$0xff] }
 0x356   :  { %vm2500_vm2 = vcmp.gt.f32.partialorder %v9817_v3, 0.0  ;;  %v2880_v35 = vmul.f32 1.442695, %v2640_v13  ;;  %v10106_v18 = vadd.f32 %v12335_v45, %v8832_v24  ;;  %3400 = vadd.xlane.f32.xlu0 %v3272_v14  ;;  %v3133_v23 = vsel %vm2493_vm1, %v9775_v49, %v6820_v22  ;;  %v12340_v49 = vld [vmem:[#allocation29_spill] sm:$0xff] }
 0x357   :  { %vm2494_vm3 = vcmp.gt.f32.partialorder %v9779_v41, 0.0  ;;  %vm2499_vm4 = vcmp.gt.f32.partialorder %v9809_v40, 0.0  ;;  %v2882_v61 = vmul.f32 1.442695, %v2641_v62  ;;  %v10113_v50 = vadd.f32 %v9947_v43, %v12336_v8  ;;  %3592 = vadd.xlane.f32.xlu1 %v3271_v5 }
 0x358   :  { %v10117_v19 = vadd.f32 %v12338_v17, %v8835_v37  ;;  %v3134_v13 = vsel %vm2494_vm3, %v9779_v41, %v6821_v15  ;;  %v10122_v14 = vadd.f32 %v9963_v25, %v12339_v58  ;;  %v10126_v51 = vadd.f32 %v12340_v49, %v8832_v24  ;;  %v12342_v58 = vld [vmem:[#allocation31_spill] sm:$0xff] }
 0x359   :  { %12337 = vst [vmem:[#allocation26_spill] sm:$0xff] %v10113_v50  ;;  %v3273_v62 = vmul.f32 %v8846_v39, %v3133_v23  ;;  %vm2496_vm5 = vcmp.gt.f32.partialorder %v9864_v31, 0.0  ;;  %v10132_v45 = vadd.f32 -1.0, %v7597_v60  ;;  %v3274_v5 = vmul.f32 %v8843_v26, %v3134_v13  ;;  %v7599_v17 = vpop.eup %7598 }
 0x35a   :  { %v10095_v47 = vpop.xlane.xlu1 %3358  ;;  %v6823_v41 = vadd.f32 -1.0, %v10003_v52  ;;  %v6822_v15 = vadd.f32 -1.0, %v9928_v48  ;;  %vm2501_vm6 = vcmp.gt.f32.partialorder %v9825_v46, 0.0  ;;  %7600 = vpow2.f32 %v2880_v35  ;;  %v12343_v48 = vld [vmem:[#allocation32_spill] sm:$0xff] }
 0x35b   :  { %v10082_v36 = vpop.xlane.xlu0 %3550  ;;  %v2642_v23 = vmin.f32 %v10106_v18, 0.0  ;;  %v10143_v49 = vadd.f32 %v12342_v58, %v8835_v37  ;;  %3594 = vadd.xlane.f32.xlu0 %v3273_v62  ;;  %vm2495_vm7 = vcmp.gt.f32.partialorder %v9787_v55, 0.0  ;;  %vm2502_vm8 = vcmp.gt.f32.partialorder %v9831_v34, 0.0  ;;  %3402 = vadd.xlane.f32.xlu1 %v3274_v5  ;;  %v12344_v62 = vld [vmem:[#allocation41_spill] sm:$0xff] }
 0x35c   :  { %12334 = vst [vmem:[#allocation28_spill] sm:$0xff] %v10082_v36  ;;  %v2643_v52 = vmin.f32 %v10117_v19, 0.0  ;;  %v10150_v60 = vadd.f32 %v12343_v48, %v8832_v24  ;;  %v3136_v35 = vsel %vm2496_vm5, %v9864_v31, %v6823_v41  ;;  %v3135_v13 = vsel %vm2495_vm7, %v9787_v55, %v6822_v15  ;;  %v12355_v36 = vld [vmem:[#allocation39_spill] sm:$0xff] }
 0x35d   :  { %v2644_v58 = vmin.f32 %v10126_v51, 0.0  ;;  %v10159_v32 = vadd.f32 %v12344_v62, %v8835_v37  ;;  %v3276_v53 = vmul.f32 %v8843_v26, %v3136_v35  ;;  %vm2498_vm10 = vcmp.gt.f32.partialorder %v9880_v21, 0.0 }
 0x35e   :  { %v10137_v8 = vpop.xlane.xlu1 %3552  ;;  %vm4024_vm11 = vcmask 1044484   ;;  %v3275_v48 = vmul.f32 %v8846_v39, %v3135_v13  ;;  %v3137_v55 = vsel %vm2497_vm14, %v9791_v4, %v9958_v1  ;;  %v6825_v31 = vadd.f32 -1.0, %v10027_v44  ;;  %v12347_v1 = vld [vmem:[#allocation33_spill] sm:$0xff] }
 0x35f   :  { %v10130_v22 = vpop.xlane.xlu0 %3332  ;;  %12341 = vst [vmem:[#allocation46_spill] sm:$0xff] %v10137_v8  ;;  %vm2504_vm15 = vcmp.gt.f32.partialorder %v9845_v0, 0.0  ;;  %v10174_v15 = vadd.f32 -1.0, %v7599_v17  ;;  %7602 = vpow2.f32 %v2882_v61  ;;  %v2884_v35 = vmul.f32 1.442695, %v2642_v23  ;;  %3404 = vadd.xlane.f32.xlu0 %v3276_v53  ;;  %v12348_v53 = vld [vmem:[#allocation42_spill] sm:$0xff] }
 0x360   :  { %v2645_v62 = vmin.f32 %v10143_v49, 0.0  ;;  %vm2503_vm0 = vcmp.gt.f32.partialorder %v9838_v59, 0.0  ;;  %v2886_v13 = vmul.f32 1.442695, %v2643_v52  ;;  %v2646_v4 = vmin.f32 %v10150_v60, 0.0  ;;  %3596 = vadd.xlane.f32.xlu1 %v3275_v48 }
 0x361   :  { %v10183_v44 = vadd.f32 %v12347_v1, %v8832_v24  ;;  %v3138_v61 = vsel %vm2498_vm10, %v9880_v21, %v6825_v31  ;;  %v2888_v17 = vmul.f32 1.442695, %v2644_v58  ;;  %v2647_v23 = vmin.f32 %v10159_v32, 0.0  ;;  %v12350_v1 = vld [vmem:[#allocation43_spill] sm:$0xff]  ;;  %v12352_v31 = vld [vmem:[#allocation58_spill] sm:$0xff] }
 0x362   :  { %v10177_v5 = vpop.xlane.xlu1 %3334  ;;  %v3277_v52 = vmul.f32 %v8846_v39, %v3137_v55  ;;  %v10198_v8 = vadd.f32 %v12350_v1, %v8832_v24  ;;  %v3278_v48 = vmul.f32 %v8843_v26, %v3138_v61  ;;  %v3140_v21 = vsel %vm2500_vm2, %v9817_v3, %v9982_v33  ;;  %v12353_v55 = vld [vmem:[#allocation37_spill] sm:$0xff] }
 0x363   :  { %v10171_v41 = vpop.xlane.xlu0 %3526  ;;  %12346 = vst [vmem:[#allocation48_spill] sm:$0xff] %v10177_v5  ;;  %v10191_v5 = vadd.f32 %v12348_v53, %v8835_v37  ;;  %vm2505_vm14 = vcmp.gt.f32.partialorder %v12352_v31, 0.0  ;;  %7604 = vpow2.f32 %v2884_v35  ;;  %v3636_v53 = vadd.f32 %v9963_v25, %v12353_v55  ;;  %v12356_v35 = vld [vmem:[#allocation45_spill] sm:$0xff] }
 0x364   :  { %12345 = vst [vmem:[#allocation25_spill] sm:$0xff] %v10171_v41  ;;  %v5713_v41 = vrot.slane %v10122_v14, %v9944_v9  ;;  %v2890_v14 = vmul.f32 1.442695, %v2645_v62  ;;  %3598 = vadd.xlane.f32.xlu0 %v3277_v52  ;;  %v3139_v61 = vsel %vm2499_vm4, %v9809_v40, %v9960_v38  ;;  %vm2506_vm1 = vcmp.gt.f32.partialorder %v12355_v36, 0.0  ;;  %3406 = vadd.xlane.f32.xlu1 %v3278_v48  ;;  %v10222_v62 = vpop.eup %7600 }
 0x365   :  { %12349 = vst [vmem:[#allocation29_spill] sm:$0xff] %v10191_v5  ;;  %7606 = vpow2.f32 %v2886_v13  ;;  %v2892_v3 = vmul.f32 1.442695, %v2646_v4  ;;  %v2648_v33 = vmin.f32 %v10183_v44, 0.0  ;;  %v2894_v52 = vmul.f32 1.442695, %v2647_v23 }
 0x366   :  { %v10214_v1 = vpop.xlane.xlu1 %3528  ;;  %7608 = vpow2.f32 %v2888_v17  ;;  %v2649_v55 = vmin.f32 %v10191_v5, 0.0  ;;  %v3280_v40 = vmul.f32 %v8843_v26, %v3140_v21  ;;  %v2650_v38 = vmin.f32 %v10198_v8, 0.0  ;;  %v12358_v13 = vld [vmem:[#allocation34_spill] sm:$0xff]  ;;  %v12360_v23 = vld [vmem:[#allocation47_spill] sm:$0xff]  ;;  %v12362_v5 = vld [vmem:[#allocation40_spill] sm:$0xff] }
 0x367   :  { %v10205_v58 = vpop.xlane.xlu0 %3360  ;;  %12354 = vst [vmem:[#allocation32_spill] sm:$0xff] %v10214_v1  ;;  %v10229_v4 = vadd.f32 %v12358_v13, %v8832_v24  ;;  %v3279_v1 = vmul.f32 %v8846_v39, %v3139_v61  ;;  %v3141_v48 = vsel %vm2501_vm6, %v9825_v46, %v9984_v16  ;;  %v5717_v17 = vrot.slane %v3636_v53, %v9944_v9  ;;  %v12363_v46 = vld [vmem:[#allocation49_spill] sm:$0xff] }
 0x368   :  { %12351 = vst [vmem:[#allocation31_spill] sm:$0xff] %v10205_v58  ;;  %v10220_v58 = vadd.f32 %v12356_v35, %v8835_v37  ;;  %7610 = vpow2.f32 %v2890_v14  ;;  %v10241_v21 = vadd.f32 %v12360_v23, %v8835_v37  ;;  %3408 = vadd.xlane.f32.xlu0 %v3280_v40  ;;  %v3142_v61 = vsel %vm2502_vm8, %v9831_v34, %v10005_v7  ;;  %v12365_v40 = vld [vmem:[#allocation60_spill] sm:$0xff] }
 0x369   :  { %vm2507_vm2 = vcmp.gt.f32.partialorder %v12362_v5, 0.0  ;;  %v10252_v16 = vadd.f32 %v9947_v43, %v12363_v46  ;;  %7612 = vpow2.f32 %v2892_v3  ;;  %v2896_v53 = vmul.f32 1.442695, %v2648_v33  ;;  %3600 = vadd.xlane.f32.xlu1 %v3279_v1  ;;  %v7603_v23 = vpop.eup %7602 }
 0x36a   :  { %12357 = vst [vmem:[#allocation41_spill] sm:$0xff] %v10220_v58  ;;  %v10247_v13 = vpop.xlane.xlu1 %3362  ;;  %v2651_v14 = vmin.f32 %v10220_v58, 0.0  ;;  %vm2508_vm3 = vcmp.gt.f32.partialorder %v12365_v40, 0.0  ;;  %v12366_v34 = vrot.slane %v10113_v50, %v9944_v9  ;;  %7614 = vpow2.f32 %v2894_v52 }
 0x36b   :  { %v10236_v35 = vpop.xlane.xlu0 %3554  ;;  %12361 = vst [vmem:[#allocation42_spill] sm:$0xff] %v10247_v13  ;;  %12364 = vst [vmem:[#allocation43_spill] sm:$0xff] %v10252_v16  ;;  %v3281_v46 = vmul.f32 %v8846_v39, %v3141_v48  ;;  %v2900_v13 = vmul.f32 1.442695, %v2650_v38  ;;  %v2652_v3 = vmin.f32 %v10229_v4, 0.0  ;;  %v3282_v33 = vmul.f32 %v8843_v26, %v3142_v61 }
 0x36c   :  { %12359 = vst [vmem:[#allocation33_spill] sm:$0xff] %v10236_v35  ;;  %v10261_v7 = vsel %vm4024_vm11, %v12366_v34, %v10098_v42  ;;  %v2898_v35 = vmul.f32 1.442695, %v2649_v55  ;;  %v3144_v1 = vsel %vm2504_vm15, %v9845_v0, %v10014_v57  ;;  %v5956_v42 = vsel %vm4022_vm13, %v5713_v41, %v10090_v10  ;;  %v12367_v55 = vld [vmem:[#allocation35_spill] sm:$0xff]  ;;  %v12370_v34 = vld [vmem:[#allocation50_spill] sm:$0xff] }
 0x36d   :  { %v2653_v52 = vmin.f32 %v10241_v21, 0.0  ;;  %v10277_v48 = vadd.f32 %v12367_v55, %v8832_v24  ;;  %3602 = vadd.xlane.f32.xlu0 %v3281_v46  ;;  %v3143_v38 = vsel %vm2503_vm0, %v9838_v59, %v10007_v6  ;;  %v10286_v0 = vsel %vm4024_vm11, %v5717_v17, %v5956_v42  ;;  %3410 = vadd.xlane.f32.xlu1 %v3282_v33  ;;  %v7605_v41 = vpop.eup %7604  ;;  %v12369_v24 = vld [vmem:[#allocation22_spill] sm:$0xff] }
 0x36e   :  { %v10283_v61 = vpop.xlane.xlu1 %3556  ;;  %7616 = vpow2.f32 %v2896_v53  ;;  %v2902_v10 = vmul.f32 1.442695, %v2651_v14  ;;  %vm2509_vm4 = vcmp.gt.f32.partialorder %v12369_v24, 0.0  ;;  %v10293_v46 = vadd.f32 %v9947_v43, %v12370_v34  ;;  %v12371_v55 = vld [vmem:[#allocation38_spill] sm:$0xff] }
 0x36f   :  { %v10270_v58 = vpop.xlane.xlu0 %3336  ;;  %12368 = vst [vmem:[#allocation58_spill] sm:$0xff] %v10283_v61  ;;  %v10297_v59 = vadd.f32 %v9963_v25, %v12371_v55  ;;  %7618 = vpow2.f32 %v2898_v35  ;;  %v3284_v6 = vmul.f32 %v8843_v26, %v3144_v1  ;;  %v7607_v17 = vpop.eup %7606  ;;  %vm2510_vm5 = vcmp.gt.f32.partialorder %v9952_v56, 0.0  ;;  %v12373_v55 = vld [vmem:[#allocation36_spill] sm:$0xff] }
 0x370   :  { %7620 = vpow2.f32 %v2900_v13  ;;  %v2904_v53 = vmul.f32 1.442695, %v2652_v3  ;;  %v3283_v14 = vmul.f32 %v8846_v39, %v3143_v38  ;;  %v3145_v33 = vsel %vm2505_vm14, %v12352_v31, %v10020_v28  ;;  %v7609_v34 = vpop.eup %7608 }
 0x371   :  { %vm2512_vm6 = vcmp.gt.f32.partialorder %v10054_v20, 0.0  ;;  %v2906_v35 = vmul.f32 1.442695, %v2653_v52  ;;  %v2654_v1 = vmin.f32 %v10277_v48, 0.0  ;;  %v10312_v57 = vadd.f32 %v12373_v55, %v8835_v37  ;;  %3412 = vadd.xlane.f32.xlu0 %v3284_v6  ;;  %v12374_v52 = vld [vmem:[#allocation51_spill] sm:$0xff] }
 0x372   :  { %v3146_v13 = vsel %vm2506_vm1, %v12355_v36, %v10042_v2  ;;  %v10318_v3 = vpop.xlane.xlu1 %3338  ;;  %v10321_v28 = vadd.f32 -1.0, %v10222_v62  ;;  %v10323_v31 = vadd.f32 -1.0, %v7603_v23  ;;  %v10327_v38 = vadd.f32 %v9963_v25, %v12374_v52  ;;  %3604 = vadd.xlane.f32.xlu1 %v3283_v14  ;;  %v7611_v37 = vpop.eup %7610  ;;  %v12375_v36 = vld [vmem:[#allocation52_spill] sm:$0xff] }
 0x373   :  { %v10306_v42 = vpop.xlane.xlu0 %3530  ;;  %7622 = vpow2.f32 %v2902_v10  ;;  %v10335_v55 = vadd.f32 %v9947_v43, %v12375_v36  ;;  %v3285_v62 = vmul.f32 %v8846_v39, %v3145_v33  ;;  %v7613_v23 = vpop.eup %7612  ;;  %vm2511_vm7 = vcmp.gt.f32.partialorder %v9973_v29, 0.0 }
 0x374   :  { %12372 = vst [vmem:[#allocation37_spill] sm:$0xff] %v10306_v42  ;;  %v10339_v52 = vadd.f32 -1.0, %v7605_v41  ;;  %7624 = vpow2.f32 %v2904_v53  ;;  %v3286_v10 = vmul.f32 %v8843_v26, %v3146_v13  ;;  %v3148_v14 = vsel %vm2508_vm3, %v12365_v40, %v10072_v27  ;;  %v7615_v6 = vpop.eup %7614 }
 0x375   :  { %12376 = vst [vmem:[#allocation39_spill] sm:$0xff] %v10335_v55  ;;  %vm2513_vm8 = vcmp.gt.f32.partialorder %v10063_v11, 0.0  ;;  %7626 = vpow2.f32 %v2906_v35  ;;  %v2908_v33 = vmul.f32 1.442695, %v2654_v1  ;;  %v2655_v36 = vmin.f32 %v10312_v57, 0.0  ;;  %3606 = vadd.xlane.f32.xlu0 %v3285_v62  ;;  %v12379_v1 = vld [vmem:[#allocation53_spill] sm:$0xff] }
 0x376   :  { %v3147_v41 = vsel %vm2507_vm2, %v12362_v5, %v10044_v30  ;;  %v10354_v53 = vpop.xlane.xlu1 %3532  ;;  %vm2514_vm10 = vcmp.gt.f32.partialorder %v10106_v18, 0.0  ;;  %v10357_v27 = vadd.f32 -1.0, %v7607_v17  ;;  %v10359_v40 = vadd.f32 -1.0, %v7609_v34  ;;  %3414 = vadd.xlane.f32.xlu1 %v3286_v10  ;;  %v12381_v5 = vld [vmem:[#allocation54_spill] sm:$0xff] }
 0x377   :  { %v10346_v2 = vpop.xlane.xlu0 %3364  ;;  %12378 = vst [vmem:[#allocation34_spill] sm:$0xff] %v10354_v53  ;;  %v10365_v13 = vadd.f32 %v9947_v43, %v12379_v1  ;;  %v10367_v62 = vadd.f32 -1.0, %v7611_v37  ;;  %v10373_v50 = vadd.f32 %v9963_v25, %v12381_v5  ;;  %v3288_v17 = vmul.f32 %v8843_v26, %v3148_v14  ;;  %v12383_v53 = vld [vmem:[#allocation55_spill] sm:$0xff] }
 0x378   :  { %12377 = vst [vmem:[#allocation45_spill] sm:$0xff] %v10346_v2  ;;  %v7617_v34 = vpop.eup %7616  ;;  %v10376_v2 = vadd.f32 -1.0, %v7613_v23  ;;  %v10378_v35 = vadd.f32 -1.0, %v7615_v6  ;;  %v3287_v1 = vmul.f32 %v8846_v39, %v3147_v41  ;;  %v3149_v37 = vsel %vm2509_vm4, %v12369_v24, %v10084_v54  ;;  %v12385_v24 = vld [vmem:[#allocation56_spill] sm:$0xff] }
 0x379   :  { %12380 = vst [vmem:[#allocation47_spill] sm:$0xff] %v10365_v13  ;;  %v7619_v30 = vpop.eup %7618  ;;  %v10389_v5 = vadd.f32 %v9963_v25, %v12383_v53  ;;  %7628 = vpow2.f32 %v2908_v33  ;;  %v2910_v14 = vmul.f32 1.442695, %v2655_v36  ;;  %3416 = vadd.xlane.f32.xlu0 %v3288_v17  ;;  %v3150_v6 = vsel %vm2510_vm5, %v9952_v56, %v10132_v45  ;;  %v12386_v33 = vld [vmem:[#allocation57_spill] sm:$0xff] }
 0x37a   :  { %v10395_v23 = vpop.xlane.xlu1 %3366  ;;  %v7621_v41 = vpop.eup %7620  ;;  %vm2515_vm15 = vcmp.gt.f32.partialorder %v10117_v19, 0.0  ;;  %v10402_v53 = vadd.f32 %v9947_v43, %v12385_v24  ;;  %v10406_v36 = vadd.f32 %v9947_v43, %v12386_v33  ;;  %v12388_v17 = vld [vmem:[#allocation61_spill] sm:$0xff]  ;;  %3608 = vadd.xlane.f32.xlu1 %v3287_v1  ;;  %v10412_v56 = vadd.f32 -1.0, %v7617_v34  ;;  %v12391_v33 = vld [vmem:[#allocation63_spill] sm:$0xff] }
 0x37b   :  { %v10385_v10 = vpop.xlane.xlu0 %3558  ;;  %12384 = vst [vmem:[#allocation49_spill] sm:$0xff] %v10395_v23  ;;  %v12390_v23 = vld [vmem:[#allocation30_spill] sm:$0xff]  ;;  %v3289_v24 = vmul.f32 %v8846_v39, %v3149_v37  ;;  %v10421_v42 = vadd.f32 -1.0, %v7619_v30  ;;  %v3641_v13 = vadd.f32 %v9963_v25, %v12391_v33  ;;  %v3152_v34 = vsel %vm2512_vm6, %v10054_v20, %v10321_v28  ;;  %v12392_v37 = vld [vmem:[#allocation59_spill] sm:$0xff] }
 0x37c   :  { %12382 = vst [vmem:[#allocation40_spill] sm:$0xff] %v10385_v10  ;;  %12387 = vst [vmem:[#allocation60_spill] sm:$0xff] %v10406_v36  ;;  %v10410_v10 = vadd.f32 %v9947_v43, %v12388_v17  ;;  %v10418_v54 = vadd.f32 %v9963_v25, %v12390_v23  ;;  %v3290_v17 = vmul.f32 %v8843_v26, %v3150_v6  ;;  %7630 = vpow2.f32 %v2910_v14 }
 0x37d   :  { %v7623_v61 = vpop.eup %7622  ;;  %v3640_v30 = vadd.f32 %v9963_v25, %v12392_v37  ;;  %3610 = vadd.xlane.f32.xlu0 %v3289_v24  ;;  %v3151_v6 = vsel %vm2511_vm7, %v9973_v29, %v10174_v15  ;;  %vm2518_vm0 = vcmp.gt.f32.partialorder %v10150_v60, 0.0  ;;  %v10443_v20 = vadd.f32 -1.0, %v7621_v41  ;;  %v12394_v15 = vld [vmem:[#allocation62_spill] sm:$0xff] }
 0x37e   :  { %12389 = vst [vmem:[#allocation35_spill] sm:$0xff] %v10410_v10  ;;  %v10440_v33 = vpop.xlane.xlu1 %3560  ;;  %v7625_v45 = vpop.eup %7624  ;;  %v3797_v14 = vrot.slane %v10406_v36, %v9944_v9  ;;  %v3801_v24 = vrot.slane %v10410_v10, %v9944_v9  ;;  %3418 = vadd.xlane.f32.xlu1 %v3290_v17  ;;  %v10451_v23 = vadd.f32 -1.0, %v7623_v61  ;;  %v10457_v41 = vadd.f32 %v9947_v43, %v12394_v15 }
 0x37f   :  { %v10430_v1 = vpop.xlane.xlu0 %3340  ;;  %12393 = vst [vmem:[#allocation22_spill] sm:$0xff] %v10440_v33  ;;  %v7627_v37 = vpop.eup %7626  ;;  %v3292_v33 = vmul.f32 %v8843_v26, %v3152_v34  ;;  %v5737_v28 = vrot.slane %v3641_v13, %v9944_v9  ;;  %v3291_v36 = vmul.f32 %v8846_v39, %v3151_v6  ;;  %v3153_v17 = vsel %vm2513_vm8, %v10063_v11, %v10323_v31  ;;  %v12396_v6 = vld [vmem:[#allocation23_spill] sm:$0xff] }
 0x380   :  { %12395 = vst [vmem:[#allocation50_spill] sm:$0xff] %v10457_v41  ;;  %vm4026_vm14 = vcmask 1045509   ;;  %vm2516_vm1 = vcmp.gt.f32.partialorder %v10126_v51, 0.0  ;;  %v10469_v29 = vadd.f32 -1.0, %v7625_v45  ;;  %v5733_v15 = vrot.slane %v3640_v30, %v9944_v9 }
 0x381   :  { %3420 = vadd.xlane.f32.xlu0 %v3292_v33  ;;  %v3154_v13 = vsel %vm2514_vm10, %v10106_v18, %v10339_v52  ;;  %vm4028_vm2 = vcmask 1046534   ;;  %vm2519_vm3 = vcmp.gt.f32.partialorder %v10159_v32, 0.0  ;;  %v10479_v11 = vadd.f32 -1.0, %v7627_v37 }
 0x382   :  { %v4032_v31 = vsel %vm4018_vm9, %v3801_v24, %v3797_v14  ;;  %v10484_v45 = vadd.f32 %v9963_v25, %v12396_v6  ;;  %3612 = vadd.xlane.f32.xlu1 %v3291_v36  ;;  %vm4030_vm4 = vcmask 1047559   ;;  %v10490_v18 = vadd.f32 %v9947_v43, %v9993_v63  ;;  %v12399_v36 = vld [vmem:[#allocation24_spill] sm:$0xff] }
 0x383   :  { %v7629_v30 = vpop.eup %7628  ;;  %v3293_v52 = vmul.f32 %v8846_v39, %v3153_v17  ;;  %v12398_v14 = vrot.slane %v10252_v16, %v9944_v9  ;;  %v5961_v37 = vsel %vm4018_vm9, %v5737_v28, %v5733_v15  ;;  %v10501_v6 = vadd.f32 %v9947_v43, %v12399_v36  ;;  %v12401_v16 = vld [vmem:[#allocation67_spill] sm:$0xff] }
 0x384   :  { %12397 = vst [vmem:[#allocation38_spill] sm:$0xff] %v10490_v18  ;;  %v3294_v33 = vmul.f32 %v8843_v26, %v3154_v13  ;;  %v12400_v63 = vrot.slane %v10293_v46, %v9944_v9  ;;  %vm2517_vm5 = vcmp.gt.f32.partialorder %v10143_v49, 0.0  ;;  %v12402_v28 = vrot.slane %v10335_v55, %v9944_v9 }
 0x385   :  { %v4027_v24 = vsel %vm4026_vm14, %v12398_v14, %v10261_v7  ;;  %v3642_v7 = vadd.f32 %v9963_v25, %v12401_v16  ;;  %3614 = vadd.xlane.f32.xlu0 %v3293_v52  ;;  %vm4089_vm6 = vcmask 64512   ;;  %v3155_v13 = vsel %vm2515_vm15, %v10117_v19, %v10357_v27  ;;  %v12403_v16 = vld [vmem:[#allocation66_spill] sm:$0xff] }
 0x386   :  { %v10476_v34 = vpop.xlane.xlu1 %3342  ;;  %v4029_v10 = vsel %vm4028_vm2, %v12400_v63, %v4027_v24  ;;  %v10523_v24 = vadd.f32 -1.0, %v7629_v30  ;;  %v10529_v52 = vadd.f32 %v9963_v25, %v12403_v16  ;;  %v12404_v63 = vld [vmem:[#allocation69_spill] sm:$0xff]  ;;  %3422 = vadd.xlane.f32.xlu1 %v3294_v33  ;;  %v3805_v19 = vrot.slane %v10490_v18, %v9944_v9 }
 0x387   :  { %v10466_v61 = vpop.xlane.xlu0 %3534  ;;  %v4031_v15 = vsel %vm4030_vm4, %v12402_v28, %v4029_v10  ;;  %v10533_v10 = vadd.f32 %v9947_v43, %v12404_v63  ;;  %v7631_v28 = vpop.eup %7630  ;;  %v3643_v27 = vadd.f32 %v9963_v25, %v10070_v12  ;;  %v10541_v30 = vadd.f32 %v9947_v43, %v10095_v47 }
 0x388   :  { %v12405_v16 = vrot.slane %v10297_v59, %v9944_v9  ;;  %vm2522_vm7 = vcmp.gt.f32.partialorder %v10198_v8, 0.0  ;;  %v10551_v33 = vadd.f32 %v9947_v43, %v10130_v22  ;;  %v4090_v63 = vsel %vm4089_vm6, %v4031_v15, -inf  ;;  %v12408_v59 = vld [vmem:[#allocation27_spill] sm:$0xff] }
 0x389   :  { %v3295_v12 = vmul.f32 %v8846_v39, %v3155_v13  ;;  %v12407_v47 = vrot.slane %v10327_v38, %v9944_v9  ;;  %vm2520_vm8 = vcmp.gt.f32.partialorder %v10183_v44, 0.0  ;;  %4091 = vmax.xlane.f32.xlu0 %v4090_v63  ;;  %v12409_v22 = vrot.slane %v10373_v50, %v9944_v9 }
 0x38a   :  { %v10521_v14 = vpop.xlane.xlu1 %3536  ;;  %v5958_v36 = vsel %vm4026_vm14, %v12405_v16, %v10286_v0  ;;  %12406 = vst [vmem:[#allocation36_spill] sm:$0xff] %v10551_v33  ;;  %v5741_v0 = vrot.slane %v3642_v7, %v9944_v9  ;;  %v10565_v16 = vadd.f32 %v9947_v43, %v12408_v59  ;;  %v3158_v38 = vsel %vm2518_vm0, %v10150_v60, %v10376_v2  ;;  %v12411_v59 = vld [vmem:[#allocation41_spill] sm:$0xff] }
 0x38b   :  { %v10508_v17 = vpop.xlane.xlu0 %3368  ;;  %v5959_v18 = vsel %vm4028_vm2, %v12407_v47, %v5958_v36  ;;  %v10577_v36 = vadd.f32 -1.0, %v7631_v28  ;;  %v3809_v63 = vrot.slane %v10533_v10, %v9944_v9  ;;  %v12410_v47 = vld [vmem:[#allocation28_spill] sm:$0xff]  ;;  %3616 = vadd.xlane.f32.xlu1 %v3295_v12  ;;  %v5745_v2 = vrot.slane %v3643_v27, %v9944_v9  ;;  %v12412_v12 = vld [vmem:[#allocation29_spill] sm:$0xff] }
 0x38c   :  { %v5960_v15 = vsel %vm4030_vm4, %v12409_v22, %v5959_v18  ;;  %v10585_v50 = vadd.f32 %v9963_v25, %v12410_v47  ;;  %v4033_v18 = vsel %vm4020_vm12, %v3805_v19, %v4032_v31  ;;  %v3865_v28 = vrot.slane %v10541_v30, %v9944_v9 }
 0x38d   :  { %vm2523_vm10 = vcmp.gt.f32.partialorder %v12411_v59, 0.0  ;;  %v3813_v22 = vrot.slane %v10551_v33, %v9944_v9  ;;  %v6018_v7 = vsel %vm4089_vm6, %v5960_v15, 0.0  ;;  %v3298_v47 = vmul.f32 %v8843_v26, %v3158_v38 }
 0x38e   :  { %v3156_v31 = vsel %vm2516_vm1, %v10126_v51, %v10359_v40  ;;  %vm2521_vm15 = vcmp.gt.f32.partialorder %v12412_v12, 0.0  ;;  %v5962_v27 = vsel %vm4020_vm12, %v5741_v0, %v5961_v37  ;;  %v3861_v60 = vrot.slane %v10565_v16, %v9944_v9  ;;  %6019 = vadd.xlane.f32.xlu0 %v6018_v7  ;;  %v12413_v37 = vld [vmem:[#allocation46_spill] sm:$0xff] }
 0x38f   :  { %v10559_v55 = vpop.xlane.xlu0 %3562  ;;  %v10575_v13 = vpop.xlane.xlu1 %3370  ;;  %v3159_v15 = vsel %vm2519_vm3, %v10159_v32, %v10378_v35  ;;  %v10612_v38 = vadd.f32 %v9947_v43, %v10476_v34  ;;  %v4034_v51 = vsel %vm4022_vm13, %v3809_v63, %v4033_v18  ;;  %v10621_v0 = vadd.f32 %v9963_v25, %v12413_v37  ;;  %3426 = vadd.xlane.f32.xlu1 %v3298_v47  ;;  %v12416_v47 = vld [vmem:[#allocation25_spill] sm:$0xff] }
 0x390   :  { %v5963_v32 = vsel %vm4022_vm13, %v5745_v2, %v5962_v27  ;;  %v10628_v35 = vsel %vm4018_vm9, %v3865_v28, %v3861_v60  ;;  %v3296_v34 = vmul.f32 %v8843_v26, %v3156_v31  ;;  %v10633_v63 = vadd.f32 %v9947_v43, %v10430_v1  ;;  %v12417_v28 = vld [vmem:[#allocation31_spill] sm:$0xff] }
 0x391   :  { %vm2526_vm0 = vcmp.gt.f32.partialorder %v10277_v48, 0.0  ;;  %v10637_v18 = vsel %vm4024_vm11, %v3813_v22, %v4034_v51  ;;  %v3299_v37 = vmul.f32 %v8846_v39, %v3159_v15  ;;  %v3157_v60 = vsel %vm2517_vm5, %v10143_v49, %v10367_v62 }
 0x392   :  { %12415 = vst [vmem:[#allocation52_spill] sm:$0xff] %v10633_v63  ;;  %v10648_v1 = vadd.f32 %v9947_v43, %v12417_v28  ;;  %3424 = vadd.xlane.f32.xlu0 %v3296_v34  ;;  %v3162_v22 = vsel %vm2522_vm7, %v10198_v8, %v10443_v20  ;;  %v3833_v31 = vrot.slane %v10612_v38, %v9944_v9  ;;  %vm2524_vm1 = vcmp.gt.f32.partialorder %v10229_v4, 0.0  ;;  %v12419_v8 = vld [vmem:[#allocation48_spill] sm:$0xff] }
 0x393   :  { %v3345_v19 = vpop.xlane.xlu0 %3344  ;;  %v10614_v33 = vpop.xlane.xlu1 %3564  ;;  %v3649_v27 = vadd.f32 %v9963_v25, %v10521_v14  ;;  %3620 = vadd.xlane.f32.xlu1 %v3299_v37  ;;  %v10669_v20 = vadd.f32 %v9947_v43, %v12419_v8  ;;  %v3297_v14 = vmul.f32 %v8846_v39, %v3157_v60  ;;  %v3648_v37 = vadd.f32 %v9963_v25, %v10466_v61 }
 0x394   :  { %v10624_v7 = vadd.f32 %v9947_v43, %v3345_v19  ;;  %v3644_v19 = vadd.f32 %v9963_v25, %v12416_v47  ;;  %12418 = vst [vmem:[#allocation53_spill] sm:$0xff] %v10648_v1  ;;  %v3829_v47 = vrot.slane %v10633_v63, %v9944_v9  ;;  %vm2527_vm3 = vcmp.gt.f32.partialorder %v10312_v57, 0.0 }
 0x395   :  { %v3302_v28 = vmul.f32 %v8843_v26, %v3162_v22  ;;  %v3869_v49 = vrot.slane %v10648_v1, %v9944_v9  ;;  %v3163_v61 = vsel %vm2523_vm10, %v12411_v59, %v10451_v23  ;;  %v5769_v22 = vrot.slane %v3649_v27, %v9944_v9  ;;  %v12421_v1 = vld [vmem:[#allocation42_spill] sm:$0xff] }
 0x396   :  { %12414 = vst [vmem:[#allocation51_spill] sm:$0xff] %v10624_v7  ;;  %v3837_v62 = vrot.slane %v10624_v7, %v9944_v9  ;;  %3618 = vadd.xlane.f32.xlu0 %v3297_v14  ;;  %vm2525_vm5 = vcmp.gt.f32.partialorder %v10241_v21, 0.0  ;;  %v10705_v23 = vadd.f32 %v9947_v43, %v12421_v1 }
 0x397   :  { %v3539_v2 = vpop.xlane.xlu0 %3538  ;;  %v3347_v15 = vpop.xlane.xlu1 %3346  ;;  %3430 = vadd.xlane.f32.xlu1 %v3302_v28 }
 0x398   :  { %v3650_v51 = vadd.f32 %v9963_v25, %v3539_v2  ;;  %v10664_v34 = vadd.f32 %v9947_v43, %v3347_v15  ;;  %v5749_v2 = vrot.slane %v3644_v19, %v9944_v9  ;;  %v3160_v15 = vsel %vm2520_vm8, %v10183_v44, %v10412_v56  ;;  %v12420_v44 = vld [vmem:[#allocation32_spill] sm:$0xff] }
 0x399   :  { %v4039_v19 = vsel %vm4018_vm9, %v3833_v31, %v3829_v47  ;;  %v10697_v56 = vadd.f32 %v9963_v25, %v12420_v44  ;;  %v3300_v59 = vmul.f32 %v8843_v26, %v3160_v15  ;;  %v5765_v31 = vrot.slane %v3648_v37, %v9944_v9  ;;  %v12422_v47 = vld [vmem:[#allocation33_spill] sm:$0xff] }
 0x39a   :  { %v3841_v60 = vrot.slane %v10664_v34, %v9944_v9  ;;  %v4040_v7 = vsel %vm4020_vm12, %v3837_v62, %v4039_v19  ;;  %v5773_v63 = vrot.slane %v3650_v51, %v9944_v9  ;;  %v10712_v28 = vadd.f32 %v9963_v25, %v12422_v47  ;;  %v12423_v19 = vld [vmem:[#allocation47_spill] sm:$0xff] }
 0x39b   :  { %v10685_v8 = vpop.xlane.xlu0 %3372  ;;  %v3541_v40 = vpop.xlane.xlu1 %3540  ;;  %v3303_v62 = vmul.f32 %v8846_v39, %v3163_v61  ;;  %v3817_v37 = vrot.slane %v10669_v20, %v9944_v9  ;;  %3428 = vadd.xlane.f32.xlu0 %v3300_v59  ;;  %v3166_v15 = vsel %vm2526_vm0, %v10277_v48, %v10523_v24  ;;  %v10738_v61 = vadd.f32 %v9947_v43, %v10318_v3  ;;  %v12425_v59 = vld [vmem:[#allocation37_spill] sm:$0xff] }
 0x39c   :  { %v3651_v14 = vadd.f32 %v9963_v25, %v3541_v40  ;;  %v4041_v27 = vsel %vm4022_vm13, %v3841_v60, %v4040_v7  ;;  %v3161_v40 = vsel %vm2521_vm15, %v12412_v12, %v10421_v42  ;;  %v10726_v7 = vadd.f32 %v9947_v43, %v10270_v58 }
 0x39d   :  { %v5968_v60 = vsel %vm4018_vm9, %v5769_v22, %v5765_v31  ;;  %v5964_v12 = vsel %vm4024_vm11, %v5749_v2, %v5963_v32  ;;  %3624 = vadd.xlane.f32.xlu1 %v3303_v62  ;;  %v12424_v44 = vrot.slane %v12423_v19, %v9944_v9  ;;  %v4047_v48 = vsel %vm4020_vm12, %v3869_v49, %v10628_v35 }
 0x39e   :  { %v5777_v1 = vrot.slane %v3651_v14, %v9944_v9  ;;  %v5969_v58 = vsel %vm4020_vm12, %v5773_v63, %v5968_v60  ;;  %v3873_v24 = vrot.slane %v10705_v23, %v9944_v9  ;;  %v3301_v32 = vmul.f32 %v8846_v39, %v3161_v40  ;;  %v12428_v40 = vld [vmem:[#allocation34_spill] sm:$0xff] }
 0x39f   :  { %v10720_v51 = vpop.xlane.xlu0 %3566  ;;  %v10733_v42 = vpop.xlane.xlu1 %3374  ;;  %v4042_v14 = vsel %vm4024_vm11, %v12424_v44, %v4041_v27  ;;  %v5753_v3 = vrot.slane %v10697_v56, %v9944_v9  ;;  %v5805_v63 = vrot.slane %v10712_v28, %v9944_v9  ;;  %v3306_v22 = vmul.f32 %v8843_v26, %v3166_v15 }
 0x3a0   :  { %v5970_v2 = vsel %vm4022_vm13, %v5777_v1, %v5969_v58  ;;  %v3164_v35 = vsel %vm2524_vm1, %v10229_v4, %v10469_v29  ;;  %v3821_v49 = vrot.slane %v10726_v7, %v9944_v9  ;;  %v3646_v31 = vadd.f32 %v9963_v25, %v12425_v59  ;;  %3622 = vadd.xlane.f32.xlu0 %v3301_v32  ;;  %v12427_v4 = vld [vmem:[#allocation58_spill] sm:$0xff]  ;;  %v12430_v58 = vld [vmem:[#allocation45_spill] sm:$0xff] }
 0x3a1   :  { %v3167_v56 = vsel %vm2527_vm3, %v10312_v57, %v10577_v36  ;;  %v12426_v47 = vrot.slane %v10402_v53, %v9944_v9  ;;  %v3659_v29 = vadd.f32 %v9963_v25, %v12427_v4  ;;  %v3825_v62 = vrot.slane %v10738_v61, %v9944_v9  ;;  %3434 = vadd.xlane.f32.xlu1 %v3306_v22 }
 0x3a2   :  { %v3647_v1 = vadd.f32 %v9963_v25, %v12428_v40  ;;  %v12429_v57 = vrot.slane %v10389_v5, %v9944_v9  ;;  %v4048_v60 = vsel %vm4022_vm13, %v3873_v24, %v4047_v48  ;;  %v10789_v44 = vadd.f32 %v9947_v43, %v12430_v58 }
 0x3a3   :  { %v10768_v27 = vpop.xlane.xlu0 %3376  ;;  %v4043_v28 = vsel %vm4026_vm14, %v12426_v47, %v4042_v14  ;;  %v10780_v15 = vpop.xlane.xlu1 %3568  ;;  %v12431_v14 = vld [vmem:[#allocation49_spill] sm:$0xff]  ;;  %v3304_v59 = vmul.f32 %v8843_v26, %v3164_v35  ;;  %v3307_v22 = vmul.f32 %v8846_v39, %v3167_v56  ;;  %v3165_v5 = vsel %vm2525_vm5, %v10241_v21, %v10479_v11 }
 0x3a4   :  { %v5971_v36 = vsel %vm4024_vm11, %v12429_v57, %v5970_v2  ;;  %v10793_v32 = vadd.f32 %v9947_v43, %v12431_v14  ;;  %v4036_v48 = vsel %vm4026_vm14, %v3817_v37, %v10637_v18  ;;  %v12432_v24 = vrot.slane %v10457_v41, %v9944_v9 }
 0x3a5   :  { %v5757_v47 = vrot.slane %v3646_v31, %v9944_v9  ;;  %v10810_v26 = vadd.f32 %v9947_v43, %v10508_v17  ;;  %3432 = vadd.xlane.f32.xlu0 %v3304_v59  ;;  %v4037_v35 = vsel %vm4028_vm2, %v3821_v49, %v4036_v48  ;;  %v12433_v21 = vrot.slane %v10418_v54, %v9944_v9  ;;  %v12434_v49 = vld [vmem:[#allocation40_spill] sm:$0xff] }
 0x3a6   :  { %v4044_v2 = vsel %vm4028_vm2, %v12432_v24, %v4043_v28  ;;  %v5809_v18 = vrot.slane %v3659_v29, %v9944_v9  ;;  %v5761_v37 = vrot.slane %v3647_v1, %v9944_v9  ;;  %3628 = vadd.xlane.f32.xlu1 %v3307_v22  ;;  %v10821_v31 = vadd.f32 %v9947_v43, %v10575_v13  ;;  %v12436_v1 = vld [vmem:[#allocation22_spill] sm:$0xff] }
 0x3a7   :  { %v5972_v11 = vsel %vm4026_vm14, %v12433_v21, %v5971_v36  ;;  %v4038_v17 = vsel %vm4030_vm4, %v3825_v62, %v4037_v35  ;;  %v3877_v56 = vrot.slane %v10789_v44, %v9944_v9  ;;  %v3660_v28 = vadd.f32 %v9963_v25, %v12434_v49  ;;  %v10833_v40 = vpop.xlane.xlu0 %3570 }
 0x3a8   :  { %v3305_v54 = vmul.f32 %v8846_v39, %v3165_v5  ;;  %v12435_v4 = vrot.slane %v10501_v6, %v9944_v9  ;;  %v3881_v13 = vrot.slane %v10793_v32, %v9944_v9  ;;  %v3661_v62 = vadd.f32 %v9963_v25, %v12436_v1  ;;  %v3379_v58 = vpop.xlane.xlu1 %3378 }
 0x3a9   :  { %v5965_v57 = vsel %vm4026_vm14, %v5753_v3, %v5964_v12  ;;  %v12437_v36 = vrot.slane %v10484_v45, %v9944_v9  ;;  %v3885_v14 = vrot.slane %v10810_v26, %v9944_v9  ;;  %v3662_v59 = vadd.f32 %v9963_v25, %v10559_v55 }
 0x3aa   :  { %v4045_v29 = vsel %vm4030_vm4, %v12435_v4, %v4044_v2  ;;  %3626 = vadd.xlane.f32.xlu0 %v3305_v54  ;;  %v4093_v22 = vsel %vm4089_vm6, %v4038_v17, -inf  ;;  %v5966_v5 = vsel %vm4028_vm2, %v5757_v47, %v5965_v57  ;;  %v3889_v12 = vrot.slane %v10821_v31, %v9944_v9 }
 0x3ab   :  { %v5973_v39 = vsel %vm4028_vm2, %v12437_v36, %v5972_v11  ;;  %4094 = vmax.xlane.f32.xlu1 %v4093_v22  ;;  %v3663_v45 = vadd.f32 %v9963_v25, %v10614_v33  ;;  %v5967_v3 = vsel %vm4030_vm4, %v5761_v37, %v5966_v5  ;;  %v4096_v48 = vsel %vm4089_vm6, %v4045_v29, -inf }
 0x3ac   :  { %v4049_v24 = vsel %vm4024_vm11, %v3877_v56, %v4048_v60  ;;  %v5813_v55 = vrot.slane %v3660_v28, %v9944_v9  ;;  %v12438_v2 = vrot.slane %v10529_v52, %v9944_v9  ;;  %v12439_v35 = vrot.slane %v10585_v50, %v9944_v9  ;;  %v3381_v49 = vpop.xlane.xlu0 %3380 }
 0x3ad   :  { %v12440_v21 = vrot.slane %v10621_v0, %v9944_v9  ;;  %v5817_v11 = vrot.slane %v3661_v62, %v9944_v9  ;;  %v4050_v37 = vsel %vm4026_vm14, %v3881_v13, %v4049_v24  ;;  %v5821_v17 = vrot.slane %v3662_v59, %v9944_v9  ;;  %v3573_v4 = vpop.xlane.xlu1 %3572 }
 0x3ae   :  { %v5974_v47 = vsel %vm4030_vm4, %v12438_v2, %v5973_v39  ;;  %v6021_v52 = vsel %vm4089_vm6, %v5967_v3, 0.0  ;;  %v4051_v56 = vsel %vm4028_vm2, %v3885_v14, %v4050_v37  ;;  %4097 = vmax.xlane.f32.xlu0 %v4096_v48  ;;  %v5825_v0 = vrot.slane %v3663_v45, %v9944_v9 }
 0x3af   :  { %v5975_v33 = vsel %vm4018_vm9, %v12440_v21, %v12439_v35  ;;  %6022 = vadd.xlane.f32.xlu1 %v6021_v52  ;;  %v4052_v28 = vsel %vm4030_vm4, %v3889_v12, %v4051_v56  ;;  %v6024_v54 = vsel %vm4089_vm6, %v5974_v47, 0.0  ;;  %v7943_v13 = vmov 0  }
 0x3b0   :  { %v5976_v60 = vsel %vm4020_vm12, %v5805_v63, %v5975_v33  ;;  %7247 = vset.pattern.permute.xlu1 %v7943_v13  ;;  %7246 = vset.pattern.permute.xlu0 %v7943_v13  ;;  %v4099_v1 = vsel %vm4089_vm6, %v4052_v28, -inf  ;;  %v3575_v57 = vpop.xlane.xlu0 %3574  ;;  %v10887_v14 = vadd.f32 %v9947_v43, %v10733_v42  ;;  %v10891_v59 = vadd.f32 %v9947_v43, %v10768_v27 }
 0x3b1   :  { %v5977_v50 = vsel %vm4022_vm13, %v5809_v18, %v5976_v60  ;;  %v3383_v36 = vpop.xlane.xlu1 %3382  ;;  %v10895_v22 = vadd.f32 %v9947_v43, %v10685_v8  ;;  %v10898_v5 = vadd.f32 %v9947_v43, %v3379_v58  ;;  %v10901_v12 = vadd.f32 %v9947_v43, %v3381_v49 }
 0x3b2   :  { %v5978_v63 = vsel %vm4024_vm11, %v5813_v55, %v5977_v50  ;;  %6025 = vadd.xlane.f32.xlu0 %v6024_v54  ;;  %12441 = vst [vmem:[#allocation54_spill] sm:$0xff] %v10891_v59  ;;  %v3897_v42 = vrot.slane %v10887_v14, %v9944_v9  ;;  %v10906_v3 = vadd.f32 %v9947_v43, %v3383_v36 }
 0x3b3   :  { %v5979_v29 = vsel %vm4026_vm14, %v5817_v11, %v5978_v63  ;;  %4100 = vmax.xlane.f32.xlu1 %v4099_v1  ;;  %12442 = vst [vmem:[#allocation55_spill] sm:$0xff] %v10895_v22  ;;  %12443 = vst [vmem:[#allocation56_spill] sm:$0xff] %v10901_v12  ;;  %v3901_v27 = vrot.slane %v10891_v59, %v9944_v9  ;;  %v3893_v58 = vrot.slane %v10895_v22, %v9944_v9 }
 0x3b4   :  { %v5980_v62 = vsel %vm4028_vm2, %v5821_v17, %v5979_v29  ;;  %v3905_v24 = vrot.slane %v10898_v5, %v9944_v9  ;;  %v3909_v55 = vrot.slane %v10901_v12, %v9944_v9  ;;  %v3913_v47 = vrot.slane %v10906_v3, %v9944_v9 }
 0x3b5   :  { %v5981_v18 = vsel %vm4030_vm4, %v5825_v0, %v5980_v62  ;;  %v3385_v45 = vpop.xlane.xlu0 %3384  ;;  %v3577_v48 = vpop.xlane.xlu1 %3576  ;;  %v4053_v2 = vsel %vm4018_vm9, %v3897_v42, %v3893_v58  ;;  %v3665_v21 = vadd.f32 %v9963_v25, %v10780_v15  ;;  %v3666_v37 = vadd.f32 %v9963_v25, %v10833_v40 }
 0x3b6   :  { %v6027_v39 = vsel %vm4089_vm6, %v5981_v18, 0.0  ;;  %v10911_v8 = vadd.f32 %v9947_v43, %v3385_v45  ;;  %v4054_v35 = vsel %vm4020_vm12, %v3901_v27, %v4053_v2  ;;  %v3664_v52 = vadd.f32 %v9963_v25, %v10720_v51 }
 0x3b7   :  { %6028 = vadd.xlane.f32.xlu1 %v6027_v39  ;;  %v4055_v60 = vsel %vm4022_vm13, %v3905_v24, %v4054_v35  ;;  %v3667_v49 = vadd.f32 %v9963_v25, %v3573_v4  ;;  %v3668_v50 = vadd.f32 %v9963_v25, %v3575_v57  ;;  %v5833_v28 = vrot.slane %v3665_v21, %v9944_v9 }
 0x3b8   :  { %12444 = vst [vmem:[#allocation57_spill] sm:$0xff] %v10911_v8  ;;  %v3917_v33 = vrot.slane %v10911_v8, %v9944_v9  ;;  %v4056_v56 = vsel %vm4024_vm11, %v3909_v55, %v4055_v60  ;;  %v3669_v54 = vadd.f32 %v9963_v25, %v3577_v48  ;;  %v5837_v51 = vrot.slane %v3666_v37, %v9944_v9 }
 0x3b9   :  { %v3387_v11 = vpop.xlane.xlu1 %3386  ;;  %v3579_v15 = vpop.xlane.xlu0 %3578  ;;  %v4057_v40 = vsel %vm4026_vm14, %v3913_v47, %v4056_v56  ;;  %v5829_v13 = vrot.slane %v3664_v52, %v9944_v9  ;;  %v5841_v1 = vrot.slane %v3667_v49, %v9944_v9  ;;  %v5845_v18 = vrot.slane %v3668_v50, %v9944_v9 }
 0x3ba   :  { %v10931_v17 = vadd.f32 %v9947_v43, %v3387_v11  ;;  %v4058_v63 = vsel %vm4028_vm2, %v3917_v33, %v4057_v40  ;;  %v3670_v29 = vadd.f32 %v9963_v25, %v3579_v15  ;;  %v5849_v36 = vrot.slane %v3669_v54, %v9944_v9 }
 0x3bb   :  { %v5982_v57 = vsel %vm4018_vm9, %v5833_v28, %v5829_v13 }
 0x3bc   :  { %v3921_v0 = vrot.slane %v10931_v17, %v9944_v9  ;;  %v5983_v39 = vsel %vm4020_vm12, %v5837_v51, %v5982_v57  ;;  %v5853_v45 = vrot.slane %v3670_v29, %v9944_v9 }
 0x3bd   :  { %v5984_v48 = vsel %vm4022_vm13, %v5841_v1, %v5983_v39 }
 0x3be   :  { %v4059_v4 = vsel %vm4030_vm4, %v3921_v0, %v4058_v63  ;;  %v5985_v24 = vsel %vm4024_vm11, %v5845_v18, %v5984_v48 }
 0x3bf   :  { %v4102_v62 = vsel %vm4089_vm6, %v4059_v4, -inf  ;;  %v3389_v27 = vpop.xlane.xlu0 %3388  ;;  %v5986_v2 = vsel %vm4026_vm14, %v5849_v36, %v5985_v24 }
 0x3c0   :  { %4103 = vmax.xlane.f32.xlu0 %v4102_v62  ;;  %v5987_v47 = vsel %vm4028_vm2, %v5853_v45, %v5986_v2  ;;  %v10970_v54 = vadd.f32 %v9947_v43, %v3389_v27 }
 0x3c1   :  { %v3581_v42 = vpop.xlane.xlu1 %3580 }
 0x3c2   :  { %v3671_v58 = vadd.f32 %v9963_v25, %v3581_v42  ;;  %12446 = vst [vmem:[#allocation30_spill] sm:$0xff] %v10970_v54  ;;  %v3925_v39 = vrot.slane %v10970_v54, %v9944_v9 }
 0x3c4   :  { %v5857_v55 = vrot.slane %v3671_v58, %v9944_v9 }
 0x3c6   :  { %v5988_v35 = vsel %vm4030_vm4, %v5857_v55, %v5987_v47 }
 0x3c7   :  { %v6030_v21 = vsel %vm4089_vm6, %v5988_v35, 0.0  ;;  %v3583_v33 = vpop.xlane.xlu0 %3582 }
 0x3c8   :  { %6031 = vadd.xlane.f32.xlu0 %v6030_v21  ;;  %v3672_v45 = vadd.f32 %v9963_v25, %v3583_v33 }
 0x3ca   :  { %v3391_v11 = vpop.xlane.xlu1 %3390 }
 0x3cb   :  { %v10964_v0 = vadd.f32 %v9947_v43, %v3391_v11 }
 0x3cd   :  { %v3393_v37 = vpop.xlane.xlu0 %3392  ;;  %v3929_v29 = vrot.slane %v10964_v0, %v9944_v9 }
 0x3ce   :  { %v3585_v60 = vpop.xlane.xlu1 %3584  ;;  %v10967_v28 = vadd.f32 %v9947_v43, %v3393_v37 }
 0x3cf   :  { %v3673_v4 = vadd.f32 %v9963_v25, %v3585_v60  ;;  %v4060_v24 = vsel %vm4018_vm9, %v3929_v29, %v3925_v39 }
 0x3d0   :  { %12445 = vst [vmem:[#allocation61_spill] sm:$0xff] %v10967_v28  ;;  %v3933_v62 = vrot.slane %v10967_v28, %v9944_v9 }
 0x3d1   :  { %v5865_v55 = vrot.slane %v3673_v4, %v9944_v9 }
 0x3d2   :  { %v4061_v21 = vsel %vm4020_vm12, %v3933_v62, %v4060_v24 }
 0x3d3   :  { %v3587_v52 = vpop.xlane.xlu0 %3586  ;;  %v3395_v56 = vpop.xlane.xlu1 %3394 }
 0x3d4   :  { %v10973_v63 = vadd.f32 %v9947_v43, %v3395_v56  ;;  %v3674_v18 = vadd.f32 %v9963_v25, %v3587_v52  ;;  %v5861_v52 = vrot.slane %v3672_v45, %v9944_v9 }
 0x3d6   :  { %v3937_v42 = vrot.slane %v10973_v63, %v9944_v9  ;;  %v5869_v33 = vrot.slane %v3674_v18, %v9944_v9  ;;  %v5989_v29 = vsel %vm4018_vm9, %v5865_v55, %v5861_v52 }
 0x3d8   :  { %v3397_v49 = vpop.xlane.xlu0 %3396  ;;  %v4062_v56 = vsel %vm4022_vm13, %v3937_v42, %v4061_v21 }
 0x3d9   :  { %v3589_v15 = vpop.xlane.xlu1 %3588  ;;  %v10976_v51 = vadd.f32 %v9947_v43, %v3397_v49 }
 0x3da   :  { %v3675_v48 = vadd.f32 %v9963_v25, %v3589_v15 }
 0x3db   :  { %12447 = vst [vmem:[#allocation63_spill] sm:$0xff] %v10976_v51  ;;  %v3941_v27 = vrot.slane %v10976_v51, %v9944_v9 }
 0x3dc   :  { %v5873_v49 = vrot.slane %v3675_v48, %v9944_v9 }
 0x3de   :  { %v3591_v50 = vpop.xlane.xlu0 %3590 }
 0x3df   :  { %v3399_v40 = vpop.xlane.xlu1 %3398  ;;  %v3676_v58 = vadd.f32 %v9963_v25, %v3591_v50  ;;  %v4063_v50 = vsel %vm4024_vm11, %v3941_v27, %v4062_v56 }
 0x3e0   :  { %v10982_v13 = vadd.f32 %v9947_v43, %v3399_v40 }
 0x3e1   :  { %v5877_v40 = vrot.slane %v3676_v58, %v9944_v9 }
 0x3e2   :  { %v3945_v2 = vrot.slane %v10982_v13, %v9944_v9 }
 0x3e3   :  { %v3401_v1 = vpop.xlane.xlu0 %3400 }
 0x3e4   :  { %v10988_v57 = vadd.f32 %v9947_v43, %v3401_v1  ;;  %v3593_v36 = vpop.xlane.xlu1 %3592  ;;  %v4064_v18 = vsel %vm4026_vm14, %v3945_v2, %v4063_v50 }
 0x3e5   :  { %v3677_v47 = vadd.f32 %v9963_v25, %v3593_v36  ;;  %v5990_v36 = vsel %vm4020_vm12, %v5869_v33, %v5989_v29 }
 0x3e6   :  { %12448 = vst [vmem:[#allocation59_spill] sm:$0xff] %v10988_v57  ;;  %v3949_v11 = vrot.slane %v10988_v57, %v9944_v9  ;;  %v5991_v48 = vsel %vm4022_vm13, %v5873_v49, %v5990_v36 }
 0x3e7   :  { %v5881_v4 = vrot.slane %v3677_v47, %v9944_v9  ;;  %v5992_v24 = vsel %vm4024_vm11, %v5877_v40, %v5991_v48 }
 0x3e8   :  { %v3595_v35 = vpop.xlane.xlu0 %3594  ;;  %v3403_v60 = vpop.xlane.xlu1 %3402  ;;  %v4065_v42 = vsel %vm4028_vm2, %v3949_v11, %v4064_v18 }
 0x3e9   :  { %v3678_v37 = vadd.f32 %v9963_v25, %v3595_v35  ;;  %v11013_v15 = vadd.f32 %v9947_v43, %v3403_v60  ;;  %v5993_v35 = vsel %vm4026_vm14, %v5881_v4, %v5992_v24 }
 0x3eb   :  { %v3953_v1 = vrot.slane %v11013_v15, %v9944_v9  ;;  %v5885_v39 = vrot.slane %v3678_v37, %v9944_v9 }
 0x3ec   :  { %v3405_v62 = vpop.xlane.xlu0 %3404 }
 0x3ed   :  { %v3597_v45 = vpop.xlane.xlu1 %3596  ;;  %v4066_v58 = vsel %vm4030_vm4, %v3953_v1, %v4065_v42  ;;  %v5994_v33 = vsel %vm4028_vm2, %v5885_v39, %v5993_v35  ;;  %v11042_v36 = vadd.f32 %v9947_v43, %v3405_v62 }
 0x3ee   :  { %v3679_v27 = vadd.f32 %v9963_v25, %v3597_v45  ;;  %v4105_v55 = vsel %vm4089_vm6, %v4066_v58, -inf }
 0x3ef   :  { %4106 = vmax.xlane.f32.xlu1 %v4105_v55  ;;  %12451 = vst [vmem:[#allocation24_spill] sm:$0xff] %v11042_v36  ;;  %v3957_v35 = vrot.slane %v11042_v36, %v9944_v9 }
 0x3f0   :  { %v5889_v47 = vrot.slane %v3679_v27, %v9944_v9 }
 0x3f1   :  { %v3599_v2 = vpop.xlane.xlu0 %3598  ;;  %v3407_v21 = vpop.xlane.xlu1 %3406 }
 0x3f2   :  { %v5995_v11 = vsel %vm4030_vm4, %v5889_v47, %v5994_v33  ;;  %v11036_v29 = vadd.f32 %v9947_v43, %v3407_v21  ;;  %v3680_v21 = vadd.f32 %v9963_v25, %v3599_v2 }
 0x3f3   :  { %v6033_v37 = vsel %vm4089_vm6, %v5995_v11, 0.0 }
 0x3f4   :  { %6034 = vadd.xlane.f32.xlu1 %v6033_v37  ;;  %12449 = vst [vmem:[#allocation62_spill] sm:$0xff] %v11036_v29  ;;  %v3961_v42 = vrot.slane %v11036_v29, %v9944_v9 }
 0x3f5   :  { %v3409_v60 = vpop.xlane.xlu0 %3408 }
 0x3f6   :  { %v3601_v52 = vpop.xlane.xlu1 %3600  ;;  %v11039_v4 = vadd.f32 %v9947_v43, %v3409_v60 }
 0x3f7   :  { %v3681_v48 = vadd.f32 %v9963_v25, %v3601_v52  ;;  %v4067_v52 = vsel %vm4018_vm9, %v3961_v42, %v3957_v35  ;;  %v5893_v42 = vrot.slane %v3680_v21, %v9944_v9 }
 0x3f8   :  { %12450 = vst [vmem:[#allocation23_spill] sm:$0xff] %v11039_v4  ;;  %v3965_v24 = vrot.slane %v11039_v4, %v9944_v9 }
 0x3fa   :  { %v3603_v56 = vpop.xlane.xlu0 %3602  ;;  %v3411_v49 = vpop.xlane.xlu1 %3410 }
 0x3fb   :  { %v11045_v39 = vadd.f32 %v9947_v43, %v3411_v49  ;;  %v3682_v62 = vadd.f32 %v9963_v25, %v3603_v56  ;;  %v5897_v56 = vrot.slane %v3681_v48, %v9944_v9 }
 0x3fd   :  { %12452 = vst [vmem:[#allocation67_spill] sm:$0xff] %v11045_v39  ;;  %v3969_v33 = vrot.slane %v11045_v39, %v9944_v9 }
 0x3fe   :  { %v3413_v50 = vpop.xlane.xlu0 %3412 }
 0x3ff   :  { %v3605_v40 = vpop.xlane.xlu1 %3604  ;;  %v11048_v45 = vadd.f32 %v9947_v43, %v3413_v50 }
 0x400   :  { %v3683_v11 = vadd.f32 %v9963_v25, %v3605_v40 }
 0x401   :  { %12453 = vst [vmem:[#allocation66_spill] sm:$0xff] %v11048_v45  ;;  %v3973_v37 = vrot.slane %v11048_v45, %v9944_v9 }
 0x402   :  { %v3607_v1 = vpop.xlane.xlu0 %3606  ;;  %v5905_v35 = vrot.slane %v3683_v11, %v9944_v9 }
 0x403   :  { %v3415_v18 = vpop.xlane.xlu1 %3414  ;;  %v3684_v60 = vadd.f32 %v9963_v25, %v3607_v1 }
 0x404   :  { %v11054_v27 = vadd.f32 %v9947_v43, %v3415_v18  ;;  %v4068_v18 = vsel %vm4020_vm12, %v3965_v24, %v4067_v52 }
 0x405   :  { %v4069_v48 = vsel %vm4022_vm13, %v3969_v33, %v4068_v18  ;;  %v5909_v24 = vrot.slane %v3684_v60, %v9944_v9 }
 0x406   :  { %12454 = vst [vmem:[#allocation69_spill] sm:$0xff] %v11054_v27  ;;  %v3417_v58 = vpop.xlane.xlu0 %3416  ;;  %v3977_v49 = vrot.slane %v11054_v27, %v9944_v9 }
 0x407   :  { %v11060_v55 = vadd.f32 %v9947_v43, %v3417_v58  ;;  %v3609_v47 = vpop.xlane.xlu1 %3608  ;;  %v5901_v58 = vrot.slane %v3682_v62, %v9944_v9  ;;  %v5996_v62 = vsel %vm4018_vm9, %v5897_v56, %v5893_v42 }
 0x408   :  { %v3685_v50 = vadd.f32 %v9963_v25, %v3609_v47  ;;  %v4070_v47 = vsel %vm4024_vm11, %v3973_v37, %v4069_v48 }
 0x409   :  { %12455 = vst [vmem:[#allocation27_spill] sm:$0xff] %v11060_v55  ;;  %v3981_v40 = vrot.slane %v11060_v55, %v9944_v9  ;;  %v4071_v21 = vsel %vm4026_vm14, %v3977_v49, %v4070_v47  ;;  %v5997_v33 = vsel %vm4020_vm12, %v5901_v58, %v5996_v62 }
 0x40a   :  { %v3611_v2 = vpop.xlane.xlu0 %3610  ;;  %v5913_v52 = vrot.slane %v3685_v50, %v9944_v9  ;;  %v5998_v60 = vsel %vm4022_vm13, %v5905_v35, %v5997_v33  ;;  %v12458_v33 = vld [vmem:[#allocation20_spill] sm:$0xff] }
 0x40b   :  { %v3686_v45 = vadd.f32 %v9963_v25, %v3611_v2  ;;  %v3419_v1 = vpop.xlane.xlu1 %3418  ;;  %v4072_v37 = vsel %vm4028_vm2, %v3981_v40, %v4071_v21  ;;  %v12457_v40 = vld [vmem:[#allocation19_spill] sm:$0xff] }
 0x40c   :  { %v11085_v4 = vadd.f32 %v9947_v43, %v3419_v1  ;;  %v5999_v1 = vsel %vm4024_vm11, %v5909_v24, %v5998_v60  ;;  %v11111_v47 = vsub.s32 2, %v12457_v40  ;;  %v11134_v51 = vsub.s32 5, %v12457_v40 }
 0x40d   :  { %v5917_v11 = vrot.slane %v3686_v45, %v9944_v9  ;;  %v6000_v45 = vsel %vm4026_vm14, %v5913_v52, %v5999_v1 }
 0x40e   :  { %12456 = vst [vmem:[#allocation28_spill] sm:$0xff] %v11085_v4  ;;  %v3985_v2 = vrot.slane %v11085_v4, %v9944_v9  ;;  %v11093_v55 = vpop.xlane.xlu0 %3420 }
 0x40f   :  { %v3613_v18 = vpop.xlane.xlu1 %3612  ;;  %v6001_v35 = vsel %vm4028_vm2, %v5917_v11, %v6000_v45  ;;  %v12461_v11 = vld [vmem:[#allocation65_spill] sm:$0xff] }
 0x410   :  { %v3687_v56 = vadd.f32 %v9963_v25, %v3613_v18  ;;  %v4073_v50 = vsel %vm4030_vm4, %v3985_v2, %v4072_v37  ;;  %v11117_v2 = vsub.s32 3, %v12457_v40  ;;  %v12459_v37 = vld [vmem:[#allocation21_spill] sm:$0xff] }
 0x411   :  { %v4108_v42 = vsel %vm4089_vm6, %v4073_v50, -inf  ;;  %v12460_v50 = vld [vmem:[#allocation64_spill] sm:$0xff] }
 0x412   :  { %v5921_v48 = vrot.slane %v3687_v56, %v9944_v9  ;;  %v11105_v49 = vpop.xlane.xlu0 %3614  ;;  %4109 = vmax.xlane.f32.xlu0 %v4108_v42 }
 0x413   :  { %v11108_v58 = vpop.xlane.xlu1 %3422 }
 0x414   :  { %v6002_v62 = vsel %vm4030_vm4, %v5921_v48, %v6001_v35  ;;  %v11127_v48 = vsub.s32 4, %v12457_v40  ;;  %v12462_v35 = vld [vmem:[#allocation68_spill] sm:$0xff] }
 0x415   :  { %v6036_v24 = vsel %vm4089_vm6, %v6002_v62, 0.0 }
 0x416   :  { %v4092_v21 = vpop.xlane.xlu0 %4091  ;;  %6037 = vadd.xlane.f32.xlu0 %v6036_v24 }
 0x417   :  { %v4125_v18 = vrot.slane %v4092_v21, %v12458_v33  ;;  %v4129_v52 = vrot.slane %v4092_v21, %v12459_v37  ;;  %v4133_v60 = vrot.slane %v4092_v21, %v11111_v47  ;;  %v4137_v45 = vrot.slane %v4092_v21, %v11117_v2 }
 0x418   :  { %v11122_v56 = vpop.xlane.xlu1 %3616 }
 0x419   :  { %v4442_v1 = vsub.f32 %v12460_v50, %v4125_v18  ;;  %v4443_v42 = vsub.f32 %v12461_v11, %v4129_v52  ;;  %v4444_v62 = vsub.f32 %v12462_v35, %v4133_v60  ;;  %v4141_v18 = vrot.slane %v4092_v21, %v11127_v48  ;;  %v12463_v50 = vld [vmem:[#allocation44_spill] sm:$0xff]  ;;  %v12464_v35 = vld [vmem:[#allocation26_spill] sm:$0xff] }
 0x41a   :  { %v4445_v52 = vsub.f32 %v12463_v50, %v4137_v45  ;;  %v11143_v60 = vsub.s32 6, %v12457_v40 }
 0x41b   :  { %v6020_v24 = vpop.xlane.xlu0 %6019  ;;  %v4508_v36 = vmul.f32 1.442695, %v4443_v42  ;;  %v4506_v4 = vmul.f32 1.442695, %v4442_v1  ;;  %v4510_v11 = vmul.f32 1.442695, %v4444_v62  ;;  %v4145_v42 = vrot.slane %v4092_v21, %v11134_v51 }
 0x41c   :  { %v11131_v57 = vpop.xlane.xlu1 %3426  ;;  %v6042_v28 = vmul.f32 0.125, %v6020_v24  ;;  %v4446_v1 = vsub.f32 %v12464_v35, %v4141_v18  ;;  %v4512_v24 = vmul.f32 1.442695, %v4445_v52  ;;  %v4149_v45 = vrot.slane %v4092_v21, %v11143_v60  ;;  %v12465_v62 = vld [vmem:[#allocation43_spill] sm:$0xff] }
 0x41d   :  { %7632 = vpow2.f32 %v4508_v36  ;;  %v11150_v36 = vsub.s32 7, %v12457_v40  ;;  %v4447_v50 = vsub.f32 %v12465_v62, %v4145_v42 }
 0x41e   :  { %6050 = vst [vmem:[#allocation13] sm:$0xff] %v6042_v28  ;;  %7634 = vpow2.f32 %v4506_v4  ;;  %v4514_v29 = vmul.f32 1.442695, %v4446_v1  ;;  %v4448_v52 = vsub.f32 %v10293_v46, %v4149_v45  ;;  %v12469_v1 = vld [vmem:[#allocation39_spill] sm:$0xff] }
 0x41f   :  { %v11138_v27 = vpop.xlane.xlu0 %3424  ;;  %7636 = vpow2.f32 %v4510_v11  ;;  %v4153_v18 = vrot.slane %v4092_v21, %v11150_v36  ;;  %v4516_v40 = vmul.f32 1.442695, %v4447_v50 }
 0x420   :  { %v11140_v54 = vpop.xlane.xlu1 %3620  ;;  %7638 = vpow2.f32 %v4512_v24  ;;  %v4518_v21 = vmul.f32 1.442695, %v4448_v52  ;;  %v12472_v52 = vld [vmem:[#allocation35_spill] sm:$0xff] }
 0x421   :  { %7640 = vpow2.f32 %v4514_v29  ;;  %v4449_v24 = vsub.f32 %v12469_v1, %v4153_v18 }
 0x422   :  { %7642 = vpow2.f32 %v4516_v40 }
 0x423   :  { %v11152_v28 = vpop.xlane.xlu0 %3618  ;;  %7644 = vpow2.f32 %v4518_v21  ;;  %v4520_v45 = vmul.f32 1.442695, %v4449_v24 }
 0x424   :  { %v11147_v39 = vpop.xlane.xlu1 %3430 }
 0x425   :  { %7646 = vpow2.f32 %v4520_v45 }
 0x427   :  { %v11158_v8 = vpop.eup %7632 }
 0x428   :  { %12466 = vst [vmem:[#allocation41_spill] sm:$0xff] %v11158_v8  ;;  %4702 = vperm.xlu1 %7247, %v11158_v8   ;;  %v11163_v11 = vpop.eup %7634  ;;  %v11165_v35 = vpop.xlane.xlu0 %3428 }
 0x429   :  { %12467 = vst [vmem:[#allocation29_spill] sm:$0xff] %v11163_v11  ;;  %v11169_v42 = vpop.eup %7636 }
 0x42a   :  { %v11156_v4 = vpop.xlane.xlu1 %3624  ;;  %12468 = vst [vmem:[#allocation46_spill] sm:$0xff] %v11169_v42  ;;  %v11176_v46 = vpop.eup %7638 }
 0x42b   :  { %12470 = vst [vmem:[#allocation25_spill] sm:$0xff] %v11176_v46  ;;  %v11183_v8 = vpop.eup %7640 }
 0x42c   :  { %4699 = vperm.xlu0 %7246, %v11163_v11   ;;  %4705 = vperm.xlu1 %7247, %v11169_v42   ;;  %12471 = vst [vmem:[#allocation31_spill] sm:$0xff] %v11183_v8  ;;  %v11196_v42 = vpop.eup %7642 }
 0x42d   :  { %v11178_v29 = vpop.xlane.xlu0 %3622  ;;  %12473 = vst [vmem:[#allocation48_spill] sm:$0xff] %v11196_v42  ;;  %v11204_v41 = vpop.eup %7644 }
 0x42e   :  { %v11167_v12 = vpop.xlane.xlu1 %3434  ;;  %12474 = vst [vmem:[#allocation32_spill] sm:$0xff] %v11204_v41 }
 0x430   :  { %4708 = vperm.xlu1 %7247, %v11176_v46  }
 0x432   :  { %v11191_v1 = vpop.xlane.xlu0 %3432 }
 0x433   :  { %v11174_v62 = vpop.xlane.xlu1 %3628 }
 0x434   :  { %4711 = vperm.xlu1 %7247, %v11183_v8  }
 0x438   :  { %v11181_v50 = vpop.xlane.xlu1 %4094  ;;  %4714 = vperm.xlu1 %7247, %v11196_v42   ;;  %v11212_v42 = vpop.eup %7646 }
 0x439   :  { %v4161_v11 = vrot.slane %v11181_v50, %v12459_v37  ;;  %v4169_v18 = vrot.slane %v11181_v50, %v11117_v2  ;;  %v4177_v24 = vrot.slane %v11181_v50, %v11134_v51  ;;  %v4185_v8 = vrot.slane %v11181_v50, %v11150_v36  ;;  %12475 = vst [vmem:[#allocation42_spill] sm:$0xff] %v11212_v42 }
 0x43b   :  { %v4451_v40 = vsub.f32 %v12472_v52, %v4161_v11  ;;  %v4453_v21 = vsub.f32 %v10533_v10, %v4169_v18  ;;  %v4455_v45 = vsub.f32 %v10669_v20, %v4177_v24  ;;  %v11206_v10 = vpop.xlane.xlu0 %3626  ;;  %v4457_v18 = vsub.f32 %v10738_v61, %v4185_v8 }
 0x43c   :  { %v6023_v46 = vpop.xlane.xlu1 %6022  ;;  %4717 = vperm.xlu1 %7247, %v11204_v41  }
 0x43d   :  { %v4524_v59 = vmul.f32 1.442695, %v4451_v40  ;;  %v6043_v22 = vmul.f32 0.125, %v6023_v46  ;;  %v4528_v11 = vmul.f32 1.442695, %v4453_v21 }
 0x43e   :  { %v4532_v46 = vmul.f32 1.442695, %v4455_v45 }
 0x43f   :  { %7648 = vpow2.f32 %v4524_v59  ;;  %6051 = vst [vmem:[#allocation13 + $0x8] sm:$0xff] %v6043_v22  ;;  %v11215_v59 = vpop.xlane.xlu0 %4097  ;;  %v4536_v22 = vmul.f32 1.442695, %v4457_v18 }
 0x440   :  { %v11202_v52 = vpop.xlane.xlu1 %4100  ;;  %7650 = vpow2.f32 %v4528_v11  ;;  %4720 = vperm.xlu1 %7247, %v11212_v42  }
 0x441   :  { %v4225_v40 = vrot.slane %v11202_v52, %v12459_v37  ;;  %7652 = vpow2.f32 %v4532_v46  ;;  %v4233_v24 = vrot.slane %v11202_v52, %v11117_v2  ;;  %v4241_v45 = vrot.slane %v11202_v52, %v11134_v51 }
 0x442   :  { %7654 = vpow2.f32 %v4536_v22  ;;  %v11234_v22 = vadd.f32 %v9947_v43, %v11108_v58  ;;  %v4193_v58 = vrot.slane %v11215_v59, %v12459_v37 }
 0x443   :  { %v4467_v21 = vsub.f32 %v10541_v30, %v4225_v40  ;;  %v4469_v11 = vsub.f32 %v10705_v23, %v4233_v24  ;;  %v6026_v46 = vpop.xlane.xlu0 %6025  ;;  %v4249_v30 = vrot.slane %v11202_v52, %v11150_v36  ;;  %v4471_v40 = vsub.f32 %v10793_v32, %v4241_v45 }
 0x444   :  { %v6029_v20 = vpop.xlane.xlu1 %6028  ;;  %v6044_v41 = vmul.f32 0.125, %v6026_v46  ;;  %v11240_v24 = vadd.f32 %v9947_v43, %v11138_v27  ;;  %v3689_v27 = vadd.f32 %v9963_v25, %v11122_v56  ;;  %v11272_v56 = vadd.f32 %v9947_v43, %v11165_v35 }
 0x445   :  { %v6045_v61 = vmul.f32 0.125, %v6029_v20  ;;  %v4556_v42 = vmul.f32 1.442695, %v4467_v21  ;;  %v4560_v20 = vmul.f32 1.442695, %v4469_v11  ;;  %v11244_v21 = vadd.f32 %v9947_v43, %v11093_v55 }
 0x446   :  { %6052 = vst [vmem:[#allocation13 + $0x10] sm:$0xff] %v6044_v41  ;;  %v4473_v32 = vsub.f32 %v10821_v31, %v4249_v30  ;;  %v3993_v41 = vrot.slane %v11234_v22, %v9944_v9  ;;  %v3688_v55 = vadd.f32 %v9963_v25, %v11105_v49  ;;  %v3997_v45 = vrot.slane %v11240_v24, %v9944_v9 }
 0x447   :  { %6053 = vst [vmem:[#allocation13 + $0x18] sm:$0xff] %v6045_v61  ;;  %7656 = vpow2.f32 %v4556_v42  ;;  %v4564_v42 = vmul.f32 1.442695, %v4471_v40  ;;  %v3690_v31 = vadd.f32 %v9963_v25, %v11152_v28  ;;  %v3989_v46 = vrot.slane %v11244_v21, %v9944_v9 }
 0x448   :  { %7658 = vpow2.f32 %v4560_v20  ;;  %v11268_v30 = vadd.f32 %v9947_v43, %v11131_v57  ;;  %v4568_v49 = vmul.f32 1.442695, %v4473_v32  ;;  %v4201_v28 = vrot.slane %v11215_v59, %v11117_v2 }
 0x449   :  { %v11220_v8 = vpop.eup %7648  ;;  %7660 = vpow2.f32 %v4564_v42  ;;  %v4459_v40 = vsub.f32 %v10612_v38, %v4193_v58  ;;  %v4074_v20 = vsel %vm4018_vm9, %v3993_v41, %v3989_v46  ;;  %v3691_v57 = vadd.f32 %v9963_v25, %v11140_v54 }
 0x44a   :  { %12476 = vst [vmem:[#allocation33_spill] sm:$0xff] %v11220_v8  ;;  %4726 = vperm.xlu0 %7246, %v11220_v8   ;;  %v11226_v18 = vpop.eup %7650  ;;  %v5925_v35 = vrot.slane %v3688_v55, %v9944_v9  ;;  %v5933_v32 = vrot.slane %v3690_v31, %v9944_v9  ;;  %v11289_v42 = vadd.f32 %v9947_v43, %v11147_v39  ;;  %7662 = vpow2.f32 %v4568_v49 }
 0x44b   :  { %12477 = vst [vmem:[#allocation47_spill] sm:$0xff] %v11226_v18  ;;  %v11236_v23 = vpop.eup %7652  ;;  %v4001_v38 = vrot.slane %v11268_v30, %v9944_v9  ;;  %v4005_v58 = vrot.slane %v11272_v56, %v9944_v9  ;;  %v3692_v54 = vadd.f32 %v9963_v25, %v11178_v29  ;;  %v11299_v41 = vadd.f32 %v9947_v43, %v11191_v1 }
 0x44c   :  { %12478 = vst [vmem:[#allocation37_spill] sm:$0xff] %v11236_v23  ;;  %v11254_v61 = vpop.eup %7654  ;;  %v4209_v39 = vrot.slane %v11215_v59, %v11134_v51  ;;  %v4540_v55 = vmul.f32 1.442695, %v4459_v40  ;;  %v5937_v46 = vrot.slane %v3691_v57, %v9944_v9  ;;  %v4009_v49 = vrot.slane %v11289_v42, %v9944_v9 }
 0x44d   :  { %12479 = vst [vmem:[#allocation58_spill] sm:$0xff] %v11254_v61  ;;  %v11262_v11 = vpop.xlane.xlu0 %4103  ;;  %v3694_v40 = vadd.f32 %v9963_v25, %v11206_v10 }
 0x44e   :  { %4732 = vperm.xlu0 %7246, %v11226_v18   ;;  %v4463_v57 = vsub.f32 %v10402_v53, %v4209_v39  ;;  %7664 = vpow2.f32 %v4540_v55  ;;  %v4257_v55 = vrot.slane %v11262_v11, %v12459_v37 }
 0x44f   :  { %v5949_v53 = vrot.slane %v3694_v40, %v9944_v9  ;;  %v12481_v40 = vld [vmem:[#allocation60_spill] sm:$0xff] }
 0x451   :  { %v11282_v18 = vpop.eup %7656 }
 0x452   :  { %4738 = vperm.xlu0 %7246, %v11236_v23   ;;  %v5929_v23 = vrot.slane %v3689_v27, %v9944_v9  ;;  %12480 = vst [vmem:[#allocation34_spill] sm:$0xff] %v11282_v18  ;;  %v4461_v27 = vsub.f32 %v10664_v34, %v4201_v28  ;;  %v11308_v8 = vpop.eup %7658  ;;  %v11317_v34 = vadd.f32 %v9947_v43, %v11167_v12 }
 0x453   :  { %v5941_v28 = vrot.slane %v3692_v54, %v9944_v9  ;;  %v11329_v12 = vpop.eup %7660  ;;  %v3695_v54 = vadd.f32 %v9963_v25, %v11174_v62  ;;  %v4157_v62 = vrot.slane %v11181_v50, %v12458_v33 }
 0x454   :  { %v6003_v31 = vsel %vm4018_vm9, %v5929_v23, %v5925_v35  ;;  %v4544_v43 = vmul.f32 1.442695, %v4461_v27  ;;  %v4548_v27 = vmul.f32 1.442695, %v4463_v57  ;;  %v4273_v57 = vrot.slane %v11262_v11, %v11134_v51 }
 0x455   :  { %v6004_v1 = vsel %vm4020_vm12, %v5933_v32, %v6003_v31 }
 0x456   :  { %4744 = vperm.xlu0 %7246, %v11254_v61   ;;  %v4075_v61 = vsel %vm4020_vm12, %v3997_v45, %v4074_v20  ;;  %v6032_v45 = vpop.xlane.xlu0 %6031  ;;  %v6005_v32 = vsel %vm4022_vm13, %v5937_v46, %v6004_v1  ;;  %7666 = vpow2.f32 %v4544_v43  ;;  %v4475_v1 = vsub.f32 %v10887_v14, %v4257_v55 }
 0x457   :  { %v4076_v29 = vsel %vm4022_vm13, %v4001_v38, %v4075_v61  ;;  %v6046_v20 = vmul.f32 0.125, %v6032_v45  ;;  %v4013_v61 = vrot.slane %v11299_v41, %v9944_v9  ;;  %v4017_v38 = vrot.slane %v11317_v34, %v9944_v9  ;;  %v11345_v45 = vpop.eup %7662 }
 0x458   :  { %v4077_v23 = vsel %vm4024_vm11, %v4005_v58, %v4076_v29  ;;  %v6006_v58 = vsel %vm4024_vm11, %v5941_v28, %v6005_v32  ;;  %7668 = vpow2.f32 %v4548_v27  ;;  %v4572_v43 = vmul.f32 1.442695, %v4475_v1 }
 0x459   :  { %6054 = vst [vmem:[#allocation13 + $0x20] sm:$0xff] %v6046_v20  ;;  %v4078_v10 = vsel %vm4026_vm14, %v4009_v49, %v4077_v23  ;;  %v4265_v20 = vrot.slane %v11262_v11, %v11117_v2  ;;  %v11358_v23 = vpop.eup %7664  ;;  %v4181_v55 = vrot.slane %v11181_v50, %v11143_v60 }
 0x45a   :  { %4774 = vperm.xlu0 %7246, %v11282_v18   ;;  %v3693_v18 = vadd.f32 %v9963_v25, %v11156_v4  ;;  %v4217_v4 = vrot.slane %v11215_v59, %v11150_v36  ;;  %v4079_v39 = vsel %vm4028_vm2, %v4013_v61, %v4078_v10  ;;  %v5953_v25 = vrot.slane %v3695_v54, %v9944_v9 }
 0x45b   :  { %v4080_v31 = vsel %vm4030_vm4, %v4017_v38, %v4079_v39  ;;  %v4165_v61 = vrot.slane %v11181_v50, %v11111_v47  ;;  %v4477_v14 = vsub.f32 %v10898_v5, %v4265_v20  ;;  %v12482_v38 = vld [vmem:[#allocation38_spill] sm:$0xff]  ;;  %v4173_v54 = vrot.slane %v11181_v50, %v11127_v48 }
 0x45c   :  { %v5945_v35 = vrot.slane %v3693_v18, %v9944_v9  ;;  %v4465_v18 = vsub.f32 %v10501_v6, %v4217_v4  ;;  %v4111_v49 = vsel %vm4089_vm6, %v4080_v31, -inf  ;;  %v4450_v4 = vsub.f32 %v12481_v40, %v4157_v62  ;;  %v12483_v31 = vld [vmem:[#allocation36_spill] sm:$0xff] }
 0x45d   :  { %v4452_v10 = vsub.f32 %v12482_v38, %v4165_v61  ;;  %v4576_v39 = vmul.f32 1.442695, %v4477_v14  ;;  %v4281_v5 = vrot.slane %v11262_v11, %v11150_v36  ;;  %v4221_v20 = vrot.slane %v11202_v52, %v12458_v33 }
 0x45e   :  { %4780 = vperm.xlu0 %7246, %v11308_v8   ;;  %v6007_v46 = vsel %vm4026_vm14, %v5945_v35, %v6006_v58  ;;  %v4552_v29 = vmul.f32 1.442695, %v4465_v18  ;;  %v4522_v58 = vmul.f32 1.442695, %v4450_v4  ;;  %v4237_v40 = vrot.slane %v11202_v52, %v11127_v48  ;;  %v12484_v4 = vld [vmem:[#allocation53_spill] sm:$0xff] }
 0x45f   :  { %v6008_v6 = vsel %vm4028_vm2, %v5949_v53, %v6007_v46  ;;  %v4479_v53 = vsub.f32 %v10906_v3, %v4273_v57  ;;  %v4526_v27 = vmul.f32 1.442695, %v4452_v10  ;;  %v4454_v46 = vsub.f32 %v12483_v31, %v4173_v54 }
 0x460   :  { %v6009_v28 = vsel %vm4030_vm4, %v5953_v25, %v6008_v6  ;;  %7670 = vpow2.f32 %v4552_v29  ;;  %v11369_v32 = vpop.eup %7666  ;;  %v4481_v3 = vsub.f32 %v10931_v17, %v4281_v5  ;;  %v4456_v6 = vsub.f32 %v10726_v7, %v4181_v55 }
 0x461   :  { %v6039_v35 = vsel %vm4089_vm6, %v6009_v28, 0.0  ;;  %7672 = vpow2.f32 %v4572_v43  ;;  %v4580_v25 = vmul.f32 1.442695, %v4479_v53  ;;  %v4530_v29 = vmul.f32 1.442695, %v4454_v46 }
 0x462   :  { %4786 = vperm.xlu0 %7246, %v11329_v12   ;;  %v11378_v18 = vpop.eup %7668  ;;  %7674 = vpow2.f32 %v4522_v58  ;;  %v4584_v1 = vmul.f32 1.442695, %v4481_v3  ;;  %v4229_v17 = vrot.slane %v11202_v52, %v11111_v47  ;;  %v4466_v28 = vsub.f32 %v10565_v16, %v4221_v20 }
 0x463   :  { %7676 = vpow2.f32 %v4576_v39  ;;  %v4245_v16 = vrot.slane %v11202_v52, %v11143_v60  ;;  %v4470_v38 = vsub.f32 %v10789_v44, %v4237_v40  ;;  %v12487_v40 = vld [vmem:[#allocation51_spill] sm:$0xff] }
 0x464   :  { %4112 = vmax.xlane.f32.xlu1 %v4111_v49  ;;  %7678 = vpow2.f32 %v4526_v27  ;;  %v4534_v49 = vmul.f32 1.442695, %v4456_v6  ;;  %v4468_v57 = vsub.f32 %v12484_v4, %v4229_v17  ;;  %v4554_v14 = vmul.f32 1.442695, %v4466_v28 }
 0x465   :  { %7680 = vpow2.f32 %v4580_v25  ;;  %v4472_v44 = vsub.f32 %v10810_v26, %v4245_v16  ;;  %v4562_v52 = vmul.f32 1.442695, %v4470_v38  ;;  %v4189_v27 = vrot.slane %v11215_v59, %v12458_v33 }
 0x466   :  { %4792 = vperm.xlu0 %7246, %v11345_v45   ;;  %7682 = vpow2.f32 %v4530_v29  ;;  %v4558_v10 = vmul.f32 1.442695, %v4468_v57  ;;  %v4197_v26 = vrot.slane %v11215_v59, %v11111_v47 }
 0x467   :  { %7684 = vpow2.f32 %v4584_v1  ;;  %v4566_v29 = vmul.f32 1.442695, %v4472_v44 }
 0x468   :  { %6040 = vadd.xlane.f32.xlu1 %v6039_v35  ;;  %7686 = vpow2.f32 %v4534_v49  ;;  %v4460_v4 = vsub.f32 %v12487_v40, %v4197_v26  ;;  %v12491_v26 = vld [vmem:[#allocation55_spill] sm:$0xff] }
 0x469   :  { %7688 = vpow2.f32 %v4554_v14  ;;  %v4205_v14 = vrot.slane %v11215_v59, %v11127_v48 }
 0x46a   :  { %4750 = vperm.xlu0 %7246, %v11358_v23   ;;  %v11385_v62 = vpop.eup %7670  ;;  %7690 = vpow2.f32 %v4558_v10 }
 0x46b   :  { %v11391_v50 = vpop.eup %7672  ;;  %7692 = vpow2.f32 %v4562_v52 }
 0x46c   :  { %v11397_v61 = vpop.eup %7674 }
 0x46d   :  { %v11399_v7 = vpop.eup %7676 }
 0x46e   :  { %4756 = vperm.xlu0 %7246, %v11369_v32   ;;  %v11406_v43 = vpop.eup %7678 }
 0x46f   :  { %v11408_v35 = vpop.eup %7680 }
 0x470   :  { %v11421_v39 = vpop.eup %7682 }
 0x471   :  { %v11423_v5 = vpop.eup %7684 }
 0x472   :  { %4762 = vperm.xlu0 %7246, %v11378_v18   ;;  %12485 = vst [vmem:[#allocation45_spill] sm:$0xff] %v11423_v5  ;;  %v11434_v6 = vpop.eup %7686 }
 0x473   :  { %v11443_v28 = vpop.eup %7688 }
 0x474   :  { %v11450_v10 = vpop.eup %7690 }
 0x475   :  { %v11456_v52 = vpop.eup %7692 }
 0x476   :  { %4768 = vperm.xlu0 %7246, %v11385_v62  }
 0x479   :  { %4723 = vperm.xlu1 %7247, %v11397_v61  }
 0x47a   :  { %4798 = vperm.xlu0 %7246, %v11391_v50  }
 0x47c   :  { %v11415_v58 = vpop.xlane.xlu1 %4106 }
 0x47d   :  { %4729 = vperm.xlu1 %7247, %v11406_v43   ;;  %v4289_v54 = vrot.slane %v11415_v58, %v12459_v37  ;;  %v4297_v53 = vrot.slane %v11415_v58, %v11117_v2  ;;  %v4305_v31 = vrot.slane %v11415_v58, %v11134_v51  ;;  %v4313_v49 = vrot.slane %v11415_v58, %v11150_v36 }
 0x47e   :  { %4804 = vperm.xlu0 %7246, %v11399_v7  }
 0x47f   :  { %v4483_v55 = vsub.f32 %v10964_v0, %v4289_v54  ;;  %v4485_v46 = vsub.f32 %v10973_v63, %v4297_v53  ;;  %v12486_v0 = vld [vmem:[#allocation52_spill] sm:$0xff]  ;;  %v4487_v63 = vsub.f32 %v10982_v13, %v4305_v31  ;;  %v4489_v16 = vsub.f32 %v11013_v15, %v4313_v49  ;;  %v12489_v15 = vld [vmem:[#allocation50_spill] sm:$0xff] }
 0x480   :  { %v4458_v20 = vsub.f32 %v12486_v0, %v4189_v27  ;;  %v4542_v13 = vmul.f32 1.442695, %v4460_v4  ;;  %v4213_v54 = vrot.slane %v11215_v59, %v11143_v60  ;;  %v4462_v53 = vsub.f32 %v12423_v19, %v4205_v14  ;;  %v12493_v49 = vld [vmem:[#allocation54_spill] sm:$0xff]  ;;  %v12495_v14 = vld [vmem:[#allocation56_spill] sm:$0xff] }
 0x481   :  { %4735 = vperm.xlu1 %7247, %v11421_v39   ;;  %v6035_v25 = vpop.xlane.xlu1 %6034  ;;  %v4588_v3 = vmul.f32 1.442695, %v4483_v55  ;;  %v4592_v17 = vmul.f32 1.442695, %v4485_v46  ;;  %v4596_v38 = vmul.f32 1.442695, %v4487_v63  ;;  %v4253_v46 = vrot.slane %v11262_v11, %v12458_v33 }
 0x482   :  { %4810 = vperm.xlu0 %7246, %v11408_v35   ;;  %v6047_v1 = vmul.f32 0.125, %v6035_v25  ;;  %v4538_v57 = vmul.f32 1.442695, %v4458_v20  ;;  %v4600_v44 = vmul.f32 1.442695, %v4489_v16  ;;  %v4464_v55 = vsub.f32 %v12489_v15, %v4213_v54  ;;  %v12496_v15 = vld [vmem:[#allocation57_spill] sm:$0xff] }
 0x483   :  { %7694 = vpow2.f32 %v4588_v3  ;;  %v4546_v31 = vmul.f32 1.442695, %v4462_v53  ;;  %v4261_v3 = vrot.slane %v11262_v11, %v11111_v47 }
 0x484   :  { %6055 = vst [vmem:[#allocation13 + $0x28] sm:$0xff] %v6047_v1  ;;  %7696 = vpow2.f32 %v4566_v29  ;;  %v4550_v25 = vmul.f32 1.442695, %v4464_v55  ;;  %v4474_v29 = vsub.f32 %v12491_v26, %v4253_v46  ;;  %v4269_v1 = vrot.slane %v11262_v11, %v11127_v48  ;;  %v12497_v46 = vld [vmem:[#allocation62_spill] sm:$0xff]  ;;  %v12498_v26 = vld [vmem:[#allocation67_spill] sm:$0xff] }
 0x485   :  { %4741 = vperm.xlu1 %7247, %v11434_v6   ;;  %7698 = vpow2.f32 %v4592_v17  ;;  %v4476_v63 = vsub.f32 %v12493_v49, %v4261_v3 }
 0x486   :  { %4816 = vperm.xlu0 %7246, %v11423_v5   ;;  %7700 = vpow2.f32 %v4538_v57  ;;  %v4570_v17 = vmul.f32 1.442695, %v4474_v29  ;;  %v4277_v57 = vrot.slane %v11262_v11, %v11143_v60  ;;  %v4478_v16 = vsub.f32 %v12495_v14, %v4269_v1  ;;  %v12499_v14 = vld [vmem:[#allocation30_spill] sm:$0xff] }
 0x487   :  { %7702 = vpow2.f32 %v4596_v38  ;;  %v4574_v38 = vmul.f32 1.442695, %v4476_v63 }
 0x488   :  { %7704 = vpow2.f32 %v4542_v13  ;;  %v4480_v11 = vsub.f32 %v12496_v15, %v4277_v57  ;;  %v4578_v55 = vmul.f32 1.442695, %v4478_v16  ;;  %v4293_v57 = vrot.slane %v11415_v58, %v11111_v47  ;;  %v12500_v15 = vld [vmem:[#allocation69_spill] sm:$0xff] }
 0x489   :  { %4771 = vperm.xlu1 %7247, %v11443_v28   ;;  %7706 = vpow2.f32 %v4600_v44 }
 0x48a   :  { %7708 = vpow2.f32 %v4546_v31  ;;  %v4285_v31 = vrot.slane %v11415_v58, %v12458_v33 }
 0x48b   :  { %7710 = vpow2.f32 %v4550_v25 }
 0x48c   :  { %7712 = vpow2.f32 %v4570_v17  ;;  %v4582_v17 = vmul.f32 1.442695, %v4480_v11  ;;  %v4482_v16 = vsub.f32 %v12499_v14, %v4285_v31  ;;  %v12501_v11 = vld [vmem:[#allocation61_spill] sm:$0xff]  ;;  %v4301_v31 = vrot.slane %v11415_v58, %v11127_v48 }
 0x48d   :  { %4777 = vperm.xlu1 %7247, %v11450_v10   ;;  %v11458_v27 = vpop.eup %7694  ;;  %7714 = vpow2.f32 %v4574_v38 }
 0x48e   :  { %12488 = vst [vmem:[#allocation49_spill] sm:$0xff] %v11458_v27  ;;  %4822 = vperm.xlu0 %7246, %v11458_v27   ;;  %v11465_v59 = vpop.eup %7696  ;;  %7716 = vpow2.f32 %v4578_v55  ;;  %v4484_v55 = vsub.f32 %v12501_v11, %v4293_v57 }
 0x48f   :  { %v11467_v19 = vpop.eup %7698 }
 0x490   :  { %12490 = vst [vmem:[#allocation40_spill] sm:$0xff] %v11467_v19  ;;  %v11474_v0 = vpop.eup %7700 }
 0x491   :  { %4783 = vperm.xlu1 %7247, %v11456_v52   ;;  %v11476_v20 = vpop.eup %7702 }
 0x492   :  { %4828 = vperm.xlu0 %7246, %v11467_v19   ;;  %12492 = vst [vmem:[#allocation22_spill] sm:$0xff] %v11476_v20  ;;  %v11483_v40 = vpop.eup %7704 }
 0x493   :  { %v11485_v4 = vpop.eup %7706 }
 0x494   :  { %12494 = vst [vmem:[#allocation19_spill] sm:$0xff] %v11485_v4  ;;  %v11498_v44 = vpop.eup %7708 }
 0x495   :  { %4789 = vperm.xlu1 %7247, %v11465_v59   ;;  %v11508_v63 = vpop.eup %7710 }
 0x496   :  { %4834 = vperm.xlu0 %7246, %v11476_v20  }
 0x499   :  { %4747 = vperm.xlu1 %7247, %v11474_v0  }
 0x49a   :  { %4840 = vperm.xlu0 %7246, %v11485_v4  }
 0x49d   :  { %4753 = vperm.xlu1 %7247, %v11483_v40  }
 0x49f   :  { %v11492_v13 = vpop.xlane.xlu0 %4109 }
 0x4a0   :  { %v4321_v54 = vrot.slane %v11492_v13, %v12459_v37  ;;  %v4329_v53 = vrot.slane %v11492_v13, %v11117_v2  ;;  %v4337_v3 = vrot.slane %v11492_v13, %v11134_v51  ;;  %v4345_v38 = vrot.slane %v11492_v13, %v11150_v36 }
 0x4a1   :  { %4759 = vperm.xlu1 %7247, %v11498_v44  }
 0x4a2   :  { %v4491_v25 = vsub.f32 %v12497_v46, %v4321_v54  ;;  %v4493_v29 = vsub.f32 %v12498_v26, %v4329_v53  ;;  %v4495_v46 = vsub.f32 %v12500_v15, %v4337_v3  ;;  %v4586_v26 = vmul.f32 1.442695, %v4482_v16 }
 0x4a3   :  { %v6038_v1 = vpop.xlane.xlu0 %6037  ;;  %v4590_v3 = vmul.f32 1.442695, %v4484_v55 }
 0x4a4   :  { %v4604_v49 = vmul.f32 1.442695, %v4491_v25  ;;  %v6048_v54 = vmul.f32 0.125, %v6038_v1  ;;  %v4608_v53 = vmul.f32 1.442695, %v4493_v29  ;;  %v11517_v25 = vpop.eup %7712  ;;  %v12502_v1 = vld [vmem:[#allocation28_spill] sm:$0xff]  ;;  %v4309_v29 = vrot.slane %v11415_v58, %v11143_v60 }
 0x4a5   :  { %4765 = vperm.xlu1 %7247, %v11508_v63   ;;  %v4497_v14 = vsub.f32 %v12502_v1, %v4345_v38  ;;  %v4612_v4 = vmul.f32 1.442695, %v4495_v46  ;;  %v11524_v20 = vpop.eup %7714  ;;  %v12506_v38 = vld [vmem:[#allocation59_spill] sm:$0xff] }
 0x4a6   :  { %7718 = vpow2.f32 %v4604_v49  ;;  %6056 = vst [vmem:[#allocation13 + $0x30] sm:$0xff] %v6048_v54  ;;  %v12503_v49 = vld [vmem:[#allocation63_spill] sm:$0xff]  ;;  %v11530_v16 = vpop.eup %7716  ;;  %v4488_v15 = vsub.f32 %v12506_v38, %v4309_v29 }
 0x4a7   :  { %7720 = vpow2.f32 %v4582_v17  ;;  %v4486_v17 = vsub.f32 %v12503_v49, %v4301_v31  ;;  %v4616_v57 = vmul.f32 1.442695, %v4497_v14  ;;  %12504 = vst [vmem:[#allocation20_spill] sm:$0xff] %v11530_v16 }
 0x4a8   :  { %7722 = vpow2.f32 %v4608_v53 }
 0x4a9   :  { %4795 = vperm.xlu1 %7247, %v11517_v25   ;;  %7724 = vpow2.f32 %v4586_v26  ;;  %v4594_v46 = vmul.f32 1.442695, %v4486_v17  ;;  %v4703_v26 = vpop.permute.xlu1 %4702 }
 0x4aa   :  { %7726 = vpow2.f32 %v4612_v4  ;;  %v4598_v4 = vmul.f32 1.442695, %v4488_v15 }
 0x4ab   :  { %7728 = vpow2.f32 %v4590_v3 }
 0x4ac   :  { %7730 = vpow2.f32 %v4616_v57  ;;  %v4700_v57 = vpop.permute.xlu0 %4699 }
 0x4ad   :  { %4801 = vperm.xlu1 %7247, %v11524_v20   ;;  %7732 = vpow2.f32 %v4594_v46  ;;  %v4706_v3 = vpop.permute.xlu1 %4705 }
 0x4ae   :  { %7734 = vpow2.f32 %v4598_v4  ;;  %v4893_v4 = vrot.slane %v4700_v57, %v9944_v9 }
 0x4b0   :  { %v11532_v54 = vpop.eup %7718 }
 0x4b1   :  { %12505 = vst [vmem:[#allocation21_spill] sm:$0xff] %v11532_v54  ;;  %4807 = vperm.xlu1 %7247, %v11530_v16   ;;  %4846 = vperm.xlu0 %7246, %v11532_v54   ;;  %v11537_v53 = vpop.eup %7720  ;;  %v4709_v49 = vpop.permute.xlu1 %4708 }
 0x4b2   :  { %12507 = vst [vmem:[#allocation64_spill] sm:$0xff] %v11537_v53  ;;  %v11539_v58 = vpop.eup %7722 }
 0x4b3   :  { %12508 = vst [vmem:[#allocation65_spill] sm:$0xff] %v11539_v58  ;;  %v11543_v11 = vpop.eup %7724 }
 0x4b4   :  { %12509 = vst [vmem:[#allocation68_spill] sm:$0xff] %v11543_v11  ;;  %v11545_v55 = vpop.eup %7726 }
 0x4b5   :  { %4813 = vperm.xlu1 %7247, %v11537_v53   ;;  %4852 = vperm.xlu0 %7246, %v11539_v58   ;;  %12510 = vst [vmem:[#allocation44_spill] sm:$0xff] %v11545_v55  ;;  %v11549_v31 = vpop.eup %7728  ;;  %v4712_v17 = vpop.permute.xlu1 %4711  ;;  %v4901_v58 = vrot.slane %v4706_v3, %v9944_v9 }
 0x4b6   :  { %12511 = vst [vmem:[#allocation26_spill] sm:$0xff] %v11549_v31  ;;  %v11551_v1 = vpop.eup %7730 }
 0x4b7   :  { %12512 = vst [vmem:[#allocation43_spill] sm:$0xff] %v11551_v1  ;;  %v11555_v14 = vpop.eup %7732 }
 0x4b8   :  { %12513 = vst [vmem:[#allocation39_spill] sm:$0xff] %v11555_v14  ;;  %v11558_v29 = vpop.eup %7734 }
 0x4b9   :  { %4819 = vperm.xlu1 %7247, %v11543_v11   ;;  %4858 = vperm.xlu0 %7246, %v11545_v55   ;;  %12514 = vst [vmem:[#allocation35_spill] sm:$0xff] %v11558_v29  ;;  %v4715_v38 = vpop.permute.xlu1 %4714 }
 0x4ba   :  { %v4913_v19 = vrot.slane %v4715_v38, %v9944_v9 }
 0x4bd   :  { %4825 = vperm.xlu1 %7247, %v11549_v31   ;;  %4864 = vperm.xlu0 %7246, %v11551_v1   ;;  %v4718_v46 = vpop.permute.xlu1 %4717  ;;  %v4897_v1 = vrot.slane %v4703_v26, %v9944_v9 }
 0x4be   :  { %v4917_v27 = vrot.slane %v4718_v46, %v9944_v9  ;;  %v12515_v46 = vld [vmem:[#allocation24_spill] sm:$0xff] }
 0x4bf   :  { %v5146_v54 = vsel %vm4018_vm9, %v4897_v1, %v4893_v4  ;;  %v4317_v1 = vrot.slane %v11492_v13, %v12458_v33 }
 0x4c0   :  { %v5147_v11 = vsel %vm4020_vm12, %v4901_v58, %v5146_v54  ;;  %v4325_v58 = vrot.slane %v11492_v13, %v11111_v47 }
 0x4c1   :  { %4831 = vperm.xlu1 %7247, %v11555_v14   ;;  %v4905_v14 = vrot.slane %v4709_v49, %v9944_v9  ;;  %v4721_v31 = vpop.permute.xlu1 %4720 }
 0x4c2   :  { %v4921_v26 = vrot.slane %v4721_v31, %v9944_v9 }
 0x4c3   :  { %v5148_v53 = vsel %vm4022_vm13, %v4905_v14, %v5147_v11  ;;  %v4490_v11 = vsub.f32 %v12515_v46, %v4317_v1  ;;  %v12516_v14 = vld [vmem:[#allocation23_spill] sm:$0xff] }
 0x4c4   :  { %v12518_v1 = vld [vmem:[#allocation27_spill] sm:$0xff] }
 0x4c5   :  { %4837 = vperm.xlu1 %7247, %v11558_v29   ;;  %v4909_v29 = vrot.slane %v4712_v17, %v9944_v9 }
 0x4c7   :  { %v5149_v3 = vsel %vm4024_vm11, %v4909_v29, %v5148_v53  ;;  %v4333_v53 = vrot.slane %v11492_v13, %v11127_v48  ;;  %v4492_v29 = vsub.f32 %v12516_v14, %v4325_v58 }
 0x4c8   :  { %v5150_v49 = vsel %vm4026_vm14, %v4913_v19, %v5149_v3  ;;  %v4602_v19 = vmul.f32 1.442695, %v4490_v11 }
 0x4c9   :  { %v11561_v15 = vpop.permute.xlu0 %4726  ;;  %v5151_v17 = vsel %vm4028_vm2, %v4917_v27, %v5150_v49  ;;  %v4341_v27 = vrot.slane %v11492_v13, %v11143_v60  ;;  %v4606_v49 = vmul.f32 1.442695, %v4492_v29 }
 0x4ca   :  { %v5152_v38 = vsel %vm4030_vm4, %v4921_v26, %v5151_v17  ;;  %v12517_v26 = vld [vmem:[#allocation66_spill] sm:$0xff]  ;;  %7736 = vpow2.f32 %v4602_v19 }
 0x4cb   :  { %v5210_v31 = vsel %vm4089_vm6, %v5152_v38, 0.0  ;;  %v4494_v3 = vsub.f32 %v12517_v26, %v4333_v53  ;;  %v4496_v38 = vsub.f32 %v12518_v1, %v4341_v27  ;;  %7738 = vpow2.f32 %v4606_v49 }
 0x4cd   :  { %v11564_v55 = vpop.permute.xlu0 %4732  ;;  %v4614_v14 = vmul.f32 1.442695, %v4496_v38 }
 0x4d1   :  { %v11574_v57 = vpop.permute.xlu0 %4738 }
 0x4d4   :  { %v11610_v26 = vpop.eup %7736 }
 0x4d5   :  { %v11584_v54 = vpop.permute.xlu0 %4744  ;;  %12519 = vst [vmem:[#allocation60_spill] sm:$0xff] %v11610_v26 }
 0x4d9   :  { %v11593_v4 = vpop.permute.xlu0 %4774 }
 0x4dd   :  { %v11601_v46 = vpop.permute.xlu0 %4780 }
 0x4e1   :  { %v11608_v29 = vpop.permute.xlu0 %4786 }
 0x4e9   :  { %5211 = vadd.xlane.f32.xlu1 %v5210_v31  ;;  %v4610_v31 = vmul.f32 1.442695, %v4494_v3 }
 0x4eb   :  { %7740 = vpow2.f32 %v4610_v31  ;;  %v11617_v31 = vpop.eup %7738 }
 0x4ec   :  { %7742 = vpow2.f32 %v4614_v14  ;;  %12520 = vst [vmem:[#allocation38_spill] sm:$0xff] %v11617_v31 }
 0x4f1   :  { %v11598_v17 = vpop.xlane.xlu1 %4112 }
 0x4f2   :  { %v4349_v58 = vrot.slane %v11598_v17, %v12458_v33  ;;  %v4357_v13 = vrot.slane %v11598_v17, %v11111_v47  ;;  %v4365_v3 = vrot.slane %v11598_v17, %v11127_v48  ;;  %v4373_v14 = vrot.slane %v11598_v17, %v11143_v60 }
 0x4f4   :  { %v4498_v53 = vsub.f32 %v11244_v21, %v4349_v58  ;;  %v4500_v49 = vsub.f32 %v11240_v24, %v4357_v13  ;;  %v4929_v21 = vrot.slane %v11561_v15, %v9944_v9  ;;  %v4502_v24 = vsub.f32 %v11272_v56, %v4365_v3 }
 0x4f5   :  { %v6041_v11 = vpop.xlane.xlu1 %6040  ;;  %v4937_v15 = vrot.slane %v11564_v55, %v9944_v9  ;;  %v4945_v55 = vrot.slane %v11574_v57, %v9944_v9 }
 0x4f6   :  { %v6049_v19 = vmul.f32 0.125, %v6041_v11  ;;  %v4618_v1 = vmul.f32 1.442695, %v4498_v53  ;;  %v11621_v11 = vpop.permute.xlu0 %4792  ;;  %v4622_v13 = vmul.f32 1.442695, %v4500_v49 }
 0x4f7   :  { %v4626_v56 = vmul.f32 1.442695, %v4502_v24 }
 0x4f8   :  { %6057 = vst [vmem:[#allocation13 + $0x38] sm:$0xff] %v6049_v19  ;;  %7744 = vpow2.f32 %v4618_v1 }
 0x4f9   :  { %v4724_v27 = vpop.permute.xlu1 %4723  ;;  %7746 = vpow2.f32 %v4622_v13 }
 0x4fa   :  { %4843 = vperm.xlu1 %7247, %v11610_v26   ;;  %v4925_v38 = vrot.slane %v4724_v27, %v9944_v9  ;;  %v11630_v26 = vpop.eup %7740  ;;  %v11640_v1 = vpop.permute.xlu0 %4750  ;;  %7748 = vpow2.f32 %v4626_v56  ;;  %v4361_v56 = vrot.slane %v11598_v17, %v11117_v2 }
 0x4fb   :  { %12521 = vst [vmem:[#allocation36_spill] sm:$0xff] %v11630_v26  ;;  %v11638_v49 = vpop.eup %7742 }
 0x4fc   :  { %v5153_v53 = vsel %vm4018_vm9, %v4929_v21, %v4925_v38  ;;  %12522 = vst [vmem:[#allocation53_spill] sm:$0xff] %v11638_v49 }
 0x4fd   :  { %v4730_v58 = vpop.permute.xlu1 %4729 }
 0x4fe   :  { %v4933_v19 = vrot.slane %v4730_v58, %v9944_v9  ;;  %4849 = vperm.xlu1 %7247, %v11617_v31   ;;  %v4504_v58 = vsub.f32 %v11299_v41, %v4373_v14  ;;  %v4953_v41 = vrot.slane %v11584_v54, %v9944_v9  ;;  %v11654_v57 = vpop.permute.xlu0 %4756 }
 0x500   :  { %v5154_v27 = vsel %vm4020_vm12, %v4933_v19, %v5153_v53  ;;  %v4630_v14 = vmul.f32 1.442695, %v4504_v58 }
 0x501   :  { %v4736_v5 = vpop.permute.xlu1 %4735  ;;  %v5155_v3 = vsel %vm4022_vm13, %v4937_v15, %v5154_v27  ;;  %v4353_v27 = vrot.slane %v11598_v17, %v12459_v37 }
 0x502   :  { %v4941_v16 = vrot.slane %v4736_v5, %v9944_v9  ;;  %4855 = vperm.xlu1 %7247, %v11630_v26   ;;  %v11651_v13 = vpop.eup %7744  ;;  %7750 = vpow2.f32 %v4630_v14 }
 0x503   :  { %12523 = vst [vmem:[#allocation52_spill] sm:$0xff] %v11651_v13  ;;  %v11660_v15 = vpop.eup %7746 }
 0x504   :  { %v5156_v38 = vsel %vm4024_vm11, %v4941_v16, %v5155_v3  ;;  %12524 = vst [vmem:[#allocation51_spill] sm:$0xff] %v11660_v15  ;;  %v4499_v3 = vsub.f32 %v11234_v22, %v4353_v27  ;;  %v4377_v22 = vrot.slane %v11598_v17, %v11150_v36 }
 0x505   :  { %v4742_v21 = vpop.permute.xlu1 %4741  ;;  %v5157_v19 = vsel %vm4026_vm14, %v4945_v55, %v5156_v38  ;;  %v11666_v38 = vpop.permute.xlu0 %4762 }
 0x506   :  { %v4949_v5 = vrot.slane %v4742_v21, %v9944_v9  ;;  %4861 = vperm.xlu1 %7247, %v11638_v49   ;;  %v11668_v55 = vpop.eup %7748  ;;  %v4620_v14 = vmul.f32 1.442695, %v4499_v3 }
 0x507   :  { %12525 = vst [vmem:[#allocation50_spill] sm:$0xff] %v11668_v55 }
 0x508   :  { %v5158_v24 = vsel %vm4028_vm2, %v4949_v5, %v5157_v19  ;;  %v4369_v5 = vrot.slane %v11598_v17, %v11134_v51  ;;  %7752 = vpow2.f32 %v4620_v14 }
 0x509   :  { %v4772_v16 = vpop.permute.xlu1 %4771  ;;  %v5159_v53 = vsel %vm4030_vm4, %v4953_v41, %v5158_v24  ;;  %v4501_v41 = vsub.f32 %v11268_v30, %v4361_v56  ;;  %v4505_v30 = vsub.f32 %v11317_v34, %v4377_v22  ;;  %v4993_v22 = vrot.slane %v11593_v4, %v9944_v9 }
 0x50a   :  { %4867 = vperm.xlu1 %7247, %v11651_v13   ;;  %v5213_v54 = vsel %vm4089_vm6, %v5159_v53, 0.0  ;;  %v11676_v53 = vpop.permute.xlu0 %4768  ;;  %v4503_v27 = vsub.f32 %v11289_v42, %v4369_v5  ;;  %v4989_v34 = vrot.slane %v4772_v16, %v9944_v9  ;;  %v5001_v16 = vrot.slane %v11601_v46, %v9944_v9 }
 0x50b   :  { %5214 = vadd.xlane.f32.xlu0 %v5213_v54  ;;  %v4624_v54 = vmul.f32 1.442695, %v4501_v41  ;;  %v4632_v13 = vmul.f32 1.442695, %v4505_v30 }
 0x50c   :  { %v11674_v19 = vpop.eup %7750  ;;  %v4628_v56 = vmul.f32 1.442695, %v4503_v27 }
 0x50d   :  { %v4778_v58 = vpop.permute.xlu1 %4777  ;;  %12526 = vst [vmem:[#allocation55_spill] sm:$0xff] %v11674_v19  ;;  %7754 = vpow2.f32 %v4624_v54  ;;  %v5167_v54 = vsel %vm4018_vm9, %v4993_v22, %v4989_v34 }
 0x50e   :  { %4873 = vperm.xlu1 %7247, %v11660_v15   ;;  %v4799_v3 = vpop.permute.xlu0 %4798  ;;  %7756 = vpow2.f32 %v4628_v56  ;;  %v4997_v41 = vrot.slane %v4778_v58, %v9944_v9 }
 0x50f   :  { %7758 = vpow2.f32 %v4632_v13 }
 0x510   :  { %v5168_v30 = vsel %vm4020_vm12, %v4997_v41, %v5167_v54  ;;  %v5009_v41 = vrot.slane %v11608_v29, %v9944_v9 }
 0x511   :  { %v4784_v21 = vpop.permute.xlu1 %4783 }
 0x512   :  { %4879 = vperm.xlu1 %7247, %v11668_v55   ;;  %v11683_v26 = vpop.eup %7752  ;;  %v11686_v42 = vpop.permute.xlu0 %4804  ;;  %v5005_v56 = vrot.slane %v4784_v21, %v9944_v9 }
 0x513   :  { %12527 = vst [vmem:[#allocation54_spill] sm:$0xff] %v11683_v26 }
 0x515   :  { %v4790_v24 = vpop.permute.xlu1 %4789 }
 0x516   :  { %4885 = vperm.xlu1 %7247, %v11674_v19   ;;  %v11699_v27 = vpop.permute.xlu0 %4810  ;;  %v5169_v19 = vsel %vm4022_vm13, %v5001_v16, %v5168_v30  ;;  %v5013_v34 = vrot.slane %v4790_v24, %v9944_v9  ;;  %v4961_v16 = vrot.slane %v11640_v1, %v9944_v9  ;;  %v5025_v1 = vrot.slane %v4799_v3, %v9944_v9 }
 0x517   :  { %v11688_v17 = vpop.eup %7754 }
 0x518   :  { %12528 = vst [vmem:[#allocation56_spill] sm:$0xff] %v11688_v17  ;;  %v11695_v14 = vpop.eup %7756 }
 0x519   :  { %v4748_v15 = vpop.permute.xlu1 %4747  ;;  %12529 = vst [vmem:[#allocation57_spill] sm:$0xff] %v11695_v14 }
 0x51a   :  { %v11710_v4 = vpop.permute.xlu0 %4816 }
 0x51d   :  { %v4754_v55 = vpop.permute.xlu1 %4753 }
 0x51e   :  { %v4823_v22 = vpop.permute.xlu0 %4822  ;;  %v4965_v24 = vrot.slane %v4754_v55, %v9944_v9 }
 0x521   :  { %v4760_v31 = vpop.permute.xlu1 %4759  ;;  %4870 = vperm.xlu0 %7246, %v11683_v26  }
 0x522   :  { %v4829_v30 = vpop.permute.xlu0 %4828 }
 0x525   :  { %v11690_v5 = vpop.permute.xlu1 %4765  ;;  %4876 = vperm.xlu0 %7246, %v11688_v17   ;;  %v11705_v17 = vpop.eup %7758 }
 0x526   :  { %12530 = vst [vmem:[#allocation62_spill] sm:$0xff] %v11705_v17 }
 0x529   :  { %v4796_v13 = vpop.permute.xlu1 %4795  ;;  %4882 = vperm.xlu0 %7246, %v11695_v14   ;;  %v5170_v14 = vsel %vm4024_vm11, %v5005_v56, %v5169_v19  ;;  %v4957_v19 = vrot.slane %v4748_v15, %v9944_v9  ;;  %v4973_v15 = vrot.slane %v4760_v31, %v9944_v9 }
 0x52a   :  { %v5171_v54 = vsel %vm4026_vm14, %v5009_v41, %v5170_v14 }
 0x52b   :  { %v5172_v46 = vsel %vm4028_vm2, %v5013_v34, %v5171_v54  ;;  %v5160_v34 = vsel %vm4018_vm9, %v4961_v16, %v4957_v19 }
 0x52c   :  { %v5161_v41 = vsel %vm4020_vm12, %v4965_v24, %v5160_v34 }
 0x52d   :  { %v4802_v58 = vpop.permute.xlu1 %4801  ;;  %4888 = vperm.xlu0 %7246, %v11705_v17   ;;  %v5017_v17 = vrot.slane %v11621_v11, %v9944_v9  ;;  %v5021_v11 = vrot.slane %v4796_v13, %v9944_v9  ;;  %v5065_v13 = vrot.slane %v4829_v30, %v9944_v9  ;;  %v5033_v30 = vrot.slane %v11686_v42, %v9944_v9 }
 0x52e   :  { %v5029_v55 = vrot.slane %v4802_v58, %v9944_v9 }
 0x52f   :  { %v5173_v49 = vsel %vm4030_vm4, %v5017_v17, %v5172_v46  ;;  %v5057_v17 = vrot.slane %v4823_v22, %v9944_v9  ;;  %v4835_v46 = vpop.permute.xlu0 %4834  ;;  %v5174_v24 = vsel %vm4018_vm9, %v5025_v1, %v5021_v11  ;;  %v5041_v1 = vrot.slane %v11699_v27, %v9944_v9 }
 0x530   :  { %v5219_v29 = vsel %vm4089_vm6, %v5173_v49, 0.0  ;;  %v4969_v49 = vrot.slane %v11654_v57, %v9944_v9  ;;  %v4981_v57 = vrot.slane %v11690_v5, %v9944_v9  ;;  %v5175_v3 = vsel %vm4020_vm12, %v5029_v55, %v5174_v24 }
 0x531   :  { %v4808_v21 = vpop.permute.xlu1 %4807 }
 0x532   :  { %v5162_v22 = vsel %vm4022_vm13, %v4969_v49, %v5161_v41  ;;  %v5176_v41 = vsel %vm4022_vm13, %v5033_v30, %v5175_v3  ;;  %v4985_v49 = vrot.slane %v11676_v53, %v9944_v9  ;;  %v5049_v53 = vrot.slane %v11710_v4, %v9944_v9 }
 0x533   :  { %v5163_v58 = vsel %vm4024_vm11, %v4973_v15, %v5162_v22 }
 0x535   :  { %v4814_v26 = vpop.permute.xlu1 %4813 }
 0x539   :  { %v4820_v56 = vpop.permute.xlu1 %4819 }
 0x53a   :  { %5220 = vadd.xlane.f32.xlu1 %v5219_v29  ;;  %v5053_v14 = vrot.slane %v4820_v56, %v9944_v9  ;;  %v5037_v29 = vrot.slane %v4808_v21, %v9944_v9  ;;  %v5073_v21 = vrot.slane %v4835_v46, %v9944_v9 }
 0x53c   :  { %v5181_v19 = vsel %vm4018_vm9, %v5057_v17, %v5053_v14  ;;  %v4977_v14 = vrot.slane %v11666_v38, %v9944_v9  ;;  %v4841_v17 = vpop.permute.xlu0 %4840  ;;  %v5177_v55 = vsel %vm4024_vm11, %v5037_v29, %v5176_v41  ;;  %v5045_v38 = vrot.slane %v4814_v26, %v9944_v9 }
 0x53d   :  { %v4826_v54 = vpop.permute.xlu1 %4825  ;;  %v5178_v26 = vsel %vm4026_vm14, %v5041_v1, %v5177_v55  ;;  %v12531_v1 = vld [vmem:[#allocation41_spill] sm:$0xff] }
 0x53e   :  { %v5061_v56 = vrot.slane %v4826_v54, %v9944_v9  ;;  %v5164_v15 = vsel %vm4026_vm14, %v4977_v14, %v5163_v58 }
 0x53f   :  { %v5165_v42 = vsel %vm4028_vm2, %v4981_v57, %v5164_v15 }
 0x540   :  { %v5182_v31 = vsel %vm4020_vm12, %v5061_v56, %v5181_v19  ;;  %v5081_v19 = vrot.slane %v4841_v17, %v9944_v9  ;;  %v5166_v22 = vsel %vm4030_vm4, %v4985_v49, %v5165_v42  ;;  %v4847_v29 = vpop.permute.xlu0 %4846 }
 0x541   :  { %v4832_v16 = vpop.permute.xlu1 %4831  ;;  %v5183_v11 = vsel %vm4022_vm13, %v5065_v13, %v5182_v31  ;;  %v5179_v31 = vsel %vm4028_vm2, %v5045_v38, %v5178_v26  ;;  %v5216_v58 = vsel %vm4089_vm6, %v5166_v22, 0.0  ;;  %v5089_v4 = vrot.slane %v4847_v29, %v9944_v9 }
 0x542   :  { %v5069_v34 = vrot.slane %v4832_v16, %v9944_v9  ;;  %v5180_v57 = vsel %vm4030_vm4, %v5049_v53, %v5179_v31  ;;  %v12532_v53 = vld [vmem:[#allocation46_spill] sm:$0xff] }
 0x543   :  { %v5222_v3 = vsel %vm4089_vm6, %v5180_v57, 0.0 }
 0x544   :  { %v5184_v5 = vsel %vm4024_vm11, %v5069_v34, %v5183_v11  ;;  %v4853_v14 = vpop.permute.xlu0 %4852 }
 0x545   :  { %v4838_v54 = vpop.permute.xlu1 %4837  ;;  %v5185_v13 = vsel %vm4026_vm14, %v5073_v21, %v5184_v5  ;;  %v5097_v55 = vrot.slane %v4853_v14, %v9944_v9  ;;  %v12533_v14 = vld [vmem:[#allocation31_spill] sm:$0xff] }
 0x546   :  { %v5077_v56 = vrot.slane %v4838_v54, %v9944_v9 }
 0x548   :  { %v5186_v46 = vsel %vm4028_vm2, %v5077_v56, %v5185_v13  ;;  %v4859_v17 = vpop.permute.xlu0 %4858 }
 0x549   :  { %v5187_v24 = vsel %vm4030_vm4, %v5081_v19, %v5186_v46  ;;  %v5105_v22 = vrot.slane %v4859_v17, %v9944_v9 }
 0x54a   :  { %v5225_v27 = vsel %vm4089_vm6, %v5187_v24, 0.0 }
 0x54b   :  { %5226 = vadd.xlane.f32.xlu1 %v5225_v27 }
 0x54c   :  { %5217 = vadd.xlane.f32.xlu0 %v5216_v58  ;;  %v4865_v13 = vpop.permute.xlu0 %4864 }
 0x54d   :  { %v5113_v31 = vrot.slane %v4865_v13, %v9944_v9 }
 0x550   :  { %5223 = vadd.xlane.f32.xlu0 %v5222_v3 }
 0x576   :  { %v5212_v16 = vpop.xlane.xlu1 %5211 }
 0x577   :  { %7760 = vrcp.f32 %v5212_v16 }
 0x57a   :  { %v4844_v30 = vpop.permute.xlu1 %4843 }
 0x57b   :  { %v5085_v34 = vrot.slane %v4844_v30, %v9944_v9 }
 0x57d   :  { %v5188_v5 = vsel %vm4018_vm9, %v5089_v4, %v5085_v34  ;;  %v12534_v4 = vld [vmem:[#allocation32_spill] sm:$0xff] }
 0x57e   :  { %v4850_v11 = vpop.permute.xlu1 %4849 }
 0x57f   :  { %v5093_v41 = vrot.slane %v4850_v11, %v9944_v9 }
 0x581   :  { %v7761_v15 = vpop.eup %7760  ;;  %v5189_v21 = vsel %vm4020_vm12, %v5093_v41, %v5188_v5 }
 0x582   :  { %v4856_v38 = vpop.permute.xlu1 %4855  ;;  %v5257_v54 = vrot.slane %v7761_v15, %v12459_v37  ;;  %v5190_v49 = vsel %vm4022_vm13, %v5097_v55, %v5189_v21  ;;  %v5261_v19 = vrot.slane %v7761_v15, %v11111_v47  ;;  %v5269_v57 = vrot.slane %v7761_v15, %v11127_v48 }
 0x583   :  { %v5101_v42 = vrot.slane %v4856_v38, %v9944_v9  ;;  %v5277_v34 = vrot.slane %v7761_v15, %v11143_v60  ;;  %v5253_v5 = vrot.slane %v7761_v15, %v12458_v33  ;;  %v12535_v38 = vld [vmem:[#allocation29_spill] sm:$0xff] }
 0x584   :  { %v5571_v56 = vmul.f32 %v12531_v1, %v5257_v54  ;;  %v5572_v27 = vmul.f32 %v12532_v53, %v5261_v19  ;;  %v5574_v30 = vmul.f32 %v12533_v14, %v5269_v57  ;;  %v12536_v19 = vld [vmem:[#allocation25_spill] sm:$0xff]  ;;  %v5281_v57 = vrot.slane %v7761_v15, %v11150_v36 }
 0x585   :  { %v5191_v46 = vsel %vm4024_vm11, %v5101_v42, %v5190_v49  ;;  %v5576_v11 = vmul.f32 %v12534_v4, %v5277_v34  ;;  %v5570_v54 = vmul.f32 %v12535_v38, %v5253_v5  ;;  %v5265_v42 = vrot.slane %v7761_v15, %v11117_v2  ;;  %v12539_v38 = vld [vmem:[#allocation33_spill] sm:$0xff] }
 0x586   :  { %v4862_v26 = vpop.permute.xlu1 %4861  ;;  %6126 = vperm.xlu1 %7247, %v5571_v56   ;;  %v5192_v58 = vsel %vm4026_vm14, %v5105_v22, %v5191_v46  ;;  %v5273_v46 = vrot.slane %v7761_v15, %v11134_v51 }
 0x587   :  { %v5109_v24 = vrot.slane %v4862_v26, %v9944_v9  ;;  %v5573_v13 = vmul.f32 %v12536_v19, %v5265_v42 }
 0x589   :  { %v5193_v3 = vsel %vm4028_vm2, %v5109_v24, %v5192_v58 }
 0x58a   :  { %6129 = vperm.xlu1 %7247, %v5572_v27   ;;  %v5194_v29 = vsel %vm4030_vm4, %v5113_v31, %v5193_v3  ;;  %v4868_v17 = vpop.permute.xlu1 %4867  ;;  %v12537_v27 = vld [vmem:[#allocation48_spill] sm:$0xff] }
 0x58b   :  { %v5228_v16 = vsel %vm4089_vm6, %v5194_v29, 0.0  ;;  %v5117_v1 = vrot.slane %v4868_v17, %v9944_v9  ;;  %v5575_v58 = vmul.f32 %v12537_v27, %v5273_v46 }
 0x58c   :  { %5229 = vadd.xlane.f32.xlu0 %v5228_v16 }
 0x58e   :  { %6135 = vperm.xlu1 %7247, %v5574_v30   ;;  %v4874_v21 = vpop.permute.xlu1 %4873 }
 0x58f   :  { %v5125_v31 = vrot.slane %v4874_v21, %v9944_v9 }
 0x592   :  { %6141 = vperm.xlu1 %7247, %v5576_v11   ;;  %v4880_v22 = vpop.permute.xlu1 %4879  ;;  %v12538_v11 = vld [vmem:[#allocation42_spill] sm:$0xff] }
 0x593   :  { %v5133_v30 = vrot.slane %v4880_v22, %v9944_v9  ;;  %v5577_v17 = vmul.f32 %v12538_v11, %v5281_v57  ;;  %v12541_v22 = vld [vmem:[#allocation37_spill] sm:$0xff] }
 0x596   :  { %v4886_v34 = vpop.permute.xlu1 %4885 }
 0x598   :  { %v5215_v41 = vpop.xlane.xlu0 %5214 }
 0x599   :  { %7762 = vrcp.f32 %v5215_v41 }
 0x5a0   :  { %v4871_v55 = vpop.permute.xlu0 %4870 }
 0x5a1   :  { %v5121_v49 = vrot.slane %v4871_v55, %v9944_v9  ;;  %v5141_v55 = vrot.slane %v4886_v34, %v9944_v9 }
 0x5a2   :  { %6123 = vperm.xlu0 %7246, %v5570_v54  }
 0x5a3   :  { %v5195_v26 = vsel %vm4018_vm9, %v5121_v49, %v5117_v1  ;;  %v7763_v3 = vpop.eup %7762 }
 0x5a4   :  { %v4877_v56 = vpop.permute.xlu0 %4876  ;;  %v5196_v29 = vsel %vm4020_vm12, %v5125_v31, %v5195_v26  ;;  %v5289_v41 = vrot.slane %v7763_v3, %v12459_v37  ;;  %v5297_v42 = vrot.slane %v7763_v3, %v11117_v2  ;;  %v12542_v31 = vld [vmem:[#allocation58_spill] sm:$0xff]  ;;  %v5285_v27 = vrot.slane %v7763_v3, %v12458_v33 }
 0x5a5   :  { %v5129_v24 = vrot.slane %v4877_v56, %v9944_v9  ;;  %v12540_v56 = vld [vmem:[#allocation47_spill] sm:$0xff]  ;;  %v5293_v57 = vrot.slane %v7763_v3, %v11111_v47  ;;  %v5309_v34 = vrot.slane %v7763_v3, %v11143_v60 }
 0x5a6   :  { %6132 = vperm.xlu0 %7246, %v5573_v13   ;;  %v5579_v54 = vmul.f32 %v12539_v38, %v5289_v41  ;;  %v5581_v19 = vmul.f32 %v12540_v56, %v5297_v42  ;;  %v5305_v13 = vrot.slane %v7763_v3, %v11134_v51  ;;  %v12543_v41 = vld [vmem:[#allocation34_spill] sm:$0xff] }
 0x5a7   :  { %v5197_v16 = vsel %vm4022_vm13, %v5129_v24, %v5196_v29  ;;  %v5313_v24 = vrot.slane %v7763_v3, %v11150_v36 }
 0x5a8   :  { %v4883_v53 = vpop.permute.xlu0 %4882  ;;  %v5198_v5 = vsel %vm4024_vm11, %v5133_v30, %v5197_v16  ;;  %v5583_v26 = vmul.f32 %v12541_v22, %v5305_v13  ;;  %v5580_v16 = vmul.f32 %v11406_v43, %v5293_v57 }
 0x5a9   :  { %v5137_v14 = vrot.slane %v4883_v53, %v9944_v9  ;;  %v5585_v53 = vmul.f32 %v12542_v31, %v5313_v24 }
 0x5aa   :  { %6138 = vperm.xlu0 %7246, %v5575_v58   ;;  %v5578_v58 = vmul.f32 %v11397_v61, %v5285_v27 }
 0x5ab   :  { %v5199_v15 = vsel %vm4026_vm14, %v5137_v14, %v5198_v5  ;;  %v5301_v14 = vrot.slane %v7763_v3, %v11127_v48 }
 0x5ac   :  { %v4889_v4 = vpop.permute.xlu0 %4888  ;;  %v5200_v49 = vsel %vm4028_vm2, %v5141_v55, %v5199_v15 }
 0x5ad   :  { %v5145_v21 = vrot.slane %v4889_v4, %v9944_v9  ;;  %v5582_v30 = vmul.f32 %v11421_v39, %v5301_v14  ;;  %v5584_v4 = vmul.f32 %v11434_v6, %v5309_v34 }
 0x5ae   :  { %6144 = vperm.xlu0 %7246, %v5577_v17  }
 0x5af   :  { %v5201_v1 = vsel %vm4030_vm4, %v5145_v21, %v5200_v49 }
 0x5b0   :  { %v5231_v46 = vsel %vm4089_vm6, %v5201_v1, 0.0 }
 0x5b2   :  { %6150 = vperm.xlu0 %7246, %v5579_v54  }
 0x5b6   :  { %6156 = vperm.xlu0 %7246, %v5581_v19   ;;  %5232 = vadd.xlane.f32.xlu1 %v5231_v46 }
 0x5ba   :  { %6162 = vperm.xlu0 %7246, %v5583_v26  }
 0x5be   :  { %6168 = vperm.xlu0 %7246, %v5585_v53  }
 0x5c7   :  { %v5221_v29 = vpop.xlane.xlu1 %5220  ;;  %6147 = vperm.xlu1 %7247, %v5578_v58  }
 0x5c8   :  { %7764 = vrcp.f32 %v5221_v29 }
 0x5cb   :  { %6153 = vperm.xlu1 %7247, %v5580_v16  }
 0x5cf   :  { %6159 = vperm.xlu1 %7247, %v5582_v30  }
 0x5d2   :  { %v7765_v11 = vpop.eup %7764 }
 0x5d3   :  { %6165 = vperm.xlu1 %7247, %v5584_v4   ;;  %v5353_v61 = vrot.slane %v7765_v11, %v12459_v37  ;;  %v5349_v17 = vrot.slane %v7765_v11, %v12458_v33  ;;  %v5361_v15 = vrot.slane %v7765_v11, %v11117_v2  ;;  %v5357_v21 = vrot.slane %v7765_v11, %v11111_v47  ;;  %v12544_v4 = vld [vmem:[#allocation20_spill] sm:$0xff] }
 0x5d4   :  { %v5369_v55 = vrot.slane %v7765_v11, %v11134_v51  ;;  %v5365_v38 = vrot.slane %v7765_v11, %v11127_v48  ;;  %v5377_v42 = vrot.slane %v7765_v11, %v11150_v36  ;;  %v5373_v49 = vrot.slane %v7765_v11, %v11143_v60 }
 0x5d5   :  { %v5595_v5 = vmul.f32 %v12543_v41, %v5353_v61  ;;  %v5594_v43 = vmul.f32 %v11443_v28, %v5349_v17  ;;  %v5597_v3 = vmul.f32 %v11308_v8, %v5361_v15  ;;  %v5596_v6 = vmul.f32 %v11450_v10, %v5357_v21 }
 0x5d6   :  { %v5599_v28 = vmul.f32 %v11329_v12, %v5369_v55  ;;  %v5598_v54 = vmul.f32 %v11456_v52, %v5365_v38  ;;  %v5601_v8 = vmul.f32 %v11345_v45, %v5377_v42  ;;  %v5600_v10 = vmul.f32 %v11465_v59, %v5373_v49  ;;  %v12549_v38 = vld [vmem:[#allocation40_spill] sm:$0xff] }
 0x5d7   :  { %6198 = vperm.xlu0 %7246, %v5595_v5   ;;  %6195 = vperm.xlu1 %7247, %v5594_v43  }
 0x5d9   :  { %v5218_v39 = vpop.xlane.xlu0 %5217 }
 0x5da   :  { %7766 = vrcp.f32 %v5218_v39  ;;  %v12548_v39 = vld [vmem:[#allocation68_spill] sm:$0xff] }
 0x5db   :  { %6204 = vperm.xlu0 %7246, %v5597_v3   ;;  %6201 = vperm.xlu1 %7247, %v5596_v6  }
 0x5dd   :  { %v5224_v1 = vpop.xlane.xlu0 %5223 }
 0x5de   :  { %7768 = vrcp.f32 %v5224_v1 }
 0x5df   :  { %6210 = vperm.xlu0 %7246, %v5599_v28   ;;  %6207 = vperm.xlu1 %7247, %v5598_v54   ;;  %v12550_v54 = vld [vmem:[#allocation26_spill] sm:$0xff] }
 0x5e3   :  { %6216 = vperm.xlu0 %7246, %v5601_v8   ;;  %6213 = vperm.xlu1 %7247, %v5600_v10   ;;  %v12551_v10 = vld [vmem:[#allocation22_spill] sm:$0xff] }
 0x5e4   :  { %v7767_v56 = vpop.eup %7766 }
 0x5e5   :  { %v5321_v19 = vrot.slane %v7767_v56, %v12459_v37  ;;  %v5317_v12 = vrot.slane %v7767_v56, %v12458_v33  ;;  %v5329_v46 = vrot.slane %v7767_v56, %v11117_v2  ;;  %v5325_v22 = vrot.slane %v7767_v56, %v11111_v47 }
 0x5e6   :  { %v5337_v26 = vrot.slane %v7767_v56, %v11134_v51  ;;  %v5333_v24 = vrot.slane %v7767_v56, %v11127_v48  ;;  %v5345_v31 = vrot.slane %v7767_v56, %v11150_v36  ;;  %v5341_v53 = vrot.slane %v7767_v56, %v11143_v60  ;;  %v12552_v56 = vld [vmem:[#allocation39_spill] sm:$0xff] }
 0x5e7   :  { %v5587_v52 = vmul.f32 %v11358_v23, %v5321_v19  ;;  %v5586_v13 = vmul.f32 %v11474_v0, %v5317_v12  ;;  %v5589_v45 = vmul.f32 %v11369_v32, %v5329_v46  ;;  %v5588_v59 = vmul.f32 %v11483_v40, %v5325_v22  ;;  %v5227_v32 = vpop.xlane.xlu1 %5226  ;;  %v12554_v22 = vld [vmem:[#allocation35_spill] sm:$0xff] }
 0x5e8   :  { %v5591_v23 = vmul.f32 %v11378_v18, %v5337_v26  ;;  %v5590_v0 = vmul.f32 %v11498_v44, %v5333_v24  ;;  %v7769_v27 = vpop.eup %7768  ;;  %v5593_v40 = vmul.f32 %v11385_v62, %v5345_v31  ;;  %v5592_v58 = vmul.f32 %v11508_v63, %v5341_v53 }
 0x5e9   :  { %6174 = vperm.xlu0 %7246, %v5587_v52   ;;  %6171 = vperm.xlu1 %7247, %v5586_v13   ;;  %v5385_v57 = vrot.slane %v7769_v27, %v12459_v37  ;;  %v5381_v29 = vrot.slane %v7769_v27, %v12458_v33  ;;  %7770 = vrcp.f32 %v5227_v32  ;;  %v5393_v16 = vrot.slane %v7769_v27, %v11117_v2  ;;  %v12553_v13 = vld [vmem:[#allocation19_spill] sm:$0xff] }
 0x5ea   :  { %v5389_v14 = vrot.slane %v7769_v27, %v11111_v47  ;;  %v5401_v30 = vrot.slane %v7769_v27, %v11134_v51  ;;  %v5397_v34 = vrot.slane %v7769_v27, %v11127_v48  ;;  %v5409_v11 = vrot.slane %v7769_v27, %v11150_v36 }
 0x5eb   :  { %v5603_v18 = vmul.f32 %v11391_v50, %v5385_v57  ;;  %v5602_v44 = vmul.f32 %v11517_v25, %v5381_v29  ;;  %v5605_v62 = vmul.f32 %v11399_v7, %v5393_v16  ;;  %v5405_v61 = vrot.slane %v7769_v27, %v11143_v60  ;;  %v12545_v7 = vld [vmem:[#allocation45_spill] sm:$0xff] }
 0x5ec   :  { %v5604_v63 = vmul.f32 %v11524_v20, %v5389_v14  ;;  %v5607_v50 = vmul.f32 %v11408_v35, %v5401_v30  ;;  %v5606_v25 = vmul.f32 %v12544_v4, %v5397_v34  ;;  %v5609_v41 = vmul.f32 %v12545_v7, %v5409_v11  ;;  %v12546_v20 = vld [vmem:[#allocation64_spill] sm:$0xff]  ;;  %v12547_v35 = vld [vmem:[#allocation49_spill] sm:$0xff] }
 0x5ed   :  { %6180 = vperm.xlu0 %7246, %v5589_v45   ;;  %6177 = vperm.xlu1 %7247, %v5588_v59   ;;  %v5608_v5 = vmul.f32 %v12546_v20, %v5405_v61  ;;  %v12555_v16 = vld [vmem:[#allocation21_spill] sm:$0xff]  ;;  %v12558_v20 = vld [vmem:[#allocation38_spill] sm:$0xff] }
 0x5ee   :  { %v12557_v7 = vld [vmem:[#allocation53_spill] sm:$0xff] }
 0x5f1   :  { %6186 = vperm.xlu0 %7246, %v5591_v23   ;;  %6183 = vperm.xlu1 %7247, %v5590_v0  }
 0x5f3   :  { %v7771_v17 = vpop.eup %7770 }
 0x5f4   :  { %v5417_v43 = vrot.slane %v7771_v17, %v12459_v37  ;;  %v5413_v15 = vrot.slane %v7771_v17, %v12458_v33  ;;  %v5425_v6 = vrot.slane %v7771_v17, %v11117_v2  ;;  %v5421_v55 = vrot.slane %v7771_v17, %v11111_v47 }
 0x5f5   :  { %6192 = vperm.xlu0 %7246, %v5593_v40   ;;  %6189 = vperm.xlu1 %7247, %v5592_v58   ;;  %v5433_v49 = vrot.slane %v7771_v17, %v11134_v51  ;;  %v5429_v8 = vrot.slane %v7771_v17, %v11127_v48  ;;  %v5441_v12 = vrot.slane %v7771_v17, %v11150_v36 }
 0x5f6   :  { %v5611_v21 = vmul.f32 %v12547_v35, %v5417_v43  ;;  %v5610_v3 = vmul.f32 %v12548_v39, %v5413_v15  ;;  %v5613_v28 = vmul.f32 %v12549_v38, %v5425_v6  ;;  %v5612_v42 = vmul.f32 %v12550_v54, %v5421_v55  ;;  %v12559_v6 = vld [vmem:[#allocation65_spill] sm:$0xff]  ;;  %v12560_v54 = vld [vmem:[#allocation36_spill] sm:$0xff] }
 0x5f7   :  { %v5615_v1 = vmul.f32 %v12551_v10, %v5433_v49  ;;  %v5614_v19 = vmul.f32 %v12552_v56, %v5429_v8  ;;  %v5437_v52 = vrot.slane %v7771_v17, %v11143_v60  ;;  %v5617_v46 = vmul.f32 %v12553_v13, %v5441_v12  ;;  %v12561_v8 = vld [vmem:[#allocation44_spill] sm:$0xff] }
 0x5f9   :  { %6222 = vperm.xlu0 %7246, %v5603_v18   ;;  %6219 = vperm.xlu1 %7247, %v5602_v44   ;;  %v5616_v45 = vmul.f32 %v12554_v22, %v5437_v52 }
 0x5fd   :  { %6228 = vperm.xlu0 %7246, %v5605_v62   ;;  %6225 = vperm.xlu1 %7247, %v5604_v63   ;;  %v12556_v62 = vld [vmem:[#allocation60_spill] sm:$0xff] }
 0x601   :  { %6234 = vperm.xlu0 %7246, %v5607_v50   ;;  %6231 = vperm.xlu1 %7247, %v5606_v25  }
 0x605   :  { %6240 = vperm.xlu0 %7246, %v5609_v41   ;;  %6237 = vperm.xlu1 %7247, %v5608_v5   ;;  %v6127_v59 = vpop.permute.xlu1 %6126 }
 0x606   :  { %v6321_v0 = vrot.slane %v6127_v59, %v9944_v9 }
 0x609   :  { %6246 = vperm.xlu0 %7246, %v5611_v21   ;;  %6243 = vperm.xlu1 %7247, %v5610_v3   ;;  %v6130_v24 = vpop.permute.xlu1 %6129 }
 0x60a   :  { %v6325_v27 = vrot.slane %v6130_v24, %v9944_v9 }
 0x60d   :  { %6252 = vperm.xlu0 %7246, %v5613_v28   ;;  %6249 = vperm.xlu1 %7247, %v5612_v42   ;;  %v6136_v32 = vpop.permute.xlu1 %6135 }
 0x60e   :  { %v6333_v4 = vrot.slane %v6136_v32, %v9944_v9 }
 0x611   :  { %6258 = vperm.xlu0 %7246, %v5615_v1   ;;  %6255 = vperm.xlu1 %7247, %v5614_v19   ;;  %v6142_v11 = vpop.permute.xlu1 %6141 }
 0x612   :  { %v6341_v35 = vrot.slane %v6142_v11, %v9944_v9 }
 0x615   :  { %6264 = vperm.xlu0 %7246, %v5617_v46   ;;  %6261 = vperm.xlu1 %7247, %v5616_v45  }
 0x619   :  { %v5230_v26 = vpop.xlane.xlu0 %5229 }
 0x61a   :  { %7772 = vrcp.f32 %v5230_v26 }
 0x621   :  { %v6124_v23 = vpop.permute.xlu0 %6123 }
 0x622   :  { %v6317_v31 = vrot.slane %v6124_v23, %v9944_v9 }
 0x624   :  { %v11909_v53 = vpop.eup %7772  ;;  %v6570_v40 = vsel %vm4018_vm9, %v6321_v0, %v6317_v31 }
 0x625   :  { %v6133_v58 = vpop.permute.xlu0 %6132  ;;  %v5449_v57 = vrot.slane %v11909_v53, %v12459_v37  ;;  %v5445_v29 = vrot.slane %v11909_v53, %v12458_v33  ;;  %v6571_v18 = vsel %vm4020_vm12, %v6325_v27, %v6570_v40  ;;  %v5469_v30 = vrot.slane %v11909_v53, %v11143_v60 }
 0x626   :  { %v6329_v44 = vrot.slane %v6133_v58, %v9944_v9  ;;  %v5453_v34 = vrot.slane %v11909_v53, %v11111_v47  ;;  %v5457_v43 = vrot.slane %v11909_v53, %v11117_v2  ;;  %v5461_v38 = vrot.slane %v11909_v53, %v11127_v48 }
 0x627   :  { %v5619_v14 = vmul.f32 %v12555_v16, %v5449_v57  ;;  %v5618_v63 = vmul.f32 %v12556_v62, %v5445_v29  ;;  %v5624_v41 = vmul.f32 %v12557_v7, %v5469_v30  ;;  %v5465_v49 = vrot.slane %v11909_v53, %v11134_v51  ;;  %v12562_v57 = vld [vmem:[#allocation54_spill] sm:$0xff] }
 0x628   :  { %v6572_v50 = vsel %vm4022_vm13, %v6329_v44, %v6571_v18  ;;  %v5620_v5 = vmul.f32 %v12558_v20, %v5453_v34  ;;  %v5621_v55 = vmul.f32 %v12559_v6, %v5457_v43  ;;  %v5622_v42 = vmul.f32 %v12560_v54, %v5461_v38  ;;  %v12563_v18 = vld [vmem:[#allocation52_spill] sm:$0xff] }
 0x629   :  { %6270 = vperm.xlu0 %7246, %v5619_v14   ;;  %6267 = vperm.xlu1 %7247, %v5618_v63   ;;  %v6139_v25 = vpop.permute.xlu0 %6138  ;;  %v6573_v17 = vsel %vm4024_vm11, %v6333_v4, %v6572_v50  ;;  %v5623_v10 = vmul.f32 %v12561_v8, %v5465_v49  ;;  %v5473_v34 = vrot.slane %v11909_v53, %v11150_v36  ;;  %v12566_v53 = vld [vmem:[#allocation43_spill] sm:$0xff] }
 0x62a   :  { %v6337_v61 = vrot.slane %v6139_v25, %v9944_v9  ;;  %v12565_v25 = vld [vmem:[#allocation55_spill] sm:$0xff] }
 0x62b   :  { %v5625_v20 = vmul.f32 %v12566_v53, %v5473_v34 }
 0x62c   :  { %v6574_v15 = vsel %vm4026_vm14, %v6337_v61, %v6573_v17 }
 0x62d   :  { %6285 = vperm.xlu0 %7246, %v5624_v41   ;;  %6273 = vperm.xlu1 %7247, %v5620_v5   ;;  %v6145_v21 = vpop.permute.xlu0 %6144  ;;  %v6575_v3 = vsel %vm4028_vm2, %v6341_v35, %v6574_v15  ;;  %v12567_v15 = vld [vmem:[#allocation56_spill] sm:$0xff] }
 0x62e   :  { %v6345_v39 = vrot.slane %v6145_v21, %v9944_v9 }
 0x630   :  { %v6576_v28 = vsel %vm4030_vm4, %v6345_v39, %v6575_v3 }
 0x631   :  { %6634 = vst.msk [vmem:[#allocation13] sm:$0xff] %vm4089_vm6, %v6576_v28  ;;  %6276 = vperm.xlu1 %7247, %v5621_v55   ;;  %v6151_v1 = vpop.permute.xlu0 %6150  ;;  %v12568_v55 = vld [vmem:[#allocation50_spill] sm:$0xff] }
 0x632   :  { %v6353_v13 = vrot.slane %v6151_v1, %v9944_v9  ;;  %v12569_v1 = vld [vmem:[#allocation57_spill] sm:$0xff] }
 0x635   :  { %6279 = vperm.xlu1 %7247, %v5622_v42   ;;  %v6157_v19 = vpop.permute.xlu0 %6156 }
 0x636   :  { %v6361_v24 = vrot.slane %v6157_v19, %v9944_v9 }
 0x639   :  { %6282 = vperm.xlu1 %7247, %v5623_v10   ;;  %v6163_v46 = vpop.permute.xlu0 %6162 }
 0x63a   :  { %v6369_v62 = vrot.slane %v6163_v46, %v9944_v9 }
 0x63d   :  { %v6169_v58 = vpop.permute.xlu0 %6168 }
 0x63e   :  { %v6377_v63 = vrot.slane %v6169_v58, %v9944_v9 }
 0x643   :  { %v5233_v56 = vpop.xlane.xlu1 %5232 }
 0x644   :  { %7774 = vrcp.f32 %v5233_v56 }
 0x647   :  { %v6148_v12 = vpop.permute.xlu1 %6147 }
 0x648   :  { %v6349_v52 = vrot.slane %v6148_v12, %v9944_v9 }
 0x64a   :  { %v6577_v59 = vsel %vm4018_vm9, %v6353_v13, %v6349_v52 }
 0x64b   :  { %v6154_v22 = vpop.permute.xlu1 %6153 }
 0x64c   :  { %v6357_v45 = vrot.slane %v6154_v22, %v9944_v9 }
 0x64e   :  { %v11950_v26 = vpop.eup %7774  ;;  %v6578_v23 = vsel %vm4020_vm12, %v6357_v45, %v6577_v59  ;;  %v12570_v59 = vld [vmem:[#allocation62_spill] sm:$0xff] }
 0x64f   :  { %v6160_v0 = vpop.permute.xlu1 %6159  ;;  %v5481_v31 = vrot.slane %v11950_v26, %v12459_v37  ;;  %v5477_v27 = vrot.slane %v11950_v26, %v12458_v33  ;;  %v6579_v40 = vsel %vm4022_vm13, %v6361_v24, %v6578_v23  ;;  %v5485_v16 = vrot.slane %v11950_v26, %v11111_v47  ;;  %v12564_v47 = vld [vmem:[#allocation51_spill] sm:$0xff] }
 0x650   :  { %v6365_v32 = vrot.slane %v6160_v0, %v9944_v9  ;;  %v5501_v14 = vrot.slane %v11950_v26, %v11143_v60  ;;  %v5489_v11 = vrot.slane %v11950_v26, %v11117_v2  ;;  %v5493_v2 = vrot.slane %v11950_v26, %v11127_v48 }
 0x651   :  { %v5627_v29 = vmul.f32 %v12562_v57, %v5481_v31  ;;  %v5626_v44 = vmul.f32 %v12563_v18, %v5477_v27  ;;  %v5628_v4 = vmul.f32 %v12564_v47, %v5485_v16  ;;  %v5497_v28 = vrot.slane %v11950_v26, %v11134_v51 }
 0x652   :  { %v6580_v37 = vsel %vm4024_vm11, %v6365_v32, %v6579_v40  ;;  %v5632_v60 = vmul.f32 %v12565_v25, %v5501_v14  ;;  %v5629_v35 = vmul.f32 %v12567_v15, %v5489_v11  ;;  %v5630_v38 = vmul.f32 %v12568_v55, %v5493_v2 }
 0x653   :  { %v6166_v33 = vpop.permute.xlu1 %6165  ;;  %6294 = vperm.xlu0 %7246, %v5627_v29   ;;  %6291 = vperm.xlu1 %7247, %v5626_v44   ;;  %v6581_v50 = vsel %vm4026_vm14, %v6369_v62, %v6580_v37  ;;  %v5631_v56 = vmul.f32 %v12569_v1, %v5497_v28  ;;  %v5505_v19 = vrot.slane %v11950_v26, %v11150_v36 }
 0x654   :  { %v6373_v30 = vrot.slane %v6166_v33, %v9944_v9 }
 0x655   :  { %v5633_v24 = vmul.f32 %v12570_v59, %v5505_v19 }
 0x656   :  { %v6582_v61 = vsel %vm4028_vm2, %v6373_v30, %v6581_v50  ;;  %v6199_v17 = vpop.permute.xlu0 %6198 }
 0x657   :  { %v6583_v7 = vsel %vm4030_vm4, %v6377_v63, %v6582_v61  ;;  %v6196_v41 = vpop.permute.xlu1 %6195  ;;  %6297 = vperm.xlu0 %7246, %v5628_v4   ;;  %6309 = vperm.xlu1 %7247, %v5632_v60   ;;  %v6417_v5 = vrot.slane %v6199_v17, %v9944_v9 }
 0x658   :  { %6635 = vst.msk [vmem:[#allocation13 + $0x8] sm:$0xff] %vm4089_vm6, %v6583_v7  ;;  %v6413_v43 = vrot.slane %v6196_v41, %v9944_v9 }
 0x65a   :  { %v6205_v21 = vpop.permute.xlu0 %6204  ;;  %v6591_v6 = vsel %vm4018_vm9, %v6417_v5, %v6413_v43 }
 0x65b   :  { %v6202_v39 = vpop.permute.xlu1 %6201  ;;  %6300 = vperm.xlu0 %7246, %v5629_v35   ;;  %6288 = vperm.xlu1 %7247, %v5625_v20   ;;  %v6425_v49 = vrot.slane %v6205_v21, %v9944_v9 }
 0x65c   :  { %v6421_v3 = vrot.slane %v6202_v39, %v9944_v9 }
 0x65e   :  { %v6592_v54 = vsel %vm4020_vm12, %v6421_v3, %v6591_v6  ;;  %v6211_v42 = vpop.permute.xlu0 %6210 }
 0x65f   :  { %v6208_v8 = vpop.permute.xlu1 %6207  ;;  %6303 = vperm.xlu0 %7246, %v5630_v38   ;;  %v6593_v10 = vsel %vm4022_vm13, %v6425_v49, %v6592_v54  ;;  %v6433_v51 = vrot.slane %v6211_v42, %v9944_v9 }
 0x660   :  { %v6429_v48 = vrot.slane %v6208_v8, %v9944_v9 }
 0x662   :  { %v6594_v12 = vsel %vm4024_vm11, %v6429_v48, %v6593_v10  ;;  %v6217_v52 = vpop.permute.xlu0 %6216 }
 0x663   :  { %v6214_v13 = vpop.permute.xlu1 %6213  ;;  %6306 = vperm.xlu0 %7246, %v5631_v56   ;;  %v6441_v22 = vrot.slane %v6217_v52, %v9944_v9  ;;  %v6595_v45 = vsel %vm4026_vm14, %v6433_v51, %v6594_v12 }
 0x664   :  { %v6437_v46 = vrot.slane %v6214_v13, %v9944_v9 }
 0x666   :  { %v6596_v23 = vsel %vm4028_vm2, %v6437_v46, %v6595_v45 }
 0x667   :  { %v6597_v0 = vsel %vm4030_vm4, %v6441_v22, %v6596_v23  ;;  %6312 = vperm.xlu0 %7246, %v5633_v24  }
 0x668   :  { %6637 = vst.msk [vmem:[#allocation13 + $0x18] sm:$0xff] %vm4089_vm6, %v6597_v0  ;;  %v6172_v36 = vpop.permute.xlu1 %6171  ;;  %v6175_v26 = vpop.permute.xlu0 %6174 }
 0x669   :  { %v6381_v31 = vrot.slane %v6172_v36, %v9944_v9  ;;  %v6385_v27 = vrot.slane %v6175_v26, %v9944_v9 }
 0x66b   :  { %v6584_v57 = vsel %vm4018_vm9, %v6385_v27, %v6381_v31 }
 0x66c   :  { %v6178_v32 = vpop.permute.xlu1 %6177  ;;  %v6181_v40 = vpop.permute.xlu0 %6180 }
 0x66d   :  { %v6389_v58 = vrot.slane %v6178_v32, %v9944_v9  ;;  %v6393_v29 = vrot.slane %v6181_v40, %v9944_v9 }
 0x66f   :  { %v6585_v18 = vsel %vm4020_vm12, %v6389_v58, %v6584_v57 }
 0x670   :  { %v6184_v44 = vpop.permute.xlu1 %6183  ;;  %v6187_v16 = vpop.permute.xlu0 %6186  ;;  %v6586_v37 = vsel %vm4022_vm13, %v6393_v29, %v6585_v18 }
 0x671   :  { %v6397_v14 = vrot.slane %v6184_v44, %v9944_v9  ;;  %v6401_v62 = vrot.slane %v6187_v16, %v9944_v9 }
 0x673   :  { %v6587_v33 = vsel %vm4024_vm11, %v6397_v14, %v6586_v37 }
 0x674   :  { %v6190_v63 = vpop.permute.xlu1 %6189  ;;  %v6193_v30 = vpop.permute.xlu0 %6192  ;;  %v6588_v47 = vsel %vm4026_vm14, %v6401_v62, %v6587_v33 }
 0x675   :  { %v6405_v34 = vrot.slane %v6190_v63, %v9944_v9  ;;  %v6409_v50 = vrot.slane %v6193_v30, %v9944_v9 }
 0x677   :  { %v6589_v4 = vsel %vm4028_vm2, %v6405_v34, %v6588_v47 }
 0x678   :  { %v6590_v25 = vsel %vm4030_vm4, %v6409_v50, %v6589_v4  ;;  %v6220_v60 = vpop.permute.xlu1 %6219  ;;  %v6223_v11 = vpop.permute.xlu0 %6222 }
 0x679   :  { %6636 = vst.msk [vmem:[#allocation13 + $0x10] sm:$0xff] %vm4089_vm6, %v6590_v25  ;;  %v6445_v61 = vrot.slane %v6220_v60, %v9944_v9  ;;  %v6449_v17 = vrot.slane %v6223_v11, %v9944_v9 }
 0x67b   :  { %v6598_v20 = vsel %vm4018_vm9, %v6449_v17, %v6445_v61 }
 0x67c   :  { %v6226_v7 = vpop.permute.xlu1 %6225  ;;  %v6229_v41 = vpop.permute.xlu0 %6228 }
 0x67d   :  { %v6453_v53 = vrot.slane %v6226_v7, %v9944_v9  ;;  %v6457_v5 = vrot.slane %v6229_v41, %v9944_v9 }
 0x67f   :  { %v6599_v43 = vsel %vm4020_vm12, %v6453_v53, %v6598_v20 }
 0x680   :  { %v6232_v15 = vpop.permute.xlu1 %6231  ;;  %v6235_v35 = vpop.permute.xlu0 %6234  ;;  %v6600_v21 = vsel %vm4022_vm13, %v6457_v5, %v6599_v43 }
 0x681   :  { %v6461_v2 = vrot.slane %v6232_v15, %v9944_v9  ;;  %v6465_v39 = vrot.slane %v6235_v35, %v9944_v9 }
 0x683   :  { %v6601_v3 = vsel %vm4024_vm11, %v6461_v2, %v6600_v21 }
 0x684   :  { %v6238_v6 = vpop.permute.xlu1 %6237  ;;  %v6241_v55 = vpop.permute.xlu0 %6240  ;;  %v6602_v54 = vsel %vm4026_vm14, %v6465_v39, %v6601_v3 }
 0x685   :  { %v6469_v38 = vrot.slane %v6238_v6, %v9944_v9  ;;  %v6473_v28 = vrot.slane %v6241_v55, %v9944_v9 }
 0x687   :  { %v6603_v42 = vsel %vm4028_vm2, %v6469_v38, %v6602_v54 }
 0x688   :  { %v6604_v49 = vsel %vm4030_vm4, %v6473_v28, %v6603_v42  ;;  %v6244_v8 = vpop.permute.xlu1 %6243  ;;  %v6247_v48 = vpop.permute.xlu0 %6246 }
 0x689   :  { %6638 = vst.msk [vmem:[#allocation13 + $0x20] sm:$0xff] %vm4089_vm6, %v6604_v49  ;;  %v6477_v10 = vrot.slane %v6244_v8, %v9944_v9  ;;  %v6481_v1 = vrot.slane %v6247_v48, %v9944_v9 }
 0x68b   :  { %v6605_v52 = vsel %vm4018_vm9, %v6481_v1, %v6477_v10 }
 0x68c   :  { %v6250_v56 = vpop.permute.xlu1 %6249  ;;  %v6253_v19 = vpop.permute.xlu0 %6252 }
 0x68d   :  { %v6485_v12 = vrot.slane %v6250_v56, %v9944_v9  ;;  %v6489_v51 = vrot.slane %v6253_v19, %v9944_v9 }
 0x68f   :  { %v6606_v13 = vsel %vm4020_vm12, %v6485_v12, %v6605_v52 }
 0x690   :  { %v6256_v46 = vpop.permute.xlu1 %6255  ;;  %v6259_v22 = vpop.permute.xlu0 %6258  ;;  %v6607_v59 = vsel %vm4022_vm13, %v6489_v51, %v6606_v13 }
 0x691   :  { %v6493_v45 = vrot.slane %v6256_v46, %v9944_v9  ;;  %v6497_v24 = vrot.slane %v6259_v22, %v9944_v9 }
 0x693   :  { %v6608_v23 = vsel %vm4024_vm11, %v6493_v45, %v6607_v59 }
 0x694   :  { %v6262_v0 = vpop.permute.xlu1 %6261  ;;  %v6265_v36 = vpop.permute.xlu0 %6264  ;;  %v6609_v27 = vsel %vm4026_vm14, %v6497_v24, %v6608_v23 }
 0x695   :  { %v6501_v26 = vrot.slane %v6262_v0, %v9944_v9  ;;  %v6505_v31 = vrot.slane %v6265_v36, %v9944_v9 }
 0x697   :  { %v6610_v32 = vsel %vm4028_vm2, %v6501_v26, %v6609_v27 }
 0x698   :  { %v6611_v40 = vsel %vm4030_vm4, %v6505_v31, %v6610_v32 }
 0x699   :  { %6639 = vst.msk [vmem:[#allocation13 + $0x28] sm:$0xff] %vm4089_vm6, %v6611_v40 }
 0x6a8   :  { %v6268_v58 = vpop.permute.xlu1 %6267  ;;  %v6271_v18 = vpop.permute.xlu0 %6270 }
 0x6a9   :  { %v6509_v37 = vrot.slane %v6268_v58, %v9944_v9  ;;  %v6513_v62 = vrot.slane %v6271_v18, %v9944_v9 }
 0x6ab   :  { %v6612_v47 = vsel %vm4018_vm9, %v6513_v62, %v6509_v37 }
 0x6ac   :  { %v6274_v57 = vpop.permute.xlu1 %6273  ;;  %v6286_v16 = vpop.permute.xlu0 %6285 }
 0x6ad   :  { %v6517_v33 = vrot.slane %v6274_v57, %v9944_v9  ;;  %v6533_v41 = vrot.slane %v6286_v16, %v9944_v9 }
 0x6af   :  { %v6613_v25 = vsel %vm4020_vm12, %v6517_v33, %v6612_v47 }
 0x6b0   :  { %v6277_v29 = vpop.permute.xlu1 %6276 }
 0x6b1   :  { %v6521_v34 = vrot.slane %v6277_v29, %v9944_v9 }
 0x6b3   :  { %v6614_v61 = vsel %vm4022_vm13, %v6521_v34, %v6613_v25 }
 0x6b4   :  { %v6280_v44 = vpop.permute.xlu1 %6279 }
 0x6b5   :  { %v6525_v50 = vrot.slane %v6280_v44, %v9944_v9 }
 0x6b7   :  { %v6615_v17 = vsel %vm4024_vm11, %v6525_v50, %v6614_v61 }
 0x6b8   :  { %v6283_v14 = vpop.permute.xlu1 %6282 }
 0x6b9   :  { %v6529_v4 = vrot.slane %v6283_v14, %v9944_v9 }
 0x6bb   :  { %v6616_v7 = vsel %vm4026_vm14, %v6529_v4, %v6615_v17 }
 0x6bc   :  { %v6617_v43 = vsel %vm4028_vm2, %v6533_v41, %v6616_v7 }
 0x6d2   :  { %v6292_v63 = vpop.permute.xlu1 %6291  ;;  %v6295_v30 = vpop.permute.xlu0 %6294 }
 0x6d3   :  { %v6541_v15 = vrot.slane %v6292_v63, %v9944_v9  ;;  %v6545_v35 = vrot.slane %v6295_v30, %v9944_v9 }
 0x6d5   :  { %v6619_v55 = vsel %vm4018_vm9, %v6545_v35, %v6541_v15 }
 0x6d6   :  { %v6310_v60 = vpop.permute.xlu1 %6309  ;;  %v6298_v11 = vpop.permute.xlu0 %6297 }
 0x6d7   :  { %v6549_v21 = vrot.slane %v6298_v11, %v9944_v9  ;;  %v6565_v48 = vrot.slane %v6310_v60, %v9944_v9 }
 0x6d9   :  { %v6620_v38 = vsel %vm4020_vm12, %v6549_v21, %v6619_v55 }
 0x6da   :  { %v6289_v53 = vpop.permute.xlu1 %6288  ;;  %v6301_v20 = vpop.permute.xlu0 %6300 }
 0x6db   :  { %v6537_v5 = vrot.slane %v6289_v53, %v9944_v9  ;;  %v6553_v3 = vrot.slane %v6301_v20, %v9944_v9 }
 0x6dd   :  { %v6618_v2 = vsel %vm4030_vm4, %v6537_v5, %v6617_v43  ;;  %v6621_v54 = vsel %vm4022_vm13, %v6553_v3, %v6620_v38 }
 0x6de   :  { %6640 = vst.msk [vmem:[#allocation13 + $0x30] sm:$0xff] %vm4089_vm6, %v6618_v2  ;;  %v6304_v39 = vpop.permute.xlu0 %6303 }
 0x6df   :  { %v6557_v6 = vrot.slane %v6304_v39, %v9944_v9 }
 0x6e1   :  { %v6622_v49 = vsel %vm4024_vm11, %v6557_v6, %v6621_v54 }
 0x6e2   :  { %v6307_v28 = vpop.permute.xlu0 %6306 }
 0x6e3   :  { %v6561_v42 = vrot.slane %v6307_v28, %v9944_v9 }
 0x6e5   :  { %v6623_v8 = vsel %vm4026_vm14, %v6561_v42, %v6622_v49 }
 0x6e6   :  { %v6313_v10 = vpop.permute.xlu0 %6312  ;;  %v6624_v56 = vsel %vm4028_vm2, %v6565_v48, %v6623_v8 }
 0x6e7   :  { %v6569_v1 = vrot.slane %v6313_v10, %v9944_v9 }
 0x6e9   :  { %v6625_v19 = vsel %vm4030_vm4, %v6569_v1, %v6624_v56 }
 0x6ea   :  { %6641 = vst.msk [vmem:[#allocation13 + $0x38] sm:$0xff] %vm4089_vm6, %v6625_v19 }
 0x6eb   :  { %7910 = shalt.err (!%p7907_p7)
}
 0x6ec   :  { %s7911_s23 = scalar_lea.hbm %s12111_s9, 1024 }
 0x6ed   :  { %p7912_p8 = scmp.ne.s32.totalorder %s12111_s9, %s7911_s23  ;;  %p7915_p9 = scmp.lt.u32.totalorder %s7911_s23, %s12111_s9 }
 0x6ef   :  { %p7917_p10 = pnand %p7915_p9, %p7912_p8 }
 0x6f1   :  { %7920 = shalt.err (!%p7917_p10)
}
 0x6f2   :  { %6653 = dma.vmem_to_hbm [thread:$0]  %s6648_s26, 1024, %s12111_s9, [#allocation4], %s7932_s19, %s7932_s19, %s7933_s20  }
 0x6f3   :  { %7929 = dma.done.wait [#allocation4], 1024  }
 0x6f4   :  { %7930 = vsyncadd [#allocation4], 4294966272 }
 0x6f5   :  { %6657 = vsyncpa [#allocation3], 1 }
 0x6f6   :  { %6658 = vsyncpa [#allocation7], 1 }
 0x6f7   :  { %6659 = vsyncpa [#allocation10], 1 }
 0x6f8   :  { %6660 = vsyncpa [#allocation4], 1 }
 0x6f9   :  { %6661 = vsyncpa [#allocation5], 1 }

</bundles_post_ra>
